<compile_context>
chip_gen: v7x
topology: tpu7x:2x2x1
jax: 0.10.0
libtpu: 0.0.40
codegen_flags: <defaults>
</compile_context>

<pallas_src>
import jax
import jax.numpy as jnp
import numpy as np
from jax import lax
from jax.experimental import pallas as pl
from jax.experimental.pallas import tpu as pltpu

OUT_SIZE = 29                      # conv2 output spatial size (29x29)
C1_SIZE = 31                       # conv1 output spatial size (31x31)
FEATURE_DIM = 50
NCHAN = 32
LN_EPS = 1e-5
P1 = C1_SIZE * C1_SIZE             # 961 conv1 spatial positions
PWIDE = OUT_SIZE * C1_SIZE         # 899 "wide" conv2 positions (29 rows x 31 cols)
C1PAD = 1024                       # conv1 scratch lane length (zero guard columns)
NFC = NCHAN * FEATURE_DIM          # 1600 fc-weight columns ([c, f] packed)


# ----------------------------------------------------------------------------
# Fused Pallas kernel: conv1 + conv2 + fc + LayerNorm + tanh
# ----------------------------------------------------------------------------
def _encoder_kernel(p1_ref, w1_ref, b1_ref, w2_ref, b2_ref, wfc_ref,
                    bfc_ref, g_ref, beta_ref, o_ref,
                    c1_ref, c2_ref, r_ref):
    B = o_ref.shape[0]

    # Zero the conv1 scratch once so guard columns (>= P1) read as 0.0.
    c1_ref[...] = jnp.zeros_like(c1_ref)

    for b in range(B):
        # ---- conv1: (32, 27) @ (27, 961) -> (32, 961), + bias, relu --------
        c1 = jnp.dot(w1_ref[...], p1_ref[b],
                     preferred_element_type=jnp.float32)
        c1 = jnp.maximum(c1 + b1_ref[...], 0.0)
        c1_ref[:, 0:P1] = c1

        # ---- conv2 ("wide"): 9 shifted taps of the resident c1 ------------
        # acc[co, p] = sum_{ky,kx,ci} w2[ky,kx,ci,co] * c1[ci, p + ky*31 + kx]
        acc = jnp.zeros((NCHAN, PWIDE), jnp.float32)
        for t in range(9):
            off = (t // 3) * C1_SIZE + (t % 3)
            acc = acc + jnp.dot(w2_ref[t], c1_ref[:, off:off + PWIDE],
                                preferred_element_type=jnp.float32)
        c2_ref[b * NCHAN:(b + 1) * NCHAN, :] = (
            jnp.maximum(acc + b2_ref[...], 0.0).astype(jnp.bfloat16))

    # ---- fc: (B*32, 899) @ (899, 1600) in bf16, f32 accumulation -----------
    # Invalid "wide" positions contribute nothing (their fc weights are zero).
    # Chunk N at 128-aligned boundaries to keep per-dot value sizes moderate.
    for n0 in range(0, NFC, 512):
        n1 = min(n0 + 512, NFC)
        r_ref[:, n0:n1] = jnp.dot(c2_ref[...], wfc_ref[:, n0:n1],
                                  preferred_element_type=jnp.float32)

    # ---- block-diagonal gather over channels + LayerNorm + tanh ------------
    # y[b, f] = bfc[f] + sum_c R[b*32 + c, c*50 + f]
    for b in range(B):
        y = bfc_ref[...]
        for c in range(NCHAN):
            row = b * NCHAN + c
            y = y + r_ref[row:row + 1, c * FEATURE_DIM:(c + 1) * FEATURE_DIM]
        mu = jnp.mean(y, axis=-1, keepdims=True)
        var = jnp.mean((y - mu) ** 2, axis=-1, keepdims=True)
        yn = (y - mu) * lax.rsqrt(var + LN_EPS)
        o_ref[b:b + 1, :] = jnp.tanh(yn * g_ref[...] + beta_ref[...])


def fused_encoder(p1t, w1t, b1, w2t, b2, wfcw, bfc, gamma, beta):
    B, K1, _ = p1t.shape
    grid_spec = pltpu.PrefetchScalarGridSpec(
        num_scalar_prefetch=0,
        grid=(1,),
        in_specs=[
            pl.BlockSpec((B, K1, P1), lambda i: (0, 0, 0)),       # conv1 patches
            pl.BlockSpec((NCHAN, K1), lambda i: (0, 0)),          # w1^T (/255 folded)
            pl.BlockSpec((NCHAN, 1), lambda i: (0, 0)),           # b1
            pl.BlockSpec((9, NCHAN, NCHAN), lambda i: (0, 0, 0)), # w2 taps [t, co, ci]
            pl.BlockSpec((NCHAN, 1), lambda i: (0, 0)),           # b2
            pl.BlockSpec((PWIDE, NFC), lambda i: (0, 0)),         # fc weight (bf16)
            pl.BlockSpec((1, FEATURE_DIM), lambda i: (0, 0)),     # fc bias
            pl.BlockSpec((1, FEATURE_DIM), lambda i: (0, 0)),     # ln gamma
            pl.BlockSpec((1, FEATURE_DIM), lambda i: (0, 0)),     # ln beta
        ],
        out_specs=pl.BlockSpec((B, FEATURE_DIM), lambda i: (0, 0)),
        scratch_shapes=[
            pltpu.VMEM((NCHAN, C1PAD), jnp.float32),              # resident conv1 out
            pltpu.VMEM((B * NCHAN, PWIDE), jnp.bfloat16),         # resident conv2 out
            pltpu.VMEM((B * NCHAN, NFC), jnp.float32),            # fc pre-gather result
        ],
    )
    return pl.pallas_call(
        _encoder_kernel,
        out_shape=jax.ShapeDtypeStruct((B, FEATURE_DIM), jnp.float32),
        grid_spec=grid_spec,
        compiler_params=pltpu.CompilerParams(
            dimension_semantics=("arbitrary",),
            vmem_limit_bytes=32 * 1024 * 1024),
    )(p1t, w1t, b1, w2t, b2, wfcw, bfc, gamma, beta)


# ----------------------------------------------------------------------------
# Glue: conv1 im2col in "transposed" layout (B, 9*Cin, 961)  [row = tap*Cin+ci]
# ----------------------------------------------------------------------------
def build_conv1_patches_t(x_nchw):
    B, cin, H, W = x_nchw.shape
    taps = []
    for ky in range(3):
        for kx in range(3):
            taps.append(x_nchw[:, :,
                               ky:ky + 2 * (C1_SIZE - 1) + 1:2,
                               kx:kx + 2 * (C1_SIZE - 1) + 1:2])   # (B, cin, 31, 31)
    p = jnp.stack(taps, axis=1)                                    # (B, 9, cin, 31, 31)
    return p.reshape(B, 9 * cin, P1)


# ----------------------------------------------------------------------------
# Parameters (torch-layout init) and one-time kernel-layout preparation
# ----------------------------------------------------------------------------
def init_params(key, frame_stack=1):
    cin = 3 * frame_stack
    k1, k2, k3, k4, k5, k6 = jax.random.split(key, 6)
    fan1 = float(cin * 9)
    fan2 = float(32 * 9)
    fan3 = float(32 * OUT_SIZE * OUT_SIZE)
    u = lambda k, shape, fan: jax.random.uniform(
        k, shape, jnp.float32, -1.0, 1.0) / jnp.sqrt(fan)
    # conv weights stored as (KH, KW, Cin, Cout) flattened to (KH*KW*Cin, Cout)
    w1 = u(k1, (3, 3, cin, 32), fan1).reshape(9 * cin, 32)
    b1 = u(k2, (1, 32), fan1)
    w2 = u(k3, (3, 3, 32, 32), fan2).reshape(9 * 32, 32)
    b2 = u(k4, (1, 32), fan2)
    wfc = u(k5, (32 * OUT_SIZE * OUT_SIZE, FEATURE_DIM), fan3)     # torch NCHW flatten order
    bfc = u(k6, (FEATURE_DIM,), fan3)
    gamma = jnp.ones((FEATURE_DIM,), jnp.float32)
    beta = jnp.zeros((FEATURE_DIM,), jnp.float32)
    return dict(w1=w1, b1=b1, w2=w2, b2=b2, wfc=wfc, bfc=bfc,
                gamma=gamma, beta=beta)


def prepare_params(params, frame_stack=1):
    """One-time repack into the fused-kernel layouts (done at init, not per call)."""
    cin = 3 * frame_stack
    # conv1: fold /255 into the weight and transpose to (Cout, K).
    w1t = (params["w1"] * (1.0 / 255.0)).T                         # (32, 9*cin)
    b1 = params["b1"].reshape(NCHAN, 1)
    # conv2: per-tap (Cout, Cin) matrices.
    w2 = params["w2"].reshape(3, 3, NCHAN, NCHAN)                  # [ky, kx, ci, co]
    w2t = jnp.transpose(w2, (0, 1, 3, 2)).reshape(9, NCHAN, NCHAN) # [tap, co, ci]
    b2 = params["b2"].reshape(NCHAN, 1)
    # fc: undo torch's CHW flatten, zero-pad W from 29->31 ("wide" positions),
    # and pack columns as c*50 + f.  bf16 halves the dominant HBM transfer.
    wfc = params["wfc"].reshape(NCHAN, OUT_SIZE, OUT_SIZE, FEATURE_DIM)
    wfc = jnp.pad(wfc, ((0, 0), (0, 0), (0, C1_SIZE - OUT_SIZE), (0, 0)))
    wfc = wfc.reshape(NCHAN, PWIDE, FEATURE_DIM)
    wfcw = jnp.transpose(wfc, (1, 0, 2)).reshape(PWIDE, NFC).astype(jnp.bfloat16)
    return dict(
        w1t=w1t.astype(jnp.float32), b1=b1, w2t=w2t, b2=b2, wfcw=wfcw,
        bfc=params["bfc"].reshape(1, FEATURE_DIM),
        gamma=params["gamma"].reshape(1, FEATURE_DIM),
        beta=params["beta"].reshape(1, FEATURE_DIM),
    )


# ----------------------------------------------------------------------------
# Forward pass (mirrors PixelsEncoder.forward with logstd=False)
# ----------------------------------------------------------------------------
@jax.jit
def pixels_encoder_forward(x_nchw, prep):
    p1t = build_conv1_patches_t(x_nchw.astype(jnp.float32))
    return fused_encoder(p1t, prep["w1t"], prep["b1"], prep["w2t"], prep["b2"],
                         prep["wfcw"], prep["bfc"], prep["gamma"], prep["beta"])


# ----------------------------------------------------------------------------
# Pure-JAX reference (same semantics as the PyTorch forward, torch-layout params)
# ----------------------------------------------------------------------------
def reference_forward(x_nchw, params, cin):
    x = x_nchw.astype(jnp.float32) / 255.0
    w1 = params["w1"].reshape(3, 3, cin, 32)
    w2 = params["w2"].reshape(3, 3, 32, 32)
    c1 = lax.conv_general_dilated(x, w1, (2, 2), "VALID",
                                  dimension_numbers=("NCHW", "HWIO", "NCHW"))
    c1 = jax.nn.relu(c1 + params["b1"].reshape(1, 32, 1, 1))
    c2 = lax.conv_general_dilated(c1, w2, (1, 1), "VALID",
                                  dimension_numbers=("NCHW", "HWIO", "NCHW"))
    c2 = jax.nn.relu(c2 + params["b2"].reshape(1, 32, 1, 1))
    h = c2.reshape(c2.shape[0], -1)
    y = h @ params["wfc"] + params["bfc"]
    mu = y.mean(-1, keepdims=True)
    var = ((y - mu) ** 2).mean(-1, keepdims=True)
    yn = (y - mu) / jnp.sqrt(var + LN_EPS)
    yn = yn * params["gamma"] + params["beta"]
    return jnp.tanh(yn)


if __name__ == "__main__":
    key = jax.random.PRNGKey(0)
    k_param, k_x = jax.random.split(key)
    frame_stack = 1
    cin = 3 * frame_stack
    params = init_params(k_param, frame_stack=frame_stack)
    prep = prepare_params(params, frame_stack=frame_stack)

    # 64x64 input -> conv1 out 31x31 -> conv2 out 29x29 (OUT_SIZE), pixels in [0, 255]
    x = jax.random.uniform(k_x, (2, cin, 64, 64), jnp.float32, 0.0, 255.0)

    out = jax.block_until_ready(pixels_encoder_forward(x, prep))
    ref = jax.block_until_ready(reference_forward(x, params, cin))

    assert out.shape == (2, FEATURE_DIM), out.shape
    assert np.allclose(np.asarray(out), np.asarray(ref), atol=2e-2, rtol=2e-2), (
        "kernel output mismatch vs reference")
    print("KERNEL_OK")
</pallas_src>

<mosaic_0001>
module attributes {stable_mosaic.version = 11 : i64} {
  func.func @_encoder_kernel(%arg0: i32, %arg1: memref<2x27x961xf32, #tpu.memory_space<vmem>>, %arg2: memref<32x27xf32, #tpu.memory_space<vmem>>, %arg3: memref<32x1xf32, #tpu.memory_space<vmem>>, %arg4: memref<9x32x32xf32, #tpu.memory_space<vmem>>, %arg5: memref<32x1xf32, #tpu.memory_space<vmem>>, %arg6: memref<899x1600xbf16, #tpu.memory_space<vmem>>, %arg7: memref<1x50xf32, #tpu.memory_space<vmem>>, %arg8: memref<1x50xf32, #tpu.memory_space<vmem>>, %arg9: memref<1x50xf32, #tpu.memory_space<vmem>>, %arg10: memref<2x50xf32, #tpu.memory_space<vmem>>, %arg11: memref<32x1024xf32, #tpu.memory_space<vmem>>, %arg12: memref<64x899xbf16, #tpu.memory_space<vmem>>, %arg13: memref<64x1600xf32, #tpu.memory_space<vmem>>) attributes {dimension_semantics = [#tpu.dimension_semantics<arbitrary>], iteration_bounds = array<i64: 1>, scalar_prefetch = 0 : i64, scratch_operands = 3 : i64, tpu.core_type = #tpu.core_type<tc>, window_params = [{pipeline_mode = #tpu.pipeline_mode<synchronous>, transform_indices = @transform_0, window_bounds = array<i64: 2, 27, 961>}, {pipeline_mode = #tpu.pipeline_mode<synchronous>, transform_indices = @transform_1, window_bounds = array<i64: 32, 27>}, {pipeline_mode = #tpu.pipeline_mode<synchronous>, transform_indices = @transform_2, window_bounds = array<i64: 32, 1>}, {pipeline_mode = #tpu.pipeline_mode<synchronous>, transform_indices = @transform_3, window_bounds = array<i64: 9, 32, 32>}, {pipeline_mode = #tpu.pipeline_mode<synchronous>, transform_indices = @transform_4, window_bounds = array<i64: 32, 1>}, {pipeline_mode = #tpu.pipeline_mode<synchronous>, transform_indices = @transform_5, window_bounds = array<i64: 899, 1600>}, {pipeline_mode = #tpu.pipeline_mode<synchronous>, transform_indices = @transform_6, window_bounds = array<i64: 1, 50>}, {pipeline_mode = #tpu.pipeline_mode<synchronous>, transform_indices = @transform_7, window_bounds = array<i64: 1, 50>}, {pipeline_mode = #tpu.pipeline_mode<synchronous>, transform_indices = @transform_8, window_bounds = array<i64: 1, 50>}, {pipeline_mode = #tpu.pipeline_mode<synchronous>, transform_indices = @transform_9, window_bounds = array<i64: 2, 50>}]} {
    %cst = arith.constant 0.000000e+00 : f32
    %0 = vector.broadcast %cst : f32 to vector<32x1024xf32>
    %c0 = arith.constant 0 : index
    %c0_0 = arith.constant 0 : index
    %1 = vector.load %arg11[%c0, %c0_0] : memref<32x1024xf32, #tpu.memory_space<vmem>>, vector<32x1024xf32>
    tpu.vector_store %arg11[%c0, %c0_0], %0 {strides = array<i32>} : memref<32x1024xf32, #tpu.memory_space<vmem>>, vector<32x1024xf32>,
    %c0_1 = arith.constant 0 : index
    %c0_2 = arith.constant 0 : index
    %2 = vector.load %arg2[%c0_1, %c0_2] : memref<32x27xf32, #tpu.memory_space<vmem>>, vector<32x27xf32>
    %c0_3 = arith.constant 0 : index
    %c0_4 = arith.constant 0 : index
    %c0_5 = arith.constant 0 : index
    %3 = vector.load %arg1[%c0_3, %c0_4, %c0_5] : memref<2x27x961xf32, #tpu.memory_space<vmem>>, vector<1x27x961xf32>
    %4 = vector.shape_cast %3 : vector<1x27x961xf32> to vector<27x961xf32>
    %cst_6 = arith.constant dense<0.000000e+00> : vector<32x961xf32>
    %5 = tpu.matmul %2, %4, %cst_6 {dimension_numbers = #tpu.dot_dimension_numbers<[1], [0], [0], [1], [0, 0, 1, 1], [], []>} : vector<32x27xf32>, vector<27x961xf32>, vector<32x961xf32> -> vector<32x961xf32>
    %c0_7 = arith.constant 0 : index
    %c0_8 = arith.constant 0 : index
    %6 = vector.load %arg3[%c0_7, %c0_8] : memref<32x1xf32, #tpu.memory_space<vmem>>, vector<32x1xf32>
    %7 = vector.broadcast %6 : vector<32x1xf32> to vector<32x961xf32>
    %8 = arith.addf %5, %7 : vector<32x961xf32>
    %cst_9 = arith.constant 0.000000e+00 : f32
    %9 = vector.broadcast %cst_9 : f32 to vector<32x961xf32>
    %10 = arith.maximumf %8, %9 : vector<32x961xf32>
    %c0_10 = arith.constant 0 : index
    %c0_11 = arith.constant 0 : index
    %11 = vector.load %arg11[%c0_10, %c0_11] : memref<32x1024xf32, #tpu.memory_space<vmem>>, vector<32x961xf32>
    tpu.vector_store %arg11[%c0_10, %c0_11], %10 {strides = array<i32>} : memref<32x1024xf32, #tpu.memory_space<vmem>>, vector<32x961xf32>,
    %cst_12 = arith.constant 0.000000e+00 : f32
    %12 = vector.broadcast %cst_12 : f32 to vector<32x899xf32>
    %c0_13 = arith.constant 0 : index
    %c0_14 = arith.constant 0 : index
    %c0_15 = arith.constant 0 : index
    %13 = vector.load %arg4[%c0_13, %c0_14, %c0_15] : memref<9x32x32xf32, #tpu.memory_space<vmem>>, vector<1x32x32xf32>
    %14 = vector.shape_cast %13 : vector<1x32x32xf32> to vector<32x32xf32>
    %c0_16 = arith.constant 0 : index
    %c0_17 = arith.constant 0 : index
    %15 = vector.load %arg11[%c0_16, %c0_17] : memref<32x1024xf32, #tpu.memory_space<vmem>>, vector<32x899xf32>
    %cst_18 = arith.constant dense<0.000000e+00> : vector<32x899xf32>
    %16 = tpu.matmul %14, %15, %cst_18 {dimension_numbers = #tpu.dot_dimension_numbers<[1], [0], [0], [1], [0, 0, 1, 1], [], []>} : vector<32x32xf32>, vector<32x899xf32>, vector<32x899xf32> -> vector<32x899xf32>
    %17 = arith.addf %12, %16 : vector<32x899xf32>
    %c1 = arith.constant 1 : index
    %c0_19 = arith.constant 0 : index
    %c0_20 = arith.constant 0 : index
    %18 = vector.load %arg4[%c1, %c0_19, %c0_20] : memref<9x32x32xf32, #tpu.memory_space<vmem>>, vector<1x32x32xf32>
    %19 = vector.shape_cast %18 : vector<1x32x32xf32> to vector<32x32xf32>
    %c0_21 = arith.constant 0 : index
    %c1_22 = arith.constant 1 : index
    %20 = vector.load %arg11[%c0_21, %c1_22] : memref<32x1024xf32, #tpu.memory_space<vmem>>, vector<32x899xf32>
    %cst_23 = arith.constant dense<0.000000e+00> : vector<32x899xf32>
    %21 = tpu.matmul %19, %20, %cst_23 {dimension_numbers = #tpu.dot_dimension_numbers<[1], [0], [0], [1], [0, 0, 1, 1], [], []>} : vector<32x32xf32>, vector<32x899xf32>, vector<32x899xf32> -> vector<32x899xf32>
    %22 = arith.addf %17, %21 : vector<32x899xf32>
    %c2 = arith.constant 2 : index
    %c0_24 = arith.constant 0 : index
    %c0_25 = arith.constant 0 : index
    %23 = vector.load %arg4[%c2, %c0_24, %c0_25] : memref<9x32x32xf32, #tpu.memory_space<vmem>>, vector<1x32x32xf32>
    %24 = vector.shape_cast %23 : vector<1x32x32xf32> to vector<32x32xf32>
    %c0_26 = arith.constant 0 : index
    %c2_27 = arith.constant 2 : index
    %25 = vector.load %arg11[%c0_26, %c2_27] : memref<32x1024xf32, #tpu.memory_space<vmem>>, vector<32x899xf32>
    %cst_28 = arith.constant dense<0.000000e+00> : vector<32x899xf32>
    %26 = tpu.matmul %24, %25, %cst_28 {dimension_numbers = #tpu.dot_dimension_numbers<[1], [0], [0], [1], [0, 0, 1, 1], [], []>} : vector<32x32xf32>, vector<32x899xf32>, vector<32x899xf32> -> vector<32x899xf32>
    %27 = arith.addf %22, %26 : vector<32x899xf32>
    %c3 = arith.constant 3 : index
    %c0_29 = arith.constant 0 : index
    %c0_30 = arith.constant 0 : index
    %28 = vector.load %arg4[%c3, %c0_29, %c0_30] : memref<9x32x32xf32, #tpu.memory_space<vmem>>, vector<1x32x32xf32>
    %29 = vector.shape_cast %28 : vector<1x32x32xf32> to vector<32x32xf32>
    %c0_31 = arith.constant 0 : index
    %c31 = arith.constant 31 : index
    %30 = vector.load %arg11[%c0_31, %c31] : memref<32x1024xf32, #tpu.memory_space<vmem>>, vector<32x899xf32>
    %cst_32 = arith.constant dense<0.000000e+00> : vector<32x899xf32>
    %31 = tpu.matmul %29, %30, %cst_32 {dimension_numbers = #tpu.dot_dimension_numbers<[1], [0], [0], [1], [0, 0, 1, 1], [], []>} : vector<32x32xf32>, vector<32x899xf32>, vector<32x899xf32> -> vector<32x899xf32>
    %32 = arith.addf %27, %31 : vector<32x899xf32>
    %c4 = arith.constant 4 : index
    %c0_33 = arith.constant 0 : index
    %c0_34 = arith.constant 0 : index
    %33 = vector.load %arg4[%c4, %c0_33, %c0_34] : memref<9x32x32xf32, #tpu.memory_space<vmem>>, vector<1x32x32xf32>
    %34 = vector.shape_cast %33 : vector<1x32x32xf32> to vector<32x32xf32>
    %c0_35 = arith.constant 0 : index
    %c32 = arith.constant 32 : index
    %35 = vector.load %arg11[%c0_35, %c32] : memref<32x1024xf32, #tpu.memory_space<vmem>>, vector<32x899xf32>
    %cst_36 = arith.constant dense<0.000000e+00> : vector<32x899xf32>
    %36 = tpu.matmul %34, %35, %cst_36 {dimension_numbers = #tpu.dot_dimension_numbers<[1], [0], [0], [1], [0, 0, 1, 1], [], []>} : vector<32x32xf32>, vector<32x899xf32>, vector<32x899xf32> -> vector<32x899xf32>
    %37 = arith.addf %32, %36 : vector<32x899xf32>
    %c5 = arith.constant 5 : index
    %c0_37 = arith.constant 0 : index
    %c0_38 = arith.constant 0 : index
    %38 = vector.load %arg4[%c5, %c0_37, %c0_38] : memref<9x32x32xf32, #tpu.memory_space<vmem>>, vector<1x32x32xf32>
    %39 = vector.shape_cast %38 : vector<1x32x32xf32> to vector<32x32xf32>
    %c0_39 = arith.constant 0 : index
    %c33 = arith.constant 33 : index
    %40 = vector.load %arg11[%c0_39, %c33] : memref<32x1024xf32, #tpu.memory_space<vmem>>, vector<32x899xf32>
    %cst_40 = arith.constant dense<0.000000e+00> : vector<32x899xf32>
    %41 = tpu.matmul %39, %40, %cst_40 {dimension_numbers = #tpu.dot_dimension_numbers<[1], [0], [0], [1], [0, 0, 1, 1], [], []>} : vector<32x32xf32>, vector<32x899xf32>, vector<32x899xf32> -> vector<32x899xf32>
    %42 = arith.addf %37, %41 : vector<32x899xf32>
    %c6 = arith.constant 6 : index
    %c0_41 = arith.constant 0 : index
    %c0_42 = arith.constant 0 : index
    %43 = vector.load %arg4[%c6, %c0_41, %c0_42] : memref<9x32x32xf32, #tpu.memory_space<vmem>>, vector<1x32x32xf32>
    %44 = vector.shape_cast %43 : vector<1x32x32xf32> to vector<32x32xf32>
    %c0_43 = arith.constant 0 : index
    %c62 = arith.constant 62 : index
    %45 = vector.load %arg11[%c0_43, %c62] : memref<32x1024xf32, #tpu.memory_space<vmem>>, vector<32x899xf32>
    %cst_44 = arith.constant dense<0.000000e+00> : vector<32x899xf32>
    %46 = tpu.matmul %44, %45, %cst_44 {dimension_numbers = #tpu.dot_dimension_numbers<[1], [0], [0], [1], [0, 0, 1, 1], [], []>} : vector<32x32xf32>, vector<32x899xf32>, vector<32x899xf32> -> vector<32x899xf32>
    %47 = arith.addf %42, %46 : vector<32x899xf32>
    %c7 = arith.constant 7 : index
    %c0_45 = arith.constant 0 : index
    %c0_46 = arith.constant 0 : index
    %48 = vector.load %arg4[%c7, %c0_45, %c0_46] : memref<9x32x32xf32, #tpu.memory_space<vmem>>, vector<1x32x32xf32>
    %49 = vector.shape_cast %48 : vector<1x32x32xf32> to vector<32x32xf32>
    %c0_47 = arith.constant 0 : index
    %c63 = arith.constant 63 : index
    %50 = vector.load %arg11[%c0_47, %c63] : memref<32x1024xf32, #tpu.memory_space<vmem>>, vector<32x899xf32>
    %cst_48 = arith.constant dense<0.000000e+00> : vector<32x899xf32>
    %51 = tpu.matmul %49, %50, %cst_48 {dimension_numbers = #tpu.dot_dimension_numbers<[1], [0], [0], [1], [0, 0, 1, 1], [], []>} : vector<32x32xf32>, vector<32x899xf32>, vector<32x899xf32> -> vector<32x899xf32>
    %52 = arith.addf %47, %51 : vector<32x899xf32>
    %c8 = arith.constant 8 : index
    %c0_49 = arith.constant 0 : index
    %c0_50 = arith.constant 0 : index
    %53 = vector.load %arg4[%c8, %c0_49, %c0_50] : memref<9x32x32xf32, #tpu.memory_space<vmem>>, vector<1x32x32xf32>
    %54 = vector.shape_cast %53 : vector<1x32x32xf32> to vector<32x32xf32>
    %c0_51 = arith.constant 0 : index
    %c64 = arith.constant 64 : index
    %55 = vector.load %arg11[%c0_51, %c64] : memref<32x1024xf32, #tpu.memory_space<vmem>>, vector<32x899xf32>
    %cst_52 = arith.constant dense<0.000000e+00> : vector<32x899xf32>
    %56 = tpu.matmul %54, %55, %cst_52 {dimension_numbers = #tpu.dot_dimension_numbers<[1], [0], [0], [1], [0, 0, 1, 1], [], []>} : vector<32x32xf32>, vector<32x899xf32>, vector<32x899xf32> -> vector<32x899xf32>
    %57 = arith.addf %52, %56 : vector<32x899xf32>
    %c0_53 = arith.constant 0 : index
    %c0_54 = arith.constant 0 : index
    %58 = vector.load %arg5[%c0_53, %c0_54] : memref<32x1xf32, #tpu.memory_space<vmem>>, vector<32x1xf32>
    %59 = vector.broadcast %58 : vector<32x1xf32> to vector<32x899xf32>
    %60 = arith.addf %57, %59 : vector<32x899xf32>
    %cst_55 = arith.constant 0.000000e+00 : f32
    %61 = vector.broadcast %cst_55 : f32 to vector<32x899xf32>
    %62 = arith.maximumf %60, %61 : vector<32x899xf32>
    %63 = arith.truncf %62 : vector<32x899xf32> to vector<32x899xbf16>
    %c0_56 = arith.constant 0 : index
    %c0_57 = arith.constant 0 : index
    %64 = vector.load %arg12[%c0_56, %c0_57] : memref<64x899xbf16, #tpu.memory_space<vmem>>, vector<32x899xbf16>
    tpu.vector_store %arg12[%c0_56, %c0_57], %63 {strides = array<i32>} : memref<64x899xbf16, #tpu.memory_space<vmem>>, vector<32x899xbf16>,
    %c0_58 = arith.constant 0 : index
    %c0_59 = arith.constant 0 : index
    %65 = vector.load %arg2[%c0_58, %c0_59] : memref<32x27xf32, #tpu.memory_space<vmem>>, vector<32x27xf32>
    %c1_60 = arith.constant 1 : index
    %c0_61 = arith.constant 0 : index
    %c0_62 = arith.constant 0 : index
    %66 = vector.load %arg1[%c1_60, %c0_61, %c0_62] : memref<2x27x961xf32, #tpu.memory_space<vmem>>, vector<1x27x961xf32>
    %67 = vector.shape_cast %66 : vector<1x27x961xf32> to vector<27x961xf32>
    %cst_63 = arith.constant dense<0.000000e+00> : vector<32x961xf32>
    %68 = tpu.matmul %65, %67, %cst_63 {dimension_numbers = #tpu.dot_dimension_numbers<[1], [0], [0], [1], [0, 0, 1, 1], [], []>} : vector<32x27xf32>, vector<27x961xf32>, vector<32x961xf32> -> vector<32x961xf32>
    %c0_64 = arith.constant 0 : index
    %c0_65 = arith.constant 0 : index
    %69 = vector.load %arg3[%c0_64, %c0_65] : memref<32x1xf32, #tpu.memory_space<vmem>>, vector<32x1xf32>
    %70 = vector.broadcast %69 : vector<32x1xf32> to vector<32x961xf32>
    %71 = arith.addf %68, %70 : vector<32x961xf32>
    %cst_66 = arith.constant 0.000000e+00 : f32
    %72 = vector.broadcast %cst_66 : f32 to vector<32x961xf32>
    %73 = arith.maximumf %71, %72 : vector<32x961xf32>
    %c0_67 = arith.constant 0 : index
    %c0_68 = arith.constant 0 : index
    %74 = vector.load %arg11[%c0_67, %c0_68] : memref<32x1024xf32, #tpu.memory_space<vmem>>, vector<32x961xf32>
    tpu.vector_store %arg11[%c0_67, %c0_68], %73 {strides = array<i32>} : memref<32x1024xf32, #tpu.memory_space<vmem>>, vector<32x961xf32>,
    %cst_69 = arith.constant 0.000000e+00 : f32
    %75 = vector.broadcast %cst_69 : f32 to vector<32x899xf32>
    %c0_70 = arith.constant 0 : index
    %c0_71 = arith.constant 0 : index
    %c0_72 = arith.constant 0 : index
    %76 = vector.load %arg4[%c0_70, %c0_71, %c0_72] : memref<9x32x32xf32, #tpu.memory_space<vmem>>, vector<1x32x32xf32>
    %77 = vector.shape_cast %76 : vector<1x32x32xf32> to vector<32x32xf32>
    %c0_73 = arith.constant 0 : index
    %c0_74 = arith.constant 0 : index
    %78 = vector.load %arg11[%c0_73, %c0_74] : memref<32x1024xf32, #tpu.memory_space<vmem>>, vector<32x899xf32>
    %cst_75 = arith.constant dense<0.000000e+00> : vector<32x899xf32>
    %79 = tpu.matmul %77, %78, %cst_75 {dimension_numbers = #tpu.dot_dimension_numbers<[1], [0], [0], [1], [0, 0, 1, 1], [], []>} : vector<32x32xf32>, vector<32x899xf32>, vector<32x899xf32> -> vector<32x899xf32>
    %80 = arith.addf %75, %79 : vector<32x899xf32>
    %c1_76 = arith.constant 1 : index
    %c0_77 = arith.constant 0 : index
    %c0_78 = arith.constant 0 : index
    %81 = vector.load %arg4[%c1_76, %c0_77, %c0_78] : memref<9x32x32xf32, #tpu.memory_space<vmem>>, vector<1x32x32xf32>
    %82 = vector.shape_cast %81 : vector<1x32x32xf32> to vector<32x32xf32>
    %c0_79 = arith.constant 0 : index
    %c1_80 = arith.constant 1 : index
    %83 = vector.load %arg11[%c0_79, %c1_80] : memref<32x1024xf32, #tpu.memory_space<vmem>>, vector<32x899xf32>
    %cst_81 = arith.constant dense<0.000000e+00> : vector<32x899xf32>
    %84 = tpu.matmul %82, %83, %cst_81 {dimension_numbers = #tpu.dot_dimension_numbers<[1], [0], [0], [1], [0, 0, 1, 1], [], []>} : vector<32x32xf32>, vector<32x899xf32>, vector<32x899xf32> -> vector<32x899xf32>
    %85 = arith.addf %80, %84 : vector<32x899xf32>
    %c2_82 = arith.constant 2 : index
    %c0_83 = arith.constant 0 : index
    %c0_84 = arith.constant 0 : index
    %86 = vector.load %arg4[%c2_82, %c0_83, %c0_84] : memref<9x32x32xf32, #tpu.memory_space<vmem>>, vector<1x32x32xf32>
    %87 = vector.shape_cast %86 : vector<1x32x32xf32> to vector<32x32xf32>
    %c0_85 = arith.constant 0 : index
    %c2_86 = arith.constant 2 : index
    %88 = vector.load %arg11[%c0_85, %c2_86] : memref<32x1024xf32, #tpu.memory_space<vmem>>, vector<32x899xf32>
    %cst_87 = arith.constant dense<0.000000e+00> : vector<32x899xf32>
    %89 = tpu.matmul %87, %88, %cst_87 {dimension_numbers = #tpu.dot_dimension_numbers<[1], [0], [0], [1], [0, 0, 1, 1], [], []>} : vector<32x32xf32>, vector<32x899xf32>, vector<32x899xf32> -> vector<32x899xf32>
    %90 = arith.addf %85, %89 : vector<32x899xf32>
    %c3_88 = arith.constant 3 : index
    %c0_89 = arith.constant 0 : index
    %c0_90 = arith.constant 0 : index
    %91 = vector.load %arg4[%c3_88, %c0_89, %c0_90] : memref<9x32x32xf32, #tpu.memory_space<vmem>>, vector<1x32x32xf32>
    %92 = vector.shape_cast %91 : vector<1x32x32xf32> to vector<32x32xf32>
    %c0_91 = arith.constant 0 : index
    %c31_92 = arith.constant 31 : index
    %93 = vector.load %arg11[%c0_91, %c31_92] : memref<32x1024xf32, #tpu.memory_space<vmem>>, vector<32x899xf32>
    %cst_93 = arith.constant dense<0.000000e+00> : vector<32x899xf32>
    %94 = tpu.matmul %92, %93, %cst_93 {dimension_numbers = #tpu.dot_dimension_numbers<[1], [0], [0], [1], [0, 0, 1, 1], [], []>} : vector<32x32xf32>, vector<32x899xf32>, vector<32x899xf32> -> vector<32x899xf32>
    %95 = arith.addf %90, %94 : vector<32x899xf32>
    %c4_94 = arith.constant 4 : index
    %c0_95 = arith.constant 0 : index
    %c0_96 = arith.constant 0 : index
    %96 = vector.load %arg4[%c4_94, %c0_95, %c0_96] : memref<9x32x32xf32, #tpu.memory_space<vmem>>, vector<1x32x32xf32>
    %97 = vector.shape_cast %96 : vector<1x32x32xf32> to vector<32x32xf32>
    %c0_97 = arith.constant 0 : index
    %c32_98 = arith.constant 32 : index
    %98 = vector.load %arg11[%c0_97, %c32_98] : memref<32x1024xf32, #tpu.memory_space<vmem>>, vector<32x899xf32>
    %cst_99 = arith.constant dense<0.000000e+00> : vector<32x899xf32>
    %99 = tpu.matmul %97, %98, %cst_99 {dimension_numbers = #tpu.dot_dimension_numbers<[1], [0], [0], [1], [0, 0, 1, 1], [], []>} : vector<32x32xf32>, vector<32x899xf32>, vector<32x899xf32> -> vector<32x899xf32>
    %100 = arith.addf %95, %99 : vector<32x899xf32>
    %c5_100 = arith.constant 5 : index
    %c0_101 = arith.constant 0 : index
    %c0_102 = arith.constant 0 : index
    %101 = vector.load %arg4[%c5_100, %c0_101, %c0_102] : memref<9x32x32xf32, #tpu.memory_space<vmem>>, vector<1x32x32xf32>
    %102 = vector.shape_cast %101 : vector<1x32x32xf32> to vector<32x32xf32>
    %c0_103 = arith.constant 0 : index
    %c33_104 = arith.constant 33 : index
    %103 = vector.load %arg11[%c0_103, %c33_104] : memref<32x1024xf32, #tpu.memory_space<vmem>>, vector<32x899xf32>
    %cst_105 = arith.constant dense<0.000000e+00> : vector<32x899xf32>
    %104 = tpu.matmul %102, %103, %cst_105 {dimension_numbers = #tpu.dot_dimension_numbers<[1], [0], [0], [1], [0, 0, 1, 1], [], []>} : vector<32x32xf32>, vector<32x899xf32>, vector<32x899xf32> -> vector<32x899xf32>
    %105 = arith.addf %100, %104 : vector<32x899xf32>
    %c6_106 = arith.constant 6 : index
    %c0_107 = arith.constant 0 : index
    %c0_108 = arith.constant 0 : index
    %106 = vector.load %arg4[%c6_106, %c0_107, %c0_108] : memref<9x32x32xf32, #tpu.memory_space<vmem>>, vector<1x32x32xf32>
    %107 = vector.shape_cast %106 : vector<1x32x32xf32> to vector<32x32xf32>
    %c0_109 = arith.constant 0 : index
    %c62_110 = arith.constant 62 : index
    %108 = vector.load %arg11[%c0_109, %c62_110] : memref<32x1024xf32, #tpu.memory_space<vmem>>, vector<32x899xf32>
    %cst_111 = arith.constant dense<0.000000e+00> : vector<32x899xf32>
    %109 = tpu.matmul %107, %108, %cst_111 {dimension_numbers = #tpu.dot_dimension_numbers<[1], [0], [0], [1], [0, 0, 1, 1], [], []>} : vector<32x32xf32>, vector<32x899xf32>, vector<32x899xf32> -> vector<32x899xf32>
    %110 = arith.addf %105, %109 : vector<32x899xf32>
    %c7_112 = arith.constant 7 : index
    %c0_113 = arith.constant 0 : index
    %c0_114 = arith.constant 0 : index
    %111 = vector.load %arg4[%c7_112, %c0_113, %c0_114] : memref<9x32x32xf32, #tpu.memory_space<vmem>>, vector<1x32x32xf32>
    %112 = vector.shape_cast %111 : vector<1x32x32xf32> to vector<32x32xf32>
    %c0_115 = arith.constant 0 : index
    %c63_116 = arith.constant 63 : index
    %113 = vector.load %arg11[%c0_115, %c63_116] : memref<32x1024xf32, #tpu.memory_space<vmem>>, vector<32x899xf32>
    %cst_117 = arith.constant dense<0.000000e+00> : vector<32x899xf32>
    %114 = tpu.matmul %112, %113, %cst_117 {dimension_numbers = #tpu.dot_dimension_numbers<[1], [0], [0], [1], [0, 0, 1, 1], [], []>} : vector<32x32xf32>, vector<32x899xf32>, vector<32x899xf32> -> vector<32x899xf32>
    %115 = arith.addf %110, %114 : vector<32x899xf32>
    %c8_118 = arith.constant 8 : index
    %c0_119 = arith.constant 0 : index
    %c0_120 = arith.constant 0 : index
    %116 = vector.load %arg4[%c8_118, %c0_119, %c0_120] : memref<9x32x32xf32, #tpu.memory_space<vmem>>, vector<1x32x32xf32>
    %117 = vector.shape_cast %116 : vector<1x32x32xf32> to vector<32x32xf32>
    %c0_121 = arith.constant 0 : index
    %c64_122 = arith.constant 64 : index
    %118 = vector.load %arg11[%c0_121, %c64_122] : memref<32x1024xf32, #tpu.memory_space<vmem>>, vector<32x899xf32>
    %cst_123 = arith.constant dense<0.000000e+00> : vector<32x899xf32>
    %119 = tpu.matmul %117, %118, %cst_123 {dimension_numbers = #tpu.dot_dimension_numbers<[1], [0], [0], [1], [0, 0, 1, 1], [], []>} : vector<32x32xf32>, vector<32x899xf32>, vector<32x899xf32> -> vector<32x899xf32>
    %120 = arith.addf %115, %119 : vector<32x899xf32>
    %c0_124 = arith.constant 0 : index
    %c0_125 = arith.constant 0 : index
    %121 = vector.load %arg5[%c0_124, %c0_125] : memref<32x1xf32, #tpu.memory_space<vmem>>, vector<32x1xf32>
    %122 = vector.broadcast %121 : vector<32x1xf32> to vector<32x899xf32>
    %123 = arith.addf %120, %122 : vector<32x899xf32>
    %cst_126 = arith.constant 0.000000e+00 : f32
    %124 = vector.broadcast %cst_126 : f32 to vector<32x899xf32>
    %125 = arith.maximumf %123, %124 : vector<32x899xf32>
    %126 = arith.truncf %125 : vector<32x899xf32> to vector<32x899xbf16>
    %c32_127 = arith.constant 32 : index
    %c0_128 = arith.constant 0 : index
    %127 = vector.load %arg12[%c32_127, %c0_128] : memref<64x899xbf16, #tpu.memory_space<vmem>>, vector<32x899xbf16>
    tpu.vector_store %arg12[%c32_127, %c0_128], %126 {strides = array<i32>} : memref<64x899xbf16, #tpu.memory_space<vmem>>, vector<32x899xbf16>,
    %c0_129 = arith.constant 0 : index
    %c0_130 = arith.constant 0 : index
    %128 = vector.load %arg12[%c0_129, %c0_130] : memref<64x899xbf16, #tpu.memory_space<vmem>>, vector<64x899xbf16>
    %c0_131 = arith.constant 0 : index
    %c0_132 = arith.constant 0 : index
    %129 = vector.load %arg6[%c0_131, %c0_132] : memref<899x1600xbf16, #tpu.memory_space<vmem>>, vector<899x512xbf16>
    %cst_133 = arith.constant dense<0.000000e+00> : vector<64x512xf32>
    %130 = tpu.matmul %128, %129, %cst_133 {dimension_numbers = #tpu.dot_dimension_numbers<[1], [0], [0], [1], [0, 0, 1, 1], [], []>} : vector<64x899xbf16>, vector<899x512xbf16>, vector<64x512xf32> -> vector<64x512xf32>
    %c0_134 = arith.constant 0 : index
    %c0_135 = arith.constant 0 : index
    %131 = vector.load %arg13[%c0_134, %c0_135] : memref<64x1600xf32, #tpu.memory_space<vmem>>, vector<64x512xf32>
    tpu.vector_store %arg13[%c0_134, %c0_135], %130 {strides = array<i32>} : memref<64x1600xf32, #tpu.memory_space<vmem>>, vector<64x512xf32>,
    %c0_136 = arith.constant 0 : index
    %c0_137 = arith.constant 0 : index
    %132 = vector.load %arg12[%c0_136, %c0_137] : memref<64x899xbf16, #tpu.memory_space<vmem>>, vector<64x899xbf16>
    %c0_138 = arith.constant 0 : index
    %c512 = arith.constant 512 : index
    %133 = vector.load %arg6[%c0_138, %c512] : memref<899x1600xbf16, #tpu.memory_space<vmem>>, vector<899x512xbf16>
    %cst_139 = arith.constant dense<0.000000e+00> : vector<64x512xf32>
    %134 = tpu.matmul %132, %133, %cst_139 {dimension_numbers = #tpu.dot_dimension_numbers<[1], [0], [0], [1], [0, 0, 1, 1], [], []>} : vector<64x899xbf16>, vector<899x512xbf16>, vector<64x512xf32> -> vector<64x512xf32>
    %c0_140 = arith.constant 0 : index
    %c512_141 = arith.constant 512 : index
    %135 = vector.load %arg13[%c0_140, %c512_141] : memref<64x1600xf32, #tpu.memory_space<vmem>>, vector<64x512xf32>
    tpu.vector_store %arg13[%c0_140, %c512_141], %134 {strides = array<i32>} : memref<64x1600xf32, #tpu.memory_space<vmem>>, vector<64x512xf32>,
    %c0_142 = arith.constant 0 : index
    %c0_143 = arith.constant 0 : index
    %136 = vector.load %arg12[%c0_142, %c0_143] : memref<64x899xbf16, #tpu.memory_space<vmem>>, vector<64x899xbf16>
    %c0_144 = arith.constant 0 : index
    %c1024 = arith.constant 1024 : index
    %137 = vector.load %arg6[%c0_144, %c1024] : memref<899x1600xbf16, #tpu.memory_space<vmem>>, vector<899x512xbf16>
    %cst_145 = arith.constant dense<0.000000e+00> : vector<64x512xf32>
    %138 = tpu.matmul %136, %137, %cst_145 {dimension_numbers = #tpu.dot_dimension_numbers<[1], [0], [0], [1], [0, 0, 1, 1], [], []>} : vector<64x899xbf16>, vector<899x512xbf16>, vector<64x512xf32> -> vector<64x512xf32>
    %c0_146 = arith.constant 0 : index
    %c1024_147 = arith.constant 1024 : index
    %139 = vector.load %arg13[%c0_146, %c1024_147] : memref<64x1600xf32, #tpu.memory_space<vmem>>, vector<64x512xf32>
    tpu.vector_store %arg13[%c0_146, %c1024_147], %138 {strides = array<i32>} : memref<64x1600xf32, #tpu.memory_space<vmem>>, vector<64x512xf32>,
    %c0_148 = arith.constant 0 : index
    %c0_149 = arith.constant 0 : index
    %140 = vector.load %arg12[%c0_148, %c0_149] : memref<64x899xbf16, #tpu.memory_space<vmem>>, vector<64x899xbf16>
    %c0_150 = arith.constant 0 : index
    %c1536 = arith.constant 1536 : index
    %141 = vector.load %arg6[%c0_150, %c1536] : memref<899x1600xbf16, #tpu.memory_space<vmem>>, vector<899x64xbf16>
    %cst_151 = arith.constant dense<0.000000e+00> : vector<64x64xf32>
    %142 = tpu.matmul %140, %141, %cst_151 {dimension_numbers = #tpu.dot_dimension_numbers<[1], [0], [0], [1], [0, 0, 1, 1], [], []>} : vector<64x899xbf16>, vector<899x64xbf16>, vector<64x64xf32> -> vector<64x64xf32>
    %c0_152 = arith.constant 0 : index
    %c1536_153 = arith.constant 1536 : index
    %143 = vector.load %arg13[%c0_152, %c1536_153] : memref<64x1600xf32, #tpu.memory_space<vmem>>, vector<64x64xf32>
    tpu.vector_store %arg13[%c0_152, %c1536_153], %142 {strides = array<i32>} : memref<64x1600xf32, #tpu.memory_space<vmem>>, vector<64x64xf32>,
    %c0_154 = arith.constant 0 : index
    %c0_155 = arith.constant 0 : index
    %144 = vector.load %arg7[%c0_154, %c0_155] : memref<1x50xf32, #tpu.memory_space<vmem>>, vector<1x50xf32>
    %c0_156 = arith.constant 0 : index
    %c0_157 = arith.constant 0 : index
    %145 = vector.load %arg13[%c0_156, %c0_157] : memref<64x1600xf32, #tpu.memory_space<vmem>>, vector<1x50xf32>
    %146 = arith.addf %144, %145 : vector<1x50xf32>
    %c1_158 = arith.constant 1 : index
    %c50 = arith.constant 50 : index
    %147 = vector.load %arg13[%c1_158, %c50] : memref<64x1600xf32, #tpu.memory_space<vmem>>, vector<1x50xf32>
    %148 = arith.addf %146, %147 : vector<1x50xf32>
    %c2_159 = arith.constant 2 : index
    %c100 = arith.constant 100 : index
    %149 = vector.load %arg13[%c2_159, %c100] : memref<64x1600xf32, #tpu.memory_space<vmem>>, vector<1x50xf32>
    %150 = arith.addf %148, %149 : vector<1x50xf32>
    %c3_160 = arith.constant 3 : index
    %c150 = arith.constant 150 : index
    %151 = vector.load %arg13[%c3_160, %c150] : memref<64x1600xf32, #tpu.memory_space<vmem>>, vector<1x50xf32>
    %152 = arith.addf %150, %151 : vector<1x50xf32>
    %c4_161 = arith.constant 4 : index
    %c200 = arith.constant 200 : index
    %153 = vector.load %arg13[%c4_161, %c200] : memref<64x1600xf32, #tpu.memory_space<vmem>>, vector<1x50xf32>
    %154 = arith.addf %152, %153 : vector<1x50xf32>
    %c5_162 = arith.constant 5 : index
    %c250 = arith.constant 250 : index
    %155 = vector.load %arg13[%c5_162, %c250] : memref<64x1600xf32, #tpu.memory_space<vmem>>, vector<1x50xf32>
    %156 = arith.addf %154, %155 : vector<1x50xf32>
    %c6_163 = arith.constant 6 : index
    %c300 = arith.constant 300 : index
    %157 = vector.load %arg13[%c6_163, %c300] : memref<64x1600xf32, #tpu.memory_space<vmem>>, vector<1x50xf32>
    %158 = arith.addf %156, %157 : vector<1x50xf32>
    %c7_164 = arith.constant 7 : index
    %c350 = arith.constant 350 : index
    %159 = vector.load %arg13[%c7_164, %c350] : memref<64x1600xf32, #tpu.memory_space<vmem>>, vector<1x50xf32>
    %160 = arith.addf %158, %159 : vector<1x50xf32>
    %c8_165 = arith.constant 8 : index
    %c400 = arith.constant 400 : index
    %161 = vector.load %arg13[%c8_165, %c400] : memref<64x1600xf32, #tpu.memory_space<vmem>>, vector<1x50xf32>
    %162 = arith.addf %160, %161 : vector<1x50xf32>
    %c9 = arith.constant 9 : index
    %c450 = arith.constant 450 : index
    %163 = vector.load %arg13[%c9, %c450] : memref<64x1600xf32, #tpu.memory_space<vmem>>, vector<1x50xf32>
    %164 = arith.addf %162, %163 : vector<1x50xf32>
    %c10 = arith.constant 10 : index
    %c500 = arith.constant 500 : index
    %165 = vector.load %arg13[%c10, %c500] : memref<64x1600xf32, #tpu.memory_space<vmem>>, vector<1x50xf32>
    %166 = arith.addf %164, %165 : vector<1x50xf32>
    %c11 = arith.constant 11 : index
    %c550 = arith.constant 550 : index
    %167 = vector.load %arg13[%c11, %c550] : memref<64x1600xf32, #tpu.memory_space<vmem>>, vector<1x50xf32>
    %168 = arith.addf %166, %167 : vector<1x50xf32>
    %c12 = arith.constant 12 : index
    %c600 = arith.constant 600 : index
    %169 = vector.load %arg13[%c12, %c600] : memref<64x1600xf32, #tpu.memory_space<vmem>>, vector<1x50xf32>
    %170 = arith.addf %168, %169 : vector<1x50xf32>
    %c13 = arith.constant 13 : index
    %c650 = arith.constant 650 : index
    %171 = vector.load %arg13[%c13, %c650] : memref<64x1600xf32, #tpu.memory_space<vmem>>, vector<1x50xf32>
    %172 = arith.addf %170, %171 : vector<1x50xf32>
    %c14 = arith.constant 14 : index
    %c700 = arith.constant 700 : index
    %173 = vector.load %arg13[%c14, %c700] : memref<64x1600xf32, #tpu.memory_space<vmem>>, vector<1x50xf32>
    %174 = arith.addf %172, %173 : vector<1x50xf32>
    %c15 = arith.constant 15 : index
    %c750 = arith.constant 750 : index
    %175 = vector.load %arg13[%c15, %c750] : memref<64x1600xf32, #tpu.memory_space<vmem>>, vector<1x50xf32>
    %176 = arith.addf %174, %175 : vector<1x50xf32>
    %c16 = arith.constant 16 : index
    %c800 = arith.constant 800 : index
    %177 = vector.load %arg13[%c16, %c800] : memref<64x1600xf32, #tpu.memory_space<vmem>>, vector<1x50xf32>
    %178 = arith.addf %176, %177 : vector<1x50xf32>
    %c17 = arith.constant 17 : index
    %c850 = arith.constant 850 : index
    %179 = vector.load %arg13[%c17, %c850] : memref<64x1600xf32, #tpu.memory_space<vmem>>, vector<1x50xf32>
    %180 = arith.addf %178, %179 : vector<1x50xf32>
    %c18 = arith.constant 18 : index
    %c900 = arith.constant 900 : index
    %181 = vector.load %arg13[%c18, %c900] : memref<64x1600xf32, #tpu.memory_space<vmem>>, vector<1x50xf32>
    %182 = arith.addf %180, %181 : vector<1x50xf32>
    %c19 = arith.constant 19 : index
    %c950 = arith.constant 950 : index
    %183 = vector.load %arg13[%c19, %c950] : memref<64x1600xf32, #tpu.memory_space<vmem>>, vector<1x50xf32>
    %184 = arith.addf %182, %183 : vector<1x50xf32>
    %c20 = arith.constant 20 : index
    %c1000 = arith.constant 1000 : index
    %185 = vector.load %arg13[%c20, %c1000] : memref<64x1600xf32, #tpu.memory_space<vmem>>, vector<1x50xf32>
    %186 = arith.addf %184, %185 : vector<1x50xf32>
    %c21 = arith.constant 21 : index
    %c1050 = arith.constant 1050 : index
    %187 = vector.load %arg13[%c21, %c1050] : memref<64x1600xf32, #tpu.memory_space<vmem>>, vector<1x50xf32>
    %188 = arith.addf %186, %187 : vector<1x50xf32>
    %c22 = arith.constant 22 : index
    %c1100 = arith.constant 1100 : index
    %189 = vector.load %arg13[%c22, %c1100] : memref<64x1600xf32, #tpu.memory_space<vmem>>, vector<1x50xf32>
    %190 = arith.addf %188, %189 : vector<1x50xf32>
    %c23 = arith.constant 23 : index
    %c1150 = arith.constant 1150 : index
    %191 = vector.load %arg13[%c23, %c1150] : memref<64x1600xf32, #tpu.memory_space<vmem>>, vector<1x50xf32>
    %192 = arith.addf %190, %191 : vector<1x50xf32>
    %c24 = arith.constant 24 : index
    %c1200 = arith.constant 1200 : index
    %193 = vector.load %arg13[%c24, %c1200] : memref<64x1600xf32, #tpu.memory_space<vmem>>, vector<1x50xf32>
    %194 = arith.addf %192, %193 : vector<1x50xf32>
    %c25 = arith.constant 25 : index
    %c1250 = arith.constant 1250 : index
    %195 = vector.load %arg13[%c25, %c1250] : memref<64x1600xf32, #tpu.memory_space<vmem>>, vector<1x50xf32>
    %196 = arith.addf %194, %195 : vector<1x50xf32>
    %c26 = arith.constant 26 : index
    %c1300 = arith.constant 1300 : index
    %197 = vector.load %arg13[%c26, %c1300] : memref<64x1600xf32, #tpu.memory_space<vmem>>, vector<1x50xf32>
    %198 = arith.addf %196, %197 : vector<1x50xf32>
    %c27 = arith.constant 27 : index
    %c1350 = arith.constant 1350 : index
    %199 = vector.load %arg13[%c27, %c1350] : memref<64x1600xf32, #tpu.memory_space<vmem>>, vector<1x50xf32>
    %200 = arith.addf %198, %199 : vector<1x50xf32>
    %c28 = arith.constant 28 : index
    %c1400 = arith.constant 1400 : index
    %201 = vector.load %arg13[%c28, %c1400] : memref<64x1600xf32, #tpu.memory_space<vmem>>, vector<1x50xf32>
    %202 = arith.addf %200, %201 : vector<1x50xf32>
    %c29 = arith.constant 29 : index
    %c1450 = arith.constant 1450 : index
    %203 = vector.load %arg13[%c29, %c1450] : memref<64x1600xf32, #tpu.memory_space<vmem>>, vector<1x50xf32>
    %204 = arith.addf %202, %203 : vector<1x50xf32>
    %c30 = arith.constant 30 : index
    %c1500 = arith.constant 1500 : index
    %205 = vector.load %arg13[%c30, %c1500] : memref<64x1600xf32, #tpu.memory_space<vmem>>, vector<1x50xf32>
    %206 = arith.addf %204, %205 : vector<1x50xf32>
    %c31_166 = arith.constant 31 : index
    %c1550 = arith.constant 1550 : index
    %207 = vector.load %arg13[%c31_166, %c1550] : memref<64x1600xf32, #tpu.memory_space<vmem>>, vector<1x50xf32>
    %208 = arith.addf %206, %207 : vector<1x50xf32>
    %cst_167 = arith.constant dense<0.000000e+00> : vector<1xf32>
    %209 = vector.multi_reduction <add>, %208, %cst_167 [1] : vector<1x50xf32> to vector<1xf32>
    %210 = vector.shape_cast %209 : vector<1xf32> to vector<1x1xf32>
    %cst_168 = arith.constant 5.000000e+01 : f32
    %211 = vector.broadcast %cst_168 : f32 to vector<1x1xf32>
    %212 = arith.divf %210, %211 : vector<1x1xf32>
    %213 = vector.broadcast %212 : vector<1x1xf32> to vector<1x50xf32>
    %214 = arith.subf %208, %213 : vector<1x50xf32>
    %215 = arith.mulf %214, %214 : vector<1x50xf32>
    %cst_169 = arith.constant dense<0.000000e+00> : vector<1xf32>
    %216 = vector.multi_reduction <add>, %215, %cst_169 [1] : vector<1x50xf32> to vector<1xf32>
    %217 = vector.shape_cast %216 : vector<1xf32> to vector<1x1xf32>
    %cst_170 = arith.constant 5.000000e+01 : f32
    %218 = vector.broadcast %cst_170 : f32 to vector<1x1xf32>
    %219 = arith.divf %217, %218 : vector<1x1xf32>
    %220 = vector.broadcast %212 : vector<1x1xf32> to vector<1x50xf32>
    %221 = arith.subf %208, %220 : vector<1x50xf32>
    %cst_171 = arith.constant 9.99999974E-6 : f32
    %222 = vector.broadcast %cst_171 : f32 to vector<1x1xf32>
    %223 = arith.addf %219, %222 : vector<1x1xf32>
    %224 = math.rsqrt %223 : vector<1x1xf32>
    %225 = vector.broadcast %224 : vector<1x1xf32> to vector<1x50xf32>
    %226 = arith.mulf %221, %225 : vector<1x50xf32>
    %c0_172 = arith.constant 0 : index
    %c0_173 = arith.constant 0 : index
    %227 = vector.load %arg8[%c0_172, %c0_173] : memref<1x50xf32, #tpu.memory_space<vmem>>, vector<1x50xf32>
    %228 = arith.mulf %226, %227 : vector<1x50xf32>
    %c0_174 = arith.constant 0 : index
    %c0_175 = arith.constant 0 : index
    %229 = vector.load %arg9[%c0_174, %c0_175] : memref<1x50xf32, #tpu.memory_space<vmem>>, vector<1x50xf32>
    %230 = arith.addf %228, %229 : vector<1x50xf32>
    %231 = math.tanh %230 : vector<1x50xf32>
    %c0_176 = arith.constant 0 : index
    %c0_177 = arith.constant 0 : index
    %232 = vector.load %arg10[%c0_176, %c0_177] : memref<2x50xf32, #tpu.memory_space<vmem>>, vector<1x50xf32>
    tpu.vector_store %arg10[%c0_176, %c0_177], %231 {strides = array<i32>} : memref<2x50xf32, #tpu.memory_space<vmem>>, vector<1x50xf32>,
    %c0_178 = arith.constant 0 : index
    %c0_179 = arith.constant 0 : index
    %233 = vector.load %arg7[%c0_178, %c0_179] : memref<1x50xf32, #tpu.memory_space<vmem>>, vector<1x50xf32>
    %c32_180 = arith.constant 32 : index
    %c0_181 = arith.constant 0 : index
    %234 = vector.load %arg13[%c32_180, %c0_181] : memref<64x1600xf32, #tpu.memory_space<vmem>>, vector<1x50xf32>
    %235 = arith.addf %233, %234 : vector<1x50xf32>
    %c33_182 = arith.constant 33 : index
    %c50_183 = arith.constant 50 : index
    %236 = vector.load %arg13[%c33_182, %c50_183] : memref<64x1600xf32, #tpu.memory_space<vmem>>, vector<1x50xf32>
    %237 = arith.addf %235, %236 : vector<1x50xf32>
    %c34 = arith.constant 34 : index
    %c100_184 = arith.constant 100 : index
    %238 = vector.load %arg13[%c34, %c100_184] : memref<64x1600xf32, #tpu.memory_space<vmem>>, vector<1x50xf32>
    %239 = arith.addf %237, %238 : vector<1x50xf32>
    %c35 = arith.constant 35 : index
    %c150_185 = arith.constant 150 : index
    %240 = vector.load %arg13[%c35, %c150_185] : memref<64x1600xf32, #tpu.memory_space<vmem>>, vector<1x50xf32>
    %241 = arith.addf %239, %240 : vector<1x50xf32>
    %c36 = arith.constant 36 : index
    %c200_186 = arith.constant 200 : index
    %242 = vector.load %arg13[%c36, %c200_186] : memref<64x1600xf32, #tpu.memory_space<vmem>>, vector<1x50xf32>
    %243 = arith.addf %241, %242 : vector<1x50xf32>
    %c37 = arith.constant 37 : index
    %c250_187 = arith.constant 250 : index
    %244 = vector.load %arg13[%c37, %c250_187] : memref<64x1600xf32, #tpu.memory_space<vmem>>, vector<1x50xf32>
    %245 = arith.addf %243, %244 : vector<1x50xf32>
    %c38 = arith.constant 38 : index
    %c300_188 = arith.constant 300 : index
    %246 = vector.load %arg13[%c38, %c300_188] : memref<64x1600xf32, #tpu.memory_space<vmem>>, vector<1x50xf32>
    %247 = arith.addf %245, %246 : vector<1x50xf32>
    %c39 = arith.constant 39 : index
    %c350_189 = arith.constant 350 : index
    %248 = vector.load %arg13[%c39, %c350_189] : memref<64x1600xf32, #tpu.memory_space<vmem>>, vector<1x50xf32>
    %249 = arith.addf %247, %248 : vector<1x50xf32>
    %c40 = arith.constant 40 : index
    %c400_190 = arith.constant 400 : index
    %250 = vector.load %arg13[%c40, %c400_190] : memref<64x1600xf32, #tpu.memory_space<vmem>>, vector<1x50xf32>
    %251 = arith.addf %249, %250 : vector<1x50xf32>
    %c41 = arith.constant 41 : index
    %c450_191 = arith.constant 450 : index
    %252 = vector.load %arg13[%c41, %c450_191] : memref<64x1600xf32, #tpu.memory_space<vmem>>, vector<1x50xf32>
    %253 = arith.addf %251, %252 : vector<1x50xf32>
    %c42 = arith.constant 42 : index
    %c500_192 = arith.constant 500 : index
    %254 = vector.load %arg13[%c42, %c500_192] : memref<64x1600xf32, #tpu.memory_space<vmem>>, vector<1x50xf32>
    %255 = arith.addf %253, %254 : vector<1x50xf32>
    %c43 = arith.constant 43 : index
    %c550_193 = arith.constant 550 : index
    %256 = vector.load %arg13[%c43, %c550_193] : memref<64x1600xf32, #tpu.memory_space<vmem>>, vector<1x50xf32>
    %257 = arith.addf %255, %256 : vector<1x50xf32>
    %c44 = arith.constant 44 : index
    %c600_194 = arith.constant 600 : index
    %258 = vector.load %arg13[%c44, %c600_194] : memref<64x1600xf32, #tpu.memory_space<vmem>>, vector<1x50xf32>
    %259 = arith.addf %257, %258 : vector<1x50xf32>
    %c45 = arith.constant 45 : index
    %c650_195 = arith.constant 650 : index
    %260 = vector.load %arg13[%c45, %c650_195] : memref<64x1600xf32, #tpu.memory_space<vmem>>, vector<1x50xf32>
    %261 = arith.addf %259, %260 : vector<1x50xf32>
    %c46 = arith.constant 46 : index
    %c700_196 = arith.constant 700 : index
    %262 = vector.load %arg13[%c46, %c700_196] : memref<64x1600xf32, #tpu.memory_space<vmem>>, vector<1x50xf32>
    %263 = arith.addf %261, %262 : vector<1x50xf32>
    %c47 = arith.constant 47 : index
    %c750_197 = arith.constant 750 : index
    %264 = vector.load %arg13[%c47, %c750_197] : memref<64x1600xf32, #tpu.memory_space<vmem>>, vector<1x50xf32>
    %265 = arith.addf %263, %264 : vector<1x50xf32>
    %c48 = arith.constant 48 : index
    %c800_198 = arith.constant 800 : index
    %266 = vector.load %arg13[%c48, %c800_198] : memref<64x1600xf32, #tpu.memory_space<vmem>>, vector<1x50xf32>
    %267 = arith.addf %265, %266 : vector<1x50xf32>
    %c49 = arith.constant 49 : index
    %c850_199 = arith.constant 850 : index
    %268 = vector.load %arg13[%c49, %c850_199] : memref<64x1600xf32, #tpu.memory_space<vmem>>, vector<1x50xf32>
    %269 = arith.addf %267, %268 : vector<1x50xf32>
    %c50_200 = arith.constant 50 : index
    %c900_201 = arith.constant 900 : index
    %270 = vector.load %arg13[%c50_200, %c900_201] : memref<64x1600xf32, #tpu.memory_space<vmem>>, vector<1x50xf32>
    %271 = arith.addf %269, %270 : vector<1x50xf32>
    %c51 = arith.constant 51 : index
    %c950_202 = arith.constant 950 : index
    %272 = vector.load %arg13[%c51, %c950_202] : memref<64x1600xf32, #tpu.memory_space<vmem>>, vector<1x50xf32>
    %273 = arith.addf %271, %272 : vector<1x50xf32>
    %c52 = arith.constant 52 : index
    %c1000_203 = arith.constant 1000 : index
    %274 = vector.load %arg13[%c52, %c1000_203] : memref<64x1600xf32, #tpu.memory_space<vmem>>, vector<1x50xf32>
    %275 = arith.addf %273, %274 : vector<1x50xf32>
    %c53 = arith.constant 53 : index
    %c1050_204 = arith.constant 1050 : index
    %276 = vector.load %arg13[%c53, %c1050_204] : memref<64x1600xf32, #tpu.memory_space<vmem>>, vector<1x50xf32>
    %277 = arith.addf %275, %276 : vector<1x50xf32>
    %c54 = arith.constant 54 : index
    %c1100_205 = arith.constant 1100 : index
    %278 = vector.load %arg13[%c54, %c1100_205] : memref<64x1600xf32, #tpu.memory_space<vmem>>, vector<1x50xf32>
    %279 = arith.addf %277, %278 : vector<1x50xf32>
    %c55 = arith.constant 55 : index
    %c1150_206 = arith.constant 1150 : index
    %280 = vector.load %arg13[%c55, %c1150_206] : memref<64x1600xf32, #tpu.memory_space<vmem>>, vector<1x50xf32>
    %281 = arith.addf %279, %280 : vector<1x50xf32>
    %c56 = arith.constant 56 : index
    %c1200_207 = arith.constant 1200 : index
    %282 = vector.load %arg13[%c56, %c1200_207] : memref<64x1600xf32, #tpu.memory_space<vmem>>, vector<1x50xf32>
    %283 = arith.addf %281, %282 : vector<1x50xf32>
    %c57 = arith.constant 57 : index
    %c1250_208 = arith.constant 1250 : index
    %284 = vector.load %arg13[%c57, %c1250_208] : memref<64x1600xf32, #tpu.memory_space<vmem>>, vector<1x50xf32>
    %285 = arith.addf %283, %284 : vector<1x50xf32>
    %c58 = arith.constant 58 : index
    %c1300_209 = arith.constant 1300 : index
    %286 = vector.load %arg13[%c58, %c1300_209] : memref<64x1600xf32, #tpu.memory_space<vmem>>, vector<1x50xf32>
    %287 = arith.addf %285, %286 : vector<1x50xf32>
    %c59 = arith.constant 59 : index
    %c1350_210 = arith.constant 1350 : index
    %288 = vector.load %arg13[%c59, %c1350_210] : memref<64x1600xf32, #tpu.memory_space<vmem>>, vector<1x50xf32>
    %289 = arith.addf %287, %288 : vector<1x50xf32>
    %c60 = arith.constant 60 : index
    %c1400_211 = arith.constant 1400 : index
    %290 = vector.load %arg13[%c60, %c1400_211] : memref<64x1600xf32, #tpu.memory_space<vmem>>, vector<1x50xf32>
    %291 = arith.addf %289, %290 : vector<1x50xf32>
    %c61 = arith.constant 61 : index
    %c1450_212 = arith.constant 1450 : index
    %292 = vector.load %arg13[%c61, %c1450_212] : memref<64x1600xf32, #tpu.memory_space<vmem>>, vector<1x50xf32>
    %293 = arith.addf %291, %292 : vector<1x50xf32>
    %c62_213 = arith.constant 62 : index
    %c1500_214 = arith.constant 1500 : index
    %294 = vector.load %arg13[%c62_213, %c1500_214] : memref<64x1600xf32, #tpu.memory_space<vmem>>, vector<1x50xf32>
    %295 = arith.addf %293, %294 : vector<1x50xf32>
    %c63_215 = arith.constant 63 : index
    %c1550_216 = arith.constant 1550 : index
    %296 = vector.load %arg13[%c63_215, %c1550_216] : memref<64x1600xf32, #tpu.memory_space<vmem>>, vector<1x50xf32>
    %297 = arith.addf %295, %296 : vector<1x50xf32>
    %cst_217 = arith.constant dense<0.000000e+00> : vector<1xf32>
    %298 = vector.multi_reduction <add>, %297, %cst_217 [1] : vector<1x50xf32> to vector<1xf32>
    %299 = vector.shape_cast %298 : vector<1xf32> to vector<1x1xf32>
    %cst_218 = arith.constant 5.000000e+01 : f32
    %300 = vector.broadcast %cst_218 : f32 to vector<1x1xf32>
    %301 = arith.divf %299, %300 : vector<1x1xf32>
    %302 = vector.broadcast %301 : vector<1x1xf32> to vector<1x50xf32>
    %303 = arith.subf %297, %302 : vector<1x50xf32>
    %304 = arith.mulf %303, %303 : vector<1x50xf32>
    %cst_219 = arith.constant dense<0.000000e+00> : vector<1xf32>
    %305 = vector.multi_reduction <add>, %304, %cst_219 [1] : vector<1x50xf32> to vector<1xf32>
    %306 = vector.shape_cast %305 : vector<1xf32> to vector<1x1xf32>
    %cst_220 = arith.constant 5.000000e+01 : f32
    %307 = vector.broadcast %cst_220 : f32 to vector<1x1xf32>
    %308 = arith.divf %306, %307 : vector<1x1xf32>
    %309 = vector.broadcast %301 : vector<1x1xf32> to vector<1x50xf32>
    %310 = arith.subf %297, %309 : vector<1x50xf32>
    %cst_221 = arith.constant 9.99999974E-6 : f32
    %311 = vector.broadcast %cst_221 : f32 to vector<1x1xf32>
    %312 = arith.addf %308, %311 : vector<1x1xf32>
    %313 = math.rsqrt %312 : vector<1x1xf32>
    %314 = vector.broadcast %313 : vector<1x1xf32> to vector<1x50xf32>
    %315 = arith.mulf %310, %314 : vector<1x50xf32>
    %c0_222 = arith.constant 0 : index
    %c0_223 = arith.constant 0 : index
    %316 = vector.load %arg8[%c0_222, %c0_223] : memref<1x50xf32, #tpu.memory_space<vmem>>, vector<1x50xf32>
    %317 = arith.mulf %315, %316 : vector<1x50xf32>
    %c0_224 = arith.constant 0 : index
    %c0_225 = arith.constant 0 : index
    %318 = vector.load %arg9[%c0_224, %c0_225] : memref<1x50xf32, #tpu.memory_space<vmem>>, vector<1x50xf32>
    %319 = arith.addf %317, %318 : vector<1x50xf32>
    %320 = math.tanh %319 : vector<1x50xf32>
    %c1_226 = arith.constant 1 : index
    %c0_227 = arith.constant 0 : index
    %321 = vector.load %arg10[%c1_226, %c0_227] : memref<2x50xf32, #tpu.memory_space<vmem>>, vector<1x50xf32>
    tpu.vector_store %arg10[%c1_226, %c0_227], %320 {strides = array<i32>} : memref<2x50xf32, #tpu.memory_space<vmem>>, vector<1x50xf32>,
    return
  }
  func.func @transform_0(%arg0: i32) -> (i32, i32, i32) {
    %c0_i32 = arith.constant 0 : i32
    %c0_i32_0 = arith.constant 0 : i32
    %c0_i32_1 = arith.constant 0 : i32
    %c0_i32_2 = arith.constant 0 : i32
    return %c0_i32, %c0_i32_0, %c0_i32_1 : i32, i32, i32
  }
  func.func @transform_1(%arg0: i32) -> (i32, i32) {
    %c0_i32 = arith.constant 0 : i32
    %c0_i32_0 = arith.constant 0 : i32
    %c0_i32_1 = arith.constant 0 : i32
    return %c0_i32, %c0_i32_0 : i32, i32
  }
  func.func @transform_2(%arg0: i32) -> (i32, i32) {
    %c0_i32 = arith.constant 0 : i32
    %c0_i32_0 = arith.constant 0 : i32
    %c0_i32_1 = arith.constant 0 : i32
    return %c0_i32, %c0_i32_0 : i32, i32
  }
  func.func @transform_3(%arg0: i32) -> (i32, i32, i32) {
    %c0_i32 = arith.constant 0 : i32
    %c0_i32_0 = arith.constant 0 : i32
    %c0_i32_1 = arith.constant 0 : i32
    %c0_i32_2 = arith.constant 0 : i32
    return %c0_i32, %c0_i32_0, %c0_i32_1 : i32, i32, i32
  }
  func.func @transform_4(%arg0: i32) -> (i32, i32) {
    %c0_i32 = arith.constant 0 : i32
    %c0_i32_0 = arith.constant 0 : i32
    %c0_i32_1 = arith.constant 0 : i32
    return %c0_i32, %c0_i32_0 : i32, i32
  }
  func.func @transform_5(%arg0: i32) -> (i32, i32) {
    %c0_i32 = arith.constant 0 : i32
    %c0_i32_0 = arith.constant 0 : i32
    %c0_i32_1 = arith.constant 0 : i32
    return %c0_i32, %c0_i32_0 : i32, i32
  }
  func.func @transform_6(%arg0: i32) -> (i32, i32) {
    %c0_i32 = arith.constant 0 : i32
    %c0_i32_0 = arith.constant 0 : i32
    %c0_i32_1 = arith.constant 0 : i32
    return %c0_i32, %c0_i32_0 : i32, i32
  }
  func.func @transform_7(%arg0: i32) -> (i32, i32) {
    %c0_i32 = arith.constant 0 : i32
    %c0_i32_0 = arith.constant 0 : i32
    %c0_i32_1 = arith.constant 0 : i32
    return %c0_i32, %c0_i32_0 : i32, i32
  }
  func.func @transform_8(%arg0: i32) -> (i32, i32) {
    %c0_i32 = arith.constant 0 : i32
    %c0_i32_0 = arith.constant 0 : i32
    %c0_i32_1 = arith.constant 0 : i32
    return %c0_i32, %c0_i32_0 : i32, i32
  }
  func.func @transform_9(%arg0: i32) -> (i32, i32) {
    %c0_i32 = arith.constant 0 : i32
    %c0_i32_0 = arith.constant 0 : i32
    %c0_i32_1 = arith.constant 0 : i32
    return %c0_i32, %c0_i32_0 : i32, i32
  }
}

</mosaic_0001>

<bundles_post_ra>
// kernel: pixels_encoder_forward.1
= control target key start
LH: loop header
LB: loop body
LE: loop exit
PB: predicated region body
PF: predicated region fallthrough
CT: control target
= control target key end

     0   :  { %vm139_vm0 = vcmask 1042432   ;;  %v31662_v7 = vmov 0.0   ;;  %v31649_v13 = vmov 0   ;;  %vm24120_vm1 = vmmov 1   ;;  %s24121_s26 = smov 127   ;;  %s24122_s27 = smov 126   ;;  %s31639_s0 = inlined_call_operand.vmem [shape: f32[2,27,961], index: 0, kind: input, shape index: {}]   ;;  %s31640_s1 = inlined_call_operand.vmem [shape: f32[32,27], index: 1, kind: input, shape index: {}]   ;;  %s31641_s2 = inlined_call_operand.vmem [shape: f32[32,1], index: 2, kind: input, shape index: {}]   ;;  %s31642_s3 = inlined_call_operand.vmem [shape: f32[9,32,32], index: 3, kind: input, shape index: {}]   ;;  %s31643_s4 = inlined_call_operand.vmem [shape: f32[32,1], index: 4, kind: input, shape index: {}]   ;;  %s31644_s5 = inlined_call_operand.vmem [shape: bf16[899,1600], index: 5, kind: input, shape index: {}]   ;;  %s31645_s6 = inlined_call_operand.vmem [shape: f32[1,50], index: 6, kind: input, shape index: {}]   ;;  %s31646_s7 = inlined_call_operand.vmem [shape: f32[1,50], index: 7, kind: input, shape index: {}]   ;;  %s31647_s8 = inlined_call_operand.vmem [shape: f32[1,50], index: 8, kind: input, shape index: {}]   ;;  %s31648_s9 = inlined_call_operand.hbm [shape: f32[2,50], index: 9, kind: output, shape index: {}]  }
   0x1   :  { %v71_v0 = vld [vmem:[%s31639_s0 + $0x8] sm:$0xff]  ;;  %v73_v2 = vld [vmem:[%s31639_s0 + $0x18] sm:$0xff]  ;;  %v70_v5 = vld [vmem:[%s31639_s0] sm:$0xff]  ;;  %228 = vmatprep.mubr.f32.mxu0 %v31662_v7  ;;  %41 = vst [vmem:[#allocation2 + $0x38] sm:$0xff] %v31662_v7  ;;  %317 = vmatprep.mubr.f32.mxu1 %v31662_v7  ;;  %vm126_vm3 = vcmask 220160   ;;  %vm559_vm4 = vcmask 531456  }
   0x2   :  { %v79_v1 = vld [vmem:[%s31639_s0 + $0x48] sm:$0xff]  ;;  %v81_v4 = vld [vmem:[%s31639_s0 + $0x58] sm:$0xff]  ;;  %v78_v6 = vld [vmem:[%s31639_s0 + $0x40] sm:$0xff]  ;;  %49 = vst [vmem:[#allocation2 + $0x78] sm:$0xff] %v31662_v7  ;;  %21723 = vset.pattern.permute.xlu0 %v31649_v13  ;;  %21724 = vset.pattern.permute.xlu1 %v31649_v13 }
   0x3   :  { %v20223_v3 = vpack.c.bf16 %v79_v1, %v71_v0  ;;  %57 = vst [vmem:[#allocation2 + $0xb8] sm:$0xff] %v31662_v7  ;;  %65 = vst [vmem:[#allocation2 + $0xf8] sm:$0xff] %v31662_v7  ;;  %v20233_v8 = vpack.c.bf16 %v81_v4, %v73_v2  ;;  %v20225_v9 = vpack.c.bf16 %v78_v6, %v70_v5  ;;  %v72_v10 = vld [vmem:[%s31639_s0 + $0x10] sm:$0xff]  ;;  %v87_v12 = vld [vmem:[%s31639_s0 + $0x88] sm:$0xff] }
   0x4   :  { %v80_v11 = vld [vmem:[%s31639_s0 + $0x50] sm:$0xff]  ;;  %v95_v15 = vld [vmem:[%s31639_s0 + $0xc8] sm:$0x7]  ;;  %vm24251_vm2 = vmpackc.low %vm139_vm0, %vm24120_vm1 }
   0x5   :  { %20224 = vmatprep.subr.bf16.mxu0 %v20223_v3  ;;  %v20235_v14 = vpack.c.bf16 %v80_v11, %v72_v10  ;;  %v89_v17 = vld [vmem:[%s31639_s0 + $0x98] sm:$0xff]  ;;  %20234 = vmatprep.subr.bf16.mxu1 %v20233_v8  ;;  %v20227_v18 = vpack.c.bf16 %v95_v15, %v87_v12  ;;  %v86_v20 = vld [vmem:[%s31639_s0 + $0x80] sm:$0xff]  ;;  %v88_v24 = vld [vmem:[%s31639_s0 + $0x90] sm:$0xff] }
   0x6   :  { %20226 = vmatpush1.bf16.msra.mxu0 %v20225_v9  ;;  %v97_v19 = vld [vmem:[%s31639_s0 + $0xd8] sm:$0x7]  ;;  %v94_v21 = vld [vmem:[%s31639_s0 + $0xc0] sm:$0x7]  ;;  %v96_v25 = vld [vmem:[%s31639_s0 + $0xd0] sm:$0x7] }
   0x7   :  { %20236 = vmatpush1.bf16.msra.mxu1 %v20235_v14  ;;  %v20237_v22 = vpack.c.bf16 %v97_v19, %v89_v17  ;;  %v20230_v23 = vpack.c.bf16 %v94_v21, %v86_v20  ;;  %20229 = vmatprep.subr.msk.bf16.mxu0 %vm24251_vm2, %v20227_v18  ;;  %v20240_v26 = vpack.c.bf16 %v96_v25, %v88_v24  ;;  %v75_v27 = vld [vmem:[%s31639_s0 + $0x28] sm:$0xff]  ;;  %v66_v29 = vld [vmem:[%s31640_s1] sm:$0xff]  ;;  %v77_v33 = vld [vmem:[%s31639_s0 + $0x38] sm:$0xff] }
   0x8   :  { %v83_v28 = vld [vmem:[%s31639_s0 + $0x68] sm:$0xff]  ;;  %v74_v31 = vld [vmem:[%s31639_s0 + $0x20] sm:$0xff]  ;;  %v85_v34 = vld [vmem:[%s31639_s0 + $0x78] sm:$0xff] }
   0x9   :  { %20239 = vmatprep.subr.msk.bf16.mxu1 %vm24251_vm2, %v20237_v22  ;;  %v20243_v30 = vpack.c.bf16 %v83_v28, %v75_v27  ;;  %v82_v32 = vld [vmem:[%s31639_s0 + $0x60] sm:$0xff]  ;;  %v76_v35 = vld [vmem:[%s31639_s0 + $0x30] sm:$0xff]  ;;  %v20253_v37 = vpack.c.bf16 %v85_v34, %v77_v33  ;;  %v91_v39 = vld [vmem:[%s31639_s0 + $0xa8] sm:$0xff] }
   0xa   :  { %20232 = vmatpush1.bf16.msk.msra.mxu0 %vm24251_vm2, %v20230_v23  ;;  %v20245_v36 = vpack.c.bf16 %v82_v32, %v74_v31  ;;  %v84_v38 = vld [vmem:[%s31639_s0 + $0x70] sm:$0xff]  ;;  %v99_v41 = vld [vmem:[%s31639_s0 + $0xe8] sm:$0x7]  ;;  %v93_v42 = vld [vmem:[%s31639_s0 + $0xb8] sm:$0xff] }
   0xb   :  { %20242 = vmatpush1.bf16.msk.msra.mxu1 %vm24251_vm2, %v20240_v26  ;;  %20244 = vmatprep.subr.bf16.mxu0 %v20243_v30  ;;  %v20255_v40 = vpack.c.bf16 %v84_v38, %v76_v35  ;;  %v101_v43 = vld [vmem:[%s31639_s0 + $0xf8] sm:$0x7]  ;;  %v20247_v44 = vpack.c.bf16 %v99_v41, %v91_v39  ;;  %v90_v46 = vld [vmem:[%s31639_s0 + $0xa0] sm:$0xff]  ;;  %v92_v48 = vld [vmem:[%s31639_s0 + $0xb0] sm:$0xff] }
   0xc   :  { %20254 = vmatprep.subr.bf16.mxu1 %v20253_v37  ;;  %v20257_v45 = vpack.c.bf16 %v101_v43, %v93_v42  ;;  %v98_v47 = vld [vmem:[%s31639_s0 + $0xe0] sm:$0x7]  ;;  %v67_v49 = vld [vmem:[%s31640_s1 + $0x8] sm:$0xff]  ;;  %v100_v50 = vld [vmem:[%s31639_s0 + $0xf0] sm:$0x7] }
   0xd   :  { %18904 = vmatmul.mubr.msk.f32.vlgmr.msra.gmra.mrb[0].mxu0 %vm126_vm3, %v66_v29  ;;  %v20250_v51 = vpack.c.bf16 %v98_v47, %v90_v46  ;;  %v102_v52 = vld [vmem:[%s31641_s2] sm:$0xff]  ;;  %v68_v53 = vld [vmem:[%s31640_s1 + $0x10] sm:$0xff]  ;;  %v20260_v54 = vpack.c.bf16 %v100_v50, %v92_v48  ;;  %v103_v56 = vld [vmem:[%s31641_s2 + $0x8] sm:$0xff] }
   0xe   :  { %18910 = vmatmul.mubr.msk.f32.vlgmr.msra.gmra.mrb[0].mxu1 %vm126_vm3, %v66_v29  ;;  %234 = vmatprep.mubr.f32.mxu0 %v31662_v7  ;;  %v104_v55 = vld [vmem:[%s31641_s2 + $0x10] sm:$0xff]  ;;  %v69_v57 = vld [vmem:[%s31640_s1 + $0x18] sm:$0xff] }
   0xf   :  { %323 = vmatprep.mubr.f32.mxu1 %v31662_v7  ;;  %20246 = vmatpush1.bf16.msra.mxu0 %v20245_v36  ;;  %v105_v58 = vld [vmem:[%s31641_s2 + $0x18] sm:$0xff] }
  0x10   :  { %20256 = vmatpush1.bf16.msra.mxu1 %v20255_v40  ;;  %20249 = vmatprep.subr.msk.bf16.mxu0 %vm24251_vm2, %v20247_v44 }
  0x11   :  { %18905 = vmatmul.mubr.msk.f32.gmra.mrb[2].mxu0 %vm126_vm3, %v67_v49  ;;  %20259 = vmatprep.subr.msk.bf16.mxu1 %vm24251_vm2, %v20257_v45 }
  0x12   :  { %18911 = vmatmul.mubr.msk.f32.gmra.mrb[2].mxu1 %vm126_vm3, %v67_v49  ;;  %240 = vmatprep.mubr.f32.mxu0 %v31662_v7 }
  0x13   :  { %329 = vmatprep.mubr.f32.mxu1 %v31662_v7  ;;  %20252 = vmatpush1.bf16.msk.msra.mxu0 %vm24251_vm2, %v20250_v51 }
  0x14   :  { %20262 = vmatpush1.bf16.msk.msra.mxu1 %vm24251_vm2, %v20260_v54  ;;  %108 = vperm.xlu0 %21723, %v102_v52  }
  0x15   :  { %18906 = vmatmul.mubr.msk.f32.gmra.mrb[4].mxu0 %vm126_vm3, %v68_v53  ;;  %118 = vperm.xlu1 %21724, %v104_v55  }
  0x16   :  { %18912 = vmatmul.mubr.msk.f32.gmra.mrb[4].mxu1 %vm126_vm3, %v68_v53  ;;  %246 = vmatprep.mubr.f32.mxu0 %v31662_v7 }
  0x17   :  { %335 = vmatprep.mubr.f32.mxu1 %v31662_v7 }
  0x18   :  { %113 = vperm.xlu0 %21723, %v103_v56  }
  0x19   :  { %18907 = vmatmul.mubr.msk.f32.gmra.mrb[6].mxu0 %vm126_vm3, %v69_v57  ;;  %123 = vperm.xlu1 %21724, %v105_v58  }
  0x1a   :  { %18913 = vmatmul.mubr.msk.f32.gmra.mrb[6].mxu1 %vm126_vm3, %v69_v57  ;;  %406 = vmatprep.mubr.f32.mxu0 %v31662_v7 }
  0x1b   :  { %495 = vmatprep.mubr.f32.mxu1 %v31662_v7 }
  0x1d   :  { %18916 = vmatmul.mubr.msk.f32.vlgmr.msra.gmra.mrb[8].mxu0 %vm126_vm3, %v66_v29 }
  0x1e   :  { %18922 = vmatmul.mubr.msk.f32.vlgmr.msra.gmra.mrb[8].mxu1 %vm126_vm3, %v66_v29  ;;  %412 = vmatprep.mubr.f32.mxu0 %v31662_v7 }
  0x1f   :  { %501 = vmatprep.mubr.f32.mxu1 %v31662_v7 }
  0x21   :  { %18917 = vmatmul.mubr.msk.f32.gmra.mrb[10].mxu0 %vm126_vm3, %v67_v49 }
  0x22   :  { %18923 = vmatmul.mubr.msk.f32.gmra.mrb[10].mxu1 %vm126_vm3, %v67_v49  ;;  %418 = vmatprep.mubr.f32.mxu0 %v31662_v7 }
  0x23   :  { %507 = vmatprep.mubr.f32.mxu1 %v31662_v7 }
  0x25   :  { %18918 = vmatmul.mubr.msk.f32.gmra.mrb[12].mxu0 %vm126_vm3, %v68_v53 }
  0x26   :  { %18924 = vmatmul.mubr.msk.f32.gmra.mrb[12].mxu1 %vm126_vm3, %v68_v53  ;;  %424 = vmatprep.mubr.f32.mxu0 %v31662_v7 }
  0x27   :  { %513 = vmatprep.mubr.f32.mxu1 %v31662_v7 }
  0x29   :  { %18919 = vmatmul.mubr.msk.f32.gmra.mrb[14].mxu0 %vm126_vm3, %v69_v57 }
  0x2a   :  { %18925 = vmatmul.mubr.msk.f32.gmra.mrb[14].mxu1 %vm126_vm3, %v69_v57  ;;  %860 = vmatprep.mubr.f32.mxu0 %v31662_v7 }
  0x2b   :  { %949 = vmatprep.mubr.f32.mxu1 %v31662_v7 }
  0x93   :  { %v24393_v59 = vpop.permute.xlu0 %108 }
  0x94   :  { %v24401_v10 = vpop.permute.xlu1 %118 }
  0x97   :  { %v24398_v3 = vpop.permute.xlu0 %113 }
  0x98   :  { %v24426_v35 = vpop.permute.xlu1 %123 }
  0xe0   :  { %v230_v60 = vpop.f32.mrb[0].mxu0 }
  0xe1   :  { %v231_v61 = vadd.f32 %v230_v60, %v24393_v59  ;;  %v319_v62 = vpop.f32.mrb[0].mxu1  ;;  %v232_v63 = vpop.f32.mrb[1].mxu0 }
  0xe2   :  { %v320_v0 = vadd.f32 %v319_v62, %v24393_v59  ;;  %v233_v1 = vadd.f32 %v232_v63, %v24393_v59  ;;  %v321_v2 = vpop.f32.mrb[1].mxu1 }
  0xe3   :  { %v520_v4 = vmax.f32 %v231_v61, 0.0  ;;  %v322_v5 = vadd.f32 %v321_v2, %v24393_v59 }
  0xe4   :  { %v522_v6 = vmax.f32 %v320_v0, 0.0  ;;  %v521_v8 = vmax.f32 %v233_v1, 0.0  ;;  %v236_v9 = vpop.f32.mrb[2].mxu0 }
  0xe5   :  { %v523_v11 = vmax.f32 %v322_v5, 0.0  ;;  %v24404_v12 = vadd.f32 %v236_v9, %v24398_v3  ;;  %v325_v14 = vpop.f32.mrb[2].mxu1  ;;  %v238_v15 = vpop.f32.mrb[3].mxu0 }
  0xe6   :  { %v326_v17 = vadd.f32 %v325_v14, %v24398_v3  ;;  %v239_v18 = vadd.f32 %v238_v15, %v24398_v3  ;;  %v327_v19 = vpop.f32.mrb[3].mxu1  ;;  %v24408_v20 = vpack.i.bf16 %v522_v6, %v521_v8 }
  0xe7   :  { %v528_v21 = vmax.f32 %v24404_v12, 0.0  ;;  %v24412_v22 = vadd.f32 %v327_v19, %v24398_v3  ;;  %v24414_v23 = vpack.i.bf16 %v523_v11, %v520_v4 }
  0xe8   :  { %v530_v24 = vmax.f32 %v326_v17, 0.0  ;;  %v529_v25 = vmax.f32 %v239_v18, 0.0  ;;  %v242_v26 = vpop.f32.mrb[4].mxu0  ;;  %21726 = vrot.lane.b32.xlu0 %v24408_v20, %s24121_s26 }
  0xe9   :  { %v531_v27 = vmax.f32 %v24412_v22, 0.0  ;;  %v243_v28 = vadd.f32 %v242_v26, %v24401_v10  ;;  %v331_v29 = vpop.f32.mrb[4].mxu1  ;;  %v244_v30 = vpop.f32.mrb[5].mxu0  ;;  %v24422_v31 = vpack.c.bf16 %v528_v21, %v520_v4 }
  0xea   :  { %v332_v32 = vadd.f32 %v331_v29, %v24401_v10  ;;  %v245_v33 = vadd.f32 %v244_v30, %v24401_v10  ;;  %v333_v34 = vpop.f32.mrb[5].mxu1  ;;  %v24428_v36 = vpack.i.bf16 %v530_v24, %v529_v25  ;;  %v24430_v37 = vpack.c.bf16 %v529_v25, %v521_v8 }
  0xeb   :  { %v536_v38 = vmax.f32 %v243_v28, 0.0  ;;  %v334_v39 = vadd.f32 %v333_v34, %v24401_v10  ;;  %v24435_v40 = vpack.c.bf16 %v531_v27, %v523_v11  ;;  %v24437_v41 = vpack.c.bf16 %v530_v24, %v522_v6 }
  0xec   :  { %v538_v42 = vmax.f32 %v332_v32, 0.0  ;;  %v537_v43 = vmax.f32 %v245_v33, 0.0  ;;  %v248_v44 = vpop.f32.mrb[6].mxu0  ;;  %21736 = vrot.lane.b32.xlu1 %v24428_v36, %s24121_s26  ;;  %21731 = vrot.lane.b32.xlu0 %v24414_v23, %s24121_s26 }
  0xed   :  { %v539_v45 = vmax.f32 %v334_v39, 0.0  ;;  %v24444_v46 = vadd.f32 %v248_v44, %v24426_v35  ;;  %v337_v47 = vpop.f32.mrb[6].mxu1  ;;  %v250_v48 = vpop.f32.mrb[7].mxu0 }
  0xee   :  { %v338_v49 = vadd.f32 %v337_v47, %v24426_v35  ;;  %v251_v50 = vadd.f32 %v250_v48, %v24426_v35  ;;  %v339_v51 = vpop.f32.mrb[7].mxu1  ;;  %v24448_v52 = vpack.i.bf16 %v538_v42, %v537_v43 }
  0xef   :  { %v544_v53 = vmax.f32 %v24444_v46, 0.0  ;;  %v24452_v54 = vadd.f32 %v339_v51, %v24426_v35  ;;  %v24454_v55 = vpack.i.bf16 %v539_v45, %v536_v38 }
  0xf0   :  { %v546_v56 = vmax.f32 %v338_v49, 0.0  ;;  %v545_v57 = vmax.f32 %v251_v50, 0.0  ;;  %v408_v58 = vpop.f32.mrb[8].mxu0  ;;  %21741 = vrot.lane.b32.xlu1 %v24448_v52, %s24121_s26 }
  0xf1   :  { %v547_v60 = vmax.f32 %v24452_v54, 0.0  ;;  %v409_v61 = vadd.f32 %v408_v58, %v24393_v59  ;;  %v497_v62 = vpop.f32.mrb[8].mxu1  ;;  %v410_v63 = vpop.f32.mrb[9].mxu0  ;;  %v24462_v0 = vpack.c.bf16 %v544_v53, %v536_v38 }
  0xf2   :  { %v498_v1 = vadd.f32 %v497_v62, %v24393_v59  ;;  %v411_v2 = vadd.f32 %v410_v63, %v24393_v59  ;;  %v499_v4 = vpop.f32.mrb[9].mxu1  ;;  %v24466_v5 = vpack.i.bf16 %v546_v56, %v545_v57  ;;  %v24468_v6 = vpack.c.bf16 %v545_v57, %v537_v43 }
  0xf3   :  { %v524_v8 = vmax.f32 %v409_v61, 0.0  ;;  %v500_v9 = vadd.f32 %v499_v4, %v24393_v59  ;;  %v24473_v11 = vpack.c.bf16 %v547_v60, %v539_v45  ;;  %v24475_v14 = vpack.c.bf16 %v546_v56, %v538_v42 }
  0xf4   :  { %v526_v15 = vmax.f32 %v498_v1, 0.0  ;;  %v525_v17 = vmax.f32 %v411_v2, 0.0  ;;  %v414_v18 = vpop.f32.mrb[10].mxu0  ;;  %21746 = vrot.lane.b32.xlu1 %v24454_v55, %s24121_s26  ;;  %21751 = vrot.lane.b32.xlu0 %v24466_v5, %s24121_s26 }
  0xf5   :  { %v527_v19 = vmax.f32 %v500_v9, 0.0  ;;  %v415_v24 = vadd.f32 %v414_v18, %v24398_v3  ;;  %v503_v59 = vpop.f32.mrb[10].mxu1  ;;  %v416_v25 = vpop.f32.mrb[11].mxu0  ;;  %v24484_v26 = vpack.i.bf16 %v528_v21, %v524_v8 }
  0xf6   :  { %v504_v28 = vadd.f32 %v503_v59, %v24398_v3  ;;  %v417_v29 = vadd.f32 %v416_v25, %v24398_v3  ;;  %v505_v30 = vpop.f32.mrb[11].mxu1  ;;  %v24488_v32 = vpack.i.bf16 %v526_v15, %v525_v17 }
  0xf7   :  { %560 = vst.msk [vmem:[#allocation2 + $0x38] sm:$0xff] %vm559_vm4, %v527_v19  ;;  %v532_v33 = vmax.f32 %v415_v24, 0.0  ;;  %v506_v34 = vadd.f32 %v505_v30, %v24398_v3 }
  0xf8   :  { %v534_v38 = vmax.f32 %v504_v28, 0.0  ;;  %v533_v39 = vmax.f32 %v417_v29, 0.0  ;;  %v420_v42 = vpop.f32.mrb[12].mxu0  ;;  %21756 = vrot.lane.b32.xlu1 %v24484_v26, %s24121_s26 }
  0xf9   :  { %v535_v12 = vmax.f32 %v506_v34, 0.0  ;;  %v421_v21 = vadd.f32 %v420_v42, %v24401_v10  ;;  %v509_v43 = vpop.f32.mrb[12].mxu1  ;;  %v422_v44 = vpop.f32.mrb[13].mxu0  ;;  %v24497_v45 = vpack.i.bf16 %v532_v33, %v531_v27  ;;  %v24499_v47 = vpack.c.bf16 %v532_v33, %v524_v8 }
  0xfa   :  { %v510_v48 = vadd.f32 %v509_v43, %v24401_v10  ;;  %v423_v3 = vadd.f32 %v422_v44, %v24401_v10  ;;  %v511_v49 = vpop.f32.mrb[13].mxu1  ;;  %v24503_v50 = vpack.i.bf16 %v534_v38, %v533_v39  ;;  %v24505_v51 = vpack.c.bf16 %v533_v39, %v525_v17 }
  0xfb   :  { %568 = vst.msk [vmem:[#allocation2 + $0x78] sm:$0xff] %vm559_vm4, %v535_v12  ;;  %v540_v56 = vmax.f32 %v421_v21, 0.0  ;;  %v512_v57 = vadd.f32 %v511_v49, %v24401_v10  ;;  %21761 = vrot.lane.b32.xlu0 %v24497_v45, %s24121_s26  ;;  %v24511_v22 = vpack.c.bf16 %v534_v38, %v526_v15 }
  0xfc   :  { %v542_v27 = vmax.f32 %v510_v48, 0.0  ;;  %v541_v58 = vmax.f32 %v423_v3, 0.0  ;;  %v426_v61 = vpop.f32.mrb[14].mxu0 }
  0xfd   :  { %v543_v62 = vmax.f32 %v512_v57, 0.0  ;;  %v427_v63 = vadd.f32 %v426_v61, %v24426_v35  ;;  %v515_v1 = vpop.f32.mrb[14].mxu1  ;;  %v428_v2 = vpop.f32.mrb[15].mxu0  ;;  %v24516_v4 = vpack.i.bf16 %v544_v53, %v540_v56 }
  0xfe   :  { %v516_v8 = vadd.f32 %v515_v1, %v24426_v35  ;;  %v429_v10 = vadd.f32 %v428_v2, %v24426_v35  ;;  %v517_v9 = vpop.f32.mrb[15].mxu1  ;;  %v24520_v17 = vpack.i.bf16 %v542_v27, %v541_v58 }
  0xff   :  { %576 = vst.msk [vmem:[#allocation2 + $0xb8] sm:$0xff] %vm559_vm4, %v543_v62  ;;  %v548_v15 = vmax.f32 %v427_v63, 0.0  ;;  %v518_v18 = vadd.f32 %v517_v9, %v24426_v35  ;;  %21766 = vrot.lane.b32.xlu0 %v24516_v4, %s24121_s26  ;;  %v24545_v35 = vld [vmem:[#allocation2 + $0x38] sm:$0xff] }
 0x100   :  { %v550_v19 = vmax.f32 %v516_v8, 0.0  ;;  %v549_v24 = vmax.f32 %v429_v10, 0.0 }
 0x101   :  { %v551_v46 = vmax.f32 %v518_v18, 0.0  ;;  %v24528_v53 = vpack.i.bf16 %v548_v15, %v547_v60  ;;  %v24530_v59 = vpack.c.bf16 %v548_v15, %v540_v56 }
 0x102   :  { %v24532_v25 = vld [vmem:[#allocation2 + $0x78] sm:$0xff]  ;;  %v24534_v28 = vpack.i.bf16 %v550_v19, %v549_v24  ;;  %v24536_v29 = vpack.c.bf16 %v549_v24, %v541_v58  ;;  %v24538_v30 = vpack.c.bf16 %v550_v19, %v542_v27 }
 0x103   :  { %584 = vst.msk [vmem:[#allocation2 + $0xf8] sm:$0xff] %vm559_vm4, %v551_v46  ;;  %21771 = vrot.lane.b32.xlu1 %v24528_v53, %s24121_s26  ;;  %21776 = vrot.lane.b32.xlu0 %v24488_v32, %s24121_s26  ;;  %v24549_v54 = vpack.i.bf16 %v24532_v25, %v24545_v35 }
 0x106   :  { %v24561_v33 = vld [vmem:[#allocation2 + $0xb8] sm:$0xff] }
 0x107   :  { %21781 = vrot.lane.b32.xlu1 %v24503_v50, %s24121_s26  ;;  %21786 = vrot.lane.b32.xlu0 %v24549_v54, %s24121_s26 }
 0x10a   :  { %v24555_v60 = vld [vmem:[#allocation2 + $0xf8] sm:$0xff] }
 0x10b   :  { %21791 = vrot.lane.b32.xlu1 %v24520_v17, %s24121_s26  ;;  %21796 = vrot.lane.b32.xlu0 %v24534_v28, %s24121_s26  ;;  %v24565_v34 = vpack.i.bf16 %v24555_v60, %v24561_v33 }
 0x10f   :  { %21801 = vrot.lane.b32.xlu1 %v24565_v34, %s24121_s26  ;;  %21806 = vrot.lane.b32.xlu0 %v24408_v20, %s24122_s27 }
 0x113   :  { %21811 = vrot.lane.b32.xlu1 %v24428_v36, %s24122_s27  ;;  %21816 = vrot.lane.b32.xlu0 %v24414_v23, %s24122_s27 }
 0x117   :  { %21821 = vrot.lane.b32.xlu1 %v24484_v26, %s24122_s27  ;;  %21826 = vrot.lane.b32.xlu0 %v24497_v45, %s24122_s27 }
 0x11b   :  { %21831 = vrot.lane.b32.xlu1 %v24448_v52, %s24122_s27  ;;  %21836 = vrot.lane.b32.xlu0 %v24466_v5, %s24122_s27 }
 0x11f   :  { %21841 = vrot.lane.b32.xlu1 %v24454_v55, %s24122_s27  ;;  %21846 = vrot.lane.b32.xlu0 %v24516_v4, %s24122_s27 }
 0x123   :  { %21851 = vrot.lane.b32.xlu1 %v24528_v53, %s24122_s27  ;;  %21856 = vrot.lane.b32.xlu0 %v24488_v32, %s24122_s27 }
 0x124   :  { %14 = vsyncpa [#allocation6], 0  ;;  %s24123_s28 = smov 97   ;;  %s24124_s29 = smov 96   ;;  %vm722_vm5 = vcmask 1039360   ;;  %vm783_vm6 = vcmask 261120  }
 0x125   :  { %s24125_s30 = smov 95   ;;  %s24126_s18 = smov 66   ;;  %vm1589_vm7 = vcmask 1031168   ;;  %vm2119_vm8 = vcmask 793600   ;;  %vm2649_vm9 = vcmask 785408   ;;  %vm3179_vm10 = vcmask 777216  }
 0x126   :  { %s24127_s11 = smov 65   ;;  %s24128_s21 = smov 64   ;;  %vm3709_vm11 = vcmask 539648   ;;  %vm4768_vm12 = vcmask 523264   ;;  %vm5340_vm13 = vcmask 23552   ;;  %vm12015_vm14 = vcmask 1040384  }
 0x127   :  { %21861 = vrot.lane.b32.xlu1 %v24503_v50, %s24122_s27  ;;  %21866 = vrot.lane.b32.xlu0 %v24549_v54, %s24122_s27  ;;  %vm12016_vm15 = vcmask 1041408   ;;  %s24131_s16 = smov 78   ;;  %s24133_s25 = smov 106   ;;  %vm17515_vm0 = vcmask 228352   ;;  %vm17581_vm1 = vcmask 48128  }
 0x128   :  { %s24135_s10 = smov 28   ;;  %s24136_s17 = smov 6  }
 0x129   :  { %s24138_s14 = smov 112   ;;  %s24140_s13 = smov 90  }
 0x12a   :  { %s24142_s12 = smov 68   ;;  %s24143_s23 = smov 12  }
 0x12b   :  { %21871 = vrot.lane.b32.xlu1 %v24520_v17, %s24122_s27  ;;  %21876 = vrot.lane.b32.xlu0 %v24534_v28, %s24122_s27  ;;  %s24145_s19 = smov 18   ;;  %s24146_s15 = smov 124  }
 0x12c   :  { %s24155_s20 = smov 80   ;;  %s24156_s22 = smov 30  }
 0x12f   :  { %21886 = vrot.lane.b32.xlu1 %v24428_v36, %s24123_s28  ;;  %21881 = vrot.lane.b32.xlu0 %v24408_v20, %s24123_s28 }
 0x133   :  { %21896 = vrot.lane.b32.xlu1 %v24565_v34, %s24122_s27  ;;  %21891 = vrot.lane.b32.xlu0 %v24414_v23, %s24123_s28 }
 0x137   :  { %21901 = vrot.lane.b32.xlu1 %v24484_v26, %s24123_s28  ;;  %21906 = vrot.lane.b32.xlu0 %v24497_v45, %s24123_s28 }
 0x13b   :  { %21911 = vrot.lane.b32.xlu1 %v24448_v52, %s24123_s28  ;;  %21916 = vrot.lane.b32.xlu0 %v24466_v5, %s24123_s28 }
 0x13f   :  { %21921 = vrot.lane.b32.xlu1 %v24454_v55, %s24123_s28  ;;  %21926 = vrot.lane.b32.xlu0 %v24516_v4, %s24123_s28 }
 0x143   :  { %21931 = vrot.lane.b32.xlu1 %v24528_v53, %s24123_s28  ;;  %21936 = vrot.lane.b32.xlu0 %v24488_v32, %s24123_s28 }
 0x147   :  { %21941 = vrot.lane.b32.xlu1 %v24503_v50, %s24123_s28  ;;  %21946 = vrot.lane.b32.xlu0 %v24549_v54, %s24123_s28 }
 0x14b   :  { %21951 = vrot.lane.b32.xlu1 %v24520_v17, %s24123_s28  ;;  %21956 = vrot.lane.b32.xlu0 %v24534_v28, %s24123_s28 }
 0x14f   :  { %21966 = vrot.lane.b32.xlu1 %v24428_v36, %s24124_s29  ;;  %21961 = vrot.lane.b32.xlu0 %v24408_v20, %s24124_s29 }
 0x153   :  { %21976 = vrot.lane.b32.xlu1 %v24565_v34, %s24123_s28  ;;  %21971 = vrot.lane.b32.xlu0 %v24414_v23, %s24124_s29 }
 0x157   :  { %21981 = vrot.lane.b32.xlu1 %v24484_v26, %s24124_s29  ;;  %21986 = vrot.lane.b32.xlu0 %v24497_v45, %s24124_s29 }
 0x15a   :  { %v21727_v38 = vpop.permute.xlu0 %21726 }
 0x15b   :  { %21991 = vrot.lane.b32.xlu1 %v24448_v52, %s24124_s29  ;;  %21996 = vrot.lane.b32.xlu0 %v24466_v5, %s24124_s29  ;;  %v21729_v39 = vunpack.i.h.bf16 %v21727_v38  ;;  %v21728_v42 = vunpack.i.l.bf16 %v21727_v38 }
 0x15d   :  { %v724_v44 = vsel %vm722_vm5, %v21728_v42, %v21729_v39 }
 0x15e   :  { %v21737_v12 = vpop.permute.xlu1 %21736  ;;  %v21732_v3 = vpop.permute.xlu0 %21731 }
 0x15f   :  { %v21739_v21 = vunpack.i.h.bf16 %v21737_v12  ;;  %v21738_v43 = vunpack.i.l.bf16 %v21737_v12  ;;  %22001 = vrot.lane.b32.xlu1 %v24454_v55, %s24124_s29  ;;  %22006 = vrot.lane.b32.xlu0 %v24516_v4, %s24124_s29  ;;  %v21733_v62 = vunpack.i.l.bf16 %v21732_v3  ;;  %v21734_v8 = vunpack.i.h.bf16 %v21732_v3 }
 0x161   :  { %v731_v48 = vsel %vm722_vm5, %v21738_v43, %v21739_v21  ;;  %v723_v18 = vsel %vm722_vm5, %v21733_v62, %v21728_v42 }
 0x162   :  { %v24653_v49 = vpop.permute.xlu1 %21741  ;;  %v20263_v56 = vpack.c.bf16 %v731_v48, %v724_v44  ;;  %v725_v48 = vsel %vm722_vm5, %v21729_v39, %v21734_v8 }
 0x163   :  { %22011 = vrot.lane.b32.xlu1 %v24528_v53, %s24124_s29  ;;  %22016 = vrot.lane.b32.xlu0 %v24488_v32, %s24124_s29  ;;  %v21744_v63 = vunpack.i.h.bf16 %v24653_v49  ;;  %v21743_v1 = vunpack.i.l.bf16 %v24653_v49 }
 0x164   :  { %20264 = vmatprep.subr.bf16.mxu0 %v20263_v56 }
 0x165   :  { %v738_v44 = vsel %vm722_vm5, %v21743_v1, %v21744_v63 }
 0x166   :  { %v21747_v57 = vpop.permute.xlu1 %21746  ;;  %v21752_v27 = vpop.permute.xlu0 %21751 }
 0x167   :  { %22021 = vrot.lane.b32.xlu1 %v24503_v50, %s24124_s29  ;;  %22026 = vrot.lane.b32.xlu0 %v24549_v54, %s24124_s29  ;;  %v21754_v58 = vunpack.i.h.bf16 %v21752_v27  ;;  %v21753_v61 = vunpack.i.l.bf16 %v21752_v27  ;;  %v21748_v49 = vunpack.i.l.bf16 %v21747_v57 }
 0x169   :  { %v745_v15 = vsel %vm722_vm5, %v21753_v61, %v21754_v58 }
 0x16a   :  { %v24665_v2 = vpop.permute.xlu1 %21756  ;;  %v20267_v3 = vpack.c.bf16 %v745_v15, %v738_v44 }
 0x16b   :  { %v21759_v10 = vunpack.i.h.bf16 %v24665_v2  ;;  %22031 = vrot.lane.b32.xlu1 %v24520_v17, %s24124_s29  ;;  %22036 = vrot.lane.b32.xlu0 %v24534_v28, %s24124_s29  ;;  %v21758_v9 = vunpack.i.l.bf16 %v24665_v2 }
 0x16d   :  { %v730_v19 = vsel %vm722_vm5, %v21759_v10, %v21738_v43  ;;  %v21762_v24 = vpop.permute.xlu0 %21761  ;;  %v726_v43 = vsel %vm722_vm5, %v21734_v8, %v21758_v9  ;;  %v21749_v10 = vunpack.i.h.bf16 %v21747_v57 }
 0x16e   :  { %v21764_v46 = vunpack.i.h.bf16 %v21762_v24  ;;  %v21763_v38 = vunpack.i.l.bf16 %v21762_v24  ;;  %v20265_v12 = vpack.c.bf16 %v730_v19, %v723_v18 }
 0x16f   :  { %22046 = vrot.lane.b32.xlu1 %v24428_v36, %s24125_s30  ;;  %22041 = vrot.lane.b32.xlu0 %v24408_v20, %s24125_s30  ;;  %v739_v57 = vsel %vm722_vm5, %v21744_v63, %v21749_v10 }
 0x170   :  { %v732_v42 = vsel %vm722_vm5, %v21739_v21, %v21763_v38  ;;  %20266 = vmatpush1.bf16.msra.mxu0 %v20265_v12  ;;  %v733_v56 = vsel %vm722_vm5, %v21763_v38, %v21764_v46  ;;  %v737_v21 = vsel %vm722_vm5, %v21748_v49, %v21743_v1  ;;  %v24704_v1 = vld [vmem:[%s31642_s3 + $0x20] sm:$0xff] }
 0x171   :  { %v24685_v27 = vpop.permute.xlu0 %21766  ;;  %20268 = vmatprep.subr.bf16.mxu0 %v20267_v3  ;;  %v20271_v39 = vpack.c.bf16 %v733_v56, %v726_v43  ;;  %v20273_v62 = vpack.c.bf16 %v732_v42, %v725_v48 }
 0x172   :  { %v21769_v2 = vunpack.i.h.bf16 %v24685_v27  ;;  %v21768_v8 = vunpack.i.l.bf16 %v24685_v27 }
 0x173   :  { %22056 = vrot.lane.b32.xlu1 %v24565_v34, %s24124_s29  ;;  %22051 = vrot.lane.b32.xlu0 %v24414_v23, %s24125_s30 }
 0x174   :  { %v744_v15 = vsel %vm722_vm5, %v21769_v2, %v21753_v61  ;;  %20272 = vmatprep.subr.bf16.mxu1 %v20271_v39  ;;  %v740_v3 = vsel %vm722_vm5, %v21749_v10, %v21768_v8 }
 0x175   :  { %20274 = vmatpush1.bf16.msra.mxu1 %v20273_v62  ;;  %v21772_v18 = vpop.permute.xlu1 %21771  ;;  %v21777_v19 = vpop.permute.xlu0 %21776  ;;  %v20269_v24 = vpack.c.bf16 %v744_v15, %v737_v21 }
 0x176   :  { %v21774_v38 = vunpack.i.h.bf16 %v21772_v18  ;;  %v21773_v12 = vunpack.i.l.bf16 %v21772_v18  ;;  %v21779_v44 = vunpack.i.h.bf16 %v21777_v19  ;;  %v21778_v48 = vunpack.i.l.bf16 %v21777_v19 }
 0x177   :  { %22061 = vrot.lane.b32.xlu1 %v24484_v26, %s24125_s30  ;;  %22066 = vrot.lane.b32.xlu0 %v24497_v45, %s24125_s30 }
 0x178   :  { %v746_v61 = vsel %vm722_vm5, %v21754_v58, %v21773_v12  ;;  %20270 = vmatpush1.bf16.msra.mxu0 %v20269_v24  ;;  %v747_v49 = vsel %vm722_vm5, %v21773_v12, %v21774_v38  ;;  %v727_v58 = vsel %vm722_vm5, %v21758_v9, %v21778_v48  ;;  %v728_v10 = vsel %vm722_vm5, %v21778_v48, %v21779_v44  ;;  %v24722_v9 = vld [vmem:[%s31642_s3 + $0x28] sm:$0xff] }
 0x179   :  { %v21782_v42 = vpop.permute.xlu1 %21781  ;;  %v21787_v43 = vpop.permute.xlu0 %21786  ;;  %v20275_v56 = vpack.c.bf16 %v747_v49, %v740_v3  ;;  %v20277_v27 = vpack.c.bf16 %v746_v61, %v739_v57 }
 0x17a   :  { %v21784_v39 = vunpack.i.h.bf16 %v21782_v42  ;;  %v21783_v62 = vunpack.i.l.bf16 %v21782_v42  ;;  %v21789_v2 = vunpack.i.h.bf16 %v21787_v43  ;;  %v21788_v63 = vunpack.i.l.bf16 %v21787_v43 }
 0x17b   :  { %18930 = vmatmul.mubr.msk.f32.vlgmr.msra.gmra.mrb[16].mxu0 %vm783_vm6, %v24704_v1  ;;  %22071 = vrot.lane.b32.xlu1 %v24448_v52, %s24125_s30 }
 0x17c   :  { %v734_v21 = vsel %vm722_vm5, %v21764_v46, %v21783_v62  ;;  %v736_v15 = vsel %vm722_vm5, %v21784_v39, %v21789_v2  ;;  %v729_v18 = vsel %vm722_vm5, %v21779_v44, %v21788_v63  ;;  %22076 = vrot.lane.b32.xlu0 %v24466_v5, %s24125_s30  ;;  %20276 = vmatprep.subr.bf16.mxu1 %v20275_v56 }
 0x17d   :  { %20278 = vmatpush1.bf16.msra.mxu1 %v20277_v27  ;;  %v21792_v19 = vpop.permute.xlu1 %21791  ;;  %v21797_v24 = vpop.permute.xlu0 %21796  ;;  %866 = vmatprep.mubr.f32.mxu0 %v31662_v7  ;;  %v20287_v12 = vpack.c.bf16 %v21789_v2, %v21788_v63  ;;  %v735_v46 = vsel %vm722_vm5, %v21783_v62, %v21784_v39  ;;  %v20281_v48 = vpack.c.bf16 %v734_v21, %v727_v58 }
 0x17e   :  { %v21794_v57 = vunpack.i.h.bf16 %v21792_v19  ;;  %v21793_v44 = vunpack.i.l.bf16 %v21792_v19  ;;  %v21799_v61 = vunpack.i.h.bf16 %v21797_v24  ;;  %v21798_v3 = vunpack.i.l.bf16 %v21797_v24  ;;  %v24764_v24 = vld [vmem:[%s31642_s3 + $0x38] sm:$0xff] }
 0x17f   :  { %18931 = vmatmul.mubr.msk.f32.gmra.mrb[18].mxu0 %vm783_vm6, %v24722_v9  ;;  %20288 = vmatprep.subr.bf16.mxu1 %v20287_v12  ;;  %v20279_v49 = vpack.c.bf16 %v735_v46, %v728_v10  ;;  %v20289_v42 = vpack.c.bf16 %v736_v15, %v729_v18 }
 0x180   :  { %v741_v43 = vsel %vm722_vm5, %v21768_v8, %v21793_v44  ;;  %v748_v56 = vsel %vm722_vm5, %v21774_v38, %v21798_v3  ;;  %22081 = vrot.lane.b32.xlu1 %v24454_v55, %s24125_s30  ;;  %22086 = vrot.lane.b32.xlu0 %v24516_v4, %s24125_s30  ;;  %v742_v27 = vsel %vm722_vm5, %v21793_v44, %v21794_v57  ;;  %v24742_v8 = vld [vmem:[%s31642_s3 + $0x30] sm:$0xff] }
 0x181   :  { %18934 = vmatmul.mubr.msk.f32.vlgmr.msra.gmra.mrb[16].mxu1 %vm783_vm6, %v24704_v1  ;;  %20280 = vmatprep.subr.bf16.mxu0 %v20279_v49  ;;  %v21802_v39 = vpop.permute.xlu1 %21801  ;;  %v24737_v62 = vpop.permute.xlu0 %21806  ;;  %v749_v38 = vsel %vm722_vm5, %v21798_v3, %v21799_v61  ;;  %v20285_v10 = vpack.c.bf16 %v748_v56, %v741_v43  ;;  %v24870_v49 = vld [vmem:[%s31642_s3 + $0x8] sm:$0xff] }
 0x182   :  { %20282 = vmatpush1.bf16.msra.mxu0 %v20281_v48  ;;  %20290 = vmatpush1.bf16.msra.mxu1 %v20289_v42  ;;  %v21804_v2 = vunpack.i.h.bf16 %v21802_v39  ;;  %v21803_v63 = vunpack.i.l.bf16 %v21802_v39  ;;  %v20283_v58 = vpack.c.bf16 %v749_v38, %v742_v27 }
 0x183   :  { %872 = vmatprep.mubr.f32.mxu0 %v31662_v7  ;;  %955 = vmatprep.mubr.f32.mxu1 %v31662_v7 }
 0x184   :  { %v743_v21 = vsel %vm722_vm5, %v21794_v57, %v21803_v63  ;;  %v750_v15 = vsel %vm722_vm5, %v21799_v61, %v21804_v2  ;;  %18932 = vmatmul.mubr.msk.f32.gmra.mrb[20].mxu0 %vm783_vm6, %v24742_v8  ;;  %22091 = vrot.lane.b32.xlu1 %v24528_v53, %s24125_s30  ;;  %v20291_v12 = vpack.c.bf16 %v21804_v2, %v21803_v63  ;;  %v24907_v63 = vld [vmem:[%s31642_s3 + $0x10] sm:$0xff] }
 0x185   :  { %22096 = vrot.lane.b32.xlu0 %v24488_v32, %s24125_s30  ;;  %18935 = vmatmul.mubr.msk.f32.gmra.mrb[18].mxu1 %vm783_vm6, %v24722_v9  ;;  %v24757_v18 = vpop.permute.xlu1 %21811  ;;  %v24759_v19 = vpop.permute.xlu0 %21816  ;;  %v20293_v46 = vpack.c.bf16 %v750_v15, %v743_v21  ;;  %v20323_v2 = vpack.c.bf16 %v24555_v60, %v24561_v33  ;;  %v24938_v15 = vld [vmem:[%s31642_s3 + $0x18] sm:$0xff] }
 0x186   :  { %20284 = vmatprep.subr.bf16.mxu0 %v20283_v58  ;;  %878 = vmatprep.mubr.f32.mxu0 %v31662_v7  ;;  %v31655_v38 = vunpack.i.h.bf16 %v24759_v19 }
 0x187   :  { %20286 = vmatpush1.bf16.msra.mxu0 %v20285_v10  ;;  %961 = vmatprep.mubr.f32.mxu1 %v31662_v7  ;;  %v21818_v10 = vunpack.i.l.bf16 %v24759_v19 }
 0x188   :  { %20296 = vmatprep.subr.bf16.mxu0 %v24430_v37  ;;  %18933 = vmatmul.mubr.msk.f32.gmra.mrb[22].mxu0 %vm783_vm6, %v24764_v24 }
 0x189   :  { %20292 = vmatprep.subr.bf16.mxu1 %v20291_v12  ;;  %22101 = vrot.lane.b32.xlu1 %v24503_v50, %s24125_s30  ;;  %v24773_v48 = vpop.permute.xlu1 %21821  ;;  %v24775_v57 = vpop.permute.xlu0 %21826 }
 0x18a   :  { %22106 = vrot.lane.b32.xlu0 %v24549_v54, %s24125_s30  ;;  %18936 = vmatmul.mubr.msk.f32.gmra.mrb[20].mxu1 %vm783_vm6, %v24742_v8  ;;  %v31652_v43 = vunpack.i.h.bf16 %v24775_v57  ;;  %v21828_v56 = vunpack.i.l.bf16 %v24775_v57 }
 0x18b   :  { %20294 = vmatpush1.bf16.msra.mxu1 %v20293_v46  ;;  %1038 = vmatprep.mubr.f32.mxu0 %v31662_v7 }
 0x18c   :  { %20304 = vmatprep.subr.bf16.mxu1 %v24435_v40  ;;  %967 = vmatprep.mubr.f32.mxu1 %v31662_v7  ;;  %v1600_v60 = vsel %vm1589_vm7, %v21828_v56, %v31652_v43 }
 0x18d   :  { %18938 = vmatmul.mubr.msk.f32.vlgmr.msra.gmra.mrb[24].mxu0 %vm783_vm6, %v24704_v1  ;;  %22111 = vrot.lane.b32.xlu1 %v24520_v17, %s24125_s30  ;;  %v24788_v37 = vpop.permute.xlu1 %21831  ;;  %v24790_v44 = vpop.permute.xlu0 %21836 }
 0x18e   :  { %20298 = vmatpush1.bf16.msra.mxu0 %v24422_v31  ;;  %22116 = vrot.lane.b32.xlu0 %v24534_v28, %s24125_s30  ;;  %v31653_v21 = vunpack.i.h.bf16 %v24788_v37  ;;  %v21839_v12 = vunpack.i.h.bf16 %v24790_v44  ;;  %v21838_v46 = vunpack.i.l.bf16 %v24790_v44 }
 0x18f   :  { %18937 = vmatmul.mubr.msk.f32.gmra.mrb[22].mxu1 %vm783_vm6, %v24764_v24  ;;  %20300 = vmatprep.subr.bf16.mxu0 %v24468_v6 }
 0x190   :  { %1044 = vmatprep.mubr.f32.mxu0 %v31662_v7  ;;  %1127 = vmatprep.mubr.f32.mxu1 %v31662_v7 }
 0x191   :  { %18939 = vmatmul.mubr.msk.f32.gmra.mrb[26].mxu0 %vm783_vm6, %v24722_v9  ;;  %22126 = vrot.lane.b32.xlu1 %v24428_v36, %s24126_s18  ;;  %v24804_v31 = vpop.permute.xlu1 %21841  ;;  %v24806_v40 = vpop.permute.xlu0 %21846 }
 0x192   :  { %20302 = vmatpush1.bf16.msra.mxu0 %v24462_v0  ;;  %22121 = vrot.lane.b32.xlu0 %v24408_v20, %s24126_s18  ;;  %v21849_v13 = vunpack.i.h.bf16 %v24806_v40 }
 0x193   :  { %18942 = vmatmul.mubr.msk.f32.vlgmr.msra.gmra.mrb[24].mxu1 %vm783_vm6, %v24704_v1  ;;  %20312 = vmatprep.subr.bf16.mxu0 %v24505_v51  ;;  %v31654_v1 = vunpack.i.h.bf16 %v24737_v62 }
 0x194   :  { %20306 = vmatpush1.bf16.msra.mxu1 %v24437_v41  ;;  %1050 = vmatprep.mubr.f32.mxu0 %v31662_v7  ;;  %v20319_v41 = vpack.c.bf16 %v24532_v25, %v24545_v35  ;;  %v24846_v25 = vld [vmem:[%s31642_s3] sm:$0xff]  ;;  %v21813_v35 = vunpack.i.l.bf16 %v24757_v18  ;;  %v1611_v43 = vsel %vm1589_vm7, %v21849_v13, %v21838_v46 }
 0x195   :  { %20308 = vmatprep.subr.bf16.mxu1 %v24473_v11  ;;  %18940 = vmatmul.mubr.msk.f32.gmra.mrb[28].mxu0 %vm783_vm6, %v24742_v8  ;;  %v24819_v6 = vpop.permute.xlu1 %21851  ;;  %v24821_v0 = vpop.permute.xlu0 %21856 }
 0x196   :  { %1133 = vmatprep.mubr.f32.mxu1 %v31662_v7  ;;  %22136 = vrot.lane.b32.xlu1 %v24565_v34, %s24125_s30 }
 0x197   :  { %22131 = vrot.lane.b32.xlu0 %v24414_v23, %s24126_s18  ;;  %18943 = vmatmul.mubr.msk.f32.gmra.mrb[26].mxu1 %vm783_vm6, %v24722_v9  ;;  %v21808_v9 = vunpack.i.l.bf16 %v24737_v62 }
 0x198   :  { %20310 = vmatpush1.bf16.msra.mxu1 %v24475_v14  ;;  %1056 = vmatprep.mubr.f32.mxu0 %v31662_v7  ;;  %v21814_v14 = vunpack.i.h.bf16 %v24757_v18  ;;  %v31700_v18 = vunpack.i.h.bf16 %v24819_v6 }
 0x199   :  { %20320 = vmatprep.subr.bf16.mxu1 %v20319_v41  ;;  %18941 = vmatmul.mubr.msk.f32.gmra.mrb[30].mxu0 %vm783_vm6, %v24764_v24  ;;  %v24836_v11 = vpop.permute.xlu1 %21861  ;;  %v24838_v51 = vpop.permute.xlu0 %21866  ;;  %v1591_v27 = vsel %vm1589_vm7, %v21808_v9, %v31654_v1  ;;  %v1590_v44 = vsel %vm1589_vm7, %v21818_v10, %v21808_v9  ;;  %v1612_v9 = vsel %vm1589_vm7, %v21838_v46, %v21839_v12  ;;  %v21858_v1 = vunpack.i.l.bf16 %v24821_v0 }
 0x19a   :  { %1139 = vmatprep.mubr.f32.mxu1 %v31662_v7  ;;  %22141 = vrot.lane.b32.xlu1 %v24484_v26, %s24126_s18  ;;  %v1598_v42 = vsel %vm1589_vm7, %v21813_v35, %v21814_v14  ;;  %v1599_v13 = vsel %vm1589_vm7, %v21814_v14, %v21828_v56 }
 0x19b   :  { %22146 = vrot.lane.b32.xlu0 %v24497_v45, %s24126_s18  ;;  %18944 = vmatmul.mubr.msk.f32.gmra.mrb[28].mxu1 %vm783_vm6, %v24742_v8  ;;  %v20327_v8 = vpack.c.bf16 %v1598_v42, %v1591_v27 }
 0x19c   :  { %1228 = vmatprep.mubr.f32.mxu0 %v31662_v7  ;;  %1145 = vmatprep.mubr.f32.mxu1 %v31662_v7 }
 0x19d   :  { %18946 = vmatmul.mubr.msk.f32.vlgmr.msra.gmra.mrb[16].mxu0 %vm783_vm6, %v24846_v25  ;;  %v24860_v61 = vpop.permute.xlu1 %21871  ;;  %v24862_v3 = vpop.permute.xlu0 %21876 }
 0x19e   :  { %20314 = vmatpush1.bf16.msra.mxu0 %v24499_v47  ;;  %22151 = vrot.lane.b32.xlu1 %v24448_v52, %s24126_s18  ;;  %v31651_v47 = vunpack.i.l.bf16 %v24773_v48 }
 0x19f   :  { %22156 = vrot.lane.b32.xlu0 %v24466_v5, %s24126_s18  ;;  %18945 = vmatmul.mubr.msk.f32.gmra.mrb[30].mxu1 %vm783_vm6, %v24764_v24  ;;  %v21833_v24 = vunpack.i.l.bf16 %v24788_v37 }
 0x1a0   :  { %20316 = vmatprep.subr.bf16.mxu0 %v24536_v29  ;;  %1234 = vmatprep.mubr.f32.mxu0 %v31662_v7 }
 0x1a1   :  { %18947 = vmatmul.mubr.msk.f32.gmra.mrb[18].mxu0 %vm783_vm6, %v24870_v49  ;;  %1317 = vmatprep.mubr.f32.mxu1 %v31662_v7  ;;  %v24890_v39 = vpop.permute.xlu1 %21886  ;;  %v24892_v29 = vpop.permute.xlu0 %21881 }
 0x1a2   :  { %20318 = vmatpush1.bf16.msra.mxu0 %v24530_v59  ;;  %22161 = vrot.lane.b32.xlu1 %v24454_v55, %s24126_s18  ;;  %v1593_v59 = vsel %vm1589_vm7, %v31655_v38, %v31651_v47  ;;  %v21844_v38 = vunpack.i.h.bf16 %v24804_v31 }
 0x1a3   :  { %22166 = vrot.lane.b32.xlu0 %v24516_v4, %s24126_s18  ;;  %18950 = vmatmul.mubr.msk.f32.vlgmr.msra.gmra.mrb[16].mxu1 %vm783_vm6, %v24846_v25  ;;  %v20335_v41 = vpack.c.bf16 %v1600_v60, %v1593_v59  ;;  %v21863_v59 = vunpack.i.l.bf16 %v24836_v11  ;;  %v21848_v60 = vunpack.i.l.bf16 %v24806_v40 }
 0x1a4   :  { %20322 = vmatpush1.bf16.msra.mxu1 %v24511_v22  ;;  %20328 = vmatprep.subr.bf16.mxu0 %v20327_v8  ;;  %v21824_v22 = vunpack.i.h.bf16 %v24773_v48 }
 0x1a5   :  { %20324 = vmatprep.subr.bf16.mxu1 %v20323_v2  ;;  %1240 = vmatprep.mubr.f32.mxu0 %v31662_v7  ;;  %v24921_v33 = vpop.permute.xlu1 %21896  ;;  %v24923_v58 = vpop.permute.xlu0 %21891  ;;  %v21843_v2 = vunpack.i.l.bf16 %v24804_v31 }
 0x1a6   :  { %18948 = vmatmul.mubr.msk.f32.gmra.mrb[20].mxu0 %vm783_vm6, %v24907_v63  ;;  %1323 = vmatprep.mubr.f32.mxu1 %v31662_v7  ;;  %v1597_v8 = vsel %vm1589_vm7, %v21824_v22, %v21813_v35  ;;  %v1605_v35 = vsel %vm1589_vm7, %v21833_v24, %v31653_v21  ;;  %v21853_v22 = vunpack.i.l.bf16 %v24819_v6  ;;  %v21859_v21 = vunpack.i.h.bf16 %v24821_v0 }
 0x1a7   :  { %22171 = vrot.lane.b32.xlu1 %v24528_v53, %s24126_s18  ;;  %22176 = vrot.lane.b32.xlu0 %v24488_v32, %s24126_s18  ;;  %v20329_v10 = vpack.c.bf16 %v1597_v8, %v1590_v44  ;;  %v1604_v47 = vsel %vm1589_vm7, %v21843_v2, %v21833_v24  ;;  %v20331_v8 = vpack.c.bf16 %v1612_v9, %v1605_v35  ;;  %v31701_v2 = vunpack.i.h.bf16 %v24759_v19 }
 0x1a8   :  { %18951 = vmatmul.mubr.msk.f32.gmra.mrb[18].mxu1 %vm783_vm6, %v24870_v49  ;;  %1246 = vmatprep.mubr.f32.mxu0 %v31662_v7  ;;  %v20333_v24 = vpack.c.bf16 %v1611_v43, %v1604_v47  ;;  %v1614_v14 = vsel %vm1589_vm7, %v21853_v22, %v31700_v18  ;;  %v31702_v44 = vunpack.i.h.bf16 %v24737_v62  ;;  %v1595_v47 = vsel %vm1589_vm7, %v21858_v1, %v21859_v21 }
 0x1a9   :  { %20326 = vmatpush1.bf16.msra.mxu1 %v24538_v30  ;;  %v24947_v42 = vpop.permute.xlu1 %21901  ;;  %v24949_v27 = vpop.permute.xlu0 %21906  ;;  %1329 = vmatprep.mubr.f32.mxu1 %v31662_v7  ;;  %v21864_v30 = vunpack.i.h.bf16 %v24836_v11  ;;  %v1607_v62 = vsel %vm1589_vm7, %v21844_v38, %v21848_v60  ;;  %v1613_v9 = vsel %vm1589_vm7, %v21839_v12, %v21853_v22  ;;  %v31703_v18 = vunpack.i.h.bf16 %v24788_v37 }
 0x1aa   :  { %20336 = vmatprep.subr.bf16.mxu1 %v20335_v41  ;;  %18949 = vmatmul.mubr.msk.f32.gmra.mrb[22].mxu0 %vm783_vm6, %v24938_v15  ;;  %v1592_v35 = vsel %vm1589_vm7, %v31702_v44, %v31701_v2  ;;  %v21873_v22 = vunpack.i.l.bf16 %v24860_v61  ;;  %v21878_v2 = vunpack.i.l.bf16 %v24862_v3  ;;  %v21898_v11 = vunpack.i.l.bf16 %v24921_v33 }
 0x1ab   :  { %22181 = vrot.lane.b32.xlu1 %v24503_v50, %s24126_s18  ;;  %22186 = vrot.lane.b32.xlu0 %v24549_v54, %s24126_s18  ;;  %v1602_v31 = vsel %vm1589_vm7, %v21863_v59, %v21864_v30  ;;  %v20337_v43 = vpack.c.bf16 %v1599_v13, %v1592_v35  ;;  %v1606_v12 = vsel %vm1589_vm7, %v31703_v18, %v21844_v38 }
 0x1ac   :  { %18952 = vmatmul.mubr.msk.f32.gmra.mrb[20].mxu1 %vm783_vm6, %v24907_v63  ;;  %1406 = vmatprep.mubr.f32.mxu0 %v31662_v7  ;;  %v20343_v19 = vpack.c.bf16 %v1602_v31, %v1595_v47 }
 0x1ad   :  { %1335 = vmatprep.mubr.f32.mxu1 %v31662_v7  ;;  %v24974_v41 = vpop.permute.xlu1 %21911  ;;  %v24976_v54 = vpop.permute.xlu0 %21916 }
 0x1ae   :  { %18954 = vmatmul.mubr.msk.f32.vlgmr.msra.gmra.mrb[24].mxu0 %vm783_vm6, %v24846_v25 }
 0x1af   :  { %20330 = vmatpush1.bf16.msra.mxu0 %v20329_v10  ;;  %22191 = vrot.lane.b32.xlu1 %v24520_v17, %s24126_s18  ;;  %v20339_v10 = vpack.c.bf16 %v1614_v14, %v1607_v62  ;;  %v21879_v14 = vunpack.i.h.bf16 %v24862_v3  ;;  %v21883_v62 = vunpack.i.l.bf16 %v24892_v29  ;;  %v21904_v3 = vunpack.i.h.bf16 %v24947_v42 }
 0x1b0   :  { %22196 = vrot.lane.b32.xlu0 %v24534_v28, %s24126_s18  ;;  %18953 = vmatmul.mubr.msk.f32.gmra.mrb[22].mxu1 %vm783_vm6, %v24938_v15 }
 0x1b1   :  { %20332 = vmatprep.subr.bf16.mxu0 %v20331_v8  ;;  %1412 = vmatprep.mubr.f32.mxu0 %v31662_v7  ;;  %v25006_v56 = vpop.permute.xlu1 %21921  ;;  %v25008_v46 = vpop.permute.xlu0 %21926  ;;  %v21869_v8 = vunpack.i.h.bf16 %v24838_v51 }
 0x1b2   :  { %18955 = vmatmul.mubr.msk.f32.gmra.mrb[26].mxu0 %vm783_vm6, %v24870_v49  ;;  %1495 = vmatprep.mubr.f32.mxu1 %v31662_v7 }
 0x1b3   :  { %20334 = vmatpush1.bf16.msra.mxu0 %v20333_v24  ;;  %22206 = vrot.lane.b32.xlu1 %v24428_v36, %s24127_s11  ;;  %v21868_v24 = vunpack.i.l.bf16 %v24838_v51  ;;  %v21874_v51 = vunpack.i.h.bf16 %v24860_v61 }
 0x1b4   :  { %22201 = vrot.lane.b32.xlu0 %v24408_v20, %s24127_s11  ;;  %18958 = vmatmul.mubr.msk.f32.vlgmr.msra.gmra.mrb[24].mxu1 %vm783_vm6, %v24846_v25  ;;  %v20341_v25 = vpack.c.bf16 %v1613_v9, %v1606_v12  ;;  %v1608_v12 = vsel %vm1589_vm7, %v21848_v60, %v21873_v22  ;;  %v21899_v60 = vunpack.i.h.bf16 %v24921_v33 }
 0x1b5   :  { %20338 = vmatpush1.bf16.msra.mxu1 %v20337_v43  ;;  %20344 = vmatprep.subr.bf16.mxu0 %v20343_v19  ;;  %v25033_v13 = vpop.permute.xlu1 %21931  ;;  %v25035_v31 = vpop.permute.xlu0 %21936  ;;  %v20351_v37 = vpack.c.bf16 %v21869_v8, %v21868_v24  ;;  %v21888_v43 = vunpack.i.l.bf16 %v24890_v39  ;;  %v31658_v19 = vunpack.i.h.bf16 %v24892_v29 }
 0x1b6   :  { %20340 = vmatprep.subr.bf16.mxu1 %v20339_v10  ;;  %1418 = vmatprep.mubr.f32.mxu0 %v31662_v7 }
 0x1b7   :  { %18956 = vmatmul.mubr.msk.f32.gmra.mrb[28].mxu0 %vm783_vm6, %v24907_v63  ;;  %1501 = vmatprep.mubr.f32.mxu1 %v31662_v7  ;;  %v2121_v0 = vsel %vm2119_vm8, %v21883_v62, %v31658_v19 }
 0x1b8   :  { %22216 = vrot.lane.b32.xlu1 %v24565_v34, %s24126_s18  ;;  %22211 = vrot.lane.b32.xlu0 %v24414_v23, %s24127_s11  ;;  %v31704_v34 = vunpack.i.h.bf16 %v24775_v57  ;;  %v25077_v57 = vld [vmem:[%s31642_s3 + $0x40] sm:$0xff] }
 0x1b9   :  { %18959 = vmatmul.mubr.msk.f32.gmra.mrb[26].mxu1 %vm783_vm6, %v24870_v49  ;;  %1424 = vmatprep.mubr.f32.mxu0 %v31662_v7  ;;  %v25055_v38 = vpop.permute.xlu1 %21941  ;;  %v25057_v44 = vpop.permute.xlu0 %21946  ;;  %v31705_v49 = vunpack.i.l.bf16 %v24773_v48  ;;  %v1616_v48 = vsel %vm1589_vm7, %v21878_v2, %v21879_v14 }
 0x1ba   :  { %20342 = vmatpush1.bf16.msra.mxu1 %v20341_v25  ;;  %1507 = vmatprep.mubr.f32.mxu1 %v31662_v7  ;;  %v1601_v35 = vsel %vm1589_vm7, %v31704_v34, %v21863_v59  ;;  %v1609_v59 = vsel %vm1589_vm7, %v21873_v22, %v21874_v51  ;;  %v31706_v25 = vunpack.i.h.bf16 %v24819_v6  ;;  %v1596_v34 = vsel %vm1589_vm7, %v21859_v21, %v21868_v24  ;;  %v25116_v6 = vld [vmem:[%s31642_s3 + $0x48] sm:$0xff] }
 0x1bb   :  { %20352 = vmatprep.subr.bf16.mxu1 %v20351_v37  ;;  %18957 = vmatmul.mubr.msk.f32.gmra.mrb[30].mxu0 %vm783_vm6, %v24938_v15  ;;  %v1594_v47 = vsel %vm1589_vm7, %v31705_v49, %v21858_v1  ;;  %v21889_v1 = vunpack.i.h.bf16 %v24890_v39  ;;  %v20347_v40 = vpack.c.bf16 %v1616_v48, %v1609_v59  ;;  %v31657_v24 = vunpack.i.h.bf16 %v24949_v27  ;;  %v25155_v59 = vld [vmem:[%s31642_s3 + $0x50] sm:$0xff] }
 0x1bc   :  { %22221 = vrot.lane.b32.xlu1 %v24484_v26, %s24127_s11  ;;  %22226 = vrot.lane.b32.xlu0 %v24497_v45, %s24127_s11  ;;  %v20345_v18 = vpack.c.bf16 %v1601_v35, %v1594_v47  ;;  %v1615_v37 = vsel %vm1589_vm7, %v31706_v25, %v21878_v2  ;;  %v21908_v22 = vunpack.i.l.bf16 %v24949_v27  ;;  %v31659_v49 = vunpack.i.h.bf16 %v24923_v58 }
 0x1bd   :  { %18960 = vmatmul.mubr.msk.f32.gmra.mrb[28].mxu1 %vm783_vm6, %v24907_v63  ;;  %1726 = vmatprep.mubr.f32.mxu0 %v31662_v7  ;;  %v25092_v9 = vpop.permute.xlu1 %21951  ;;  %v25094_v10 = vpop.permute.xlu0 %21956  ;;  %v1603_v63 = vsel %vm1589_vm7, %v21864_v30, %v21869_v8  ;;  %v2128_v21 = vsel %vm2119_vm8, %v21888_v43, %v21889_v1  ;;  %v31656_v8 = vunpack.i.l.bf16 %v24947_v42  ;;  %v20355_v47 = vpack.c.bf16 %v21899_v60, %v21898_v11 }
 0x1be   :  { %1513 = vmatprep.mubr.f32.mxu1 %v31662_v7  ;;  %v20353_v2 = vpack.c.bf16 %v1603_v63, %v1596_v34  ;;  %v20359_v35 = vpack.c.bf16 %v2128_v21, %v2121_v0  ;;  %v1617_v25 = vsel %vm1589_vm7, %v21879_v14, %v21899_v60  ;;  %v2130_v61 = vsel %vm2119_vm8, %v21908_v22, %v31657_v24  ;;  %v25191_v34 = vld [vmem:[%s31642_s3 + $0x58] sm:$0xff] }
 0x1bf   :  { %18966 = vmatmul.mubr.msk.f32.vlgmr.msra.gmra.mrb[16].mxu0 %vm783_vm6, %v25077_v57  ;;  %v31660_v14 = vunpack.i.h.bf16 %v24974_v41  ;;  %v31661_v0 = vunpack.i.h.bf16 %v24976_v54  ;;  %v21918_v21 = vunpack.i.l.bf16 %v24976_v54 }
 0x1c0   :  { %20346 = vmatpush1.bf16.msra.mxu0 %v20345_v18  ;;  %22231 = vrot.lane.b32.xlu1 %v24448_v52, %s24127_s11 }
 0x1c1   :  { %22236 = vrot.lane.b32.xlu0 %v24466_v5, %s24127_s11  ;;  %18961 = vmatmul.mubr.msk.f32.gmra.mrb[30].mxu1 %vm783_vm6, %v24938_v15  ;;  %v25134_v30 = vpop.permute.xlu1 %21966  ;;  %v25136_v33 = vpop.permute.xlu0 %21961  ;;  %v20349_v15 = vpack.c.bf16 %v1615_v37, %v1608_v12  ;;  %v1610_v12 = vsel %vm1589_vm7, %v21874_v51, %v21898_v11  ;;  %v2123_v37 = vsel %vm2119_vm8, %v31659_v49, %v31656_v8  ;;  %v21893_v51 = vunpack.i.l.bf16 %v24923_v58 }
 0x1c2   :  { %20348 = vmatprep.subr.bf16.mxu0 %v20347_v40  ;;  %1732 = vmatprep.mubr.f32.mxu0 %v31662_v7  ;;  %v20357_v63 = vpack.c.bf16 %v1617_v25, %v1610_v12  ;;  %v21913_v11 = vunpack.i.l.bf16 %v24974_v41  ;;  %v2127_v12 = vsel %vm2119_vm8, %v21904_v3, %v21888_v43  ;;  %v21923_v25 = vunpack.i.l.bf16 %v25006_v56 }
 0x1c3   :  { %18967 = vmatmul.mubr.msk.f32.gmra.mrb[18].mxu0 %vm783_vm6, %v25116_v6  ;;  %1815 = vmatprep.mubr.f32.mxu1 %v31662_v7  ;;  %v21929_v8 = vunpack.i.h.bf16 %v25008_v46  ;;  %v21944_v3 = vunpack.i.h.bf16 %v25055_v38  ;;  %v21939_v49 = vunpack.i.h.bf16 %v25035_v31 }
 0x1c4   :  { %20350 = vmatpush1.bf16.msra.mxu0 %v20349_v15  ;;  %22241 = vrot.lane.b32.xlu1 %v24454_v55, %s24127_s11  ;;  %v20367_v15 = vpack.c.bf16 %v2130_v61, %v2123_v37  ;;  %v2120_v37 = vsel %vm2119_vm8, %v21893_v51, %v21883_v62  ;;  %v2135_v62 = vsel %vm2119_vm8, %v21913_v11, %v31660_v14  ;;  %v21924_v14 = vunpack.i.h.bf16 %v25006_v56 }
 0x1c5   :  { %22246 = vrot.lane.b32.xlu0 %v24516_v4, %s24127_s11  ;;  %18970 = vmatmul.mubr.msk.f32.vlgmr.msra.gmra.mrb[16].mxu1 %vm783_vm6, %v25077_v57  ;;  %v25157_v48 = vpop.permute.xlu1 %21976  ;;  %v25159_v18 = vpop.permute.xlu0 %21971  ;;  %v2142_v51 = vsel %vm2119_vm8, %v21918_v21, %v31661_v0  ;;  %v2134_v24 = vsel %vm2119_vm8, %v21923_v25, %v21913_v11  ;;  %v2141_v19 = vsel %vm2119_vm8, %v21929_v8, %v21918_v21  ;;  %v21928_v0 = vunpack.i.l.bf16 %v25008_v46 }
 0x1c6   :  { %20354 = vmatpush1.bf16.msra.mxu1 %v20353_v2  ;;  %20360 = vmatprep.subr.bf16.mxu0 %v20359_v35  ;;  %v24090_v2 = vld [vmem:[#allocation2 + $0x78] sm:$0xff]  ;;  %v2129_v8 = vsel %vm2119_vm8, %v21889_v1, %v21908_v22  ;;  %v31707_v56 = vunpack.i.l.bf16 %v25055_v38  ;;  %v20365_v25 = vpack.c.bf16 %v2141_v19, %v2134_v24  ;;  %v31708_v1 = vunpack.i.h.bf16 %v24923_v58 }
 0x1c7   :  { %20356 = vmatprep.subr.bf16.mxu1 %v20355_v47  ;;  %1738 = vmatprep.mubr.f32.mxu0 %v31662_v7  ;;  %v24091_v35 = vld [vmem:[#allocation2 + $0x38] sm:$0xff]  ;;  %v31709_v22 = vunpack.i.h.bf16 %v24892_v29  ;;  %v2137_v24 = vsel %vm2119_vm8, %v21924_v14, %v21928_v0 }
 0x1c8   :  { %18968 = vmatmul.mubr.msk.f32.gmra.mrb[20].mxu0 %vm783_vm6, %v25155_v59  ;;  %1821 = vmatprep.mubr.f32.mxu1 %v31662_v7  ;;  %v25204_v47 = vpack.i.bf16 %v24090_v2, %v24091_v35  ;;  %v21933_v2 = vunpack.i.l.bf16 %v25033_v13  ;;  %v20361_v35 = vpack.c.bf16 %v2127_v12, %v2120_v37  ;;  %v20363_v12 = vpack.c.bf16 %v2142_v51, %v2135_v62 }
 0x1c9   :  { %22251 = vrot.lane.b32.xlu1 %v24528_v53, %s24127_s11  ;;  %22256 = vrot.lane.b32.xlu0 %v24488_v32, %s24127_s11  ;;  %v25193_v40 = vpop.permute.xlu1 %21981  ;;  %v25195_v60 = vpop.permute.xlu0 %21986  ;;  %v2132_v21 = vsel %vm2119_vm8, %v31707_v56, %v21944_v3  ;;  %v2122_v62 = vsel %vm2119_vm8, %v31709_v22, %v31708_v1  ;;  %v21959_v22 = vunpack.i.h.bf16 %v25094_v10 }
 0x1ca   :  { %18971 = vmatmul.mubr.msk.f32.gmra.mrb[18].mxu1 %vm783_vm6, %v25116_v6  ;;  %1744 = vmatprep.mubr.f32.mxu0 %v31662_v7  ;;  %v20369_v58 = vpack.c.bf16 %v2129_v8, %v2122_v62  ;;  %v21949_v8 = vunpack.i.h.bf16 %v25057_v44  ;;  %v21958_v62 = vunpack.i.l.bf16 %v25094_v10 }
 0x1cb   :  { %20358 = vmatpush1.bf16.msra.mxu1 %v20357_v63  ;;  %1827 = vmatprep.mubr.f32.mxu1 %v31662_v7  ;;  %v21938_v63 = vunpack.i.l.bf16 %v25035_v31 }
 0x1cc   :  { %20368 = vmatprep.subr.bf16.mxu1 %v20367_v15  ;;  %18969 = vmatmul.mubr.msk.f32.gmra.mrb[22].mxu0 %vm783_vm6, %v25191_v34  ;;  %v21934_v15 = vunpack.i.h.bf16 %v25033_v13 }
 0x1cd   :  { %22261 = vrot.lane.b32.xlu1 %v24503_v50, %s24127_s11  ;;  %22266 = vrot.lane.b32.xlu0 %v25204_v47, %s24127_s11  ;;  %v25220_v61 = vpop.permute.xlu1 %21991  ;;  %v25222_v43 = vpop.permute.xlu0 %21996  ;;  %v2125_v19 = vsel %vm2119_vm8, %v21938_v63, %v21939_v49 }
 0x1ce   :  { %18972 = vmatmul.mubr.msk.f32.gmra.mrb[20].mxu1 %vm783_vm6, %v25155_v59  ;;  %1904 = vmatprep.mubr.f32.mxu0 %v31662_v7  ;;  %v2144_v39 = vsel %vm2119_vm8, %v21933_v2, %v21934_v15  ;;  %v20375_v29 = vpack.c.bf16 %v2132_v21, %v2125_v19  ;;  %v21948_v21 = vunpack.i.l.bf16 %v25057_v44 }
 0x1cf   :  { %1833 = vmatprep.mubr.f32.mxu1 %v31662_v7 }
 0x1d0   :  { %18974 = vmatmul.mubr.msk.f32.vlgmr.msra.gmra.mrb[24].mxu0 %vm783_vm6, %v25077_v57  ;;  %v20383_v19 = vpack.c.bf16 %v21949_v8, %v21948_v21  ;;  %v2126_v46 = vsel %vm2119_vm8, %v21939_v49, %v21948_v21 }
 0x1d1   :  { %20362 = vmatpush1.bf16.msra.mxu0 %v20361_v35  ;;  %22271 = vrot.lane.b32.xlu1 %v24520_v17, %s24127_s11  ;;  %v25248_v37 = vpop.permute.xlu1 %22001  ;;  %v25250_v11 = vpop.permute.xlu0 %22006 }
 0x1d2   :  { %22276 = vrot.lane.b32.xlu0 %v24534_v28, %s24127_s11  ;;  %18973 = vmatmul.mubr.msk.f32.gmra.mrb[22].mxu1 %vm783_vm6, %v25191_v34 }
 0x1d3   :  { %20364 = vmatprep.subr.bf16.mxu0 %v20363_v12  ;;  %1910 = vmatprep.mubr.f32.mxu0 %v31662_v7  ;;  %v31710_v12 = vunpack.i.h.bf16 %v24976_v54  ;;  %v24092_v54 = vld [vmem:[#allocation2 + $0xf8] sm:$0xff] }
 0x1d4   :  { %18975 = vmatmul.mubr.msk.f32.gmra.mrb[26].mxu0 %vm783_vm6, %v25116_v6  ;;  %1993 = vmatprep.mubr.f32.mxu1 %v31662_v7 }
 0x1d5   :  { %20366 = vmatpush1.bf16.msra.mxu0 %v20365_v25  ;;  %22286 = vrot.lane.b32.xlu1 %v24428_v36, %s24128_s21  ;;  %v25288_v51 = vpop.permute.xlu1 %22011  ;;  %v25290_v35 = vpop.permute.xlu0 %22016  ;;  %v2143_v56 = vsel %vm2119_vm8, %v31710_v12, %v21933_v2  ;;  %v20371_v36 = vpack.c.bf16 %v2144_v39, %v2137_v24  ;;  %v31711_v25 = vunpack.i.h.bf16 %v24974_v41  ;;  %v24093_v2 = vld [vmem:[#allocation2 + $0xb8] sm:$0xff]  ;;  %v21954_v41 = vunpack.i.h.bf16 %v25092_v9 }
 0x1d6   :  { %22281 = vrot.lane.b32.xlu0 %v24408_v20, %s24128_s21  ;;  %18978 = vmatmul.mubr.msk.f32.vlgmr.msra.gmra.mrb[24].mxu1 %vm783_vm6, %v25077_v57  ;;  %v25305_v20 = vpack.i.bf16 %v24092_v54, %v24093_v2  ;;  %v2145_v2 = vsel %vm2119_vm8, %v21934_v15, %v21958_v62  ;;  %v21979_v15 = vunpack.i.h.bf16 %v25157_v48 }
 0x1d7   :  { %20370 = vmatpush1.bf16.msra.mxu1 %v20369_v58  ;;  %20376 = vmatprep.subr.bf16.mxu0 %v20375_v29  ;;  %v2136_v1 = vsel %vm2119_vm8, %v31711_v25, %v21924_v14  ;;  %v21953_v14 = vunpack.i.l.bf16 %v25092_v9  ;;  %v31712_v58 = vunpack.i.l.bf16 %v25055_v38  ;;  %v31713_v29 = vunpack.i.h.bf16 %v24949_v27  ;;  %v25349_v27 = vld [vmem:[%s31642_s3 + $0x60] sm:$0xff] }
 0x1d8   :  { %20372 = vmatprep.subr.bf16.mxu1 %v20371_v36  ;;  %1916 = vmatprep.mubr.f32.mxu0 %v31662_v7  ;;  %v20373_v57 = vpack.c.bf16 %v2143_v56, %v2136_v1  ;;  %v21964_v25 = vunpack.i.h.bf16 %v25136_v33  ;;  %v21978_v38 = vunpack.i.l.bf16 %v25157_v48  ;;  %v21989_v48 = vunpack.i.h.bf16 %v25195_v60 }
 0x1d9   :  { %18976 = vmatmul.mubr.msk.f32.gmra.mrb[28].mxu0 %vm783_vm6, %v25155_v59  ;;  %1999 = vmatprep.mubr.f32.mxu1 %v31662_v7  ;;  %v25310_v44 = vpop.permute.xlu1 %22021  ;;  %v25312_v39 = vpop.permute.xlu0 %22026  ;;  %v2131_v24 = vsel %vm2119_vm8, %v31713_v29, %v31712_v58  ;;  %v2139_v36 = vsel %vm2119_vm8, %v21953_v14, %v21954_v41  ;;  %v2138_v54 = vsel %vm2119_vm8, %v21928_v0, %v21953_v14  ;;  %v25388_v0 = vld [vmem:[%s31642_s3 + $0x68] sm:$0xff]  ;;  %v25427_v29 = vld [vmem:[%s31642_s3 + $0x70] sm:$0xff] }
 0x1da   :  { %22296 = vrot.lane.b32.xlu1 %v25305_v20, %s24127_s11  ;;  %22291 = vrot.lane.b32.xlu0 %v24414_v23, %s24128_s21  ;;  %v20381_v49 = vpack.c.bf16 %v2145_v2, %v2138_v54  ;;  %v20387_v58 = vpack.c.bf16 %v21979_v15, %v21978_v38  ;;  %v21999_v54 = vunpack.i.h.bf16 %v25222_v43  ;;  %v21998_v2 = vunpack.i.l.bf16 %v25222_v43 }
 0x1db   :  { %18979 = vmatmul.mubr.msk.f32.gmra.mrb[26].mxu1 %vm783_vm6, %v25116_v6  ;;  %1922 = vmatprep.mubr.f32.mxu0 %v31662_v7  ;;  %v31714_v6 = vunpack.i.l.bf16 %v24947_v42  ;;  %v2146_v42 = vsel %vm2119_vm8, %v21958_v62, %v21959_v22  ;;  %v21974_v62 = vunpack.i.h.bf16 %v25159_v18 }
 0x1dc   :  { %20374 = vmatpush1.bf16.msra.mxu1 %v20373_v57  ;;  %2005 = vmatprep.mubr.f32.mxu1 %v31662_v7  ;;  %v20379_v13 = vpack.c.bf16 %v2146_v42, %v2139_v36  ;;  %v25463_v42 = vld [vmem:[%s31642_s3 + $0x78] sm:$0xff] }
 0x1dd   :  { %20384 = vmatprep.subr.bf16.mxu1 %v20383_v19  ;;  %18977 = vmatmul.mubr.msk.f32.gmra.mrb[30].mxu0 %vm783_vm6, %v25191_v34  ;;  %v25333_v23 = vpop.permute.xlu1 %22031  ;;  %v25335_v12 = vpop.permute.xlu0 %22036  ;;  %v2124_v56 = vsel %vm2119_vm8, %v31714_v6, %v21938_v63  ;;  %v21969_v63 = vunpack.i.h.bf16 %v25134_v30  ;;  %v2133_v19 = vsel %vm2119_vm8, %v21944_v3, %v21949_v8  ;;  %v21973_v6 = vunpack.i.l.bf16 %v25159_v18 }
 0x1de   :  { %22301 = vrot.lane.b32.xlu1 %v24484_v26, %s24128_s21  ;;  %22306 = vrot.lane.b32.xlu0 %v24497_v45, %s24128_s21  ;;  %v21968_v26 = vunpack.i.l.bf16 %v25134_v30  ;;  %v21963_v45 = vunpack.i.l.bf16 %v25136_v33  ;;  %v20377_v1 = vpack.c.bf16 %v2131_v24, %v2124_v56  ;;  %v20385_v21 = vpack.c.bf16 %v2133_v19, %v2126_v46  ;;  %v5387_v30 = vld [vmem:[%s31641_s2] sm:$0xff] }
 0x1df   :  { %18980 = vmatmul.mubr.msk.f32.gmra.mrb[28].mxu1 %vm783_vm6, %v25155_v59  ;;  %2256 = vmatprep.mubr.f32.mxu0 %v31662_v7  ;;  %v2147_v24 = vsel %vm2119_vm8, %v21959_v22, %v21979_v15  ;;  %v21984_v22 = vunpack.i.h.bf16 %v25193_v40  ;;  %v21994_v56 = vunpack.i.h.bf16 %v25220_v61  ;;  %v22003_v46 = vunpack.i.l.bf16 %v25248_v37 }
 0x1e0   :  { %2011 = vmatprep.mubr.f32.mxu1 %v31662_v7  ;;  %v2658_v31 = vsel %vm2649_vm9, %v21968_v26, %v21969_v63 }
 0x1e1   :  { %18986 = vmatmul.mubr.msk.f32.vlgmr.msra.gmra.mrb[16].mxu0 %vm783_vm6, %v25349_v27  ;;  %v25373_v57 = vpop.permute.xlu1 %22046  ;;  %v25375_v59 = vpop.permute.xlu0 %22041 }
 0x1e2   :  { %20378 = vmatpush1.bf16.msra.mxu0 %v20377_v1  ;;  %22311 = vrot.lane.b32.xlu1 %v24448_v52, %s24128_s21  ;;  %v2651_v52 = vsel %vm2649_vm9, %v21963_v45, %v21964_v25  ;;  %v21993_v1 = vunpack.i.l.bf16 %v25220_v61 }
 0x1e3   :  { %22316 = vrot.lane.b32.xlu0 %v24466_v5, %s24128_s21  ;;  %18981 = vmatmul.mubr.msk.f32.gmra.mrb[30].mxu1 %vm783_vm6, %v25191_v34  ;;  %v21983_v5 = vunpack.i.l.bf16 %v25193_v40  ;;  %v21988_v34 = vunpack.i.l.bf16 %v25195_v60  ;;  %v20391_v14 = vpack.c.bf16 %v2658_v31, %v2651_v52  ;;  %v22023_v52 = vunpack.i.l.bf16 %v25310_v44 }
 0x1e4   :  { %20380 = vmatprep.subr.bf16.mxu0 %v20379_v13  ;;  %2262 = vmatprep.mubr.f32.mxu0 %v31662_v7  ;;  %v22009_v13 = vunpack.i.h.bf16 %v25250_v11  ;;  %v2665_v31 = vsel %vm2649_vm9, %v21993_v1, %v21994_v56  ;;  %v22043_v60 = vunpack.i.l.bf16 %v25375_v59 }
 0x1e5   :  { %18987 = vmatmul.mubr.msk.f32.gmra.mrb[18].mxu0 %vm783_vm6, %v25388_v0  ;;  %2345 = vmatprep.mubr.f32.mxu1 %v31662_v7  ;;  %v25413_v3 = vpop.permute.xlu1 %22056  ;;  %v25415_v8 = vpop.permute.xlu0 %22051  ;;  %v2660_v9 = vsel %vm2649_vm9, %v21988_v34, %v21989_v48 }
 0x1e6   :  { %20382 = vmatpush1.bf16.msra.mxu0 %v20381_v49  ;;  %22321 = vrot.lane.b32.xlu1 %v24454_v55, %s24128_s21  ;;  %v2140_v55 = vsel %vm2119_vm8, %v21954_v41, %v21978_v38  ;;  %v2650_v38 = vsel %vm2649_vm9, %v21973_v6, %v21963_v45  ;;  %v22014_v45 = vunpack.i.h.bf16 %v25288_v51 }
 0x1e7   :  { %22326 = vrot.lane.b32.xlu0 %v24516_v4, %s24128_s21  ;;  %18990 = vmatmul.mubr.msk.f32.vlgmr.msra.gmra.mrb[16].mxu1 %vm783_vm6, %v25349_v27  ;;  %v2653_v4 = vsel %vm2649_vm9, %v21974_v62, %v21983_v5  ;;  %v20389_v36 = vpack.c.bf16 %v2147_v24, %v2140_v55  ;;  %v22018_v55 = vunpack.i.l.bf16 %v25290_v35 }
 0x1e8   :  { %20386 = vmatpush1.bf16.msra.mxu1 %v20385_v21  ;;  %20392 = vmatprep.subr.bf16.mxu0 %v20391_v14  ;;  %v20399_v19 = vpack.c.bf16 %v2660_v9, %v2653_v4  ;;  %v2664_v21 = vsel %vm2649_vm9, %v22003_v46, %v21993_v1  ;;  %v2671_v14 = vsel %vm2649_vm9, %v22009_v13, %v21998_v2  ;;  %v22004_v9 = vunpack.i.h.bf16 %v25248_v37  ;;  %v5388_v46 = vld [vmem:[%s31641_s2 + $0x8] sm:$0xff]  ;;  %v5389_v13 = vld [vmem:[%s31641_s2 + $0x10] sm:$0xff] }
 0x1e9   :  { %20388 = vmatprep.subr.bf16.mxu1 %v20387_v58  ;;  %2268 = vmatprep.mubr.f32.mxu0 %v31662_v7  ;;  %v25446_v10 = vpop.permute.xlu1 %22061  ;;  %v25448_v41 = vpop.permute.xlu0 %22066  ;;  %v22019_v58 = vunpack.i.h.bf16 %v25290_v35 }
 0x1ea   :  { %18988 = vmatmul.mubr.msk.f32.gmra.mrb[20].mxu0 %vm783_vm6, %v25427_v29  ;;  %2351 = vmatprep.mubr.f32.mxu1 %v31662_v7  ;;  %v2666_v43 = vsel %vm2649_vm9, %v21994_v56, %v22004_v9 }
 0x1eb   :  { %22331 = vrot.lane.b32.xlu1 %v24528_v53, %s24128_s21  ;;  %22336 = vrot.lane.b32.xlu0 %v24488_v32, %s24128_s21  ;;  %v2657_v53 = vsel %vm2649_vm9, %v21984_v22, %v21968_v26  ;;  %v22024_v26 = vunpack.i.h.bf16 %v25310_v44  ;;  %v22008_v22 = vunpack.i.l.bf16 %v25250_v11  ;;  %v25643_v11 = vld [vmem:[%s31642_s3 + $0x88] sm:$0xff] }
 0x1ec   :  { %18991 = vmatmul.mubr.msk.f32.gmra.mrb[18].mxu1 %vm783_vm6, %v25388_v0  ;;  %2274 = vmatprep.mubr.f32.mxu0 %v31662_v7  ;;  %v20393_v49 = vpack.c.bf16 %v2657_v53, %v2650_v38  ;;  %v22029_v53 = vunpack.i.h.bf16 %v25312_v39  ;;  %v22038_v38 = vunpack.i.l.bf16 %v25335_v12 }
 0x1ed   :  { %20390 = vmatpush1.bf16.msra.mxu1 %v20389_v36  ;;  %2357 = vmatprep.mubr.f32.mxu1 %v31662_v7  ;;  %v25472_v32 = vpop.permute.xlu1 %22071  ;;  %v2659_v36 = vsel %vm2649_vm9, %v21969_v63, %v21988_v34  ;;  %v2662_v37 = vsel %vm2649_vm9, %v22023_v52, %v22024_v26  ;;  %v2652_v63 = vsel %vm2649_vm9, %v21964_v25, %v21974_v62 }
 0x1ee   :  { %20400 = vmatprep.subr.bf16.mxu1 %v20399_v19  ;;  %18989 = vmatmul.mubr.msk.f32.gmra.mrb[22].mxu0 %vm783_vm6, %v25463_v42  ;;  %v25481_v15 = vpop.permute.xlu0 %22076  ;;  %v2655_v34 = vsel %vm2649_vm9, %v22018_v55, %v22019_v58  ;;  %v20401_v33 = vpack.c.bf16 %v2659_v36, %v2652_v63  ;;  %v2667_v25 = vsel %vm2649_vm9, %v22004_v9, %v22008_v22  ;;  %v22044_v9 = vunpack.i.h.bf16 %v25375_v59 }
 0x1ef   :  { %22341 = vrot.lane.b32.xlu1 %v24503_v50, %s24128_s21  ;;  %22346 = vrot.lane.b32.xlu0 %v25204_v47, %s24128_s21  ;;  %v2672_v50 = vsel %vm2649_vm9, %v21998_v2, %v21999_v54  ;;  %v22013_v47 = vunpack.i.l.bf16 %v25288_v51  ;;  %v20407_v18 = vpack.c.bf16 %v2662_v37, %v2655_v34  ;;  %v22069_v63 = vunpack.i.h.bf16 %v25448_v41 }
 0x1f0   :  { %18992 = vmatmul.mubr.msk.f32.gmra.mrb[20].mxu1 %vm783_vm6, %v25427_v29  ;;  %2434 = vmatprep.mubr.f32.mxu0 %v31662_v7  ;;  %v20395_v6 = vpack.c.bf16 %v2672_v50, %v2665_v31  ;;  %v2661_v50 = vsel %vm2649_vm9, %v21989_v48, %v22023_v52  ;;  %v25615_v48 = vld [vmem:[%s31642_s3 + $0x80] sm:$0xff]  ;;  %v3181_v51 = vsel %vm3179_vm10, %v22043_v60, %v22044_v9  ;;  %v22068_v34 = vunpack.i.l.bf16 %v25448_v41 }
 0x1f1   :  { %2363 = vmatprep.mubr.f32.mxu1 %v31662_v7  ;;  %v2673_v19 = vsel %vm2649_vm9, %v21999_v54, %v22013_v47  ;;  %v22039_v54 = vunpack.i.h.bf16 %v25335_v12  ;;  %v5390_v12 = vld [vmem:[%s31641_s2 + $0x18] sm:$0xff]  ;;  %v25833_v41 = vld [vmem:[%s31642_s3 + $0xa0] sm:$0xff] }
 0x1f2   :  { %18994 = vmatmul.mubr.msk.f32.vlgmr.msra.gmra.mrb[24].mxu0 %vm783_vm6, %v25349_v27  ;;  %v25510_v24 = vpop.permute.xlu1 %22081  ;;  %v25512_v4 = vpop.permute.xlu0 %22086  ;;  %v20405_v61 = vpack.c.bf16 %v2673_v19, %v2666_v43 }
 0x1f3   :  { %20394 = vmatpush1.bf16.msra.mxu0 %v20393_v49  ;;  %22351 = vrot.lane.b32.xlu1 %v24520_v17, %s24128_s21  ;;  %v20397_v17 = vpack.c.bf16 %v2671_v14, %v2664_v21  ;;  %v22049_v21 = vunpack.i.h.bf16 %v25373_v57  ;;  %v22048_v14 = vunpack.i.l.bf16 %v25373_v57 }
 0x1f4   :  { %22356 = vrot.lane.b32.xlu0 %v24534_v28, %s24128_s21  ;;  %18993 = vmatmul.mubr.msk.f32.gmra.mrb[22].mxu1 %vm783_vm6, %v25463_v42  ;;  %v2674_v28 = vsel %vm2649_vm9, %v22013_v47, %v22014_v45  ;;  %v2676_v47 = vsel %vm2649_vm9, %v22038_v38, %v22039_v54 }
 0x1f5   :  { %20396 = vmatprep.subr.bf16.mxu0 %v20395_v6  ;;  %2440 = vmatprep.mubr.f32.mxu0 %v31662_v7  ;;  %v20403_v2 = vpack.c.bf16 %v2674_v28, %v2667_v25  ;;  %v2654_v6 = vsel %vm2649_vm9, %v21983_v5, %v22018_v55  ;;  %v22059_v55 = vunpack.i.h.bf16 %v25413_v3  ;;  %v22063_v28 = vunpack.i.l.bf16 %v25446_v10 }
 0x1f6   :  { %18995 = vmatmul.mubr.msk.f32.gmra.mrb[26].mxu0 %vm783_vm6, %v25388_v0  ;;  %2523 = vmatprep.mubr.f32.mxu1 %v31662_v7  ;;  %v25552_v1 = vpop.permute.xlu1 %22091  ;;  %v20409_v36 = vpack.c.bf16 %v2661_v50, %v2654_v6  ;;  %v22089_v6 = vunpack.i.h.bf16 %v25512_v4 }
 0x1f7   :  { %20398 = vmatpush1.bf16.msra.mxu0 %v20397_v17  ;;  %22361 = vrot.lane.b32.xlu1 %v25305_v20, %s24128_s21  ;;  %v25559_v62 = vpop.permute.xlu0 %22096  ;;  %v22028_v20 = vunpack.i.l.bf16 %v25312_v39  ;;  %v22033_v39 = vunpack.i.l.bf16 %v25333_v23  ;;  %v2675_v17 = vsel %vm2649_vm9, %v22014_v45, %v22038_v38  ;;  %v22078_v38 = vunpack.i.l.bf16 %v25481_v15 }
 0x1f8   :  { %5393 = vperm.xlu0 %21723, %v5387_v30   ;;  %18998 = vmatmul.mubr.msk.f32.vlgmr.msra.gmra.mrb[24].mxu1 %vm783_vm6, %v25349_v27  ;;  %v22034_v27 = vunpack.i.h.bf16 %v25333_v23 }
 0x1f9   :  { %20402 = vmatpush1.bf16.msra.mxu1 %v20401_v33  ;;  %20408 = vmatprep.subr.bf16.mxu0 %v20407_v18  ;;  %v20415_v23 = vpack.c.bf16 %v22029_v53, %v22028_v20  ;;  %v2668_v37 = vsel %vm2649_vm9, %v22008_v22, %v22033_v39  ;;  %v2663_v22 = vsel %vm2649_vm9, %v22024_v26, %v22029_v53  ;;  %v25678_v18 = vld [vmem:[%s31642_s3 + $0x90] sm:$0xff]  ;;  %v22064_v53 = vunpack.i.h.bf16 %v25446_v10 }
 0x1fa   :  { %20404 = vmatprep.subr.bf16.mxu1 %v20403_v2  ;;  %2446 = vmatprep.mubr.f32.mxu0 %v31662_v7  ;;  %v2656_v30 = vsel %vm2649_vm9, %v22019_v58, %v22028_v20  ;;  %v20413_v33 = vpack.c.bf16 %v2675_v17, %v2668_v37  ;;  %v2677_v26 = vsel %vm2649_vm9, %v22039_v54, %v22059_v55  ;;  %v22079_v54 = vunpack.i.h.bf16 %v25481_v15 }
 0x1fb   :  { %18996 = vmatmul.mubr.msk.f32.gmra.mrb[28].mxu0 %vm783_vm6, %v25427_v29  ;;  %2529 = vmatprep.mubr.f32.mxu1 %v31662_v7  ;;  %v25585_v31 = vpop.permute.xlu1 %22101  ;;  %v20417_v58 = vpack.c.bf16 %v2663_v22, %v2656_v30  ;;  %v22098_v22 = vunpack.i.l.bf16 %v25559_v62 }
 0x1fc   :  { %5398 = vperm.xlu1 %21724, %v5388_v46   ;;  %5403 = vperm.xlu0 %21723, %v5389_v13   ;;  %v25587_v56 = vpop.permute.xlu0 %22106  ;;  %v3190_v46 = vsel %vm3179_vm10, %v22068_v34, %v22069_v63  ;;  %v22053_v13 = vunpack.i.l.bf16 %v25415_v8  ;;  %v22103_v37 = vunpack.i.l.bf16 %v25585_v31 }
 0x1fd   :  { %18999 = vmatmul.mubr.msk.f32.gmra.mrb[26].mxu1 %vm783_vm6, %v25388_v0  ;;  %2452 = vmatprep.mubr.f32.mxu0 %v31662_v7  ;;  %v2669_v0 = vsel %vm2649_vm9, %v22033_v39, %v22034_v27  ;;  %v22073_v39 = vunpack.i.l.bf16 %v25472_v32  ;;  %v22108_v59 = vunpack.i.l.bf16 %v25587_v56 }
 0x1fe   :  { %20406 = vmatpush1.bf16.msra.mxu1 %v20405_v61  ;;  %2535 = vmatprep.mubr.f32.mxu1 %v31662_v7  ;;  %v20411_v40 = vpack.c.bf16 %v2676_v47, %v2669_v0  ;;  %v25709_v61 = vld [vmem:[%s31642_s3 + $0x98] sm:$0xff]  ;;  %v3187_v0 = vsel %vm3179_vm10, %v22064_v53, %v22048_v14  ;;  %v3180_v15 = vsel %vm3179_vm10, %v22053_v13, %v22043_v60  ;;  %v22083_v47 = vunpack.i.l.bf16 %v25510_v24 }
 0x1ff   :  { %20416 = vmatprep.subr.bf16.mxu1 %v20415_v23  ;;  %18997 = vmatmul.mubr.msk.f32.gmra.mrb[30].mxu0 %vm783_vm6, %v25463_v42  ;;  %v25605_v49 = vpop.permute.xlu1 %22111  ;;  %v3202_v60 = vsel %vm3179_vm10, %v22078_v38, %v22079_v54  ;;  %v3189_v53 = vsel %vm3179_vm10, %v22049_v21, %v22068_v34 }
 0x200   :  { %5408 = vperm.xlu1 %21724, %v5390_v12   ;;  %2786 = vmatprep.mubr.f32.mxu0 %v31662_v7  ;;  %v25617_v52 = vpop.permute.xlu0 %22116  ;;  %v3194_v30 = vsel %vm3179_vm10, %v22083_v47, %v22073_v39 }
 0x201   :  { %19000 = vmatmul.mubr.msk.f32.gmra.mrb[28].mxu1 %vm783_vm6, %v25427_v29  ;;  %v22058_v29 = vunpack.i.l.bf16 %v25413_v3  ;;  %v3188_v3 = vsel %vm3179_vm10, %v22048_v14, %v22049_v21 }
 0x202   :  { %2541 = vmatprep.mubr.f32.mxu1 %v31662_v7  ;;  %v20423_v44 = vpack.c.bf16 %v3188_v3, %v3181_v51  ;;  %v22093_v51 = vunpack.i.l.bf16 %v25552_v1  ;;  %v22099_v3 = vunpack.i.h.bf16 %v25559_v62 }
 0x203   :  { %19006 = vmatmul.mubr.msk.f32.vlgmr.msra.gmra.mrb[16].mxu0 %vm783_vm6, %v25615_v48  ;;  %v25635_v5 = vpop.permute.xlu1 %22126  ;;  %v2670_v35 = vsel %vm2649_vm9, %v22034_v27, %v22058_v29  ;;  %v20419_v2 = vpack.c.bf16 %v22059_v55, %v22058_v29  ;;  %v22074_v27 = vunpack.i.h.bf16 %v25472_v32  ;;  %v22094_v29 = vunpack.i.h.bf16 %v25552_v1 }
 0x204   :  { %20410 = vmatpush1.bf16.msra.mxu0 %v20409_v36  ;;  %2792 = vmatprep.mubr.f32.mxu0 %v31662_v7  ;;  %v25655_v45 = vpop.permute.xlu0 %22121  ;;  %v20421_v43 = vpack.c.bf16 %v2677_v26, %v2670_v35  ;;  %v22104_v36 = vunpack.i.h.bf16 %v25585_v31  ;;  %v22084_v35 = vunpack.i.h.bf16 %v25510_v24  ;;  %v22088_v26 = vunpack.i.l.bf16 %v25512_v4  ;;  %v25861_v4 = vld [vmem:[%s31642_s3 + $0xa8] sm:$0xff] }
 0x205   :  { %19001 = vmatmul.mubr.msk.f32.gmra.mrb[30].mxu1 %vm783_vm6, %v25463_v42  ;;  %20412 = vmatprep.subr.bf16.mxu0 %v20411_v40  ;;  %v22054_v42 = vunpack.i.h.bf16 %v25415_v8  ;;  %v3195_v14 = vsel %vm3179_vm10, %v22073_v39, %v22074_v27  ;;  %v20425_v40 = vpack.c.bf16 %v3187_v0, %v3180_v15  ;;  %v3204_v57 = vsel %vm3179_vm10, %v22093_v51, %v22094_v29 }
 0x206   :  { %2875 = vmatprep.mubr.f32.mxu1 %v31662_v7  ;;  %v3203_v39 = vsel %vm3179_vm10, %v22079_v54, %v22093_v51  ;;  %v22109_v8 = vunpack.i.h.bf16 %v25587_v56  ;;  %v22114_v54 = vunpack.i.h.bf16 %v25605_v49  ;;  %v22113_v56 = vunpack.i.l.bf16 %v25605_v49 }
 0x207   :  { %19007 = vmatmul.mubr.msk.f32.gmra.mrb[18].mxu0 %vm783_vm6, %v25643_v11  ;;  %v3183_v20 = vsel %vm3179_vm10, %v22054_v42, %v22063_v28  ;;  %v3182_v21 = vsel %vm3179_vm10, %v22044_v9, %v22054_v42  ;;  %v22119_v0 = vunpack.i.h.bf16 %v25617_v52 }
 0x208   :  { %20414 = vmatpush1.bf16.msra.mxu0 %v20413_v33  ;;  %2798 = vmatprep.mubr.f32.mxu0 %v31662_v7  ;;  %v25680_v25 = vpop.permute.xlu1 %22136  ;;  %v20431_v12 = vpack.c.bf16 %v3190_v46, %v3183_v20  ;;  %v3201_v33 = vsel %vm3179_vm10, %v22089_v6, %v22078_v38  ;;  %v3185_v46 = vsel %vm3179_vm10, %v22098_v22, %v22099_v3  ;;  %v22129_v6 = vunpack.i.h.bf16 %v25635_v5 }
 0x209   :  { %19010 = vmatmul.mubr.msk.f32.vlgmr.msra.gmra.mrb[16].mxu1 %vm783_vm6, %v25615_v48  ;;  %20424 = vmatprep.subr.bf16.mxu0 %v20423_v44  ;;  %v25684_v19 = vpop.permute.xlu0 %22131  ;;  %v20427_v44 = vpack.c.bf16 %v3202_v60, %v3195_v14  ;;  %v20429_v20 = vpack.c.bf16 %v3201_v33, %v3194_v30  ;;  %v20433_v13 = vpack.c.bf16 %v3189_v53, %v3182_v21  ;;  %v22128_v14 = vunpack.i.l.bf16 %v25635_v5 }
 0x20a   :  { %20418 = vmatpush1.bf16.msra.mxu1 %v20417_v58  ;;  %2881 = vmatprep.mubr.f32.mxu1 %v31662_v7  ;;  %v3192_v58 = vsel %vm3179_vm10, %v22103_v37, %v22104_v36  ;;  %v20447_v32 = vpack.c.bf16 %v22109_v8, %v22108_v59  ;;  %v22124_v60 = vunpack.i.h.bf16 %v25655_v45  ;;  %v3198_v33 = vsel %vm3179_vm10, %v22088_v26, %v22113_v56 }
 0x20b   :  { %20420 = vmatprep.subr.bf16.mxu1 %v20419_v2  ;;  %19008 = vmatmul.mubr.msk.f32.gmra.mrb[20].mxu0 %vm783_vm6, %v25678_v18  ;;  %v20439_v34 = vpack.c.bf16 %v3192_v58, %v3185_v46 }
 0x20c   :  { %2804 = vmatprep.mubr.f32.mxu0 %v31662_v7  ;;  %v25711_v23 = vpop.permute.xlu1 %22141 }
 0x20d   :  { %19011 = vmatmul.mubr.msk.f32.gmra.mrb[18].mxu1 %vm783_vm6, %v25643_v11  ;;  %v25715_v50 = vpop.permute.xlu0 %22146 }
 0x20e   :  { %20422 = vmatpush1.bf16.msra.mxu1 %v20421_v43  ;;  %2887 = vmatprep.mubr.f32.mxu1 %v31662_v7  ;;  %v3197_v43 = vsel %vm3179_vm10, %v22084_v35, %v22088_v26  ;;  %v22143_v26 = vunpack.i.l.bf16 %v25711_v23  ;;  %v22149_v58 = vunpack.i.h.bf16 %v25715_v50  ;;  %v22148_v53 = vunpack.i.l.bf16 %v25715_v50 }
 0x20f   :  { %20432 = vmatprep.subr.bf16.mxu1 %v20431_v12  ;;  %19009 = vmatmul.mubr.msk.f32.gmra.mrb[22].mxu0 %vm783_vm6, %v25709_v61  ;;  %v20435_v9 = vpack.c.bf16 %v3204_v57, %v3197_v43  ;;  %v3196_v12 = vsel %vm3179_vm10, %v22074_v27, %v22084_v35  ;;  %v25898_v57 = vld [vmem:[%s31642_s3 + $0xb0] sm:$0xff] }
 0x210   :  { %2964 = vmatprep.mubr.f32.mxu0 %v31662_v7  ;;  %v25735_v17 = vpop.permute.xlu1 %22151  ;;  %v20437_v15 = vpack.c.bf16 %v3203_v39, %v3196_v12  ;;  %v3720_v43 = vsel %vm3709_vm11, %v22148_v53, %v22149_v58 }
 0x211   :  { %19012 = vmatmul.mubr.msk.f32.gmra.mrb[20].mxu1 %vm783_vm6, %v25678_v18  ;;  %v25739_v55 = vpop.permute.xlu0 %22156  ;;  %v22154_v12 = vunpack.i.h.bf16 %v25735_v17 }
 0x212   :  { %2893 = vmatprep.mubr.f32.mxu1 %v31662_v7 }
 0x213   :  { %19014 = vmatmul.mubr.msk.f32.vlgmr.msra.gmra.mrb[24].mxu0 %vm783_vm6, %v25615_v48 }
 0x214   :  { %20426 = vmatpush1.bf16.msra.mxu0 %v20425_v40  ;;  %2970 = vmatprep.mubr.f32.mxu0 %v31662_v7  ;;  %v25758_v2 = vpop.permute.xlu1 %22161  ;;  %v22123_v40 = vunpack.i.l.bf16 %v25655_v45 }
 0x215   :  { %19013 = vmatmul.mubr.msk.f32.gmra.mrb[22].mxu1 %vm783_vm6, %v25709_v61  ;;  %20428 = vmatprep.subr.bf16.mxu0 %v20427_v44  ;;  %v25767_v24 = vpop.permute.xlu0 %22166  ;;  %v3186_v44 = vsel %vm3179_vm10, %v22099_v3, %v22108_v59  ;;  %v22133_v59 = vunpack.i.l.bf16 %v25684_v19 }
 0x216   :  { %3053 = vmatprep.mubr.f32.mxu1 %v31662_v7  ;;  %v3711_v1 = vsel %vm3709_vm11, %v22123_v40, %v22124_v60 }
 0x217   :  { %19015 = vmatmul.mubr.msk.f32.gmra.mrb[26].mxu0 %vm783_vm6, %v25643_v11 }
 0x218   :  { %20430 = vmatpush1.bf16.msra.mxu0 %v20429_v20  ;;  %2976 = vmatprep.mubr.f32.mxu0 %v31662_v7  ;;  %v22134_v20 = vunpack.i.h.bf16 %v25684_v19 }
 0x219   :  { %19018 = vmatmul.mubr.msk.f32.vlgmr.msra.gmra.mrb[24].mxu1 %vm783_vm6, %v25615_v48  ;;  %20440 = vmatprep.subr.bf16.mxu0 %v20439_v34  ;;  %v25794_v42 = vpop.permute.xlu1 %22171  ;;  %v25796_v38 = vpop.permute.xlu0 %22176  ;;  %v22118_v48 = vunpack.i.l.bf16 %v25617_v52  ;;  %v3191_v52 = vsel %vm3179_vm10, %v22069_v63, %v22103_v37  ;;  %v3184_v63 = vsel %vm3179_vm10, %v22063_v28, %v22098_v22  ;;  %v22138_v22 = vunpack.i.l.bf16 %v25680_v25 }
 0x21a   :  { %20434 = vmatpush1.bf16.msra.mxu1 %v20433_v13  ;;  %3059 = vmatprep.mubr.f32.mxu1 %v31662_v7  ;;  %v20441_v51 = vpack.c.bf16 %v3191_v52, %v3184_v63  ;;  %v22144_v34 = vunpack.i.h.bf16 %v25711_v23  ;;  %v3713_v13 = vsel %vm3709_vm11, %v22134_v20, %v22143_v26  ;;  %v22169_v63 = vunpack.i.h.bf16 %v25767_v24 }
 0x21b   :  { %20436 = vmatprep.subr.bf16.mxu1 %v20435_v9  ;;  %19016 = vmatmul.mubr.msk.f32.gmra.mrb[28].mxu0 %vm783_vm6, %v25678_v18  ;;  %v3206_v47 = vsel %vm3179_vm10, %v22118_v48, %v22119_v0  ;;  %v3205_v10 = vsel %vm3179_vm10, %v22094_v29, %v22118_v48  ;;  %v3193_v29 = vsel %vm3179_vm10, %v22104_v36, %v22109_v8  ;;  %v25929_v48 = vld [vmem:[%s31642_s3 + $0xb8] sm:$0xff] }
 0x21c   :  { %2982 = vmatprep.mubr.f32.mxu0 %v31662_v7  ;;  %v20445_v31 = vpack.c.bf16 %v3205_v10, %v3198_v33  ;;  %v20449_v46 = vpack.c.bf16 %v3193_v29, %v3186_v44 }
 0x21d   :  { %19019 = vmatmul.mubr.msk.f32.gmra.mrb[26].mxu1 %vm783_vm6, %v25643_v11  ;;  %v25811_v27 = vpop.permute.xlu1 %22181  ;;  %v25814_v49 = vpop.permute.xlu0 %22186  ;;  %v3199_v11 = vsel %vm3179_vm10, %v22113_v56, %v22114_v54  ;;  %v22159_v56 = vunpack.i.h.bf16 %v25739_v55 }
 0x21e   :  { %20438 = vmatpush1.bf16.msra.mxu1 %v20437_v15  ;;  %3065 = vmatprep.mubr.f32.mxu1 %v31662_v7  ;;  %v20443_v28 = vpack.c.bf16 %v3206_v47, %v3199_v11  ;;  %v20463_v15 = vpack.c.bf16 %v3720_v43, %v3713_v13  ;;  %v3710_v11 = vsel %vm3709_vm11, %v22133_v59, %v22123_v40  ;;  %v22163_v47 = vunpack.i.l.bf16 %v25758_v2 }
 0x21f   :  { %20448 = vmatprep.subr.bf16.mxu1 %v20447_v32  ;;  %19017 = vmatmul.mubr.msk.f32.gmra.mrb[30].mxu0 %vm783_vm6, %v25709_v61  ;;  %v3717_v32 = vsel %vm3709_vm11, %v22144_v34, %v22128_v14  ;;  %v22189_v19 = vunpack.i.h.bf16 %v25814_v49  ;;  %v22188_v45 = vunpack.i.l.bf16 %v25814_v49 }
 0x220   :  { %3316 = vmatprep.mubr.f32.mxu0 %v31662_v7  ;;  %v20457_v10 = vpack.c.bf16 %v3717_v32, %v3710_v11 }
 0x221   :  { %19020 = vmatmul.mubr.msk.f32.gmra.mrb[28].mxu1 %vm783_vm6, %v25678_v18  ;;  %v25842_v37 = vpop.permute.xlu1 %22191  ;;  %v22139_v18 = vunpack.i.h.bf16 %v25680_v25  ;;  %v3718_v25 = vsel %vm3709_vm11, %v22128_v14, %v22129_v6  ;;  %v22184_v14 = vunpack.i.h.bf16 %v25811_v27 }
 0x222   :  { %3071 = vmatprep.mubr.f32.mxu1 %v31662_v7  ;;  %v25845_v30 = vpop.permute.xlu0 %22196  ;;  %v20455_v62 = vpack.c.bf16 %v3718_v25, %v3711_v1  ;;  %v22178_v1 = vunpack.i.l.bf16 %v25796_v38 }
 0x223   :  { %19026 = vmatmul.mubr.msk.f32.vlgmr.msra.gmra.mrb[16].mxu0 %vm783_vm6, %v25833_v41  ;;  %v3207_v3 = vsel %vm3179_vm10, %v22119_v0, %v22139_v18  ;;  %v20451_v21 = vpack.c.bf16 %v22139_v18, %v22138_v22  ;;  %v22158_v0 = vunpack.i.l.bf16 %v25739_v55  ;;  %v22173_v18 = vunpack.i.l.bf16 %v25794_v42 }
 0x224   :  { %20442 = vmatpush1.bf16.msra.mxu0 %v20441_v51  ;;  %3322 = vmatprep.mubr.f32.mxu0 %v31662_v7  ;;  %v22183_v51 = vunpack.i.l.bf16 %v25811_v27  ;;  %v22198_v49 = vunpack.i.l.bf16 %v25845_v30 }
 0x225   :  { %19021 = vmatmul.mubr.msk.f32.gmra.mrb[30].mxu1 %vm783_vm6, %v25709_v61  ;;  %20444 = vmatprep.subr.bf16.mxu0 %v20443_v28  ;;  %v25881_v35 = vpop.permute.xlu1 %22206  ;;  %v3200_v61 = vsel %vm3179_vm10, %v22114_v54, %v22138_v22  ;;  %v22153_v54 = vunpack.i.l.bf16 %v25735_v17  ;;  %v3732_v40 = vsel %vm3709_vm11, %v22158_v0, %v22159_v56  ;;  %v22174_v28 = vunpack.i.h.bf16 %v25794_v42  ;;  %v26074_v42 = vld [vmem:[%s31642_s3 + $0xc8] sm:$0xff] }
 0x226   :  { %3405 = vmatprep.mubr.f32.mxu1 %v31662_v7  ;;  %v25887_v36 = vpop.permute.xlu0 %22201  ;;  %v20453_v9 = vpack.c.bf16 %v3207_v3, %v3200_v61  ;;  %v22179_v22 = vunpack.i.h.bf16 %v25796_v38  ;;  %v3731_v44 = vsel %vm3709_vm11, %v22169_v63, %v22158_v0  ;;  %v22164_v61 = vunpack.i.h.bf16 %v25758_v2 }
 0x227   :  { %19027 = vmatmul.mubr.msk.f32.gmra.mrb[18].mxu0 %vm783_vm6, %v25861_v4  ;;  %v3725_v33 = vsel %vm3709_vm11, %v22153_v54, %v22154_v12  ;;  %v3724_v29 = vsel %vm3709_vm11, %v22163_v47, %v22153_v54  ;;  %v22168_v3 = vunpack.i.l.bf16 %v25767_v24  ;;  %v3734_v34 = vsel %vm3709_vm11, %v22173_v18, %v22174_v28 }
 0x228   :  { %20446 = vmatpush1.bf16.msra.mxu0 %v20445_v31  ;;  %3328 = vmatprep.mubr.f32.mxu0 %v31662_v7  ;;  %v20459_v31 = vpack.c.bf16 %v3732_v40, %v3725_v33  ;;  %v20461_v2 = vpack.c.bf16 %v3731_v44, %v3724_v29  ;;  %v3715_v24 = vsel %vm3709_vm11, %v22178_v1, %v22179_v22  ;;  %v22194_v54 = vunpack.i.h.bf16 %v25842_v37 }
 0x229   :  { %19030 = vmatmul.mubr.msk.f32.vlgmr.msra.gmra.mrb[16].mxu1 %vm783_vm6, %v25833_v41  ;;  %20456 = vmatprep.subr.bf16.mxu0 %v20455_v62  ;;  %v3727_v43 = vsel %vm3709_vm11, %v22164_v61, %v22168_v3  ;;  %v22199_v0 = vunpack.i.h.bf16 %v25845_v30  ;;  %v22209_v11 = vunpack.i.h.bf16 %v25881_v35  ;;  %v22208_v47 = vunpack.i.l.bf16 %v25881_v35 }
 0x22a   :  { %20450 = vmatpush1.bf16.msra.mxu1 %v20449_v46  ;;  %3411 = vmatprep.mubr.f32.mxu1 %v31662_v7  ;;  %v25914_v39 = vpop.permute.xlu1 %22216  ;;  %v25916_v8 = vpop.permute.xlu0 %22211  ;;  %v3722_v46 = vsel %vm3709_vm11, %v22183_v51, %v22184_v14  ;;  %v22204_v63 = vunpack.i.h.bf16 %v25887_v36  ;;  %v22203_v50 = vunpack.i.l.bf16 %v25887_v36  ;;  %v3723_v40 = vsel %vm3709_vm11, %v22184_v14, %v22189_v19 }
 0x22b   :  { %20452 = vmatprep.subr.bf16.mxu1 %v20451_v21  ;;  %19028 = vmatmul.mubr.msk.f32.gmra.mrb[20].mxu0 %vm783_vm6, %v25898_v57  ;;  %v3719_v21 = vsel %vm3709_vm11, %v22129_v6, %v22148_v53  ;;  %v3712_v6 = vsel %vm3709_vm11, %v22124_v60, %v22134_v20  ;;  %v20471_v53 = vpack.c.bf16 %v3722_v46, %v3715_v24 }
 0x22c   :  { %3334 = vmatprep.mubr.f32.mxu0 %v31662_v7  ;;  %v20465_v13 = vpack.c.bf16 %v3719_v21, %v3712_v6  ;;  %v20467_v60 = vpack.c.bf16 %v3734_v34, %v3727_v43  ;;  %v3726_v20 = vsel %vm3709_vm11, %v22154_v12, %v22164_v61  ;;  %v20479_v12 = vpack.c.bf16 %v22189_v19, %v22188_v45 }
 0x22d   :  { %19031 = vmatmul.mubr.msk.f32.gmra.mrb[18].mxu1 %vm783_vm6, %v25861_v4  ;;  %v4240_v14 = vsel %vm559_vm4, %v22203_v50, %v22204_v63 }
 0x22e   :  { %20454 = vmatpush1.bf16.msra.mxu1 %v20453_v9  ;;  %3417 = vmatprep.mubr.f32.mxu1 %v31662_v7  ;;  %v25937_v52 = vpop.permute.xlu1 %22221  ;;  %v25939_v55 = vpop.permute.xlu0 %22226  ;;  %v3733_v9 = vsel %vm3709_vm11, %v22159_v56, %v22173_v18  ;;  %v22193_v56 = vunpack.i.l.bf16 %v25842_v37  ;;  %v3721_v37 = vsel %vm3709_vm11, %v22149_v58, %v22183_v51  ;;  %v26045_v58 = vld [vmem:[%s31642_s3 + $0xc0] sm:$0xff]  ;;  %v3714_v51 = vsel %vm3709_vm11, %v22143_v26, %v22178_v1 }
 0x22f   :  { %20464 = vmatprep.subr.bf16.mxu1 %v20463_v15  ;;  %19029 = vmatmul.mubr.msk.f32.gmra.mrb[22].mxu0 %vm783_vm6, %v25929_v48  ;;  %v20469_v17 = vpack.c.bf16 %v3733_v9, %v3726_v20  ;;  %v20473_v33 = vpack.c.bf16 %v3721_v37, %v3714_v51  ;;  %v3735_v18 = vsel %vm3709_vm11, %v22174_v28, %v22198_v49  ;;  %v22219_v26 = vunpack.i.h.bf16 %v25914_v39 }
 0x230   :  { %3494 = vmatprep.mubr.f32.mxu0 %v31662_v7  ;;  %v3729_v32 = vsel %vm3709_vm11, %v22193_v56, %v22194_v54  ;;  %v3716_v28 = vsel %vm3709_vm11, %v22179_v22, %v22188_v45  ;;  %v22223_v29 = vunpack.i.l.bf16 %v25937_v52  ;;  %v22229_v44 = vunpack.i.h.bf16 %v25939_v55 }
 0x231   :  { %19032 = vmatmul.mubr.msk.f32.gmra.mrb[20].mxu1 %vm783_vm6, %v25898_v57  ;;  %v3737_v46 = vsel %vm3709_vm11, %v22199_v0, %v22219_v26  ;;  %v20481_v21 = vpack.c.bf16 %v3723_v40, %v3716_v28 }
 0x232   :  { %3423 = vmatprep.mubr.f32.mxu1 %v31662_v7  ;;  %v25962_v25 = vpop.permute.xlu1 %22231 }
 0x233   :  { %19034 = vmatmul.mubr.msk.f32.vlgmr.msra.gmra.mrb[24].mxu0 %vm783_vm6, %v25833_v41  ;;  %v25968_v62 = vpop.permute.xlu0 %22236  ;;  %v22234_v19 = vunpack.i.h.bf16 %v25962_v25  ;;  %v22233_v45 = vunpack.i.l.bf16 %v25962_v25 }
 0x234   :  { %20458 = vmatpush1.bf16.msra.mxu0 %v20457_v10  ;;  %3500 = vmatprep.mubr.f32.mxu0 %v31662_v7  ;;  %v3728_v10 = vsel %vm3709_vm11, %v22168_v3, %v22193_v56  ;;  %v22214_v3 = vunpack.i.h.bf16 %v25916_v8  ;;  %v22238_v20 = vunpack.i.l.bf16 %v25968_v62  ;;  %v22213_v56 = vunpack.i.l.bf16 %v25916_v8 }
 0x235   :  { %19033 = vmatmul.mubr.msk.f32.gmra.mrb[22].mxu1 %vm783_vm6, %v25929_v48  ;;  %20460 = vmatprep.subr.bf16.mxu0 %v20459_v31  ;;  %v22228_v31 = vunpack.i.l.bf16 %v25939_v55  ;;  %v20477_v61 = vpack.c.bf16 %v3735_v18, %v3728_v10  ;;  %v26237_v55 = vld [vmem:[%s31642_s3 + $0xe0] sm:$0xff] }
 0x236   :  { %3583 = vmatprep.mubr.f32.mxu1 %v31662_v7  ;;  %v25992_v5 = vpop.permute.xlu1 %22241  ;;  %v4242_v24 = vsel %vm559_vm4, %v22214_v3, %v22223_v29 }
 0x237   :  { %19035 = vmatmul.mubr.msk.f32.gmra.mrb[26].mxu0 %vm783_vm6, %v25861_v4  ;;  %v26002_v59 = vpop.permute.xlu0 %22246  ;;  %v4249_v34 = vsel %vm559_vm4, %v22228_v31, %v22229_v44  ;;  %v4248_v51 = vsel %vm559_vm4, %v22209_v11, %v22228_v31  ;;  %v22244_v10 = vunpack.i.h.bf16 %v25992_v5 }
 0x238   :  { %20462 = vmatpush1.bf16.msra.mxu0 %v20461_v2  ;;  %3506 = vmatprep.mubr.f32.mxu0 %v31662_v7  ;;  %v20495_v9 = vpack.c.bf16 %v4249_v34, %v4242_v24 }
 0x239   :  { %19038 = vmatmul.mubr.msk.f32.vlgmr.msra.gmra.mrb[24].mxu1 %vm783_vm6, %v25833_v41  ;;  %20472 = vmatprep.subr.bf16.mxu0 %v20471_v53 }
 0x23a   :  { %20466 = vmatpush1.bf16.msra.mxu1 %v20465_v13  ;;  %3589 = vmatprep.mubr.f32.mxu1 %v31662_v7  ;;  %v22224_v13 = vunpack.i.h.bf16 %v25937_v52 }
 0x23b   :  { %20468 = vmatprep.subr.bf16.mxu1 %v20467_v60  ;;  %19036 = vmatmul.mubr.msk.f32.gmra.mrb[28].mxu0 %vm783_vm6, %v25898_v57  ;;  %v26020_v41 = vpop.permute.xlu1 %22251  ;;  %v26025_v15 = vpop.permute.xlu0 %22256  ;;  %v22239_v60 = vunpack.i.h.bf16 %v25968_v62  ;;  %v22243_v62 = vunpack.i.l.bf16 %v25992_v5 }
 0x23c   :  { %3512 = vmatprep.mubr.f32.mxu0 %v31662_v7  ;;  %v4246_v25 = vsel %vm559_vm4, %v22224_v13, %v22208_v47  ;;  %v22253_v40 = vunpack.i.l.bf16 %v26020_v41  ;;  %v22259_v18 = vunpack.i.h.bf16 %v26025_v15 }
 0x23d   :  { %19039 = vmatmul.mubr.msk.f32.gmra.mrb[26].mxu1 %vm783_vm6, %v25861_v4  ;;  %v3736_v4 = vsel %vm3709_vm11, %v22198_v49, %v22199_v0  ;;  %v22249_v0 = vunpack.i.h.bf16 %v26002_v59 }
 0x23e   :  { %20470 = vmatpush1.bf16.msra.mxu1 %v20469_v17  ;;  %3595 = vmatprep.mubr.f32.mxu1 %v31662_v7  ;;  %v20475_v23 = vpack.c.bf16 %v3736_v4, %v3729_v32  ;;  %v4254_v32 = vsel %vm559_vm4, %v22233_v45, %v22234_v19  ;;  %v4261_v4 = vsel %vm559_vm4, %v22238_v20, %v22239_v60 }
 0x23f   :  { %20480 = vmatprep.subr.bf16.mxu1 %v20479_v12  ;;  %19037 = vmatmul.mubr.msk.f32.gmra.mrb[30].mxu0 %vm783_vm6, %v25929_v48  ;;  %v26033_v30 = vpop.permute.xlu1 %22261  ;;  %v26066_v1 = vpop.permute.xlu0 %22266  ;;  %v4260_v35 = vsel %vm559_vm4, %v22249_v0, %v22238_v20 }
 0x240   :  { %3846 = vmatprep.mubr.f32.mxu0 %v31662_v7  ;;  %v22264_v12 = vunpack.i.h.bf16 %v26033_v30  ;;  %v22263_v37 = vunpack.i.l.bf16 %v26033_v30  ;;  %v22269_v8 = vunpack.i.h.bf16 %v26066_v1 }
 0x241   :  { %19040 = vmatmul.mubr.msk.f32.gmra.mrb[28].mxu1 %vm783_vm6, %v25898_v57  ;;  %v22218_v57 = vunpack.i.l.bf16 %v25914_v39  ;;  %v4247_v39 = vsel %vm559_vm4, %v22208_v47, %v22209_v11  ;;  %v4239_v47 = vsel %vm559_vm4, %v22213_v56, %v22203_v50  ;;  %v22248_v50 = vunpack.i.l.bf16 %v26002_v59 }
 0x242   :  { %3601 = vmatprep.mubr.f32.mxu1 %v31662_v7  ;;  %v20487_v38 = vpack.c.bf16 %v4247_v39, %v4240_v14  ;;  %v20491_v11 = vpack.c.bf16 %v4261_v4, %v4254_v32  ;;  %v4251_v5 = vsel %vm559_vm4, %v22263_v37, %v22264_v12  ;;  %v4241_v14 = vsel %vm559_vm4, %v22204_v63, %v22214_v3 }
 0x243   :  { %19046 = vmatmul.mubr.msk.f32.vlgmr.msra.gmra.mrb[16].mxu0 %vm783_vm6, %v26045_v58  ;;  %v26068_v27 = vpop.permute.xlu1 %22271  ;;  %v3730_v22 = vsel %vm3709_vm11, %v22194_v54, %v22218_v57  ;;  %v20483_v2 = vpack.c.bf16 %v22219_v26, %v22218_v57  ;;  %v26134_v54 = vld [vmem:[%s31642_s3 + $0xd8] sm:$0xff]  ;;  %v20489_v26 = vpack.c.bf16 %v4246_v25, %v4239_v47  ;;  %v4253_v57 = vsel %vm559_vm4, %v22243_v62, %v22233_v45 }
 0x244   :  { %20474 = vmatpush1.bf16.msra.mxu0 %v20473_v33  ;;  %3852 = vmatprep.mubr.f32.mxu0 %v31662_v7  ;;  %v26116_v6 = vpop.permute.xlu0 %22276  ;;  %v20485_v43 = vpack.c.bf16 %v3737_v46, %v3730_v22  ;;  %v22254_v33 = vunpack.i.h.bf16 %v26020_v41  ;;  %v22268_v63 = vunpack.i.l.bf16 %v26066_v1  ;;  %v4256_v22 = vsel %vm559_vm4, %v22244_v10, %v22248_v50 }
 0x245   :  { %19041 = vmatmul.mubr.msk.f32.gmra.mrb[30].mxu1 %vm783_vm6, %v25929_v48  ;;  %20476 = vmatprep.subr.bf16.mxu0 %v20475_v23  ;;  %v26104_v48 = vld [vmem:[%s31642_s3 + $0xd0] sm:$0xff]  ;;  %v22258_v23 = vunpack.i.l.bf16 %v26025_v15  ;;  %v4262_v46 = vsel %vm559_vm4, %v22239_v60, %v22253_v40  ;;  %v4250_v45 = vsel %vm559_vm4, %v22229_v44, %v22263_v37  ;;  %v4252_v25 = vsel %vm559_vm4, %v22264_v12, %v22269_v8 }
 0x246   :  { %3935 = vmatprep.mubr.f32.mxu1 %v31662_v7  ;;  %v4263_v31 = vsel %vm559_vm4, %v22253_v40, %v22254_v33  ;;  %v20511_v13 = vpack.c.bf16 %v22269_v8, %v22268_v63  ;;  %v4245_v0 = vsel %vm559_vm4, %v22259_v18, %v22268_v63  ;;  %v26326_v63 = vld [vmem:[%s31642_s3 + $0xf8] sm:$0xff] }
 0x247   :  { %19047 = vmatmul.mubr.msk.f32.gmra.mrb[18].mxu0 %vm783_vm6, %v26074_v42  ;;  %v26118_v53 = vpop.permute.xlu1 %22286  ;;  %v4244_v36 = vsel %vm559_vm4, %v22258_v23, %v22259_v18  ;;  %v4243_v56 = vsel %vm559_vm4, %v22223_v29, %v22258_v23  ;;  %v20513_v23 = vpack.c.bf16 %v4252_v25, %v4245_v0 }
 0x248   :  { %20478 = vmatpush1.bf16.msra.mxu0 %v20477_v61  ;;  %3858 = vmatprep.mubr.f32.mxu0 %v31662_v7  ;;  %v26143_v49 = vpop.permute.xlu0 %22281  ;;  %v20493_v61 = vpack.c.bf16 %v4260_v35, %v4253_v57  ;;  %v20503_v3 = vpack.c.bf16 %v4251_v5, %v4244_v36  ;;  %v22289_v60 = vunpack.i.h.bf16 %v26118_v53  ;;  %v20505_v29 = vpack.c.bf16 %v4250_v45, %v4243_v56 }
 0x249   :  { %19050 = vmatmul.mubr.msk.f32.vlgmr.msra.gmra.mrb[16].mxu1 %vm783_vm6, %v26045_v58  ;;  %20488 = vmatprep.subr.bf16.mxu0 %v20487_v38  ;;  %v20497_v38 = vpack.c.bf16 %v4248_v51, %v4241_v14 }
 0x24a   :  { %20482 = vmatpush1.bf16.msra.mxu1 %v20481_v21  ;;  %3941 = vmatprep.mubr.f32.mxu1 %v31662_v7  ;;  %v20499_v21 = vpack.c.bf16 %v4263_v31, %v4256_v22 }
 0x24b   :  { %20484 = vmatprep.subr.bf16.mxu1 %v20483_v2  ;;  %19048 = vmatmul.mubr.msk.f32.gmra.mrb[20].mxu0 %vm783_vm6, %v26104_v48  ;;  %v4255_v2 = vsel %vm559_vm4, %v22234_v19, %v22244_v10  ;;  %v22278_v19 = vunpack.i.l.bf16 %v26116_v6 }
 0x24c   :  { %3864 = vmatprep.mubr.f32.mxu0 %v31662_v7  ;;  %v26145_v17 = vpop.permute.xlu1 %22296  ;;  %v26183_v39 = vpop.permute.xlu0 %22291  ;;  %v20501_v34 = vpack.c.bf16 %v4262_v46, %v4255_v2 }
 0x24d   :  { %19051 = vmatmul.mubr.msk.f32.gmra.mrb[18].mxu1 %vm783_vm6, %v26074_v42  ;;  %v4264_v30 = vsel %vm559_vm4, %v22254_v33, %v22278_v19  ;;  %v22299_v12 = vunpack.i.h.bf16 %v26145_v17  ;;  %v22298_v37 = vunpack.i.l.bf16 %v26145_v17  ;;  %v26278_v17 = vld [vmem:[%s31642_s3 + $0xe8] sm:$0xff]  ;;  %v22294_v51 = vunpack.i.h.bf16 %v26183_v39 }
 0x24e   :  { %20486 = vmatpush1.bf16.msra.mxu1 %v20485_v43  ;;  %3947 = vmatprep.mubr.f32.mxu1 %v31662_v7  ;;  %v22273_v43 = vunpack.i.l.bf16 %v26068_v27 }
 0x24f   :  { %20496 = vmatprep.subr.bf16.mxu1 %v20495_v9  ;;  %19049 = vmatmul.mubr.msk.f32.gmra.mrb[22].mxu0 %vm783_vm6, %v26134_v54  ;;  %v22279_v9 = vunpack.i.h.bf16 %v26116_v6  ;;  %v22283_v6 = vunpack.i.l.bf16 %v26143_v49  ;;  %v20515_v57 = vpack.c.bf16 %v22299_v12, %v22298_v37 }
 0x250   :  { %4024 = vmatprep.mubr.f32.mxu0 %v31662_v7  ;;  %v26185_v28 = vpop.permute.xlu1 %22301  ;;  %v26207_v1 = vpop.permute.xlu0 %22306  ;;  %v4257_v52 = vsel %vm559_vm4, %v22248_v50, %v22273_v43  ;;  %v26301_v50 = vld [vmem:[%s31642_s3 + $0xf0] sm:$0xff] }
 0x251   :  { %19052 = vmatmul.mubr.msk.f32.gmra.mrb[20].mxu1 %vm783_vm6, %v26104_v48  ;;  %v4265_v20 = vsel %vm559_vm4, %v22278_v19, %v22279_v9  ;;  %v22303_v15 = vunpack.i.l.bf16 %v26185_v28  ;;  %v22309_v41 = vunpack.i.h.bf16 %v26207_v1  ;;  %v22308_v4 = vunpack.i.l.bf16 %v26207_v1 }
 0x252   :  { %3953 = vmatprep.mubr.f32.mxu1 %v31662_v7  ;;  %v20509_v33 = vpack.c.bf16 %v4264_v30, %v4257_v52  ;;  %v4266_v40 = vsel %vm559_vm4, %v22279_v9, %v22299_v12  ;;  %v22304_v5 = vunpack.i.h.bf16 %v26185_v28 }
 0x253   :  { %19054 = vmatmul.mubr.msk.f32.vlgmr.msra.gmra.mrb[24].mxu0 %vm783_vm6, %v26045_v58  ;;  %v4772_v35 = vsel %vm4768_vm12, %v22294_v51, %v22303_v15  ;;  %v4778_v45 = vsel %vm4768_vm12, %v22289_v60, %v22308_v4 }
 0x254   :  { %20490 = vmatpush1.bf16.msra.mxu0 %v20489_v26  ;;  %4030 = vmatprep.mubr.f32.mxu0 %v31662_v7  ;;  %v26209_v24 = vpop.permute.xlu1 %22311 }
 0x255   :  { %19053 = vmatmul.mubr.msk.f32.gmra.mrb[22].mxu1 %vm783_vm6, %v26134_v54  ;;  %20492 = vmatprep.subr.bf16.mxu0 %v20491_v11  ;;  %v4779_v11 = vsel %vm4768_vm12, %v22308_v4, %v22309_v41 }
 0x256   :  { %4113 = vmatprep.mubr.f32.mxu1 %v31662_v7  ;;  %v20527_v31 = vpack.c.bf16 %v4779_v11, %v4772_v35 }
 0x257   :  { %19055 = vmatmul.mubr.msk.f32.gmra.mrb[26].mxu0 %vm783_vm6, %v26074_v42 }
 0x258   :  { %20494 = vmatpush1.bf16.msra.mxu0 %v20493_v61  ;;  %4036 = vmatprep.mubr.f32.mxu0 %v31662_v7  ;;  %v26249_v62 = vpop.permute.xlu1 %22321  ;;  %v22314_v61 = vunpack.i.h.bf16 %v26209_v24 }
 0x259   :  { %19058 = vmatmul.mubr.msk.f32.vlgmr.msra.gmra.mrb[24].mxu1 %vm783_vm6, %v26045_v58  ;;  %20504 = vmatprep.subr.bf16.mxu0 %v20503_v3  ;;  %v22274_v58 = vunpack.i.h.bf16 %v26068_v27  ;;  %v22288_v27 = vunpack.i.l.bf16 %v26118_v53  ;;  %v22293_v3 = vunpack.i.l.bf16 %v26183_v39  ;;  %v22323_v2 = vunpack.i.l.bf16 %v26249_v62 }
 0x25a   :  { %20498 = vmatpush1.bf16.msra.mxu1 %v20497_v38  ;;  %4119 = vmatprep.mubr.f32.mxu1 %v31662_v7  ;;  %v22313_v38 = vunpack.i.l.bf16 %v26209_v24 }
 0x25b   :  { %20500 = vmatprep.subr.bf16.mxu1 %v20499_v21  ;;  %19056 = vmatmul.mubr.msk.f32.gmra.mrb[28].mxu0 %vm783_vm6, %v26104_v48  ;;  %v4258_v44 = vsel %vm559_vm4, %v22273_v43, %v22274_v58  ;;  %v4777_v59 = vsel %vm4768_vm12, %v22288_v27, %v22289_v60  ;;  %v4776_v21 = vsel %vm4768_vm12, %v22304_v5, %v22288_v27 }
 0x25c   :  { %4042 = vmatprep.mubr.f32.mxu0 %v31662_v7  ;;  %v20507_v32 = vpack.c.bf16 %v4265_v20, %v4258_v44  ;;  %v4784_v43 = vsel %vm4768_vm12, %v22313_v38, %v22314_v61  ;;  %v4769_v19 = vsel %vm4768_vm12, %v22293_v3, %v22283_v6  ;;  %v22324_v20 = vunpack.i.h.bf16 %v26249_v62 }
 0x25d   :  { %19059 = vmatmul.mubr.msk.f32.gmra.mrb[26].mxu1 %vm783_vm6, %v26074_v42  ;;  %v22284_v42 = vunpack.i.h.bf16 %v26143_v49  ;;  %v26292_v18 = vpop.permute.xlu1 %22331  ;;  %v4783_v0 = vsel %vm4768_vm12, %v22323_v2, %v22313_v38 }
 0x25e   :  { %20502 = vmatpush1.bf16.msra.mxu1 %v20501_v34  ;;  %4125 = vmatprep.mubr.f32.mxu1 %v31662_v7  ;;  %v22334_v27 = vunpack.i.h.bf16 %v26292_v18  ;;  %v22333_v44 = vunpack.i.l.bf16 %v26292_v18  ;;  %v26438_v18 = vld [vmem:[%s31642_s3 + $0x108] sm:$0xff] }
 0x25f   :  { %20512 = vmatprep.subr.bf16.mxu1 %v20511_v13  ;;  %19057 = vmatmul.mubr.msk.f32.gmra.mrb[30].mxu0 %vm783_vm6, %v26134_v54  ;;  %v4770_v47 = vsel %vm4768_vm12, %v22283_v6, %v22284_v42  ;;  %v4771_v30 = vsel %vm4768_vm12, %v22284_v42, %v22294_v51 }
 0x260   :  { %4375 = vmatprep.mubr.f32.mxu0 %v31662_v7  ;;  %v20519_v26 = vpack.c.bf16 %v4777_v59, %v4770_v47 }
 0x261   :  { %19060 = vmatmul.mubr.msk.f32.gmra.mrb[28].mxu1 %vm783_vm6, %v26104_v48  ;;  %v26247_v48 = vpop.permute.xlu0 %22316  ;;  %v26331_v46 = vpop.permute.xlu1 %22341 }
 0x262   :  { %4131 = vmatprep.mubr.f32.mxu1 %v31662_v7  ;;  %v22319_v36 = vunpack.i.h.bf16 %v26247_v48  ;;  %v22318_v8 = vunpack.i.l.bf16 %v26247_v48  ;;  %v22344_v13 = vunpack.i.h.bf16 %v26331_v46  ;;  %v20521_v48 = vpack.c.bf16 %v4776_v21, %v4769_v19  ;;  %v19113_v21 = vld [vmem:[%s31639_s0 + $0x158] sm:$0xff] }
 0x263   :  { %19066 = vmatmul.mubr.msk.f32.vlgmr.msra.gmra.mrb[16].mxu0 %vm783_vm6, %v26237_v55  ;;  %v26475_v19 = vld [vmem:[%s31642_s3 + $0x118] sm:$0xff] }
 0x264   :  { %20506 = vmatpush1.bf16.msra.mxu0 %v20505_v29  ;;  %4381 = vmatprep.mubr.f32.mxu0 %v31662_v7  ;;  %v4791_v9 = vsel %vm4768_vm12, %v22318_v8, %v22319_v36  ;;  %v4793_v29 = vsel %vm4768_vm12, %v22333_v44, %v22334_v27  ;;  %v4792_v4 = vsel %vm4768_vm12, %v22319_v36, %v22333_v44  ;;  %v19103_v36 = vld [vmem:[%s31639_s0 + $0x108] sm:$0xff] }
 0x265   :  { %19061 = vmatmul.mubr.msk.f32.gmra.mrb[30].mxu1 %vm783_vm6, %v26134_v54  ;;  %20508 = vmatprep.subr.bf16.mxu0 %v20507_v32  ;;  %v4259_v54 = vsel %vm559_vm4, %v22274_v58, %v22298_v37  ;;  %v26290_v10 = vpop.permute.xlu0 %22326  ;;  %v22343_v58 = vunpack.i.l.bf16 %v26331_v46  ;;  %v20523_v52 = vpack.c.bf16 %v4791_v9, %v4784_v43  ;;  %v20529_v37 = vpack.c.bf16 %v4778_v45, %v4771_v30  ;;  %v22352_v51 = vpop.permute.xlu1 %22351  ;;  %v19105_v46 = vld [vmem:[%s31639_s0 + $0x118] sm:$0xff]  ;;  %v19102_v45 = vld [vmem:[%s31639_s0 + $0x100] sm:$0xff]  ;;  %v19119_v44 = vld [vmem:[%s31639_s0 + $0x188] sm:$0xff] }
 0x266   :  { %4464 = vmatprep.mubr.f32.mxu1 %v31662_v7  ;;  %v20517_v14 = vpack.c.bf16 %v4266_v40, %v4259_v54  ;;  %v22329_v34 = vunpack.i.h.bf16 %v26290_v10  ;;  %v22328_v6 = vunpack.i.l.bf16 %v26290_v10  ;;  %v4785_v54 = vsel %vm4768_vm12, %v22314_v61, %v22324_v20  ;;  %v19115_v30 = vld [vmem:[%s31639_s0 + $0x168] sm:$0xff] }
 0x267   :  { %19067 = vmatmul.mubr.msk.f32.gmra.mrb[18].mxu0 %vm783_vm6, %v26278_v17  ;;  %v4781_v62 = vsel %vm4768_vm12, %v22343_v58, %v22344_v13  ;;  %v20533_v40 = vpack.c.bf16 %v4792_v4, %v4785_v54  ;;  %v4780_v24 = vsel %vm4768_vm12, %v22309_v41, %v22343_v58  ;;  %v26463_v58 = vld [vmem:[%s31642_s3 + $0x110] sm:$0xff]  ;;  %v20561_v43 = vpack.c.bf16 %v19113_v21, %v19105_v46  ;;  %v19123_v54 = vld [vmem:[%s31639_s0 + $0x1a8] sm:$0xff] }
 0x268   :  { %20510 = vmatpush1.bf16.msra.mxu0 %v20509_v33  ;;  %4387 = vmatprep.mubr.f32.mxu0 %v31662_v7  ;;  %v4790_v53 = vsel %vm4768_vm12, %v22329_v34, %v22318_v8  ;;  %v4786_v42 = vsel %vm4768_vm12, %v22324_v20, %v22328_v6  ;;  %v19111_v8 = vld [vmem:[%s31639_s0 + $0x148] sm:$0xff] }
 0x269   :  { %19070 = vmatmul.mubr.msk.f32.vlgmr.msra.gmra.mrb[16].mxu1 %vm783_vm6, %v26237_v55  ;;  %20520 = vmatprep.subr.bf16.mxu0 %v20519_v26  ;;  %v26329_v22 = vpop.permute.xlu0 %22336  ;;  %v20525_v12 = vpack.c.bf16 %v4790_v53, %v4783_v0  ;;  %v20531_v47 = vpack.c.bf16 %v4793_v29, %v4786_v42  ;;  %v22362_v41 = vpop.permute.xlu1 %22361  ;;  %v19127_v20 = vld [vmem:[%s31639_s0 + $0x1c8] sm:$0x7]  ;;  %v19126_v53 = vld [vmem:[%s31639_s0 + $0x1c0] sm:$0x7]  ;;  %v19117_v42 = vld [vmem:[%s31639_s0 + $0x178] sm:$0xff] }
 0x26a   :  { %20514 = vmatpush1.bf16.msra.mxu1 %v20513_v23  ;;  %4470 = vmatprep.mubr.f32.mxu1 %v31662_v7  ;;  %v22339_v56 = vunpack.i.h.bf16 %v26329_v22  ;;  %v22338_v25 = vunpack.i.l.bf16 %v26329_v22  ;;  %v22353_v23 = vunpack.i.l.bf16 %v22352_v51  ;;  %v22364_v61 = vunpack.i.h.bf16 %v22362_v41 }
 0x26b   :  { %20516 = vmatprep.subr.bf16.mxu1 %v20515_v57  ;;  %19068 = vmatmul.mubr.msk.f32.gmra.mrb[20].mxu0 %vm783_vm6, %v26301_v50  ;;  %v22363_v38 = vunpack.i.l.bf16 %v22362_v41  ;;  %v20551_v22 = vpack.c.bf16 %v19111_v8, %v19103_v36  ;;  %v20555_v0 = vpack.c.bf16 %v19127_v20, %v19119_v44 }
 0x26c   :  { %4393 = vmatprep.mubr.f32.mxu0 %v31662_v7  ;;  %v4774_v32 = vsel %vm4768_vm12, %v22338_v25, %v22339_v56  ;;  %v4773_v1 = vsel %vm4768_vm12, %v22303_v15, %v22338_v25  ;;  %v19104_v25 = vld [vmem:[%s31639_s0 + $0x110] sm:$0xff] }
 0x26d   :  { %19071 = vmatmul.mubr.msk.f32.gmra.mrb[18].mxu1 %vm783_vm6, %v26278_v17  ;;  %v22347_v60 = vpop.permute.xlu0 %22346  ;;  %v20535_v49 = vpack.c.bf16 %v4781_v62, %v4774_v32  ;;  %v20537_v5 = vpack.c.bf16 %v4780_v24, %v4773_v1  ;;  %v19107_v62 = vld [vmem:[%s31639_s0 + $0x128] sm:$0xff]  ;;  %v19120_v32 = vld [vmem:[%s31639_s0 + $0x190] sm:$0xff]  ;;  %v19122_v24 = vld [vmem:[%s31639_s0 + $0x1a0] sm:$0xff] }
 0x26e   :  { %20518 = vmatpush1.bf16.msra.mxu1 %v20517_v14  ;;  %4476 = vmatprep.mubr.f32.mxu1 %v31662_v7  ;;  %v22349_v39 = vunpack.i.h.bf16 %v22347_v60  ;;  %v22348_v59 = vunpack.i.l.bf16 %v22347_v60  ;;  %v19121_v60 = vld [vmem:[%s31639_s0 + $0x198] sm:$0xff]  ;;  %v5351_v1 = vld [vmem:[%s31640_s1 + $0x8] sm:$0xff] }
 0x26f   :  { %20528 = vmatprep.subr.bf16.mxu1 %v20527_v31  ;;  %19069 = vmatmul.mubr.msk.f32.gmra.mrb[22].mxu0 %vm783_vm6, %v26326_v63 }
 0x270   :  { %4553 = vmatprep.mubr.f32.mxu0 %v31662_v7  ;;  %v20543_v10 = vpack.c.bf16 %v22349_v39, %v22348_v59  ;;  %v4782_v28 = vsel %vm4768_vm12, %v22344_v13, %v22349_v39  ;;  %v4775_v15 = vsel %vm4768_vm12, %v22339_v56, %v22348_v59  ;;  %v20547_v13 = vpack.c.bf16 %v22364_v61, %v22363_v38  ;;  %v19128_v39 = vld [vmem:[%s31639_s0 + $0x1d0] sm:$0x7] }
 0x271   :  { %19072 = vmatmul.mubr.msk.f32.gmra.mrb[20].mxu1 %vm783_vm6, %v26301_v50  ;;  %v22357_v33 = vpop.permute.xlu0 %22356  ;;  %v20571_v59 = vpack.c.bf16 %v19115_v30, %v19107_v62  ;;  %v20568_v4 = vpack.c.bf16 %v19128_v39, %v19120_v32 }
 0x272   :  { %4482 = vmatprep.mubr.f32.mxu1 %v31662_v7  ;;  %v22359_v26 = vunpack.i.h.bf16 %v22357_v33  ;;  %v22358_v57 = vunpack.i.l.bf16 %v22357_v33  ;;  %v19114_v33 = vld [vmem:[%s31639_s0 + $0x160] sm:$0xff] }
 0x273   :  { %19074 = vmatmul.mubr.msk.f32.vlgmr.msra.gmra.mrb[24].mxu0 %vm783_vm6, %v26237_v55 }
 0x274   :  { %20522 = vmatpush1.bf16.msra.mxu0 %v20521_v48  ;;  %4559 = vmatprep.mubr.f32.mxu0 %v31662_v7  ;;  %v4795_v11 = vsel %vm4768_vm12, %v22358_v57, %v22359_v26  ;;  %v4794_v14 = vsel %vm4768_vm12, %v22334_v27, %v22358_v57  ;;  %v4796_v34 = vsel %vm4768_vm12, %v22359_v26, %v22364_v61  ;;  %v19110_v27 = vld [vmem:[%s31639_s0 + $0x140] sm:$0xff]  ;;  %v19112_v48 = vld [vmem:[%s31639_s0 + $0x150] sm:$0xff]  ;;  %v5353_v61 = vld [vmem:[%s31640_s1 + $0x18] sm:$0xff] }
 0x275   :  { %19073 = vmatmul.mubr.msk.f32.gmra.mrb[22].mxu1 %vm783_vm6, %v26326_v63  ;;  %20524 = vmatprep.subr.bf16.mxu0 %v20523_v52  ;;  %v20553_v56 = vpack.c.bf16 %v19110_v27, %v19102_v45  ;;  %v19129_v52 = vld [vmem:[%s31639_s0 + $0x1d8] sm:$0x7]  ;;  %v20563_v29 = vpack.c.bf16 %v19112_v48, %v19104_v25  ;;  %v19116_v26 = vld [vmem:[%s31639_s0 + $0x170] sm:$0xff] }
 0x276   :  { %4642 = vmatprep.mubr.f32.mxu1 %v31662_v7 }
 0x277   :  { %19075 = vmatmul.mubr.msk.f32.gmra.mrb[26].mxu0 %vm783_vm6, %v26278_v17  ;;  %v26715_v30 = vpop.permute.xlu0 %5393 }
 0x278   :  { %20526 = vmatpush1.bf16.msra.mxu0 %v20525_v12  ;;  %4565 = vmatprep.mubr.f32.mxu0 %v31662_v7 }
 0x279   :  { %19078 = vmatmul.mubr.msk.f32.vlgmr.msra.gmra.mrb[24].mxu1 %vm783_vm6, %v26237_v55  ;;  %20536 = vmatprep.subr.bf16.mxu0 %v20535_v49  ;;  %v22354_v55 = vunpack.i.h.bf16 %v22352_v51  ;;  %v19109_v49 = vld [vmem:[%s31639_s0 + $0x138] sm:$0xff]  ;;  %v19106_v51 = vld [vmem:[%s31639_s0 + $0x120] sm:$0xff] }
 0x27a   :  { %20530 = vmatpush1.bf16.msra.mxu1 %v20529_v37  ;;  %4648 = vmatprep.mubr.f32.mxu1 %v31662_v7  ;;  %v20565_v37 = vpack.c.bf16 %v19129_v52, %v19121_v60 }
 0x27b   :  { %20532 = vmatprep.subr.bf16.mxu1 %v20531_v47  ;;  %19076 = vmatmul.mubr.msk.f32.gmra.mrb[28].mxu0 %vm783_vm6, %v26301_v50  ;;  %v4788_v35 = vsel %vm4768_vm12, %v22353_v23, %v22354_v55  ;;  %v4789_v2 = vsel %vm4768_vm12, %v22354_v55, %v22363_v38  ;;  %v20581_v47 = vpack.c.bf16 %v19117_v42, %v19109_v49  ;;  %v26723_v42 = vpop.permute.xlu1 %5398 }
 0x27c   :  { %4571 = vmatprep.mubr.f32.mxu0 %v31662_v7  ;;  %v20539_v31 = vpack.c.bf16 %v4795_v11, %v4788_v35  ;;  %v20549_v9 = vpack.c.bf16 %v4796_v34, %v4789_v2  ;;  %v20573_v55 = vpack.c.bf16 %v19114_v33, %v19106_v51  ;;  %v19125_v35 = vld [vmem:[%s31639_s0 + $0x1b8] sm:$0xff] }
 0x27d   :  { %19079 = vmatmul.mubr.msk.f32.gmra.mrb[26].mxu1 %vm783_vm6, %v26278_v17  ;;  %v26413_v17 = vld [vmem:[%s31642_s3 + $0x100] sm:$0xff]  ;;  %v19133_v11 = vld [vmem:[%s31639_s0 + $0x1f8] sm:$0x7] }
 0x27e   :  { %20534 = vmatpush1.bf16.msra.mxu1 %v20533_v40  ;;  %4654 = vmatprep.mubr.f32.mxu1 %v31662_v7  ;;  %v19131_v40 = vld [vmem:[%s31639_s0 + $0x1e8] sm:$0x7] }
 0x27f   :  { %20544 = vmatprep.subr.bf16.mxu1 %v20543_v10  ;;  %19077 = vmatmul.mubr.msk.f32.gmra.mrb[30].mxu0 %vm783_vm6, %v26326_v63  ;;  %v5350_v10 = vld [vmem:[%s31640_s1] sm:$0xff]  ;;  %v20575_v57 = vpack.c.bf16 %v19131_v40, %v19123_v54 }
 0x280   :  { %4905 = vmatprep.mubr.f32.mxu0 %v31662_v7 }
 0x281   :  { %19080 = vmatmul.mubr.msk.f32.gmra.mrb[28].mxu1 %vm783_vm6, %v26301_v50  ;;  %v4787_v50 = vsel %vm4768_vm12, %v22328_v6, %v22353_v23  ;;  %v19118_v6 = vld [vmem:[%s31639_s0 + $0x180] sm:$0xff]  ;;  %v19108_v23 = vld [vmem:[%s31639_s0 + $0x130] sm:$0xff] }
 0x282   :  { %4660 = vmatprep.mubr.f32.mxu1 %v31662_v7  ;;  %v20541_v3 = vpack.c.bf16 %v4794_v14, %v4787_v50  ;;  %v20558_v12 = vpack.c.bf16 %v19126_v53, %v19118_v6  ;;  %v20583_v41 = vpack.c.bf16 %v19116_v26, %v19108_v23  ;;  %v20585_v50 = vpack.c.bf16 %v19133_v11, %v19125_v35  ;;  %v19124_v14 = vld [vmem:[%s31639_s0 + $0x1b0] sm:$0xff] }
 0x283   :  { %19086 = vmatmul.mubr.msk.f32.vlgmr.msra.gmra.mrb[16].mxu0 %vm783_vm6, %v26413_v17 }
 0x284   :  { %20538 = vmatpush1.bf16.msra.mxu0 %v20537_v5  ;;  %4911 = vmatprep.mubr.f32.mxu0 %v31662_v7 }
 0x285   :  { %19081 = vmatmul.mubr.msk.f32.gmra.mrb[30].mxu1 %vm783_vm6, %v26326_v63  ;;  %20540 = vmatprep.subr.bf16.mxu0 %v20539_v31  ;;  %v20545_v63 = vpack.c.bf16 %v4782_v28, %v4775_v15  ;;  %v19132_v31 = vld [vmem:[%s31639_s0 + $0x1f0] sm:$0x7] }
 0x286   :  { %4994 = vmatprep.mubr.f32.mxu1 %v31662_v7  ;;  %v5352_v28 = vld [vmem:[%s31640_s1 + $0x10] sm:$0xff]  ;;  %v20588_v15 = vpack.c.bf16 %v19132_v31, %v19124_v14  ;;  %s24160_s1 = smov 114  }
 0x287   :  { %19087 = vmatmul.mubr.msk.f32.gmra.mrb[18].mxu0 %vm783_vm6, %v26438_v18 }
 0x288   :  { %20542 = vmatpush1.bf16.msra.mxu0 %v20541_v3  ;;  %4917 = vmatprep.mubr.f32.mxu0 %v31662_v7 }
 0x289   :  { %19090 = vmatmul.mubr.msk.f32.vlgmr.msra.gmra.mrb[16].mxu1 %vm783_vm6, %v26413_v17  ;;  %20552 = vmatprep.subr.bf16.mxu0 %v20551_v22 }
 0x28a   :  { %20546 = vmatpush1.bf16.msra.mxu1 %v20545_v63  ;;  %5000 = vmatprep.mubr.f32.mxu1 %v31662_v7 }
 0x28b   :  { %20548 = vmatprep.subr.bf16.mxu1 %v20547_v13  ;;  %19088 = vmatmul.mubr.msk.f32.gmra.mrb[20].mxu0 %vm783_vm6, %v26463_v58 }
 0x28c   :  { %4923 = vmatprep.mubr.f32.mxu0 %v31662_v7 }
 0x28d   :  { %19091 = vmatmul.mubr.msk.f32.gmra.mrb[18].mxu1 %vm783_vm6, %v26438_v18 }
 0x28e   :  { %20550 = vmatpush1.bf16.msra.mxu1 %v20549_v9  ;;  %5006 = vmatprep.mubr.f32.mxu1 %v31662_v7 }
 0x28f   :  { %20562 = vmatprep.subr.bf16.mxu1 %v20561_v43  ;;  %19089 = vmatmul.mubr.msk.f32.gmra.mrb[22].mxu0 %vm783_vm6, %v26475_v19 }
 0x290   :  { %5083 = vmatprep.mubr.f32.mxu0 %v31662_v7 }
 0x291   :  { %19092 = vmatmul.mubr.msk.f32.gmra.mrb[20].mxu1 %vm783_vm6, %v26463_v58 }
 0x292   :  { %5012 = vmatprep.mubr.f32.mxu1 %v31662_v7 }
 0x293   :  { %19094 = vmatmul.mubr.msk.f32.vlgmr.msra.gmra.mrb[24].mxu0 %vm783_vm6, %v26413_v17 }
 0x294   :  { %5089 = vmatprep.mubr.f32.mxu0 %v31662_v7  ;;  %20554 = vmatpush1.bf16.msra.mxu0 %v20553_v56 }
 0x295   :  { %19093 = vmatmul.mubr.msk.f32.gmra.mrb[22].mxu1 %vm783_vm6, %v26475_v19  ;;  %20557 = vmatprep.subr.msk.bf16.mxu0 %vm24251_vm2, %v20555_v0 }
 0x296   :  { %5172 = vmatprep.mubr.f32.mxu1 %v31662_v7 }
 0x297   :  { %19095 = vmatmul.mubr.msk.f32.gmra.mrb[26].mxu0 %vm783_vm6, %v26438_v18 }
 0x298   :  { %5095 = vmatprep.mubr.f32.mxu0 %v31662_v7  ;;  %20560 = vmatpush1.bf16.msk.msra.mxu0 %vm24251_vm2, %v20558_v12 }
 0x299   :  { %19098 = vmatmul.mubr.msk.f32.vlgmr.msra.gmra.mrb[24].mxu1 %vm783_vm6, %v26413_v17  ;;  %20572 = vmatprep.subr.bf16.mxu0 %v20571_v59  ;;  %v19130_v17 = vld [vmem:[%s31639_s0 + $0x1e0] sm:$0x7]  ;;  %s24132_s0 = smov 84  }
 0x29a   :  { %5178 = vmatprep.mubr.f32.mxu1 %v31662_v7  ;;  %20564 = vmatpush1.bf16.msra.mxu1 %v20563_v29  ;;  %v20578_v5 = vpack.c.bf16 %v19130_v17, %v19122_v24 }
 0x29b   :  { %20567 = vmatprep.subr.msk.bf16.mxu1 %vm24251_vm2, %v20565_v37  ;;  %19096 = vmatmul.mubr.msk.f32.gmra.mrb[28].mxu0 %vm783_vm6, %v26463_v58 }
 0x29c   :  { %5101 = vmatprep.mubr.f32.mxu0 %v31662_v7 }
 0x29d   :  { %19099 = vmatmul.mubr.msk.f32.gmra.mrb[26].mxu1 %vm783_vm6, %v26438_v18 }
 0x29e   :  { %5184 = vmatprep.mubr.f32.mxu1 %v31662_v7  ;;  %20570 = vmatpush1.bf16.msk.msra.mxu1 %vm24251_vm2, %v20568_v4 }
 0x29f   :  { %20582 = vmatprep.subr.bf16.mxu1 %v20581_v47  ;;  %19097 = vmatmul.mubr.msk.f32.gmra.mrb[30].mxu0 %vm783_vm6, %v26475_v19 }
 0x2a0   :  { %5511 = vmatprep.mubr.f32.mxu0 %v31662_v7 }
 0x2a1   :  { %19100 = vmatmul.mubr.msk.f32.gmra.mrb[28].mxu1 %vm783_vm6, %v26463_v58 }
 0x2a2   :  { %5190 = vmatprep.mubr.f32.mxu1 %v31662_v7 }
 0x2a3   :  { %19136 = vmatmul.mubr.msk.f32.vlgmr.msra.gmra.mrb[32].mxu0 %vm126_vm3, %v5350_v10 }
 0x2a4   :  { %5517 = vmatprep.mubr.f32.mxu0 %v31662_v7  ;;  %20574 = vmatpush1.bf16.msra.mxu0 %v20573_v55 }
 0x2a5   :  { %19101 = vmatmul.mubr.msk.f32.gmra.mrb[30].mxu1 %vm783_vm6, %v26475_v19  ;;  %20577 = vmatprep.subr.msk.bf16.mxu0 %vm24251_vm2, %v20575_v57  ;;  %v26729_v57 = vpop.permute.xlu0 %5403 }
 0x2a6   :  { %5600 = vmatprep.mubr.f32.mxu1 %v31662_v7 }
 0x2a7   :  { %19137 = vmatmul.mubr.msk.f32.gmra.mrb[34].mxu0 %vm126_vm3, %v5351_v1 }
 0x2a8   :  { %5523 = vmatprep.mubr.f32.mxu0 %v31662_v7  ;;  %20580 = vmatpush1.bf16.msk.msra.mxu0 %vm24251_vm2, %v20578_v5 }
 0x2a9   :  { %19142 = vmatmul.mubr.msk.f32.vlgmr.msra.gmra.mrb[32].mxu1 %vm126_vm3, %v5350_v10 }
 0x2aa   :  { %5606 = vmatprep.mubr.f32.mxu1 %v31662_v7  ;;  %20584 = vmatpush1.bf16.msra.mxu1 %v20583_v41 }
 0x2ab   :  { %20587 = vmatprep.subr.msk.bf16.mxu1 %vm24251_vm2, %v20585_v50  ;;  %19138 = vmatmul.mubr.msk.f32.gmra.mrb[36].mxu0 %vm126_vm3, %v5352_v28 }
 0x2ac   :  { %5529 = vmatprep.mubr.f32.mxu0 %v31662_v7 }
 0x2ad   :  { %19143 = vmatmul.mubr.msk.f32.gmra.mrb[34].mxu1 %vm126_vm3, %v5351_v1 }
 0x2ae   :  { %5612 = vmatprep.mubr.f32.mxu1 %v31662_v7  ;;  %20590 = vmatpush1.bf16.msk.msra.mxu1 %vm24251_vm2, %v20588_v15  ;;  %vm17627_vm2 = vcmask 277504  }
 0x2af   :  { %19139 = vmatmul.mubr.msk.f32.gmra.mrb[38].mxu0 %vm126_vm3, %v5353_v61 }
 0x2b0   :  { %5689 = vmatprep.mubr.f32.mxu0 %v31662_v7 }
 0x2b1   :  { %19144 = vmatmul.mubr.msk.f32.gmra.mrb[36].mxu1 %vm126_vm3, %v5352_v28 }
 0x2b2   :  { %5618 = vmatprep.mubr.f32.mxu1 %v31662_v7 }
 0x2b3   :  { %19148 = vmatmul.mubr.msk.f32.vlgmr.msra.gmra.mrb[40].mxu0 %vm126_vm3, %v5350_v10 }
 0x2b4   :  { %5695 = vmatprep.mubr.f32.mxu0 %v31662_v7 }
 0x2b5   :  { %19145 = vmatmul.mubr.msk.f32.gmra.mrb[38].mxu1 %vm126_vm3, %v5353_v61 }
 0x2b6   :  { %5778 = vmatprep.mubr.f32.mxu1 %v31662_v7 }
 0x2b7   :  { %19149 = vmatmul.mubr.msk.f32.gmra.mrb[42].mxu0 %vm126_vm3, %v5351_v1 }
 0x2b8   :  { %5701 = vmatprep.mubr.f32.mxu0 %v31662_v7 }
 0x2b9   :  { %19154 = vmatmul.mubr.msk.f32.vlgmr.msra.gmra.mrb[40].mxu1 %vm126_vm3, %v5350_v10 }
 0x2ba   :  { %5784 = vmatprep.mubr.f32.mxu1 %v31662_v7 }
 0x2bb   :  { %19150 = vmatmul.mubr.msk.f32.gmra.mrb[44].mxu0 %vm126_vm3, %v5352_v28 }
 0x2bc   :  { %5707 = vmatprep.mubr.f32.mxu0 %v31662_v7 }
 0x2bd   :  { %19155 = vmatmul.mubr.msk.f32.gmra.mrb[42].mxu1 %vm126_vm3, %v5351_v1 }
 0x2be   :  { %5790 = vmatprep.mubr.f32.mxu1 %v31662_v7 }
 0x2bf   :  { %19151 = vmatmul.mubr.msk.f32.gmra.mrb[46].mxu0 %vm126_vm3, %v5353_v61 }
 0x2c0   :  { %6139 = vmatprep.mubr.f32.mxu0 %v31662_v7 }
 0x2c1   :  { %19156 = vmatmul.mubr.msk.f32.gmra.mrb[44].mxu1 %vm126_vm3, %v5352_v28 }
 0x2c2   :  { %5796 = vmatprep.mubr.f32.mxu1 %v31662_v7 }
 0x2c5   :  { %19157 = vmatmul.mubr.msk.f32.gmra.mrb[46].mxu1 %vm126_vm3, %v5353_v61  ;;  %vm17693_vm3 = vcmask 97280  }
 0x2c6   :  { %6228 = vmatprep.mubr.f32.mxu1 %v31662_v7 }
 0x356   :  { %v26655_v16 = vpop.f32.mrb[16].mxu0 }
 0x357   :  { %31715 = vst [vmem:[#allocation8_spill] sm:$0xff] %v26655_v16  ;;  %v26657_v38 = vpop.f32.mrb[17].mxu0 }
 0x358   :  { %31716 = vst [vmem:[#allocation9_spill] sm:$0xff] %v26657_v38 }
 0x35a   :  { %v26659_v18 = vpop.f32.mrb[18].mxu0 }
 0x35b   :  { %31717 = vst [vmem:[#allocation10_spill] sm:$0xff] %v26659_v18  ;;  %v26661_v36 = vpop.f32.mrb[19].mxu0 }
 0x35c   :  { %31718 = vst [vmem:[#allocation11_spill] sm:$0xff] %v26661_v36  ;;  %v26663_v8 = vpop.f32.mrb[16].mxu1 }
 0x35d   :  { %31719 = vst [vmem:[#allocation12_spill] sm:$0xff] %v26663_v8  ;;  %v26665_v3 = vpop.f32.mrb[17].mxu1 }
 0x35e   :  { %31720 = vst [vmem:[#allocation13_spill] sm:$0xff] %v26665_v3  ;;  %v26667_v63 = vpop.f32.mrb[20].mxu0 }
 0x35f   :  { %31721 = vst [vmem:[#allocation14_spill] sm:$0xff] %v26667_v63  ;;  %v26669_v22 = vpop.f32.mrb[21].mxu0 }
 0x360   :  { %31722 = vst [vmem:[#allocation15_spill] sm:$0xff] %v26669_v22  ;;  %v26671_v46 = vpop.f32.mrb[18].mxu1 }
 0x361   :  { %31723 = vst [vmem:[#allocation16_spill] sm:$0xff] %v26671_v46  ;;  %v26673_v21 = vpop.f32.mrb[19].mxu1 }
 0x362   :  { %31724 = vst [vmem:[#allocation17_spill] sm:$0xff] %v26673_v21  ;;  %v26675_v2 = vpop.f32.mrb[22].mxu0 }
 0x363   :  { %31725 = vst [vmem:[#allocation18_spill] sm:$0xff] %v26675_v2  ;;  %v26677_v34 = vpop.f32.mrb[23].mxu0 }
 0x364   :  { %31726 = vst [vmem:[#allocation19_spill] sm:$0xff] %v26677_v34  ;;  %v26679_v13 = vpop.f32.mrb[20].mxu1 }
 0x365   :  { %31727 = vst [vmem:[#allocation20_spill] sm:$0xff] %v26679_v13  ;;  %v26681_v58 = vpop.f32.mrb[21].mxu1 }
 0x366   :  { %31728 = vst [vmem:[#allocation21_spill] sm:$0xff] %v26681_v58  ;;  %v26683_v43 = vpop.f32.mrb[24].mxu0 }
 0x367   :  { %31729 = vst [vmem:[#allocation22_spill] sm:$0xff] %v26683_v43  ;;  %v26687_v19 = vpop.f32.mrb[25].mxu0 }
 0x368   :  { %v26685_v9 = vpop.f32.mrb[22].mxu1  ;;  %31731 = vst [vmem:[#allocation24_spill] sm:$0xff] %v26687_v19 }
 0x369   :  { %31730 = vst [vmem:[#allocation23_spill] sm:$0xff] %v26685_v9  ;;  %v26689_v45 = vpop.f32.mrb[23].mxu1 }
 0x36a   :  { %31732 = vst [vmem:[#allocation25_spill] sm:$0xff] %v26689_v45  ;;  %v26691_v27 = vpop.f32.mrb[26].mxu0 }
 0x36b   :  { %31733 = vst [vmem:[#allocation26_spill] sm:$0xff] %v26691_v27  ;;  %v26693_v44 = vpop.f32.mrb[27].mxu0 }
 0x36c   :  { %31734 = vst [vmem:[#allocation27_spill] sm:$0xff] %v26693_v44  ;;  %v26695_v20 = vpop.f32.mrb[24].mxu1 }
 0x36d   :  { %31735 = vst [vmem:[#allocation28_spill] sm:$0xff] %v26695_v20  ;;  %v26697_v56 = vpop.f32.mrb[25].mxu1 }
 0x36e   :  { %31736 = vst [vmem:[#allocation29_spill] sm:$0xff] %v26697_v56  ;;  %v26699_v25 = vpop.f32.mrb[28].mxu0 }
 0x36f   :  { %31737 = vst [vmem:[#allocation30_spill] sm:$0xff] %v26699_v25  ;;  %v26701_v48 = vpop.f32.mrb[29].mxu0 }
 0x370   :  { %31738 = vst [vmem:[#allocation31_spill] sm:$0xff] %v26701_v48  ;;  %v26703_v0 = vpop.f32.mrb[26].mxu1 }
 0x371   :  { %31739 = vst [vmem:[#allocation32_spill] sm:$0xff] %v26703_v0  ;;  %v26705_v6 = vpop.f32.mrb[27].mxu1  ;;  %v31763_v0 = vmov 0.0  }
 0x372   :  { %31740 = vst [vmem:[#allocation33_spill] sm:$0xff] %v26705_v6  ;;  %v26707_v53 = vpop.f32.mrb[30].mxu0 }
 0x373   :  { %31741 = vst [vmem:[#allocation34_spill] sm:$0xff] %v26707_v53  ;;  %v26709_v60 = vpop.f32.mrb[31].mxu0 }
 0x374   :  { %31742 = vst [vmem:[#allocation35_spill] sm:$0xff] %v26709_v60  ;;  %v26711_v52 = vpop.f32.mrb[28].mxu1 }
 0x375   :  { %31743 = vst [vmem:[#allocation36_spill] sm:$0xff] %v26711_v52  ;;  %v26713_v62 = vpop.f32.mrb[29].mxu1 }
 0x376   :  { %31744 = vst [vmem:[#allocation37_spill] sm:$0xff] %v26713_v62  ;;  %v5513_v29 = vpop.f32.mrb[32].mxu0 }
 0x377   :  { %v5514_v12 = vadd.f32 %v5513_v29, %v26715_v30  ;;  %v5515_v32 = vpop.f32.mrb[33].mxu0 }
 0x378   :  { %v26718_v37 = vpop.f32.mrb[30].mxu1  ;;  %v5516_v39 = vadd.f32 %v5515_v32, %v26715_v30 }
 0x379   :  { %31745 = vst [vmem:[#allocation38_spill] sm:$0xff] %v26718_v37  ;;  %v26721_v59 = vpop.f32.mrb[31].mxu1  ;;  %v5803_v49 = vmax.f32 %v5514_v12, 0.0 }
 0x37a   :  { %31746 = vst [vmem:[#allocation39_spill] sm:$0xff] %v26721_v59  ;;  %v5804_v4 = vmax.f32 %v5516_v39, 0.0  ;;  %v5519_v47 = vpop.f32.mrb[34].mxu0  ;;  %v26747_v39 = vpop.permute.xlu1 %5408 }
 0x37b   :  { %v5520_v51 = vadd.f32 %v5519_v47, %v26723_v42  ;;  %v5521_v33 = vpop.f32.mrb[35].mxu0 }
 0x37c   :  { %v5602_v54 = vpop.f32.mrb[32].mxu1  ;;  %v5522_v40 = vadd.f32 %v5521_v33, %v26723_v42 }
 0x37d   :  { %v5603_v10 = vadd.f32 %v5602_v54, %v26715_v30  ;;  %v5604_v55 = vpop.f32.mrb[33].mxu1  ;;  %v5811_v23 = vmax.f32 %v5520_v51, 0.0 }
 0x37e   :  { %v5605_v26 = vadd.f32 %v5604_v55, %v26715_v30  ;;  %v5812_v24 = vmax.f32 %v5522_v40, 0.0  ;;  %v5525_v35 = vpop.f32.mrb[36].mxu0 }
 0x37f   :  { %v5805_v17 = vmax.f32 %v5603_v10, 0.0  ;;  %v5526_v1 = vadd.f32 %v5525_v35, %v26729_v57  ;;  %v5527_v41 = vpop.f32.mrb[37].mxu0  ;;  %v26734_v50 = vpack.i.bf16 %v5811_v23, %v5803_v49  ;;  %v26736_v14 = vpack.c.bf16 %v5811_v23, %v5803_v49 }
 0x380   :  { %v26731_v11 = vmax.f32 %v5605_v26, 0.0  ;;  %v5608_v5 = vpop.f32.mrb[34].mxu1  ;;  %v5528_v31 = vadd.f32 %v5527_v41, %v26729_v57  ;;  %v26742_v29 = vpack.c.bf16 %v5812_v24, %v5804_v4 }
 0x381   :  { %v5609_v28 = vadd.f32 %v5608_v5, %v26723_v42  ;;  %v5610_v15 = vpop.f32.mrb[35].mxu1  ;;  %v26740_v61 = vpack.i.bf16 %v5805_v17, %v5804_v4  ;;  %v5819_v12 = vmax.f32 %v5526_v1, 0.0  ;;  %22366 = vrot.lane.b32.xlu0 %v26734_v50, %s24121_s26 }
 0x382   :  { %31747 = vst [vmem:[#allocation40_spill] sm:$0xff] %v26731_v11  ;;  %v5611_v32 = vadd.f32 %v5610_v15, %v26723_v42  ;;  %v5820_v47 = vmax.f32 %v5528_v31, 0.0  ;;  %v5531_v51 = vpop.f32.mrb[38].mxu0 }
 0x383   :  { %v5813_v49 = vmax.f32 %v5609_v28, 0.0  ;;  %v5532_v54 = vadd.f32 %v5531_v51, %v26747_v39  ;;  %v5533_v40 = vpop.f32.mrb[39].mxu0 }
 0x384   :  { %v26749_v33 = vmax.f32 %v5611_v32, 0.0  ;;  %v5614_v10 = vpop.f32.mrb[36].mxu1  ;;  %v5534_v4 = vadd.f32 %v5533_v40, %v26747_v39 }
 0x385   :  { %v5615_v55 = vadd.f32 %v5614_v10, %v26729_v57  ;;  %v5616_v23 = vpop.f32.mrb[37].mxu1  ;;  %v26754_v26 = vpack.i.bf16 %v5813_v49, %v5812_v24  ;;  %v26756_v35 = vpack.c.bf16 %v5813_v49, %v5805_v17  ;;  %v5827_v1 = vmax.f32 %v5532_v54, 0.0  ;;  %22371 = vrot.lane.b32.xlu0 %v26740_v61, %s24121_s26 }
 0x386   :  { %31748 = vst [vmem:[#allocation41_spill] sm:$0xff] %v26749_v33  ;;  %v5617_v41 = vadd.f32 %v5616_v23, %v26729_v57  ;;  %v26763_v5 = vpack.i.bf16 %v26749_v33, %v26731_v11  ;;  %v5828_v28 = vmax.f32 %v5534_v4, 0.0  ;;  %v5691_v32 = vpop.f32.mrb[40].mxu0 }
 0x387   :  { %v5821_v15 = vmax.f32 %v5615_v55, 0.0  ;;  %22376 = vrot.lane.b32.xlu1 %v26754_v26, %s24121_s26  ;;  %v5692_v17 = vadd.f32 %v5691_v32, %v26715_v30  ;;  %v5693_v51 = vpop.f32.mrb[41].mxu0  ;;  %v26772_v54 = vpack.i.bf16 %v5827_v1, %v5819_v12  ;;  %v26774_v40 = vpack.c.bf16 %v5827_v1, %v5819_v12 }
 0x388   :  { %v26769_v24 = vmax.f32 %v5617_v41, 0.0  ;;  %v5620_v49 = vpop.f32.mrb[38].mxu1  ;;  %v5694_v23 = vadd.f32 %v5693_v51, %v26715_v30  ;;  %v26780_v31 = vpack.c.bf16 %v5828_v28, %v5820_v47 }
 0x389   :  { %v5621_v10 = vadd.f32 %v5620_v49, %v26747_v39  ;;  %v5622_v4 = vpop.f32.mrb[39].mxu1  ;;  %v26778_v55 = vpack.i.bf16 %v5821_v15, %v5820_v47  ;;  %v26782_v7 = vmax.f32 %v5692_v17, 0.0 }
 0x38a   :  { %31749 = vst [vmem:[#allocation42_spill] sm:$0xff] %v26769_v24  ;;  %v5623_v41 = vadd.f32 %v5622_v4, %v26747_v39  ;;  %v5808_v62 = vmax.f32 %v5694_v23, 0.0  ;;  %v5697_v52 = vpop.f32.mrb[42].mxu0 }
 0x38b   :  { %31750 = vst [vmem:[#allocation43_spill] sm:$0xff] %v26782_v7  ;;  %v5829_v32 = vmax.f32 %v5621_v10, 0.0  ;;  %22381 = vrot.lane.b32.xlu1 %v26778_v55, %s24121_s26  ;;  %v5698_v1 = vadd.f32 %v5697_v52, %v26723_v42  ;;  %v5699_v49 = vpop.f32.mrb[43].mxu0 }
 0x38c   :  { %v26787_v12 = vmax.f32 %v5623_v41, 0.0  ;;  %v5780_v51 = vpop.f32.mrb[40].mxu1  ;;  %v5700_v17 = vadd.f32 %v5699_v49, %v26723_v42 }
 0x38d   :  { %v5781_v48 = vadd.f32 %v5780_v51, %v26715_v30  ;;  %v5782_v4 = vpop.f32.mrb[41].mxu1  ;;  %v26794_v10 = vpack.i.bf16 %v5829_v32, %v5828_v28  ;;  %v26796_v23 = vpack.c.bf16 %v5829_v32, %v5821_v15  ;;  %v26798_v25 = vmax.f32 %v5698_v1, 0.0 }
 0x38e   :  { %31751 = vst [vmem:[#allocation44_spill] sm:$0xff] %v26787_v12  ;;  %v5783_v41 = vadd.f32 %v5782_v4, %v26715_v30  ;;  %v26803_v52 = vpack.i.bf16 %v26787_v12, %v26769_v24  ;;  %v5816_v58 = vmax.f32 %v5700_v17, 0.0  ;;  %v5703_v13 = vpop.f32.mrb[44].mxu0 }
 0x38f   :  { %v5809_v49 = vmax.f32 %v5781_v48, 0.0  ;;  %22391 = vrot.lane.b32.xlu1 %v26772_v54, %s24121_s26  ;;  %22386 = vrot.lane.b32.xlu0 %v26794_v10, %s24121_s26  ;;  %v5704_v15 = vadd.f32 %v5703_v13, %v26729_v57  ;;  %v5705_v30 = vpop.f32.mrb[45].mxu0  ;;  %v26814_v1 = vpack.i.bf16 %v26798_v25, %v26782_v7 }
 0x390   :  { %v5810_v28 = vmax.f32 %v5783_v41, 0.0  ;;  %v5786_v32 = vpop.f32.mrb[42].mxu1  ;;  %v5706_v48 = vadd.f32 %v5705_v30, %v26729_v57  ;;  %v26822_v22 = vpack.c.bf16 %v5816_v58, %v5808_v62 }
 0x391   :  { %v5787_v17 = vadd.f32 %v5786_v32, %v26723_v42  ;;  %v5788_v4 = vpop.f32.mrb[43].mxu1  ;;  %v26820_v47 = vpack.i.bf16 %v5809_v49, %v5808_v62  ;;  %v26825_v13 = vmax.f32 %v5704_v15, 0.0 }
 0x392   :  { %5842 = vst.msk [vmem:[#allocation2 + $0x38] sm:$0xff] %vm559_vm4, %v5810_v28  ;;  %v5789_v41 = vadd.f32 %v5788_v4, %v26723_v42  ;;  %v5824_v59 = vmax.f32 %v5706_v48, 0.0  ;;  %v5709_v37 = vpop.f32.mrb[46].mxu0 }
 0x393   :  { %31752 = vst [vmem:[#allocation45_spill] sm:$0xff] %v26820_v47  ;;  %31753 = vst [vmem:[#allocation46_spill] sm:$0xff] %v26825_v13  ;;  %v5817_v51 = vmax.f32 %v5787_v17, 0.0  ;;  %22396 = vrot.lane.b32.xlu0 %v26814_v1, %s24121_s26  ;;  %v5710_v32 = vadd.f32 %v5709_v37, %v26747_v39  ;;  %v5711_v62 = vpop.f32.mrb[47].mxu0 }
 0x394   :  { %v5818_v30 = vmax.f32 %v5789_v41, 0.0  ;;  %v5792_v60 = vpop.f32.mrb[44].mxu1  ;;  %v5712_v15 = vadd.f32 %v5711_v62, %v26747_v39 }
 0x395   :  { %v5793_v42 = vadd.f32 %v5792_v60, %v26729_v57  ;;  %v5794_v4 = vpop.f32.mrb[45].mxu1  ;;  %v26837_v63 = vpack.i.bf16 %v5817_v51, %v5816_v58  ;;  %v26839_v48 = vpack.c.bf16 %v5817_v51, %v5809_v49  ;;  %v26842_v17 = vmax.f32 %v5710_v32, 0.0 }
 0x396   :  { %5850 = vst.msk [vmem:[#allocation2 + $0x78] sm:$0xff] %vm559_vm4, %v5818_v30  ;;  %v5795_v37 = vadd.f32 %v5794_v4, %v26729_v57  ;;  %v5832_v41 = vmax.f32 %v5712_v15, 0.0 }
 0x397   :  { %31754 = vst [vmem:[#allocation47_spill] sm:$0xff] %v26837_v63  ;;  %31755 = vst [vmem:[#allocation48_spill] sm:$0xff] %v26839_v48  ;;  %v5825_v53 = vmax.f32 %v5793_v42, 0.0  ;;  %22406 = vrot.lane.b32.xlu1 %v26837_v63, %s24121_s26  ;;  %22401 = vrot.lane.b32.xlu0 %v26820_v47, %s24121_s26  ;;  %v26851_v58 = vpack.i.bf16 %v26842_v17, %v26825_v13 }
 0x398   :  { %31756 = vst [vmem:[#allocation49_spill] sm:$0xff] %v26842_v17  ;;  %v5826_v60 = vmax.f32 %v5795_v37, 0.0  ;;  %v5798_v62 = vpop.f32.mrb[46].mxu1  ;;  %v26858_v32 = vpack.c.bf16 %v5832_v41, %v5824_v59 }
 0x399   :  { %v5799_v51 = vadd.f32 %v5798_v62, %v26747_v39  ;;  %v5800_v57 = vpop.f32.mrb[47].mxu1  ;;  %v26856_v30 = vpack.i.bf16 %v5825_v53, %v5824_v59  ;;  %v26868_v62 = vld [vmem:[#allocation2 + $0x38] sm:$0xff] }
 0x39a   :  { %5858 = vst.msk [vmem:[#allocation2 + $0xb8] sm:$0xff] %vm559_vm4, %v5826_v60  ;;  %v5801_v15 = vadd.f32 %v5800_v57, %v26747_v39  ;;  %31759 = vst [vmem:[#allocation52_spill] sm:$0xff] %v26868_v62 }
 0x39b   :  { %31757 = vst [vmem:[#allocation50_spill] sm:$0xff] %v26856_v30  ;;  %v5833_v4 = vmax.f32 %v5799_v51, 0.0  ;;  %22411 = vrot.lane.b32.xlu1 %v26856_v30, %s24121_s26 }
 0x39c   :  { %v5834_v37 = vmax.f32 %v5801_v15, 0.0 }
 0x39d   :  { %v26866_v28 = vpack.i.bf16 %v5833_v4, %v5832_v41  ;;  %v26870_v49 = vld [vmem:[#allocation2 + $0x78] sm:$0xff]  ;;  %v26872_v59 = vpack.c.bf16 %v5833_v4, %v5825_v53 }
 0x39e   :  { %5866 = vst.msk [vmem:[#allocation2 + $0xf8] sm:$0xff] %vm559_vm4, %v5834_v37  ;;  %v26877_v39 = vpack.i.bf16 %v26870_v49, %v26868_v62 }
 0x39f   :  { %31758 = vst [vmem:[#allocation51_spill] sm:$0xff] %v26866_v28  ;;  %31760 = vst [vmem:[#allocation53_spill] sm:$0xff] %v26872_v59  ;;  %22421 = vrot.lane.b32.xlu1 %v26851_v58, %s24121_s26  ;;  %22416 = vrot.lane.b32.xlu0 %v26866_v28, %s24121_s26  ;;  %v27110_v59 = vld [vmem:[%s31642_s3 + $0x38] sm:$0xff] }
 0x3a1   :  { %v26889_v53 = vld [vmem:[#allocation2 + $0xb8] sm:$0xff] }
 0x3a2   :  { %31761 = vst [vmem:[#allocation54_spill] sm:$0xff] %v26889_v53 }
 0x3a3   :  { %22431 = vrot.lane.b32.xlu1 %v26740_v61, %s24122_s27  ;;  %22426 = vrot.lane.b32.xlu0 %v26763_v5, %s24121_s26 }
 0x3a5   :  { %v26891_v60 = vld [vmem:[#allocation2 + $0xf8] sm:$0xff] }
 0x3a6   :  { %31762 = vst [vmem:[#allocation55_spill] sm:$0xff] %v26891_v60  ;;  %v26895_v51 = vpack.i.bf16 %v26891_v60, %v26889_v53 }
 0x3a7   :  { %22441 = vrot.lane.b32.xlu1 %v26734_v50, %s24122_s27  ;;  %22436 = vrot.lane.b32.xlu0 %v26754_v26, %s24122_s27 }
 0x3ab   :  { %22451 = vrot.lane.b32.xlu1 %v26778_v55, %s24122_s27  ;;  %22446 = vrot.lane.b32.xlu0 %v26803_v52, %s24121_s26 }
 0x3af   :  { %22461 = vrot.lane.b32.xlu1 %v26772_v54, %s24122_s27  ;;  %22456 = vrot.lane.b32.xlu0 %v26794_v10, %s24122_s27 }
 0x3b3   :  { %22471 = vrot.lane.b32.xlu1 %v26837_v63, %s24122_s27  ;;  %22466 = vrot.lane.b32.xlu0 %v26820_v47, %s24122_s27 }
 0x3b7   :  { %22481 = vrot.lane.b32.xlu1 %v26814_v1, %s24122_s27  ;;  %22476 = vrot.lane.b32.xlu0 %v26877_v39, %s24121_s26 }
 0x3bb   :  { %22491 = vrot.lane.b32.xlu1 %v26866_v28, %s24122_s27  ;;  %22486 = vrot.lane.b32.xlu0 %v26856_v30, %s24122_s27 }
 0x3bf   :  { %22501 = vrot.lane.b32.xlu1 %v26851_v58, %s24122_s27  ;;  %22496 = vrot.lane.b32.xlu0 %v26895_v51, %s24121_s26  ;;  %s24139_s26 = smov 62  }
 0x3c3   :  { %22511 = vrot.lane.b32.xlu1 %v26754_v26, %s24123_s28  ;;  %22506 = vrot.lane.b32.xlu0 %v26740_v61, %s24123_s28 }
 0x3c7   :  { %22521 = vrot.lane.b32.xlu1 %v26778_v55, %s24123_s28  ;;  %22516 = vrot.lane.b32.xlu0 %v26734_v50, %s24123_s28 }
 0x3cb   :  { %22531 = vrot.lane.b32.xlu1 %v26772_v54, %s24123_s28  ;;  %22526 = vrot.lane.b32.xlu0 %v26794_v10, %s24123_s28 }
 0x3cf   :  { %22541 = vrot.lane.b32.xlu1 %v26837_v63, %s24123_s28  ;;  %22536 = vrot.lane.b32.xlu0 %v26820_v47, %s24123_s28 }
 0x3d3   :  { %22551 = vrot.lane.b32.xlu1 %v26856_v30, %s24123_s28  ;;  %22546 = vrot.lane.b32.xlu0 %v26814_v1, %s24123_s28 }
 0x3d7   :  { %22561 = vrot.lane.b32.xlu1 %v26851_v58, %s24123_s28  ;;  %22556 = vrot.lane.b32.xlu0 %v26866_v28, %s24123_s28 }
 0x3db   :  { %22571 = vrot.lane.b32.xlu1 %v26740_v61, %s24124_s29  ;;  %22566 = vrot.lane.b32.xlu0 %v26763_v5, %s24122_s27 }
 0x3df   :  { %22581 = vrot.lane.b32.xlu1 %v26734_v50, %s24124_s29  ;;  %22576 = vrot.lane.b32.xlu0 %v26754_v26, %s24124_s29 }
 0x3e3   :  { %22591 = vrot.lane.b32.xlu1 %v26778_v55, %s24124_s29  ;;  %22586 = vrot.lane.b32.xlu0 %v26803_v52, %s24122_s27 }
 0x3e7   :  { %22601 = vrot.lane.b32.xlu1 %v26772_v54, %s24124_s29  ;;  %22596 = vrot.lane.b32.xlu0 %v26794_v10, %s24124_s29 }
 0x3eb   :  { %22611 = vrot.lane.b32.xlu1 %v26837_v63, %s24124_s29  ;;  %22606 = vrot.lane.b32.xlu0 %v26820_v47, %s24124_s29 }
 0x3ef   :  { %22621 = vrot.lane.b32.xlu1 %v26814_v1, %s24124_s29  ;;  %22616 = vrot.lane.b32.xlu0 %v26877_v39, %s24122_s27 }
 0x3f3   :  { %22631 = vrot.lane.b32.xlu1 %v26866_v28, %s24124_s29  ;;  %22626 = vrot.lane.b32.xlu0 %v26856_v30, %s24124_s29  ;;  %v22367_v15 = vpop.permute.xlu0 %22366 }
 0x3f4   :  { %v22368_v37 = vunpack.i.l.bf16 %v22367_v15  ;;  %v22369_v45 = vunpack.i.h.bf16 %v22367_v15 }
 0x3f7   :  { %22636 = vrot.lane.b32.xlu1 %v26851_v58, %s24124_s29  ;;  %22641 = vrot.lane.b32.xlu0 %v26895_v51, %s24122_s27  ;;  %v26983_v4 = vpop.permute.xlu0 %22371 }
 0x3f8   :  { %v31664_v42 = vunpack.i.h.bf16 %v26983_v4  ;;  %v22373_v57 = vunpack.i.l.bf16 %v26983_v4 }
 0x3f9   :  { %v26987_v41 = vpop.permute.xlu1 %22376 }
 0x3fa   :  { %v31665_v9 = vunpack.i.h.bf16 %v26987_v41  ;;  %v22378_v34 = vunpack.i.l.bf16 %v26987_v41  ;;  %v6003_v2 = vsel %vm722_vm5, %v22368_v37, %v22373_v57  ;;  %v6004_v56 = vsel %vm722_vm5, %v22373_v57, %v31664_v42 }
 0x3fb   :  { %22651 = vrot.lane.b32.xlu1 %v26740_v61, %s24125_s30  ;;  %22646 = vrot.lane.b32.xlu0 %v26763_v5, %s24123_s28 }
 0x3fc   :  { %v6010_v20 = vsel %vm722_vm5, %v22369_v45, %v22378_v34  ;;  %v6011_v15 = vsel %vm722_vm5, %v22378_v34, %v31665_v9 }
 0x3fd   :  { %v27003_v19 = vpop.permute.xlu1 %22381  ;;  %v20591_v43 = vpack.c.bf16 %v6011_v15, %v6004_v56  ;;  %v20593_v37 = vpack.c.bf16 %v6010_v20, %v6003_v2 }
 0x3fe   :  { %v31666_v3 = vunpack.i.h.bf16 %v27003_v19  ;;  %v22383_v57 = vunpack.i.l.bf16 %v27003_v19 }
 0x3ff   :  { %22661 = vrot.lane.b32.xlu1 %v26734_v50, %s24125_s30  ;;  %22656 = vrot.lane.b32.xlu0 %v26754_v26, %s24125_s30 }
 0x400   :  { %20592 = vmatprep.subr.bf16.mxu0 %v20591_v43  ;;  %v6018_v15 = vsel %vm722_vm5, %v22383_v57, %v31666_v3 }
 0x401   :  { %20594 = vmatpush1.bf16.msra.mxu0 %v20593_v37  ;;  %v22392_v45 = vpop.permute.xlu1 %22391  ;;  %v27011_v42 = vpop.permute.xlu0 %22386 }
 0x402   :  { %v22394_v34 = vunpack.i.h.bf16 %v22392_v45  ;;  %v22393_v9 = vunpack.i.l.bf16 %v22392_v45  ;;  %v31667_v56 = vunpack.i.h.bf16 %v27011_v42  ;;  %v22388_v2 = vunpack.i.l.bf16 %v27011_v42 }
 0x403   :  { %22671 = vrot.lane.b32.xlu1 %v26778_v55, %s24125_s30  ;;  %22666 = vrot.lane.b32.xlu0 %v26803_v52, %s24123_s28 }
 0x404   :  { %v6017_v20 = vsel %vm722_vm5, %v22393_v9, %v22383_v57  ;;  %v6024_v43 = vsel %vm722_vm5, %v22394_v34, %v22388_v2  ;;  %v6025_v37 = vsel %vm722_vm5, %v22388_v2, %v31667_v56  ;;  %v27042_v2 = vld [vmem:[%s31642_s3 + $0x20] sm:$0xff] }
 0x405   :  { %v27027_v45 = vpop.permute.xlu0 %22396  ;;  %v20595_v8 = vpack.c.bf16 %v6025_v37, %v6018_v15  ;;  %v20597_v38 = vpack.c.bf16 %v6024_v43, %v6017_v20 }
 0x406   :  { %v31668_v9 = vunpack.i.h.bf16 %v27027_v45  ;;  %v22398_v34 = vunpack.i.l.bf16 %v27027_v45 }
 0x407   :  { %22681 = vrot.lane.b32.xlu1 %v26772_v54, %s24125_s30  ;;  %22676 = vrot.lane.b32.xlu0 %v26794_v10, %s24125_s30 }
 0x408   :  { %20596 = vmatprep.subr.bf16.mxu0 %v20595_v8 }
 0x409   :  { %20598 = vmatpush1.bf16.msra.mxu0 %v20597_v38  ;;  %v27035_v57 = vpop.permute.xlu1 %22406  ;;  %v27037_v3 = vpop.permute.xlu0 %22401 }
 0x40a   :  { %v31670_v20 = vunpack.i.h.bf16 %v27035_v57  ;;  %v22408_v43 = vunpack.i.l.bf16 %v27035_v57  ;;  %v31669_v8 = vunpack.i.h.bf16 %v27037_v3  ;;  %v22403_v15 = vunpack.i.l.bf16 %v27037_v3 }
 0x40b   :  { %22691 = vrot.lane.b32.xlu1 %v26837_v63, %s24125_s30  ;;  %22686 = vrot.lane.b32.xlu0 %v26820_v47, %s24125_s30 }
 0x40c   :  { %v6014_v38 = vsel %vm722_vm5, %v31668_v9, %v22408_v43  ;;  %v6007_v37 = vsel %vm722_vm5, %v22398_v34, %v22403_v15  ;;  %19162 = vmatmul.mubr.msk.f32.vlgmr.msra.gmra.mrb[48].mxu0 %vm783_vm6, %v27042_v2  ;;  %v6008_v56 = vsel %vm722_vm5, %v22403_v15, %v31669_v8  ;;  %v6015_v16 = vsel %vm722_vm5, %v22408_v43, %v31670_v20  ;;  %v27070_v9 = vld [vmem:[%s31642_s3 + $0x28] sm:$0xff] }
 0x40d   :  { %v27064_v6 = vpop.permute.xlu1 %22411  ;;  %6145 = vmatprep.mubr.f32.mxu0 %v31763_v0  ;;  %v20607_v44 = vpack.c.bf16 %v6015_v16, %v6008_v56  ;;  %v20609_v27 = vpack.c.bf16 %v6014_v38, %v6007_v37  ;;  %v27086_v16 = vld [vmem:[%s31642_s3 + $0x30] sm:$0xff] }
 0x40e   :  { %v22413_v43 = vunpack.i.l.bf16 %v27064_v6  ;;  %v31764_v21 = vunpack.i.h.bf16 %v27064_v6 }
 0x40f   :  { %22701 = vrot.lane.b32.xlu1 %v26814_v1, %s24125_s30  ;;  %22696 = vrot.lane.b32.xlu0 %v26877_v39, %s24123_s28 }
 0x410   :  { %19163 = vmatmul.mubr.msk.f32.gmra.mrb[50].mxu0 %vm783_vm6, %v27070_v9  ;;  %20608 = vmatprep.subr.bf16.mxu0 %v20607_v44 }
 0x411   :  { %20610 = vmatpush1.bf16.msra.mxu0 %v20609_v27  ;;  %v22422_v8 = vpop.permute.xlu1 %22421  ;;  %v27080_v20 = vpop.permute.xlu0 %22416  ;;  %6151 = vmatprep.mubr.f32.mxu0 %v31763_v0 }
 0x412   :  { %v22424_v56 = vunpack.i.h.bf16 %v22422_v8  ;;  %v22423_v38 = vunpack.i.l.bf16 %v22422_v8  ;;  %v31674_v37 = vunpack.i.h.bf16 %v27080_v20  ;;  %v22418_v15 = vunpack.i.l.bf16 %v27080_v20 }
 0x413   :  { %22711 = vrot.lane.b32.xlu1 %v26866_v28, %s24125_s30  ;;  %22706 = vrot.lane.b32.xlu0 %v26856_v30, %s24125_s30  ;;  %v6022_v8 = vsel %vm722_vm5, %v22413_v43, %v31764_v21  ;;  %v31765_v21 = vunpack.i.h.bf16 %v26987_v41  ;;  %v31767_v41 = vunpack.i.h.bf16 %v27027_v45  ;;  %v31768_v45 = vunpack.i.h.bf16 %v27003_v19 }
 0x414   :  { %v6021_v27 = vsel %vm722_vm5, %v22423_v38, %v22413_v43  ;;  %v6028_v44 = vsel %vm722_vm5, %v22424_v56, %v22418_v15  ;;  %19164 = vmatmul.mubr.msk.f32.gmra.mrb[52].mxu0 %vm783_vm6, %v27086_v16  ;;  %v6029_v46 = vsel %vm722_vm5, %v22418_v15, %v31674_v37  ;;  %v31766_v43 = vunpack.i.h.bf16 %v26983_v4 }
 0x415   :  { %v27104_v36 = vpop.permute.xlu1 %22431  ;;  %v22427_v18 = vpop.permute.xlu0 %22426  ;;  %6157 = vmatprep.mubr.f32.mxu0 %v31763_v0  ;;  %v20611_v53 = vpack.c.bf16 %v6029_v46, %v6022_v8  ;;  %v20613_v60 = vpack.c.bf16 %v6028_v44, %v6021_v27 }
 0x416   :  { %v22429_v48 = vunpack.i.h.bf16 %v22427_v18  ;;  %v22428_v62 = vunpack.i.l.bf16 %v22427_v18 }
 0x417   :  { %22716 = vrot.lane.b32.xlu1 %v26851_v58, %s24125_s30  ;;  %22721 = vrot.lane.b32.xlu0 %v26895_v51, %s24123_s28 }
 0x418   :  { %v6012_v15 = vsel %vm722_vm5, %v31765_v21, %v22429_v48  ;;  %v6005_v37 = vsel %vm722_vm5, %v31766_v43, %v22428_v62  ;;  %19165 = vmatmul.mubr.msk.f32.gmra.mrb[54].mxu0 %vm783_vm6, %v27110_v59  ;;  %20612 = vmatprep.subr.bf16.mxu0 %v20611_v53  ;;  %v6006_v18 = vsel %vm722_vm5, %v22428_v62, %v22398_v34 }
 0x419   :  { %20614 = vmatpush1.bf16.msra.mxu0 %v20613_v60  ;;  %v27125_v46 = vpop.permute.xlu1 %22441  ;;  %v27127_v27 = vpop.permute.xlu0 %22436  ;;  %6317 = vmatprep.mubr.f32.mxu0 %v31763_v0  ;;  %v6013_v44 = vsel %vm722_vm5, %v22429_v48, %v31767_v41  ;;  %v20601_v4 = vpack.c.bf16 %v6012_v15, %v6005_v37  ;;  %v31769_v37 = vunpack.i.h.bf16 %v27011_v42 }
 0x41a   :  { %20624 = vmatprep.subr.bf16.mxu0 %v26742_v29  ;;  %v20599_v62 = vpack.c.bf16 %v6013_v44, %v6006_v18  ;;  %v31675_v43 = vunpack.i.h.bf16 %v27127_v27  ;;  %v22438_v18 = vunpack.i.l.bf16 %v27127_v27 }
 0x41b   :  { %22731 = vrot.lane.b32.xlu1 %v26740_v61, %s24126_s18  ;;  %22726 = vrot.lane.b32.xlu0 %v26763_v5, %s24124_s29 }
 0x41c   :  { %19170 = vmatmul.mubr.msk.f32.vlgmr.msra.gmra.mrb[56].mxu0 %vm783_vm6, %v27042_v2  ;;  %20600 = vmatprep.subr.bf16.mxu1 %v20599_v62  ;;  %v31676_v62 = vunpack.i.h.bf16 %v27104_v36 }
 0x41d   :  { %20626 = vmatpush1.bf16.msra.mxu0 %v26736_v14  ;;  %v27141_v53 = vpop.permute.xlu1 %22451  ;;  %v22447_v60 = vpop.permute.xlu0 %22446  ;;  %20602 = vmatpush1.bf16.msra.mxu1 %v20601_v4  ;;  %v27193_v4 = vld [vmem:[%s31642_s3] sm:$0xff] }
 0x41e   :  { %v22449_v48 = vunpack.i.h.bf16 %v22447_v60  ;;  %v22448_v29 = vunpack.i.l.bf16 %v22447_v60  ;;  %20628 = vmatprep.subr.bf16.mxu0 %v26780_v31  ;;  %6323 = vmatprep.mubr.f32.mxu0 %v31763_v0  ;;  %v22433_v60 = vunpack.i.l.bf16 %v27104_v36 }
 0x41f   :  { %22741 = vrot.lane.b32.xlu1 %v26734_v50, %s24126_s18  ;;  %22736 = vrot.lane.b32.xlu0 %v26754_v26, %s24126_s18 }
 0x420   :  { %v6019_v34 = vsel %vm722_vm5, %v31768_v45, %v22448_v29  ;;  %v6026_v14 = vsel %vm722_vm5, %v31769_v37, %v22449_v48  ;;  %19171 = vmatmul.mubr.msk.f32.gmra.mrb[58].mxu0 %vm783_vm6, %v27070_v9  ;;  %v6020_v31 = vsel %vm722_vm5, %v22448_v29, %v22423_v38  ;;  %v6027_v19 = vsel %vm722_vm5, %v22449_v48, %v22424_v56 }
 0x421   :  { %20630 = vmatpush1.bf16.msra.mxu0 %v26774_v40  ;;  %v27159_v8 = vpop.permute.xlu1 %22461  ;;  %v27161_v21 = vpop.permute.xlu0 %22456  ;;  %6329 = vmatprep.mubr.f32.mxu0 %v31763_v0  ;;  %v20605_v42 = vpack.c.bf16 %v6026_v14, %v6019_v34  ;;  %v20603_v15 = vpack.c.bf16 %v6027_v19, %v6020_v31  ;;  %v31770_v48 = vunpack.i.h.bf16 %v27035_v57  ;;  %v31771_v45 = vunpack.i.h.bf16 %v27037_v3  ;;  %v27223_v19 = vld [vmem:[%s31642_s3 + $0x8] sm:$0xff] }
 0x422   :  { %20640 = vmatprep.subr.bf16.mxu0 %v26822_v22  ;;  %v31772_v3 = vpack.c.bf16 %v26798_v25, %v26782_v7 }
 0x423   :  { %22751 = vrot.lane.b32.xlu1 %v26778_v55, %s24126_s18  ;;  %22746 = vrot.lane.b32.xlu0 %v26803_v52, %s24124_s29 }
 0x424   :  { %19172 = vmatmul.mubr.msk.f32.gmra.mrb[60].mxu0 %vm783_vm6, %v27086_v16  ;;  %20604 = vmatprep.subr.bf16.mxu1 %v20603_v15  ;;  %v6868_v15 = vsel %vm1589_vm7, %v22433_v60, %v31676_v62  ;;  %v22463_v62 = vunpack.i.l.bf16 %v27159_v8 }
 0x425   :  { %v27172_v40 = vpop.permute.xlu1 %22471  ;;  %v27174_v38 = vpop.permute.xlu0 %22466  ;;  %6335 = vmatprep.mubr.f32.mxu0 %v31763_v0  ;;  %20606 = vmatpush1.bf16.msra.mxu1 %v20605_v42  ;;  %v6875_v42 = vsel %vm1589_vm7, %v22438_v18, %v31675_v43  ;;  %v22464_v43 = vunpack.i.h.bf16 %v27159_v8 }
 0x427   :  { %22761 = vrot.lane.b32.xlu1 %v26772_v54, %s24126_s18  ;;  %22756 = vrot.lane.b32.xlu0 %v26794_v10, %s24126_s18 }
 0x428   :  { %19173 = vmatmul.mubr.msk.f32.gmra.mrb[62].mxu0 %vm783_vm6, %v27110_v59  ;;  %19166 = vmatmul.mubr.msk.f32.vlgmr.msra.gmra.mrb[48].mxu1 %vm783_vm6, %v27042_v2 }
 0x429   :  { %v27183_v22 = vpop.permute.xlu1 %22481  ;;  %v22477_v56 = vpop.permute.xlu0 %22476  ;;  %6507 = vmatprep.mubr.f32.mxu0 %v31763_v0  ;;  %6234 = vmatprep.mubr.f32.mxu1 %v31763_v0 }
 0x42a   :  { %v22479_v41 = vunpack.i.h.bf16 %v22477_v56  ;;  %v22478_v44 = vunpack.i.l.bf16 %v22477_v56  ;;  %v20655_v56 = vpack.c.bf16 %v6875_v42, %v6868_v15 }
 0x42b   :  { %22771 = vrot.lane.b32.xlu1 %v26837_v63, %s24126_s18  ;;  %22766 = vrot.lane.b32.xlu0 %v26820_v47, %s24126_s18 }
 0x42c   :  { %v6016_v29 = vsel %vm722_vm5, %v31770_v48, %v22479_v41  ;;  %v6009_v34 = vsel %vm722_vm5, %v31771_v45, %v22478_v44  ;;  %19178 = vmatmul.mubr.msk.f32.vlgmr.msra.gmra.mrb[48].mxu0 %vm783_vm6, %v27193_v4  ;;  %19167 = vmatmul.mubr.msk.f32.gmra.mrb[50].mxu1 %vm783_vm6, %v27070_v9  ;;  %v20615_v57 = vpack.c.bf16 %v22479_v41, %v22478_v44  ;;  %v27251_v45 = vld [vmem:[%s31642_s3 + $0x10] sm:$0xff] }
 0x42d   :  { %v27210_v37 = vpop.permute.xlu1 %22491  ;;  %v27212_v14 = vpop.permute.xlu0 %22486  ;;  %v20617_v31 = vpack.c.bf16 %v6016_v29, %v6009_v34  ;;  %20642 = vmatpush1.bf16.msra.mxu0 %v31772_v3  ;;  %6513 = vmatprep.mubr.f32.mxu0 %v31763_v0  ;;  %v31774_v34 = vunpack.i.h.bf16 %v27064_v6 }
 0x42e   :  { %20644 = vmatprep.subr.bf16.mxu0 %v26858_v32  ;;  %20616 = vmatprep.subr.bf16.mxu1 %v20615_v57  ;;  %v31773_v32 = vpack.c.bf16 %v26842_v17, %v26825_v13 }
 0x42f   :  { %22781 = vrot.lane.b32.xlu1 %v26814_v1, %s24126_s18  ;;  %22776 = vrot.lane.b32.xlu0 %v26877_v39, %s24124_s29 }
 0x430   :  { %20618 = vmatpush1.bf16.msra.mxu1 %v20617_v31  ;;  %19179 = vmatmul.mubr.msk.f32.gmra.mrb[50].mxu0 %vm783_vm6, %v27223_v19  ;;  %v31775_v31 = vunpack.i.h.bf16 %v27080_v20  ;;  %v22443_v20 = vunpack.i.l.bf16 %v27125_v46 }
 0x431   :  { %v27240_v41 = vpop.permute.xlu1 %22501  ;;  %v22497_v44 = vpop.permute.xlu0 %22496  ;;  %20646 = vmatpush1.bf16.msra.mxu0 %v31773_v32  ;;  %6240 = vmatprep.mubr.f32.mxu1 %v31763_v0  ;;  %v31677_v32 = vunpack.i.h.bf16 %v27161_v21 }
 0x432   :  { %v22499_v48 = vunpack.i.h.bf16 %v22497_v44  ;;  %v22498_v29 = vunpack.i.l.bf16 %v22497_v44  ;;  %20656 = vmatprep.subr.bf16.mxu0 %v20655_v56  ;;  %19168 = vmatmul.mubr.msk.f32.gmra.mrb[52].mxu1 %vm783_vm6, %v27086_v16  ;;  %v22444_v44 = vunpack.i.h.bf16 %v27125_v46  ;;  %v31680_v46 = vunpack.i.h.bf16 %v27141_v53 }
 0x433   :  { %6519 = vmatprep.mubr.f32.mxu0 %v31763_v0  ;;  %22791 = vrot.lane.b32.xlu1 %v26866_v28, %s24126_s18 }
 0x434   :  { %v6023_v57 = vsel %vm722_vm5, %v31774_v34, %v22498_v29  ;;  %v6030_v3 = vsel %vm722_vm5, %v31775_v31, %v22499_v48  ;;  %22786 = vrot.lane.b32.xlu0 %v26856_v30, %s24126_s18  ;;  %v20619_v56 = vpack.c.bf16 %v22499_v48, %v22498_v29  ;;  %19180 = vmatmul.mubr.msk.f32.gmra.mrb[52].mxu0 %vm783_vm6, %v27251_v45  ;;  %v22458_v34 = vunpack.i.l.bf16 %v27161_v21  ;;  %v27280_v48 = vld [vmem:[%s31642_s3 + $0x18] sm:$0xff] }
 0x435   :  { %v27264_v42 = vpop.permute.xlu1 %22511  ;;  %v27266_v15 = vpop.permute.xlu0 %22506  ;;  %v20621_v6 = vpack.c.bf16 %v6030_v3, %v6023_v57  ;;  %6246 = vmatprep.mubr.f32.mxu1 %v31763_v0  ;;  %6525 = vmatprep.mubr.f32.mxu0 %v31763_v0  ;;  %v22453_v29 = vunpack.i.l.bf16 %v27141_v53  ;;  %v6867_v3 = vsel %vm1589_vm7, %v22443_v20, %v22433_v60  ;;  %vm17805_vm5 = vcmask 146432  }
 0x436   :  { %19169 = vmatmul.mubr.msk.f32.gmra.mrb[54].mxu1 %vm783_vm6, %v27110_v59  ;;  %20620 = vmatprep.subr.bf16.mxu1 %v20619_v56  ;;  %v6874_v56 = vsel %vm1589_vm7, %v22444_v44, %v22438_v18  ;;  %v6889_v60 = vsel %vm1589_vm7, %v22458_v34, %v31677_v32  ;;  %v22473_v44 = vunpack.i.l.bf16 %v27172_v40  ;;  %v6888_v17 = vsel %vm1589_vm7, %v22464_v43, %v22458_v34 }
 0x437   :  { %20622 = vmatpush1.bf16.msra.mxu1 %v20621_v6  ;;  %22796 = vrot.lane.b32.xlu1 %v26851_v58, %s24126_s18  ;;  %v31776_v6 = vpack.c.bf16 %v26749_v33, %v26731_v11  ;;  %v20657_v8 = vpack.c.bf16 %v6874_v56, %v6867_v3  ;;  %v6882_v32 = vsel %vm1589_vm7, %v22453_v29, %v31680_v46  ;;  %v31778_v56 = vunpack.i.h.bf16 %v27174_v38 }
 0x438   :  { %22801 = vrot.lane.b32.xlu0 %v26895_v51, %s24124_s29  ;;  %19181 = vmatmul.mubr.msk.f32.gmra.mrb[54].mxu0 %vm783_vm6, %v27280_v48  ;;  %v6881_v20 = vsel %vm1589_vm7, %v22463_v62, %v22453_v29  ;;  %v31777_v3 = vpack.c.bf16 %v26787_v12, %v26769_v24  ;;  %v31779_v46 = vunpack.i.h.bf16 %v27172_v40  ;;  %v31786_v11 = vunpack.i.l.bf16 %v27240_v41 }
 0x439   :  { %v27289_v57 = vpop.permute.xlu1 %22521  ;;  %v27291_v31 = vpop.permute.xlu0 %22516  ;;  %20632 = vmatprep.subr.bf16.mxu1 %v31776_v6  ;;  %6406 = vmatprep.mubr.f32.mxu1 %v31763_v0  ;;  %v22468_v6 = vunpack.i.l.bf16 %v27174_v38  ;;  %v20661_v34 = vpack.c.bf16 %v6888_v17, %v6881_v20  ;;  %v22483_v17 = vunpack.i.l.bf16 %v27183_v22  ;;  %v31681_v20 = vunpack.i.h.bf16 %v27212_v14 }
 0x43a   :  { %6685 = vmatprep.mubr.f32.mxu0 %v31763_v0  ;;  %19174 = vmatmul.mubr.msk.f32.vlgmr.msra.gmra.mrb[56].mxu1 %vm783_vm6, %v27042_v2  ;;  %v20659_v2 = vpack.c.bf16 %v6889_v60, %v6882_v32  ;;  %v6879_v32 = vsel %vm1589_vm7, %v22473_v44, %v31779_v46 }
 0x43b   :  { %22811 = vrot.lane.b32.xlu1 %v26740_v61, %s24127_s11  ;;  %20634 = vmatpush1.bf16.msra.mxu1 %v26756_v35  ;;  %v6872_v35 = vsel %vm1589_vm7, %v22468_v6, %v31778_v56 }
 0x43c   :  { %22806 = vrot.lane.b32.xlu0 %v26763_v5, %s24125_s30  ;;  %19186 = vmatmul.mubr.msk.f32.vlgmr.msra.gmra.mrb[56].mxu0 %vm783_vm6, %v27193_v4  ;;  %v20671_v46 = vpack.c.bf16 %v6879_v32, %v6872_v35  ;;  %v31784_v32 = vld [vmem:[#allocation54_spill] sm:$0xff] }
 0x43d   :  { %v27322_v18 = vpop.permute.xlu1 %22531  ;;  %v27324_v13 = vpop.permute.xlu0 %22526  ;;  %20658 = vmatpush1.bf16.msra.mxu0 %v20657_v8  ;;  %20636 = vmatprep.subr.bf16.mxu1 %v31777_v3 }
 0x43e   :  { %20660 = vmatprep.subr.bf16.mxu0 %v20659_v2  ;;  %6412 = vmatprep.mubr.f32.mxu1 %v31763_v0  ;;  %v22488_v2 = vunpack.i.l.bf16 %v27212_v14 }
 0x43f   :  { %19175 = vmatmul.mubr.msk.f32.gmra.mrb[58].mxu1 %vm783_vm6, %v27070_v9  ;;  %6691 = vmatprep.mubr.f32.mxu0 %v31763_v0  ;;  %v31780_v9 = vld [vmem:[#allocation52_spill] sm:$0xff] }
 0x440   :  { %22821 = vrot.lane.b32.xlu1 %v26734_v50, %s24127_s11  ;;  %22816 = vrot.lane.b32.xlu0 %v26754_v26, %s24127_s11  ;;  %v31781_v29 = vpack.c.bf16 %v26870_v49, %v31780_v9  ;;  %v31682_v49 = vunpack.i.h.bf16 %v27210_v37  ;;  %v6885_v7 = vsel %vm1589_vm7, %v31786_v11, %v22488_v2  ;;  %v27447_v11 = vld [vmem:[%s31642_s3 + $0x48] sm:$0xff] }
 0x441   :  { %v27344_v43 = vpop.permute.xlu1 %22541  ;;  %v27346_v62 = vpop.permute.xlu0 %22536  ;;  %20638 = vmatpush1.bf16.msra.mxu1 %v26796_v23  ;;  %19187 = vmatmul.mubr.msk.f32.gmra.mrb[58].mxu0 %vm783_vm6, %v27223_v19  ;;  %v22484_v23 = vunpack.i.h.bf16 %v27183_v22  ;;  %v6871_v22 = vsel %vm1589_vm7, %v22483_v17, %v22468_v6 }
 0x442   :  { %20662 = vmatpush1.bf16.msra.mxu0 %v20661_v34  ;;  %20648 = vmatprep.subr.bf16.mxu1 %v31781_v29  ;;  %v31783_v34 = vld [vmem:[#allocation55_spill] sm:$0xff] }
 0x443   :  { %20672 = vmatprep.subr.bf16.mxu0 %v20671_v46  ;;  %6418 = vmatprep.mubr.f32.mxu1 %v31763_v0  ;;  %v6878_v35 = vsel %vm1589_vm7, %v22484_v23, %v22473_v44  ;;  %v31785_v24 = vpack.c.bf16 %v31783_v34, %v31784_v32  ;;  %v31792_v32 = vld [vmem:[#allocation53_spill] sm:$0xff] }
 0x444   :  { %19176 = vmatmul.mubr.msk.f32.gmra.mrb[60].mxu1 %vm783_vm6, %v27086_v16  ;;  %6697 = vmatprep.mubr.f32.mxu0 %v31763_v0  ;;  %v22493_v16 = vunpack.i.l.bf16 %v27210_v37  ;;  %v20673_v12 = vpack.c.bf16 %v6878_v35, %v6871_v22  ;;  %v31790_v22 = vunpack.i.h.bf16 %v27264_v42  ;;  %v31791_v35 = vunpack.i.l.bf16 %v27264_v42 }
 0x445   :  { %v27359_v60 = vpop.permute.xlu1 %22551  ;;  %v27361_v8 = vpop.permute.xlu0 %22546  ;;  %22831 = vrot.lane.b32.xlu1 %v26778_v55, %s24127_s11  ;;  %22826 = vrot.lane.b32.xlu0 %v26803_v52, %s24125_s30 }
 0x446   :  { %19188 = vmatmul.mubr.msk.f32.gmra.mrb[60].mxu0 %vm783_vm6, %v27251_v45  ;;  %6424 = vmatprep.mubr.f32.mxu1 %v31763_v0  ;;  %v6893_v6 = vsel %vm1589_vm7, %v22493_v16, %v31682_v49  ;;  %v31782_v49 = vld [vmem:[#allocation48_spill] sm:$0xff] }
 0x447   :  { %6703 = vmatprep.mubr.f32.mxu0 %v31763_v0 }
 0x448   :  { %19177 = vmatmul.mubr.msk.f32.gmra.mrb[62].mxu1 %vm783_vm6, %v27110_v59  ;;  %v6886_v59 = vsel %vm1589_vm7, %v22488_v2, %v31681_v20  ;;  %v27417_v20 = vld [vmem:[%s31642_s3 + $0x40] sm:$0xff] }
 0x449   :  { %v27380_v3 = vpop.permute.xlu1 %22561  ;;  %v27382_v56 = vpop.permute.xlu0 %22556  ;;  %22841 = vrot.lane.b32.xlu1 %v26772_v54, %s24127_s11  ;;  %22836 = vrot.lane.b32.xlu0 %v26794_v10, %s24127_s11 }
 0x44a   :  { %19189 = vmatmul.mubr.msk.f32.gmra.mrb[62].mxu0 %vm783_vm6, %v27280_v48  ;;  %6596 = vmatprep.mubr.f32.mxu1 %v31763_v0 }
 0x44b   :  { %7003 = vmatprep.mubr.f32.mxu0 %v31763_v0 }
 0x44c   :  { %19182 = vmatmul.mubr.msk.f32.vlgmr.msra.gmra.mrb[48].mxu1 %vm783_vm6, %v27193_v4 }
 0x44d   :  { %v27404_v44 = vpop.permute.xlu1 %22571  ;;  %v27406_v46 = vpop.permute.xlu0 %22566  ;;  %20650 = vmatpush1.bf16.msra.mxu1 %v31782_v49  ;;  %22851 = vrot.lane.b32.xlu1 %v26837_v63, %s24127_s11  ;;  %v31787_v49 = vunpack.i.h.bf16 %v27240_v41 }
 0x44e   :  { %v22569_v9 = vunpack.i.h.bf16 %v27406_v46  ;;  %v22568_v29 = vunpack.i.l.bf16 %v27406_v46  ;;  %22846 = vrot.lane.b32.xlu0 %v26820_v47, %s24127_s11  ;;  %20652 = vmatprep.subr.bf16.mxu1 %v31785_v24  ;;  %v20675_v46 = vpack.c.bf16 %v6893_v6, %v6886_v59  ;;  %v31788_v24 = vunpack.i.h.bf16 %v27266_v15 }
 0x44f   :  { %v6892_v63 = vsel %vm1589_vm7, %v31787_v49, %v22493_v16  ;;  %19198 = vmatmul.mubr.msk.f32.vlgmr.msra.gmra.mrb[48].mxu0 %vm783_vm6, %v27417_v20  ;;  %6602 = vmatprep.mubr.f32.mxu1 %v31763_v0  ;;  %v31789_v16 = vunpack.i.l.bf16 %v27266_v15 }
 0x450   :  { %20674 = vmatpush1.bf16.msra.mxu0 %v20673_v12  ;;  %19183 = vmatmul.mubr.msk.f32.gmra.mrb[50].mxu1 %vm783_vm6, %v27223_v19  ;;  %v7403_v12 = vsel %vm2119_vm8, %v31791_v35, %v31790_v22  ;;  %v6870_v34 = vsel %vm1589_vm7, %v22568_v29, %v22483_v17  ;;  %v6877_v59 = vsel %vm1589_vm7, %v22569_v9, %v22484_v23  ;;  %v27475_v23 = vld [vmem:[%s31642_s3 + $0x50] sm:$0xff]  ;;  %v22519_v17 = vunpack.i.h.bf16 %v27291_v31 }
 0x451   :  { %v27438_v47 = vpop.permute.xlu1 %22581  ;;  %v27440_v33 = vpop.permute.xlu0 %22576  ;;  %v7396_v2 = vsel %vm2119_vm8, %v31789_v16, %v31788_v24  ;;  %20676 = vmatprep.subr.bf16.mxu0 %v20675_v46  ;;  %20654 = vmatpush1.bf16.msra.mxu1 %v31792_v32  ;;  %v20677_v6 = vpack.c.bf16 %v6892_v63, %v6885_v7  ;;  %v22518_v16 = vunpack.i.l.bf16 %v27291_v31  ;;  %v27498_v31 = vld [vmem:[%s31642_s3 + $0x58] sm:$0xff]  ;;  %v31793_v32 = vunpack.i.l.bf16 %v27240_v41 }
 0x452   :  { %7009 = vmatprep.mubr.f32.mxu0 %v31763_v0  ;;  %22861 = vrot.lane.b32.xlu1 %v26814_v1, %s24127_s11  ;;  %v20687_v49 = vpack.c.bf16 %v7403_v12, %v7396_v2  ;;  %v20663_v1 = vpack.c.bf16 %v6877_v59, %v6870_v34  ;;  %v22528_v12 = vunpack.i.l.bf16 %v27324_v13  ;;  %v31794_v59 = vunpack.i.h.bf16 %v27240_v41 }
 0x453   :  { %22856 = vrot.lane.b32.xlu0 %v26877_v39, %s24125_s30  ;;  %19199 = vmatmul.mubr.msk.f32.gmra.mrb[50].mxu0 %vm783_vm6, %v27447_v11  ;;  %v31797_v41 = vunpack.i.l.bf16 %v27264_v42 }
 0x454   :  { %20678 = vmatpush1.bf16.msra.mxu0 %v20677_v6  ;;  %6608 = vmatprep.mubr.f32.mxu1 %v31763_v0 }
 0x455   :  { %v27469_v46 = vpop.permute.xlu1 %22591  ;;  %v22587_v24 = vpop.permute.xlu0 %22586  ;;  %20688 = vmatprep.subr.bf16.mxu0 %v20687_v49  ;;  %19184 = vmatmul.mubr.msk.f32.gmra.mrb[52].mxu1 %vm783_vm6, %v27251_v45  ;;  %v31795_v49 = vunpack.i.h.bf16 %v27104_v36  ;;  %v31798_v36 = vunpack.i.l.bf16 %v27266_v15 }
 0x456   :  { %v22589_v7 = vunpack.i.h.bf16 %v22587_v24  ;;  %v22588_v63 = vunpack.i.l.bf16 %v22587_v24  ;;  %7015 = vmatprep.mubr.f32.mxu0 %v31763_v0  ;;  %22871 = vrot.lane.b32.xlu1 %v26866_v28, %s24127_s11  ;;  %v22538_v28 = vunpack.i.l.bf16 %v27346_v62 }
 0x457   :  { %22866 = vrot.lane.b32.xlu0 %v26856_v30, %s24127_s11  ;;  %19200 = vmatmul.mubr.msk.f32.gmra.mrb[52].mxu0 %vm783_vm6, %v27475_v23  ;;  %v6869_v24 = vsel %vm1589_vm7, %v31795_v49, %v22568_v29  ;;  %v22533_v29 = vunpack.i.l.bf16 %v27322_v18  ;;  %v22539_v30 = vunpack.i.h.bf16 %v27346_v62 }
 0x458   :  { %20664 = vmatprep.subr.bf16.mxu1 %v20663_v1  ;;  %6614 = vmatprep.mubr.f32.mxu1 %v31763_v0  ;;  %v6884_v34 = vsel %vm1589_vm7, %v22588_v63, %v31793_v32  ;;  %v6891_v6 = vsel %vm1589_vm7, %v22589_v7, %v31794_v59  ;;  %v31796_v1 = vunpack.i.h.bf16 %v27127_v27  ;;  %v22523_v32 = vunpack.i.l.bf16 %v27289_v57 }
 0x459   :  { %v27488_v2 = vpop.permute.xlu1 %22601  ;;  %v27490_v22 = vpop.permute.xlu0 %22596  ;;  %19185 = vmatmul.mubr.msk.f32.gmra.mrb[54].mxu1 %vm783_vm6, %v27280_v48  ;;  %7021 = vmatprep.mubr.f32.mxu0 %v31763_v0  ;;  %v7402_v59 = vsel %vm2119_vm8, %v22519_v17, %v31797_v41  ;;  %v7395_v27 = vsel %vm2119_vm8, %v22518_v16, %v31798_v36  ;;  %v20667_v17 = vpack.c.bf16 %v6891_v6, %v6884_v34  ;;  %v22543_v41 = vunpack.i.l.bf16 %v27344_v43 }
 0x45a   :  { %v6876_v35 = vsel %vm1589_vm7, %v31796_v1, %v22569_v9  ;;  %22876 = vrot.lane.b32.xlu1 %v26851_v58, %s24127_s11  ;;  %6774 = vmatprep.mubr.f32.mxu1 %v31763_v0  ;;  %v22534_v9 = vunpack.i.h.bf16 %v27322_v18  ;;  %v31800_v18 = vunpack.i.h.bf16 %v27324_v13  ;;  %v31801_v34 = vunpack.i.h.bf16 %v27141_v53 }
 0x45b   :  { %22881 = vrot.lane.b32.xlu0 %v26895_v51, %s24125_s30  ;;  %19201 = vmatmul.mubr.msk.f32.gmra.mrb[54].mxu0 %vm783_vm6, %v27498_v31  ;;  %v20665_v16 = vpack.c.bf16 %v6876_v35, %v6869_v24  ;;  %v7409_v35 = vsel %vm2119_vm8, %v22533_v29, %v22523_v32  ;;  %v20689_v53 = vpack.c.bf16 %v7402_v59, %v7395_v27  ;;  %v31804_v59 = vunpack.i.h.bf16 %v27344_v43 }
 0x45c   :  { %7181 = vmatprep.mubr.f32.mxu0 %v31763_v0  ;;  %v7417_v36 = vsel %vm2119_vm8, %v22528_v12, %v31800_v18  ;;  %v6883_v6 = vsel %vm1589_vm7, %v31801_v34, %v22588_v63  ;;  %v31803_v63 = vunpack.i.h.bf16 %v27289_v57  ;;  %v22554_v18 = vunpack.i.h.bf16 %v27359_v60 }
 0x45d   :  { %v27532_v49 = vpop.permute.xlu1 %22611  ;;  %v27534_v58 = vpop.permute.xlu0 %22606  ;;  %19190 = vmatmul.mubr.msk.f32.vlgmr.msra.gmra.mrb[56].mxu1 %vm783_vm6, %v27193_v4  ;;  %v7416_v4 = vsel %vm2119_vm8, %v22534_v9, %v22528_v12  ;;  %v7407_v12 = vsel %vm2119_vm8, %v22543_v41, %v31804_v59  ;;  %v22549_v34 = vunpack.i.h.bf16 %v27361_v8  ;;  %v22578_v59 = vunpack.i.l.bf16 %v27440_v33 }
 0x45e   :  { %31799 = vst [vmem:[#allocation52_spill] sm:$0xff] %v27534_v58  ;;  %v31802_v58 = vunpack.i.h.bf16 %v27161_v21  ;;  %20666 = vmatpush1.bf16.msra.mxu1 %v20665_v16  ;;  %22891 = vrot.lane.b32.xlu1 %v26740_v61, %s24128_s21  ;;  %v7410_v21 = vsel %vm2119_vm8, %v22523_v32, %v31803_v63  ;;  %v7400_v32 = vsel %vm2119_vm8, %v22538_v28, %v22539_v30 }
 0x45f   :  { %22886 = vrot.lane.b32.xlu0 %v26763_v5, %s24126_s18  ;;  %20668 = vmatprep.subr.bf16.mxu1 %v20667_v17  ;;  %v20691_v61 = vpack.c.bf16 %v7417_v36, %v7410_v21  ;;  %v22553_v36 = vunpack.i.l.bf16 %v27359_v60 }
 0x460   :  { %v6890_v1 = vsel %vm1589_vm7, %v31802_v58, %v22589_v7  ;;  %19206 = vmatmul.mubr.msk.f32.vlgmr.msra.gmra.mrb[56].mxu0 %vm783_vm6, %v27417_v20  ;;  %6780 = vmatprep.mubr.f32.mxu1 %v31763_v0 }
 0x461   :  { %v27560_v24 = vpop.permute.xlu1 %22621  ;;  %v22617_v7 = vpop.permute.xlu0 %22616  ;;  %v20669_v29 = vpack.c.bf16 %v6890_v1, %v6883_v6  ;;  %20690 = vmatpush1.bf16.msra.mxu0 %v20689_v53  ;;  %19191 = vmatmul.mubr.msk.f32.gmra.mrb[58].mxu1 %vm783_vm6, %v27223_v19  ;;  %v20693_v19 = vpack.c.bf16 %v7416_v4, %v7409_v35  ;;  %v20703_v1 = vpack.c.bf16 %v7407_v12, %v7400_v32  ;;  %v22548_v6 = vunpack.i.l.bf16 %v27361_v8 }
 0x462   :  { %20692 = vmatprep.subr.bf16.mxu0 %v20691_v61  ;;  %v22619_v27 = vunpack.i.h.bf16 %v22617_v7  ;;  %v22618_v9 = vunpack.i.l.bf16 %v22617_v7  ;;  %7187 = vmatprep.mubr.f32.mxu0 %v31763_v0  ;;  %v31805_v35 = vunpack.i.h.bf16 %v27172_v40  ;;  %v31806_v8 = vunpack.i.h.bf16 %v27174_v38 }
 0x463   :  { %20670 = vmatpush1.bf16.msra.mxu1 %v20669_v29  ;;  %22901 = vrot.lane.b32.xlu1 %v26734_v50, %s24128_s21  ;;  %v7406_v38 = vsel %vm2119_vm8, %v22549_v34, %v22543_v41  ;;  %v22564_v61 = vunpack.i.h.bf16 %v27380_v3  ;;  %v22563_v29 = vunpack.i.l.bf16 %v27380_v3  ;;  %v31694_v41 = vunpack.i.h.bf16 %v27440_v33 }
 0x464   :  { %22896 = vrot.lane.b32.xlu0 %v26754_v26, %s24128_s21  ;;  %19207 = vmatmul.mubr.msk.f32.gmra.mrb[58].mxu0 %vm783_vm6, %v27447_v11  ;;  %v20679_v50 = vpack.c.bf16 %v22619_v27, %v22618_v9  ;;  %v6880_v53 = vsel %vm1589_vm7, %v31805_v35, %v22619_v27  ;;  %v6873_v63 = vsel %vm1589_vm7, %v31806_v8, %v22618_v9  ;;  %v31807_v12 = vunpack.i.h.bf16 %v27210_v37 }
 0x465   :  { %v27581_v17 = vpop.permute.xlu1 %22631  ;;  %v27583_v58 = vpop.permute.xlu0 %22626  ;;  %20694 = vmatpush1.bf16.msra.mxu0 %v20693_v19  ;;  %6786 = vmatprep.mubr.f32.mxu1 %v31763_v0  ;;  %v20681_v32 = vpack.c.bf16 %v6880_v53, %v6873_v63  ;;  %v31808_v9 = vunpack.i.h.bf16 %v27212_v14  ;;  %v22574_v14 = vunpack.i.h.bf16 %v27404_v44  ;;  %v22573_v8 = vunpack.i.l.bf16 %v27404_v44 }
 0x466   :  { %20704 = vmatprep.subr.bf16.mxu0 %v20703_v1  ;;  %19192 = vmatmul.mubr.msk.f32.gmra.mrb[60].mxu1 %vm783_vm6, %v27251_v45  ;;  %v22559_v45 = vunpack.i.h.bf16 %v27382_v56 }
 0x467   :  { %7193 = vmatprep.mubr.f32.mxu0 %v31763_v0  ;;  %22911 = vrot.lane.b32.xlu1 %v26778_v55, %s24128_s21  ;;  %v22558_v55 = vunpack.i.l.bf16 %v27382_v56 }
 0x468   :  { %22906 = vrot.lane.b32.xlu0 %v26803_v52, %s24126_s18  ;;  %19208 = vmatmul.mubr.msk.f32.gmra.mrb[60].mxu0 %vm783_vm6, %v27475_v23 }
 0x469   :  { %v27595_v16 = vpop.permute.xlu1 %22636  ;;  %v22642_v26 = vpop.permute.xlu0 %22641  ;;  %6792 = vmatprep.mubr.f32.mxu1 %v31763_v0  ;;  %7199 = vmatprep.mubr.f32.mxu0 %v31763_v0 }
 0x46a   :  { %19193 = vmatmul.mubr.msk.f32.gmra.mrb[62].mxu1 %vm783_vm6, %v27280_v48  ;;  %20680 = vmatprep.subr.bf16.mxu1 %v20679_v50  ;;  %v22644_v21 = vunpack.i.h.bf16 %v22642_v26  ;;  %v22643_v7 = vunpack.i.l.bf16 %v22642_v26  ;;  %v7399_v48 = vsel %vm2119_vm8, %v22548_v6, %v22538_v28  ;;  %v27643_v28 = vld [vmem:[%s31642_s3 + $0x60] sm:$0xff] }
 0x46b   :  { %22921 = vrot.lane.b32.xlu1 %v26772_v54, %s24128_s21  ;;  %7092 = vmatprep.mubr.f32.mxu1 %v31763_v0  ;;  %v7414_v54 = vsel %vm2119_vm8, %v22553_v36, %v22554_v18  ;;  %v20705_v1 = vpack.c.bf16 %v7406_v38, %v7399_v48  ;;  %v27684_v38 = vld [vmem:[%s31642_s3 + $0x68] sm:$0xff] }
 0x46c   :  { %22916 = vrot.lane.b32.xlu0 %v26794_v10, %s24128_s21  ;;  %19209 = vmatmul.mubr.msk.f32.gmra.mrb[62].mxu0 %vm783_vm6, %v27498_v31  ;;  %v7421_v10 = vsel %vm2119_vm8, %v22558_v55, %v22559_v45  ;;  %v6894_v27 = vsel %vm1589_vm7, %v31807_v12, %v22644_v21  ;;  %v6887_v19 = vsel %vm1589_vm7, %v31808_v9, %v22643_v7  ;;  %vm17917_vm7 = vcmask 195584  }
 0x46d   :  { %v27620_v4 = vpop.permute.xlu1 %22651  ;;  %v27622_v40 = vpop.permute.xlu0 %22646  ;;  %7531 = vmatprep.mubr.f32.mxu0 %v31763_v0  ;;  %v20683_v35 = vpack.c.bf16 %v22644_v21, %v22643_v7  ;;  %v20707_v63 = vpack.c.bf16 %v7421_v10, %v7414_v54  ;;  %v7420_v21 = vsel %vm2119_vm8, %v22564_v61, %v22558_v55  ;;  %v20685_v7 = vpack.c.bf16 %v6894_v27, %v6887_v19 }
 0x46e   :  { %19202 = vmatmul.mubr.msk.f32.vlgmr.msra.gmra.mrb[48].mxu1 %vm783_vm6, %v27417_v20  ;;  %v22649_v50 = vunpack.i.h.bf16 %v27622_v40  ;;  %v22648_v26 = vunpack.i.l.bf16 %v27622_v40  ;;  %v7413_v40 = vsel %vm2119_vm8, %v22563_v29, %v22553_v36  ;;  %v7931_v36 = vsel %vm2649_vm9, %v22578_v59, %v31694_v41 }
 0x46f   :  { %20682 = vmatpush1.bf16.msra.mxu1 %v20681_v32  ;;  %22931 = vrot.lane.b32.xlu1 %v26895_v51, %s24126_s18  ;;  %v20709_v10 = vpack.c.bf16 %v7420_v21, %v7413_v40  ;;  %v7924_v12 = vsel %vm2649_vm9, %v22573_v8, %v22574_v14  ;;  %v22598_v40 = vunpack.i.l.bf16 %v27490_v22  ;;  %v22653_v56 = vunpack.i.l.bf16 %v27620_v4 }
 0x470   :  { %22926 = vrot.lane.b32.xlu0 %v26877_v39, %s24126_s18  ;;  %19218 = vmatmul.mubr.msk.f32.vlgmr.msra.gmra.mrb[48].mxu0 %vm783_vm6, %v27643_v28  ;;  %v7398_v55 = vsel %vm2119_vm8, %v22648_v26, %v22548_v6  ;;  %v7405_v48 = vsel %vm2119_vm8, %v22649_v50, %v22549_v34  ;;  %v20719_v6 = vpack.c.bf16 %v7931_v36, %v7924_v12  ;;  %v31809_v36 = vunpack.i.h.bf16 %v27264_v42  ;;  %s24144_s18 = smov 40  }
 0x471   :  { %v27662_v37 = vpop.permute.xlu1 %22661  ;;  %v27664_v53 = vpop.permute.xlu0 %22656  ;;  %20706 = vmatpush1.bf16.msra.mxu0 %v20705_v1  ;;  %7098 = vmatprep.mubr.f32.mxu1 %v31763_v0  ;;  %v20695_v34 = vpack.c.bf16 %v7405_v48, %v7398_v55  ;;  %v22584_v1 = vunpack.i.h.bf16 %v27438_v47  ;;  %v31810_v48 = vunpack.i.h.bf16 %v27266_v15  ;;  %v31811_v15 = vld [vmem:[#allocation41_spill] sm:$0xff]  ;;  %v22604_v12 = vunpack.i.h.bf16 %v27488_v2 }
 0x472   :  { %20708 = vmatprep.subr.bf16.mxu0 %v20707_v63  ;;  %19203 = vmatmul.mubr.msk.f32.gmra.mrb[50].mxu1 %vm783_vm6, %v27447_v11  ;;  %v31693_v63 = vunpack.i.h.bf16 %v27490_v22  ;;  %v7404_v55 = vsel %vm2119_vm8, %v31809_v36, %v22649_v50  ;;  %v31812_v50 = vpack.i.bf16 %v26798_v25, %v31811_v15  ;;  %v22614_v25 = vunpack.i.h.bf16 %v27532_v49 }
 0x473   :  { %20684 = vmatprep.subr.bf16.mxu1 %v20683_v35  ;;  %7537 = vmatprep.mubr.f32.mxu0 %v31763_v0  ;;  %v22583_v35 = vunpack.i.l.bf16 %v27438_v47  ;;  %v27732_v47 = vld [vmem:[%s31642_s3 + $0x78] sm:$0xff]  ;;  %v7930_v42 = vsel %vm2649_vm9, %v22584_v1, %v22578_v59  ;;  %v22613_v1 = vunpack.i.l.bf16 %v27532_v49 }
 0x474   :  { %22941 = vrot.lane.b32.xlu1 %v26803_v52, %s24127_s11  ;;  %22936 = vrot.lane.b32.xlu0 %v26763_v5, %s24127_s11  ;;  %v27709_v52 = vld [vmem:[%s31642_s3 + $0x70] sm:$0xff] }
 0x475   :  { %v27694_v54 = vpop.permute.xlu1 %22671  ;;  %v22667_v32 = vpop.permute.xlu0 %22666  ;;  %20686 = vmatpush1.bf16.msra.mxu1 %v20685_v7  ;;  %19219 = vmatmul.mubr.msk.f32.gmra.mrb[50].mxu0 %vm783_vm6, %v27684_v38  ;;  %v7923_v3 = vsel %vm2649_vm9, %v22583_v35, %v22573_v8  ;;  %v31813_v8 = vld [vmem:[#allocation43_spill] sm:$0xff] }
 0x476   :  { %20710 = vmatpush1.bf16.msra.mxu0 %v20709_v10  ;;  %7104 = vmatprep.mubr.f32.mxu1 %v31763_v0  ;;  %v22669_v5 = vunpack.i.h.bf16 %v22667_v32  ;;  %v22668_v27 = vunpack.i.l.bf16 %v22667_v32  ;;  %v7397_v32 = vsel %vm2119_vm8, %v31810_v48, %v22648_v26  ;;  %v22593_v26 = vunpack.i.l.bf16 %v27469_v46  ;;  %v31816_v48 = vld [vmem:[#allocation52_spill] sm:$0xff] }
 0x477   :  { %20720 = vmatprep.subr.bf16.mxu0 %v20719_v6  ;;  %19204 = vmatmul.mubr.msk.f32.gmra.mrb[52].mxu1 %vm783_vm6, %v27475_v23  ;;  %v22603_v6 = vunpack.i.l.bf16 %v27488_v2  ;;  %v20697_v36 = vpack.c.bf16 %v7404_v55, %v7397_v32  ;;  %v7945_v2 = vsel %vm2649_vm9, %v22598_v40, %v31693_v63  ;;  %v22609_v15 = vunpack.i.h.bf16 %v31816_v48  ;;  %v31820_v63 = vld [vmem:[#allocation44_spill] sm:$0xff] }
 0x478   :  { %7543 = vmatprep.mubr.f32.mxu0 %v31763_v0  ;;  %22951 = vrot.lane.b32.xlu1 %v26895_v51, %s24127_s11  ;;  %v7412_v21 = vsel %vm2119_vm8, %v22668_v27, %v22563_v29  ;;  %v7419_v7 = vsel %vm2119_vm8, %v22669_v5, %v22564_v61  ;;  %v22594_v61 = vunpack.i.h.bf16 %v27469_v46 }
 0x479   :  { %v27713_v9 = vpop.permute.xlu1 %22681  ;;  %v27715_v19 = vpop.permute.xlu0 %22676  ;;  %22946 = vrot.lane.b32.xlu0 %v26877_v39, %s24127_s11  ;;  %19220 = vmatmul.mubr.msk.f32.gmra.mrb[52].mxu0 %vm783_vm6, %v27709_v52  ;;  %v20699_v59 = vpack.c.bf16 %v7419_v7, %v7412_v21  ;;  %v31818_v21 = vunpack.i.h.bf16 %v27324_v13  ;;  %s24150_s11 = smov 52  }
 0x47a   :  { %20696 = vmatprep.subr.bf16.mxu1 %v20695_v34  ;;  %7110 = vmatprep.mubr.f32.mxu1 %v31763_v0  ;;  %v31814_v34 = vld [vmem:[#allocation40_spill] sm:$0xff]  ;;  %v22683_v44 = vunpack.i.l.bf16 %v27713_v9 }
 0x47b   :  { %19205 = vmatmul.mubr.msk.f32.gmra.mrb[54].mxu1 %vm783_vm6, %v27498_v31  ;;  %7549 = vmatprep.mubr.f32.mxu0 %v31763_v0  ;;  %v31815_v35 = vpack.i.bf16 %v31813_v8, %v31814_v34  ;;  %v31817_v8 = vunpack.i.h.bf16 %v27289_v57  ;;  %v7418_v7 = vsel %vm2119_vm8, %v31818_v21, %v22669_v5  ;;  %v7937_v57 = vsel %vm2649_vm9, %v22603_v6, %v22593_v26  ;;  %v31825_v6 = vld [vmem:[#allocation47_spill] sm:$0xff] }
 0x47c   :  { %22961 = vrot.lane.b32.xlu1 %v31812_v50, %s24128_s21  ;;  %7270 = vmatprep.mubr.f32.mxu1 %v31763_v0  ;;  %v22608_v50 = vunpack.i.l.bf16 %v31816_v48  ;;  %v20721_v5 = vpack.c.bf16 %v7930_v42, %v7923_v3 }
 0x47d   :  { %v27749_v10 = vpop.permute.xlu1 %22691  ;;  %v27751_v29 = vpop.permute.xlu0 %22686  ;;  %22956 = vrot.lane.b32.xlu0 %v31815_v35, %s24128_s21  ;;  %19221 = vmatmul.mubr.msk.f32.gmra.mrb[54].mxu0 %vm783_vm6, %v27732_v47  ;;  %v7411_v34 = vsel %vm2119_vm8, %v31817_v8, %v22668_v27  ;;  %v31819_v35 = vld [vmem:[#allocation49_spill] sm:$0xff]  ;;  %v31822_v27 = vld [vmem:[#allocation46_spill] sm:$0xff] }
 0x47e   :  { %7709 = vmatprep.mubr.f32.mxu0 %v31763_v0  ;;  %v31821_v41 = vpack.i.bf16 %v31819_v35, %v31820_v63  ;;  %v31823_v8 = vld [vmem:[#allocation42_spill] sm:$0xff]  ;;  %v7928_v3 = vsel %vm2649_vm9, %v22608_v50, %v22609_v15  ;;  %v31827_v35 = vld [vmem:[#allocation51_spill] sm:$0xff] }
 0x47f   :  { %19210 = vmatmul.mubr.msk.f32.vlgmr.msra.gmra.mrb[56].mxu1 %vm783_vm6, %v27417_v20  ;;  %v31824_v13 = vpack.i.bf16 %v31822_v27, %v31823_v8  ;;  %v7938_v20 = vsel %vm2649_vm9, %v22593_v26, %v22594_v61  ;;  %v22623_v27 = vunpack.i.l.bf16 %v27560_v24  ;;  %v22629_v8 = vunpack.i.h.bf16 %v27583_v58 }
 0x480   :  { %20698 = vmatpush1.bf16.msra.mxu1 %v20697_v36  ;;  %22971 = vrot.lane.b32.xlu1 %v31821_v41, %s24128_s21  ;;  %v7944_v36 = vsel %vm2649_vm9, %v22604_v12, %v22598_v40  ;;  %v20723_v63 = vpack.c.bf16 %v7945_v2, %v7938_v20  ;;  %v20701_v41 = vpack.c.bf16 %v7418_v7, %v7411_v34  ;;  %v31826_v2 = vld [vmem:[#allocation45_spill] sm:$0xff]  ;;  %v22633_v20 = vunpack.i.l.bf16 %v27581_v17 }
 0x481   :  { %v27788_v55 = vpop.permute.xlu1 %22701  ;;  %v22697_v32 = vpop.permute.xlu0 %22696  ;;  %22966 = vrot.lane.b32.xlu0 %v31824_v13, %s24128_s21  ;;  %20700 = vmatprep.subr.bf16.mxu1 %v20699_v59  ;;  %v7935_v40 = vsel %vm2649_vm9, %v22613_v1, %v22614_v25  ;;  %v20725_v59 = vpack.c.bf16 %v7944_v36, %v7937_v57  ;;  %v22624_v57 = vunpack.i.h.bf16 %v27560_v24  ;;  %v22628_v13 = vunpack.i.l.bf16 %v27583_v58  ;;  %v27968_v24 = vld [vmem:[%s31642_s3 + $0x90] sm:$0xff] }
 0x482   :  { %19226 = vmatmul.mubr.msk.f32.vlgmr.msra.gmra.mrb[56].mxu0 %vm783_vm6, %v27643_v28  ;;  %7276 = vmatprep.mubr.f32.mxu1 %v31763_v0  ;;  %v22699_v12 = vunpack.i.h.bf16 %v22697_v32  ;;  %v20735_v34 = vpack.c.bf16 %v7935_v40, %v7928_v3 }
 0x483   :  { %20722 = vmatpush1.bf16.msra.mxu0 %v20721_v5  ;;  %19211 = vmatmul.mubr.msk.f32.gmra.mrb[58].mxu1 %vm783_vm6, %v27447_v11  ;;  %v22698_v11 = vunpack.i.l.bf16 %v22697_v32  ;;  %v31828_v5 = vld [vmem:[#allocation50_spill] sm:$0xff]  ;;  %v7942_v62 = vsel %vm2649_vm9, %v22628_v13, %v22629_v8 }
 0x484   :  { %20724 = vmatprep.subr.bf16.mxu0 %v20723_v63  ;;  %20702 = vmatpush1.bf16.msra.mxu1 %v20701_v41  ;;  %v31829_v41 = vunpack.i.h.bf16 %v27344_v43  ;;  %v7927_v43 = vsel %vm2649_vm9, %v22623_v27, %v22608_v50  ;;  %v22638_v50 = vunpack.i.l.bf16 %v27595_v16 }
 0x485   :  { %v27818_v42 = vpop.permute.xlu1 %22711  ;;  %v27820_v26 = vpop.permute.xlu0 %22706  ;;  %7715 = vmatprep.mubr.f32.mxu0 %v31763_v0  ;;  %22981 = vrot.lane.b32.xlu1 %v31825_v6, %s24128_s21  ;;  %v20711_v32 = vpack.c.bf16 %v22699_v12, %v22698_v11  ;;  %v7401_v40 = vsel %vm2119_vm8, %v22539_v30, %v22698_v11  ;;  %v7934_v30 = vsel %vm2649_vm9, %v22624_v57, %v22613_v1 }
 0x486   :  { %22976 = vrot.lane.b32.xlu0 %v31826_v2, %s24128_s21  ;;  %19227 = vmatmul.mubr.msk.f32.gmra.mrb[58].mxu0 %vm783_vm6, %v27684_v38  ;;  %v7408_v3 = vsel %vm2119_vm8, %v31829_v41, %v22699_v12  ;;  %v27895_v12 = vld [vmem:[%s31642_s3 + $0x80] sm:$0xff]  ;;  %v20737_v41 = vpack.c.bf16 %v7934_v30, %v7927_v43 }
 0x487   :  { %20726 = vmatpush1.bf16.msra.mxu0 %v20725_v59  ;;  %7282 = vmatprep.mubr.f32.mxu1 %v31763_v0  ;;  %v20713_v1 = vpack.c.bf16 %v7408_v3, %v7401_v40 }
 0x488   :  { %20736 = vmatprep.subr.bf16.mxu0 %v20735_v34  ;;  %19212 = vmatmul.mubr.msk.f32.gmra.mrb[60].mxu1 %vm783_vm6, %v27475_v23  ;;  %v22634_v23 = vunpack.i.h.bf16 %v27581_v17  ;;  %v31695_v34 = vunpack.i.h.bf16 %v27664_v53 }
 0x489   :  { %v27830_v21 = vpop.permute.xlu1 %22716  ;;  %v22722_v7 = vpop.permute.xlu0 %22721  ;;  %7721 = vmatprep.mubr.f32.mxu0 %v31763_v0  ;;  %22991 = vrot.lane.b32.xlu1 %v31827_v35, %s24128_s21 }
 0x48a   :  { %22986 = vrot.lane.b32.xlu0 %v31828_v5, %s24128_s21  ;;  %19228 = vmatmul.mubr.msk.f32.gmra.mrb[60].mxu0 %vm783_vm6, %v27709_v52  ;;  %v22724_v6 = vunpack.i.h.bf16 %v22722_v7  ;;  %v22723_v59 = vunpack.i.l.bf16 %v22722_v7  ;;  %v7949_v11 = vsel %vm2649_vm9, %v22633_v20, %v22634_v23  ;;  %v22658_v7 = vunpack.i.l.bf16 %v27664_v53 }
 0x48b   :  { %7288 = vmatprep.mubr.f32.mxu1 %v31763_v0  ;;  %7727 = vmatprep.mubr.f32.mxu0 %v31763_v0  ;;  %v22718_v48 = vunpack.i.l.bf16 %v27830_v21 }
 0x48c   :  { %19213 = vmatmul.mubr.msk.f32.gmra.mrb[62].mxu1 %vm783_vm6, %v27498_v31  ;;  %20712 = vmatprep.subr.bf16.mxu1 %v20711_v32  ;;  %v22639_v31 = vunpack.i.h.bf16 %v27595_v16  ;;  %v7415_v32 = vsel %vm2119_vm8, %v22554_v18, %v22723_v59  ;;  %v7422_v35 = vsel %vm2119_vm8, %v22559_v45, %v22724_v6  ;;  %v20715_v60 = vpack.c.bf16 %v22724_v6, %v22723_v59  ;;  %v5231_v6 = vld [vmem:[%s31643_s4 + $0x10] sm:$0xff] }
 0x48d   :  { %v27849_v36 = vpop.permute.xlu1 %22731  ;;  %v27851_v63 = vpop.permute.xlu0 %22726  ;;  %23001 = vrot.lane.b32.xlu1 %v26895_v51, %s24128_s21  ;;  %7620 = vmatprep.mubr.f32.mxu1 %v31763_v0  ;;  %v27881_v51 = vld [vmem:[%s31643_s4 + $0x8] sm:$0xff]  ;;  %v31697_v18 = vunpack.i.h.bf16 %v27620_v4  ;;  %v20739_v45 = vpack.c.bf16 %v7949_v11, %v7942_v62  ;;  %v20717_v59 = vpack.c.bf16 %v7422_v35, %v7415_v32  ;;  %vm17983_vm8 = vcmask 15360  }
 0x48e   :  { %22996 = vrot.lane.b32.xlu0 %v26877_v39, %s24128_s21  ;;  %19229 = vmatmul.mubr.msk.f32.gmra.mrb[62].mxu0 %vm783_vm6, %v27732_v47  ;;  %v5229_v39 = vld [vmem:[%s31643_s4] sm:$0xff]  ;;  %v22729_v3 = vunpack.i.h.bf16 %v27851_v63  ;;  %v22728_v40 = vunpack.i.l.bf16 %v27851_v63  ;;  %v7948_v43 = vsel %vm2649_vm9, %v22639_v31, %v22633_v20  ;;  %v5232_v63 = vld [vmem:[%s31643_s4 + $0x18] sm:$0xff]  ;;  %v8459_v20 = vsel %vm3179_vm10, %v22658_v7, %v31695_v34  ;;  %s24148_s4 = smov 46   ;;  %s24152_s21 = smov 108  }
 0x48f   :  { %8059 = vmatprep.mubr.f32.mxu0 %v31763_v0 }
 0x490   :  { %19222 = vmatmul.mubr.msk.f32.vlgmr.msra.gmra.mrb[48].mxu1 %vm783_vm6, %v27643_v28  ;;  %v7926_v11 = vsel %vm2649_vm9, %v22728_v40, %v22623_v27  ;;  %v7933_v32 = vsel %vm2649_vm9, %v22729_v3, %v22624_v57 }
 0x491   :  { %v27900_v2 = vpop.permute.xlu1 %22741  ;;  %v27912_v5 = vpop.permute.xlu0 %22736  ;;  %20714 = vmatpush1.bf16.msra.mxu1 %v20713_v1  ;;  %5240 = vperm.xlu1 %21724, %v27881_v51   ;;  %v7941_v1 = vsel %vm2649_vm9, %v22638_v50, %v22628_v13  ;;  %v27941_v13 = vld [vmem:[%s31642_s3 + $0x88] sm:$0xff]  ;;  %v20727_v57 = vpack.c.bf16 %v7933_v32, %v7926_v11  ;;  %v22678_v32 = vunpack.i.l.bf16 %v27715_v19 }
 0x492   :  { %5235 = vperm.xlu0 %21723, %v5229_v39   ;;  %19238 = vmatmul.mubr.msk.f32.vlgmr.msra.gmra.mrb[48].mxu0 %vm783_vm6, %v27895_v12  ;;  %v20741_v35 = vpack.c.bf16 %v7948_v43, %v7941_v1 }
 0x493   :  { %20738 = vmatpush1.bf16.msra.mxu0 %v20737_v41  ;;  %7626 = vmatprep.mubr.f32.mxu1 %v31763_v0  ;;  %v8452_v41 = vsel %vm3179_vm10, %v22653_v56, %v31697_v18 }
 0x494   :  { %20740 = vmatprep.subr.bf16.mxu0 %v20739_v45  ;;  %19223 = vmatmul.mubr.msk.f32.gmra.mrb[50].mxu1 %vm783_vm6, %v27684_v38 }
 0x495   :  { %v27934_v30 = vpop.permute.xlu1 %22751  ;;  %v27948_v62 = vpop.permute.xlu0 %22746  ;;  %20716 = vmatprep.subr.bf16.mxu1 %v20715_v60  ;;  %8065 = vmatprep.mubr.f32.mxu0 %v31763_v0  ;;  %v20751_v60 = vpack.c.bf16 %v8459_v20, %v8452_v41  ;;  %v22664_v20 = vunpack.i.h.bf16 %v27662_v37 }
 0x496   :  { %5250 = vperm.xlu1 %21724, %v5232_v63   ;;  %5245 = vperm.xlu0 %21723, %v5231_v6   ;;  %v22749_v27 = vunpack.i.h.bf16 %v27948_v62  ;;  %v22748_v1 = vunpack.i.l.bf16 %v27948_v62  ;;  %v31696_v62 = vunpack.i.h.bf16 %v27715_v19 }
 0x497   :  { %20718 = vmatpush1.bf16.msra.mxu1 %v20717_v59  ;;  %19239 = vmatmul.mubr.msk.f32.gmra.mrb[50].mxu0 %vm783_vm6, %v27941_v13  ;;  %v22663_v59 = vunpack.i.l.bf16 %v27662_v37  ;;  %v27990_v37 = vld [vmem:[%s31642_s3 + $0x98] sm:$0xff]  ;;  %v8458_v16 = vsel %vm3179_vm10, %v22664_v20, %v22658_v7 }
 0x498   :  { %20742 = vmatpush1.bf16.msra.mxu0 %v20741_v35  ;;  %7632 = vmatprep.mubr.f32.mxu1 %v31763_v0 }
 0x499   :  { %v27962_v45 = vpop.permute.xlu1 %22761  ;;  %v27972_v43 = vpop.permute.xlu0 %22756  ;;  %20752 = vmatprep.subr.bf16.mxu0 %v20751_v60  ;;  %19224 = vmatmul.mubr.msk.f32.gmra.mrb[52].mxu1 %vm783_vm6, %v27709_v52  ;;  %v8451_v41 = vsel %vm3179_vm10, %v22663_v59, %v22653_v56  ;;  %v7925_v60 = vsel %vm2649_vm9, %v22574_v14, %v22728_v40  ;;  %v22689_v14 = vunpack.i.h.bf16 %v27751_v29  ;;  %v22694_v40 = vunpack.i.h.bf16 %v27749_v10 }
 0x49a   :  { %8071 = vmatprep.mubr.f32.mxu0 %v31763_v0  ;;  %10506 = vperm.xlu1 %21724, %v27881_v51   ;;  %v7940_v51 = vsel %vm2649_vm9, %v22748_v1, %v22638_v50  ;;  %v22673_v50 = vunpack.i.l.bf16 %v27694_v54  ;;  %v22693_v56 = vunpack.i.l.bf16 %v27749_v10 }
 0x49b   :  { %10501 = vperm.xlu0 %21723, %v5229_v39   ;;  %19240 = vmatmul.mubr.msk.f32.gmra.mrb[52].mxu0 %vm783_vm6, %v27968_v24  ;;  %v7947_v39 = vsel %vm2649_vm9, %v22749_v27, %v22639_v31  ;;  %v22674_v31 = vunpack.i.h.bf16 %v27694_v54 }
 0x49c   :  { %20728 = vmatprep.subr.bf16.mxu1 %v20727_v57  ;;  %7638 = vmatprep.mubr.f32.mxu1 %v31763_v0  ;;  %v31830_v57 = vunpack.i.h.bf16 %v27440_v33  ;;  %v22684_v33 = vunpack.i.h.bf16 %v27713_v9  ;;  %v20731_v7 = vpack.c.bf16 %v7947_v39, %v7940_v51  ;;  %v8473_v9 = vsel %vm3179_vm10, %v22678_v32, %v31696_v62 }
 0x49d   :  { %v27982_v11 = vpop.permute.xlu1 %22771  ;;  %v27998_v35 = vpop.permute.xlu0 %22766  ;;  %19225 = vmatmul.mubr.msk.f32.gmra.mrb[54].mxu1 %vm783_vm6, %v27732_v47  ;;  %8077 = vmatprep.mubr.f32.mxu0 %v31763_v0  ;;  %v31831_v51 = vunpack.i.h.bf16 %v27490_v22  ;;  %v20753_v62 = vpack.c.bf16 %v8458_v16, %v8451_v41  ;;  %v8466_v18 = vsel %vm3179_vm10, %v22673_v50, %v22674_v31  ;;  %v22704_v16 = vunpack.i.h.bf16 %v27788_v55 }
 0x49e   :  { %v7932_v34 = vsel %vm2649_vm9, %v31830_v57, %v22729_v3  ;;  %10516 = vperm.xlu1 %21724, %v5232_v63   ;;  %7798 = vmatprep.mubr.f32.mxu1 %v31763_v0  ;;  %v22688_v3 = vunpack.i.l.bf16 %v27751_v29  ;;  %v8465_v57 = vsel %vm3179_vm10, %v22683_v44, %v22673_v50  ;;  %v8472_v46 = vsel %vm3179_vm10, %v22684_v33, %v22678_v32 }
 0x49f   :  { %10511 = vperm.xlu0 %21723, %v5231_v6   ;;  %19241 = vmatmul.mubr.msk.f32.gmra.mrb[54].mxu0 %vm783_vm6, %v27990_v37  ;;  %v20729_v59 = vpack.c.bf16 %v7932_v34, %v7925_v60  ;;  %v7939_v6 = vsel %vm2649_vm9, %v22594_v61, %v22748_v1  ;;  %v7946_v39 = vsel %vm2649_vm9, %v31831_v51, %v22749_v27  ;;  %v22703_v50 = vunpack.i.l.bf16 %v27788_v55 }
 0x4a0   :  { %8237 = vmatprep.mubr.f32.mxu0 %v31763_v0  ;;  %v20755_v22 = vpack.c.bf16 %v8473_v9, %v8466_v18  ;;  %v20733_v61 = vpack.c.bf16 %v7946_v39, %v7939_v6  ;;  %v8463_v27 = vsel %vm3179_vm10, %v22693_v56, %v22694_v40  ;;  %v20757_v41 = vpack.c.bf16 %v8472_v46, %v8465_v57 }
 0x4a1   :  { %v28028_v63 = vpop.permute.xlu1 %22781  ;;  %v22777_v20 = vpop.permute.xlu0 %22776  ;;  %19230 = vmatmul.mubr.msk.f32.vlgmr.msra.gmra.mrb[56].mxu1 %vm783_vm6, %v27643_v28  ;;  %v8456_v28 = vsel %vm3179_vm10, %v22688_v3, %v22689_v14  ;;  %v22713_v44 = vunpack.i.l.bf16 %v27818_v42  ;;  %v22709_v33 = vunpack.i.h.bf16 %v27820_v26  ;;  %v8455_v6 = vsel %vm3179_vm10, %v22703_v50, %v22688_v3 }
 0x4a2   :  { %v22779_v34 = vunpack.i.h.bf16 %v22777_v20  ;;  %v22778_v60 = vunpack.i.l.bf16 %v22777_v20  ;;  %20730 = vmatpush1.bf16.msra.mxu1 %v20729_v59  ;;  %7804 = vmatprep.mubr.f32.mxu1 %v31763_v0  ;;  %v8462_v51 = vsel %vm3179_vm10, %v22704_v16, %v22693_v56 }
 0x4a3   :  { %20732 = vmatprep.subr.bf16.mxu1 %v20731_v7  ;;  %19246 = vmatmul.mubr.msk.f32.vlgmr.msra.gmra.mrb[56].mxu0 %vm783_vm6, %v27895_v12  ;;  %v22708_v7 = vunpack.i.l.bf16 %v27820_v26 }
 0x4a4   :  { %20754 = vmatpush1.bf16.msra.mxu0 %v20753_v62  ;;  %8243 = vmatprep.mubr.f32.mxu0 %v31763_v0  ;;  %v20743_v1 = vpack.c.bf16 %v22779_v34, %v22778_v60  ;;  %v20767_v62 = vpack.c.bf16 %v8463_v27, %v8456_v28  ;;  %v7929_v39 = vsel %vm2649_vm9, %v22609_v15, %v22778_v60  ;;  %v22738_v28 = vunpack.i.l.bf16 %v27912_v5  ;;  %v28116_v27 = vld [vmem:[%s31642_s3 + $0xa0] sm:$0xff] }
 0x4a5   :  { %20756 = vmatprep.subr.bf16.mxu0 %v20755_v22  ;;  %19231 = vmatmul.mubr.msk.f32.gmra.mrb[58].mxu1 %vm783_vm6, %v27684_v38  ;;  %v28055_v32 = vpop.permute.xlu1 %22791  ;;  %v22714_v38 = vunpack.i.h.bf16 %v27818_v42  ;;  %v8470_v57 = vsel %vm3179_vm10, %v22708_v7, %v22709_v33 }
 0x4a6   :  { %v28057_v18 = vpop.permute.xlu0 %22786  ;;  %20734 = vmatpush1.bf16.msra.mxu1 %v20733_v61  ;;  %7810 = vmatprep.mubr.f32.mxu1 %v31763_v0 }
 0x4a7   :  { %19247 = vmatmul.mubr.msk.f32.gmra.mrb[58].mxu0 %vm783_vm6, %v27941_v13  ;;  %20744 = vmatprep.subr.bf16.mxu1 %v20743_v1  ;;  %v8477_v3 = vsel %vm3179_vm10, %v22713_v44, %v22714_v38  ;;  %v22733_v1 = vunpack.i.l.bf16 %v27849_v36 }
 0x4a8   :  { %20758 = vmatpush1.bf16.msra.mxu0 %v20757_v41  ;;  %8249 = vmatprep.mubr.f32.mxu0 %v31763_v0  ;;  %v20771_v41 = vpack.c.bf16 %v8477_v3, %v8470_v57  ;;  %v28164_v3 = vld [vmem:[%s31642_s3 + $0xb0] sm:$0xff] }
 0x4a9   :  { %20768 = vmatprep.subr.bf16.mxu0 %v20767_v62  ;;  %19232 = vmatmul.mubr.msk.f32.gmra.mrb[60].mxu1 %vm783_vm6, %v27709_v52  ;;  %v28071_v59 = vpop.permute.xlu1 %22796  ;;  %v7936_v52 = vsel %vm2649_vm9, %v22614_v25, %v22779_v34  ;;  %v22719_v25 = vunpack.i.h.bf16 %v27830_v21  ;;  %v22739_v34 = vunpack.i.h.bf16 %v27912_v5 }
 0x4aa   :  { %v22802_v9 = vpop.permute.xlu0 %22801  ;;  %7816 = vmatprep.mubr.f32.mxu1 %v31763_v0  ;;  %v20745_v61 = vpack.c.bf16 %v7936_v52, %v7929_v39  ;;  %v22799_v29 = vunpack.i.h.bf16 %v28071_v59 }
 0x4ab   :  { %19248 = vmatmul.mubr.msk.f32.gmra.mrb[60].mxu0 %vm783_vm6, %v27968_v24  ;;  %v22804_v55 = vunpack.i.h.bf16 %v22802_v9  ;;  %v22803_v20 = vunpack.i.l.bf16 %v22802_v9 }
 0x4ac   :  { %8255 = vmatprep.mubr.f32.mxu0 %v31763_v0 }
 0x4ad   :  { %19233 = vmatmul.mubr.msk.f32.gmra.mrb[62].mxu1 %vm783_vm6, %v27732_v47  ;;  %v28093_v56 = vpop.permute.xlu1 %22811  ;;  %v7950_v60 = vsel %vm2649_vm9, %v22634_v23, %v22804_v55  ;;  %v7943_v46 = vsel %vm2649_vm9, %v22629_v8, %v22803_v20  ;;  %v20747_v22 = vpack.c.bf16 %v22804_v55, %v22803_v20  ;;  %v20769_v8 = vpack.c.bf16 %v8462_v51, %v8455_v6  ;;  %v28145_v6 = vld [vmem:[%s31642_s3 + $0xa8] sm:$0xff] }
 0x4ae   :  { %v28095_v49 = vpop.permute.xlu0 %22806  ;;  %8148 = vmatprep.mubr.f32.mxu1 %v31763_v0  ;;  %v22734_v23 = vunpack.i.h.bf16 %v27849_v36  ;;  %v20749_v62 = vpack.c.bf16 %v7950_v60, %v7943_v46  ;;  %v8476_v55 = vsel %vm3179_vm10, %v22719_v25, %v22713_v44  ;;  %vm18029_vm9 = vcmask 244736  }
 0x4af   :  { %v22809_v47 = vunpack.i.h.bf16 %v28095_v49  ;;  %v22808_v15 = vunpack.i.l.bf16 %v28095_v49  ;;  %19249 = vmatmul.mubr.msk.f32.gmra.mrb[62].mxu0 %vm783_vm6, %v27990_v37  ;;  %v22774_v49 = vunpack.i.h.bf16 %v27982_v11 }
 0x4b0   :  { %8587 = vmatprep.mubr.f32.mxu0 %v31763_v0  ;;  %v8980_v51 = vsel %vm3709_vm11, %v22733_v1, %v22734_v23 }
 0x4b1   :  { %v8454_v17 = vsel %vm3179_vm10, %v22808_v15, %v22703_v50  ;;  %v8461_v58 = vsel %vm3179_vm10, %v22809_v47, %v22704_v16  ;;  %19242 = vmatmul.mubr.msk.f32.vlgmr.msra.gmra.mrb[48].mxu1 %vm783_vm6, %v27895_v12  ;;  %v8469_v16 = vsel %vm3179_vm10, %v22718_v48, %v22708_v7  ;;  %v8987_v7 = vsel %vm3709_vm11, %v22738_v28, %v22739_v34 }
 0x4b2   :  { %20746 = vmatpush1.bf16.msra.mxu1 %v20745_v61  ;;  %8154 = vmatprep.mubr.f32.mxu1 %v31763_v0  ;;  %v28129_v9 = vpop.permute.xlu1 %22821  ;;  %v28131_v50 = vpop.permute.xlu0 %22816  ;;  %v20759_v20 = vpack.c.bf16 %v8461_v58, %v8454_v17  ;;  %v20773_v44 = vpack.c.bf16 %v8476_v55, %v8469_v16  ;;  %v20783_v52 = vpack.c.bf16 %v8987_v7, %v8980_v51  ;;  %v22744_v61 = vunpack.i.h.bf16 %v27900_v2 }
 0x4b3   :  { %19258 = vmatmul.mubr.msk.f32.vlgmr.msra.gmra.mrb[48].mxu0 %vm783_vm6, %v28116_v27  ;;  %20748 = vmatprep.subr.bf16.mxu1 %v20747_v22  ;;  %v22743_v22 = vunpack.i.l.bf16 %v27900_v2  ;;  %v22759_v17 = vunpack.i.h.bf16 %v27972_v43  ;;  %v22758_v58 = vunpack.i.l.bf16 %v27972_v43 }
 0x4b4   :  { %20770 = vmatpush1.bf16.msra.mxu0 %v20769_v8  ;;  %8593 = vmatprep.mubr.f32.mxu0 %v31763_v0  ;;  %v8986_v21 = vsel %vm3709_vm11, %v22744_v61, %v22738_v28  ;;  %v22773_v28 = vunpack.i.l.bf16 %v27982_v11 }
 0x4b5   :  { %20772 = vmatprep.subr.bf16.mxu0 %v20771_v41  ;;  %19243 = vmatmul.mubr.msk.f32.gmra.mrb[50].mxu1 %vm783_vm6, %v27941_v13  ;;  %v8979_v55 = vsel %vm3709_vm11, %v22743_v22, %v22733_v1  ;;  %v22764_v1 = vunpack.i.h.bf16 %v27962_v45 }
 0x4b6   :  { %20750 = vmatpush1.bf16.msra.mxu1 %v20749_v62  ;;  %8160 = vmatprep.mubr.f32.mxu1 %v31763_v0  ;;  %v28183_v62 = vld [vmem:[%s31642_s3 + $0xb8] sm:$0xff] }
 0x4b7   :  { %19259 = vmatmul.mubr.msk.f32.gmra.mrb[50].mxu0 %vm783_vm6, %v28145_v6  ;;  %20760 = vmatprep.subr.bf16.mxu1 %v20759_v20  ;;  %v28158_v39 = vpop.permute.xlu1 %22831  ;;  %v22827_v57 = vpop.permute.xlu0 %22826  ;;  %v31832_v20 = vunpack.i.h.bf16 %v27620_v4  ;;  %v22763_v4 = vunpack.i.l.bf16 %v27962_v45  ;;  %v9000_v54 = vsel %vm3709_vm11, %v22764_v1, %v22758_v58 }
 0x4b8   :  { %20774 = vmatpush1.bf16.msra.mxu0 %v20773_v44  ;;  %8599 = vmatprep.mubr.f32.mxu0 %v31763_v0  ;;  %v22829_v60 = vunpack.i.h.bf16 %v22827_v57  ;;  %v22828_v46 = vunpack.i.l.bf16 %v22827_v57  ;;  %v31833_v44 = vunpack.i.h.bf16 %v27664_v53  ;;  %v22768_v57 = vunpack.i.l.bf16 %v27998_v35 }
 0x4b9   :  { %20784 = vmatprep.subr.bf16.mxu0 %v20783_v52  ;;  %19244 = vmatmul.mubr.msk.f32.gmra.mrb[52].mxu1 %vm783_vm6, %v27968_v24  ;;  %v8453_v7 = vsel %vm3179_vm10, %v31832_v20, %v22808_v15  ;;  %v22769_v52 = vunpack.i.h.bf16 %v27998_v35  ;;  %v20785_v20 = vpack.c.bf16 %v8986_v21, %v8979_v55 }
 0x4ba   :  { %8166 = vmatprep.mubr.f32.mxu1 %v31763_v0  ;;  %v8468_v2 = vsel %vm3179_vm10, %v22828_v46, %v22718_v48  ;;  %v8475_v16 = vsel %vm3179_vm10, %v22829_v60, %v22719_v25  ;;  %v8460_v51 = vsel %vm3179_vm10, %v31833_v44, %v22809_v47  ;;  %v22754_v25 = vunpack.i.h.bf16 %v27934_v30 }
 0x4bb   :  { %19260 = vmatmul.mubr.msk.f32.gmra.mrb[52].mxu0 %vm783_vm6, %v28164_v3  ;;  %v28175_v8 = vpop.permute.xlu1 %22841  ;;  %v28177_v41 = vpop.permute.xlu0 %22836  ;;  %v22753_v48 = vunpack.i.l.bf16 %v27934_v30  ;;  %v20763_v53 = vpack.c.bf16 %v8475_v16, %v8468_v2  ;;  %v9001_v47 = vsel %vm3709_vm11, %v22758_v58, %v22759_v17  ;;  %v20761_v22 = vpack.c.bf16 %v8460_v51, %v8453_v7 }
 0x4bc   :  { %8605 = vmatprep.mubr.f32.mxu0 %v31763_v0  ;;  %v8467_v61 = vsel %vm3179_vm10, %v22674_v31, %v22828_v46  ;;  %v31834_v2 = vunpack.i.h.bf16 %v27715_v19 }
 0x4bd   :  { %19245 = vmatmul.mubr.msk.f32.gmra.mrb[54].mxu1 %vm783_vm6, %v27990_v37  ;;  %v8994_v7 = vsel %vm3709_vm11, %v22753_v48, %v22754_v25  ;;  %v8993_v44 = vsel %vm3709_vm11, %v22763_v4, %v22753_v48 }
 0x4be   :  { %8326 = vmatprep.mubr.f32.mxu1 %v31763_v0  ;;  %v8474_v16 = vsel %vm3179_vm10, %v31834_v2, %v22829_v60  ;;  %v20787_v19 = vpack.c.bf16 %v9001_v47, %v8994_v7  ;;  %v8991_v60 = vsel %vm3709_vm11, %v22773_v28, %v22774_v49  ;;  %v20789_v55 = vpack.c.bf16 %v9000_v54, %v8993_v44 }
 0x4bf   :  { %19261 = vmatmul.mubr.msk.f32.gmra.mrb[54].mxu0 %vm783_vm6, %v28183_v62  ;;  %v28216_v15 = vpop.permute.xlu1 %22851  ;;  %v20765_v31 = vpack.c.bf16 %v8474_v16, %v8467_v61  ;;  %v22793_v61 = vunpack.i.l.bf16 %v28055_v32  ;;  %v22789_v2 = vunpack.i.h.bf16 %v28057_v18  ;;  %v22788_v16 = vunpack.i.l.bf16 %v28057_v18 }
 0x4c0   :  { %8765 = vmatprep.mubr.f32.mxu0 %v31763_v0  ;;  %v28222_v45 = vpop.permute.xlu0 %22846 }
 0x4c1   :  { %19250 = vmatmul.mubr.msk.f32.vlgmr.msra.gmra.mrb[56].mxu1 %vm783_vm6, %v27895_v12  ;;  %v8984_v12 = vsel %vm3709_vm11, %v22768_v57, %v22769_v52 }
 0x4c2   :  { %20762 = vmatpush1.bf16.msra.mxu1 %v20761_v22  ;;  %8332 = vmatprep.mubr.f32.mxu1 %v31763_v0  ;;  %v20799_v48 = vpack.c.bf16 %v8991_v60, %v8984_v12  ;;  %v22794_v22 = vunpack.i.h.bf16 %v28055_v32 }
 0x4c3   :  { %20764 = vmatprep.subr.bf16.mxu1 %v20763_v53  ;;  %19266 = vmatmul.mubr.msk.f32.vlgmr.msra.gmra.mrb[56].mxu0 %vm783_vm6, %v28116_v27  ;;  %v22784_v53 = vunpack.i.h.bf16 %v28028_v63 }
 0x4c4   :  { %20786 = vmatpush1.bf16.msra.mxu0 %v20785_v20  ;;  %8771 = vmatprep.mubr.f32.mxu0 %v31763_v0  ;;  %v28247_v46 = vpop.permute.xlu1 %22861  ;;  %v9005_v10 = vsel %vm3709_vm11, %v22793_v61, %v22794_v22 }
 0x4c5   :  { %20788 = vmatprep.subr.bf16.mxu0 %v20787_v19  ;;  %19251 = vmatmul.mubr.msk.f32.gmra.mrb[58].mxu1 %vm783_vm6, %v27941_v13  ;;  %v22857_v58 = vpop.permute.xlu0 %22856  ;;  %v22783_v13 = vunpack.i.l.bf16 %v28028_v63  ;;  %v8990_v20 = vsel %vm3709_vm11, %v22784_v53, %v22773_v28  ;;  %v8998_v28 = vsel %vm3709_vm11, %v22788_v16, %v22789_v2 }
 0x4c6   :  { %20766 = vmatpush1.bf16.msra.mxu1 %v20765_v31  ;;  %v22859_v51 = vunpack.i.h.bf16 %v22857_v58  ;;  %v22858_v21 = vunpack.i.l.bf16 %v22857_v58  ;;  %8338 = vmatprep.mubr.f32.mxu1 %v31763_v0  ;;  %v28306_v58 = vld [vmem:[%s31642_s3 + $0xc0] sm:$0xff] }
 0x4c7   :  { %19267 = vmatmul.mubr.msk.f32.gmra.mrb[58].mxu0 %vm783_vm6, %v28145_v6 }
 0x4c8   :  { %20790 = vmatpush1.bf16.msra.mxu0 %v20789_v55  ;;  %8777 = vmatprep.mubr.f32.mxu0 %v31763_v0  ;;  %v28255_v1 = vpop.permute.xlu1 %22871  ;;  %v20775_v4 = vpack.c.bf16 %v22859_v51, %v22858_v21  ;;  %v8464_v7 = vsel %vm3179_vm10, %v22694_v40, %v22859_v51  ;;  %v8457_v44 = vsel %vm3179_vm10, %v22689_v14, %v22858_v21  ;;  %v22798_v14 = vunpack.i.l.bf16 %v28071_v59 }
 0x4c9   :  { %20800 = vmatprep.subr.bf16.mxu0 %v20799_v48  ;;  %19252 = vmatmul.mubr.msk.f32.gmra.mrb[60].mxu1 %vm783_vm6, %v27968_v24  ;;  %v28261_v47 = vpop.permute.xlu0 %22866  ;;  %v8983_v24 = vsel %vm3709_vm11, %v22783_v13, %v22768_v57  ;;  %v22819_v40 = vunpack.i.h.bf16 %v28131_v50  ;;  %v20777_v60 = vpack.c.bf16 %v8464_v7, %v8457_v44  ;;  %v22814_v21 = vunpack.i.h.bf16 %v28093_v56 }
 0x4ca   :  { %8344 = vmatprep.mubr.f32.mxu1 %v31763_v0  ;;  %20776 = vmatprep.subr.bf16.mxu1 %v20775_v4  ;;  %v20801_v42 = vpack.c.bf16 %v8990_v20, %v8983_v24  ;;  %v8997_v7 = vsel %vm3709_vm11, %v22798_v14, %v22788_v16  ;;  %v9004_v44 = vsel %vm3709_vm11, %v22799_v29, %v22793_v61  ;;  %v28327_v20 = vld [vmem:[%s31642_s3 + $0xc8] sm:$0xff] }
 0x4cb   :  { %19268 = vmatmul.mubr.msk.f32.gmra.mrb[60].mxu0 %vm783_vm6, %v28164_v3  ;;  %v20803_v24 = vpack.c.bf16 %v9005_v10, %v8998_v28 }
 0x4cc   :  { %8783 = vmatprep.mubr.f32.mxu0 %v31763_v0  ;;  %v28271_v63 = vpop.permute.xlu1 %22876 }
 0x4cd   :  { %19253 = vmatmul.mubr.msk.f32.gmra.mrb[62].mxu1 %vm783_vm6, %v27990_v37  ;;  %v22882_v54 = vpop.permute.xlu0 %22881  ;;  %v22818_v37 = vunpack.i.l.bf16 %v28131_v50 }
 0x4ce   :  { %v22884_v19 = vunpack.i.h.bf16 %v22882_v54  ;;  %v22883_v31 = vunpack.i.l.bf16 %v22882_v54  ;;  %8676 = vmatprep.mubr.f32.mxu1 %v31763_v0 }
 0x4cf   :  { %19269 = vmatmul.mubr.msk.f32.gmra.mrb[62].mxu0 %vm783_vm6, %v28183_v62  ;;  %v9515_v16 = vsel %vm559_vm4, %v22818_v37, %v22819_v40 }
 0x4d0   :  { %v8478_v57 = vsel %vm3179_vm10, %v22714_v38, %v22884_v19  ;;  %v8471_v12 = vsel %vm3179_vm10, %v22709_v33, %v22883_v31  ;;  %9115 = vmatprep.mubr.f32.mxu0 %v31763_v0  ;;  %v28308_v55 = vpop.permute.xlu1 %22891  ;;  %v20779_v51 = vpack.c.bf16 %v22884_v19, %v22883_v31  ;;  %v22813_v38 = vunpack.i.l.bf16 %v28093_v56 }
 0x4d1   :  { %19262 = vmatmul.mubr.msk.f32.vlgmr.msra.gmra.mrb[48].mxu1 %vm783_vm6, %v28116_v27  ;;  %v22887_v26 = vpop.permute.xlu0 %22886  ;;  %v20781_v4 = vpack.c.bf16 %v8478_v57, %v8471_v12  ;;  %v20805_v31 = vpack.c.bf16 %v9004_v44, %v8997_v7  ;;  %vm18095_vm10 = vcmask 64512  }
 0x4d2   :  { %20778 = vmatpush1.bf16.msra.mxu1 %v20777_v60  ;;  %v22889_v33 = vunpack.i.h.bf16 %v22887_v26  ;;  %v22888_v48 = vunpack.i.l.bf16 %v22887_v26  ;;  %8682 = vmatprep.mubr.f32.mxu1 %v31763_v0  ;;  %v9508_v28 = vsel %vm559_vm4, %v22813_v38, %v22814_v21  ;;  %v22824_v60 = vunpack.i.h.bf16 %v28129_v9 }
 0x4d3   :  { %19278 = vmatmul.mubr.msk.f32.vlgmr.msra.gmra.mrb[48].mxu0 %vm783_vm6, %v28306_v58  ;;  %20780 = vmatprep.subr.bf16.mxu1 %v20779_v51  ;;  %v22823_v51 = vunpack.i.l.bf16 %v28129_v9  ;;  %v22839_v26 = vunpack.i.h.bf16 %v28177_v41  ;;  %v28371_v9 = vld [vmem:[%s31642_s3 + $0xd8] sm:$0xff] }
 0x4d4   :  { %20802 = vmatpush1.bf16.msra.mxu0 %v20801_v42  ;;  %9121 = vmatprep.mubr.f32.mxu0 %v31763_v0  ;;  %v8982_v61 = vsel %vm3709_vm11, %v22888_v48, %v22783_v13  ;;  %v8989_v19 = vsel %vm3709_vm11, %v22889_v33, %v22784_v53  ;;  %v20815_v13 = vpack.c.bf16 %v9515_v16, %v9508_v28  ;;  %v28352_v53 = vld [vmem:[%s31642_s3 + $0xd0] sm:$0xff]  ;;  %v22833_v16 = vunpack.i.l.bf16 %v28158_v39 }
 0x4d5   :  { %20804 = vmatprep.subr.bf16.mxu0 %v20803_v24  ;;  %19263 = vmatmul.mubr.msk.f32.gmra.mrb[50].mxu1 %vm783_vm6, %v28145_v6  ;;  %v28337_v54 = vpop.permute.xlu1 %22901  ;;  %v20791_v57 = vpack.c.bf16 %v8989_v19, %v8982_v61  ;;  %v22834_v24 = vunpack.i.h.bf16 %v28158_v39  ;;  %v8981_v61 = vsel %vm3709_vm11, %v22734_v23, %v22888_v48  ;;  %v8988_v19 = vsel %vm3709_vm11, %v22739_v34, %v22889_v33 }
 0x4d6   :  { %20782 = vmatpush1.bf16.msra.mxu1 %v20781_v4  ;;  %v28343_v10 = vpop.permute.xlu0 %22896  ;;  %8688 = vmatprep.mubr.f32.mxu1 %v31763_v0  ;;  %v22838_v4 = vunpack.i.l.bf16 %v28177_v41  ;;  %v9507_v36 = vsel %vm559_vm4, %v22823_v51, %v22813_v38  ;;  %v9514_v5 = vsel %vm559_vm4, %v22824_v60, %v22818_v37  ;;  %v22843_v34 = vunpack.i.l.bf16 %v28175_v8 }
 0x4d7   :  { %19279 = vmatmul.mubr.msk.f32.gmra.mrb[50].mxu0 %vm783_vm6, %v28327_v20  ;;  %20792 = vmatprep.subr.bf16.mxu1 %v20791_v57  ;;  %v22844_v33 = vunpack.i.h.bf16 %v28175_v8  ;;  %v22853_v37 = vunpack.i.l.bf16 %v28216_v15  ;;  %v22849_v38 = vunpack.i.h.bf16 %v28222_v45  ;;  %v22848_v48 = vunpack.i.l.bf16 %v28222_v45 }
 0x4d8   :  { %20806 = vmatpush1.bf16.msra.mxu0 %v20805_v31  ;;  %9127 = vmatprep.mubr.f32.mxu0 %v31763_v0  ;;  %v20817_v8 = vpack.c.bf16 %v9514_v5, %v9507_v36  ;;  %v9522_v60 = vsel %vm559_vm4, %v22833_v16, %v22834_v24  ;;  %v22899_v11 = vunpack.i.h.bf16 %v28343_v10  ;;  %v22898_v35 = vunpack.i.l.bf16 %v28343_v10 }
 0x4d9   :  { %20816 = vmatprep.subr.bf16.mxu0 %v20815_v13  ;;  %19264 = vmatmul.mubr.msk.f32.gmra.mrb[52].mxu1 %vm783_vm6, %v28164_v3  ;;  %v28356_v12 = vpop.permute.xlu1 %22911  ;;  %v20793_v13 = vpack.c.bf16 %v8988_v19, %v8981_v61  ;;  %v9512_v30 = vsel %vm559_vm4, %v22848_v48, %v22849_v38 }
 0x4da   :  { %v22907_v42 = vpop.permute.xlu0 %22906  ;;  %8694 = vmatprep.mubr.f32.mxu1 %v31763_v0  ;;  %v22914_v56 = vunpack.i.h.bf16 %v28356_v12 }
 0x4db   :  { %19280 = vmatmul.mubr.msk.f32.gmra.mrb[52].mxu0 %vm783_vm6, %v28352_v53  ;;  %v22909_v7 = vunpack.i.h.bf16 %v22907_v42  ;;  %v22908_v44 = vunpack.i.l.bf16 %v22907_v42  ;;  %v9521_v42 = vsel %vm559_vm4, %v22843_v34, %v22833_v16  ;;  %v22864_v34 = vunpack.i.h.bf16 %v28247_v46 }
 0x4dc   :  { %9133 = vmatprep.mubr.f32.mxu0 %v31763_v0 }
 0x4dd   :  { %19265 = vmatmul.mubr.msk.f32.gmra.mrb[54].mxu1 %vm783_vm6, %v28183_v62  ;;  %v28381_v31 = vpop.permute.xlu1 %22921  ;;  %v8996_v28 = vsel %vm3709_vm11, %v22908_v44, %v22798_v14  ;;  %v9003_v57 = vsel %vm3709_vm11, %v22909_v7, %v22799_v29  ;;  %v22854_v14 = vunpack.i.h.bf16 %v28216_v15  ;;  %v9529_v29 = vsel %vm559_vm4, %v22838_v4, %v22839_v26 }
 0x4de   :  { %v28394_v23 = vpop.permute.xlu0 %22916  ;;  %8854 = vmatprep.mubr.f32.mxu1 %v31763_v0  ;;  %v20795_v59 = vpack.c.bf16 %v9003_v57, %v8996_v28  ;;  %v8995_v28 = vsel %vm3709_vm11, %v22754_v25, %v22908_v44  ;;  %v9002_v61 = vsel %vm3709_vm11, %v22759_v17, %v22909_v7  ;;  %v20819_v57 = vpack.c.bf16 %v9529_v29, %v9522_v60 }
 0x4df   :  { %19281 = vmatmul.mubr.msk.f32.gmra.mrb[54].mxu0 %vm783_vm6, %v28371_v9  ;;  %v9519_v43 = vsel %vm559_vm4, %v22853_v37, %v22854_v14  ;;  %v20797_v17 = vpack.c.bf16 %v9002_v61, %v8995_v28  ;;  %v22869_v29 = vunpack.i.h.bf16 %v28261_v47 }
 0x4e0   :  { %9293 = vmatprep.mubr.f32.mxu0 %v31763_v0  ;;  %v20831_v5 = vpack.c.bf16 %v9519_v43, %v9512_v30 }
 0x4e1   :  { %19270 = vmatmul.mubr.msk.f32.vlgmr.msra.gmra.mrb[56].mxu1 %vm783_vm6, %v28116_v27  ;;  %v28413_v51 = vpop.permute.xlu1 %22931  ;;  %v9528_v27 = vsel %vm559_vm4, %v22844_v33, %v22838_v4  ;;  %v22863_v33 = vunpack.i.l.bf16 %v28247_v46 }
 0x4e2   :  { %20794 = vmatpush1.bf16.msra.mxu1 %v20793_v13  ;;  %v22927_v19 = vpop.permute.xlu0 %22926  ;;  %8860 = vmatprep.mubr.f32.mxu1 %v31763_v0  ;;  %v20821_v25 = vpack.c.bf16 %v9528_v27, %v9521_v42  ;;  %v22868_v13 = vunpack.i.l.bf16 %v28261_v47  ;;  %v9518_v42 = vsel %vm559_vm4, %v22864_v34, %v22853_v37  ;;  %v22934_v61 = vunpack.i.h.bf16 %v28413_v51 }
 0x4e3   :  { %20796 = vmatprep.subr.bf16.mxu1 %v20795_v59  ;;  %19286 = vmatmul.mubr.msk.f32.vlgmr.msra.gmra.mrb[56].mxu0 %vm783_vm6, %v28306_v58  ;;  %v22929_v16 = vunpack.i.h.bf16 %v22927_v19  ;;  %v22928_v36 = vunpack.i.l.bf16 %v22927_v19  ;;  %v22873_v59 = vunpack.i.l.bf16 %v28255_v1  ;;  %v9511_v46 = vsel %vm559_vm4, %v22863_v33, %v22848_v48 }
 0x4e4   :  { %20818 = vmatpush1.bf16.msra.mxu0 %v20817_v8  ;;  %9299 = vmatprep.mubr.f32.mxu0 %v31763_v0  ;;  %v9526_v28 = vsel %vm559_vm4, %v22868_v13, %v22869_v29  ;;  %v22933_v19 = vunpack.i.l.bf16 %v28413_v51  ;;  %v22894_v51 = vunpack.i.h.bf16 %v28308_v55 }
 0x4e5   :  { %20820 = vmatprep.subr.bf16.mxu0 %v20819_v57  ;;  %19271 = vmatmul.mubr.msk.f32.gmra.mrb[58].mxu1 %vm783_vm6, %v28145_v6  ;;  %v20807_v44 = vpack.c.bf16 %v22929_v16, %v22928_v36  ;;  %v22874_v6 = vunpack.i.h.bf16 %v28255_v1  ;;  %v8992_v27 = vsel %vm3709_vm11, %v22774_v49, %v22929_v16  ;;  %v8985_v37 = vsel %vm3709_vm11, %v22769_v52, %v22928_v36 }
 0x4e6   :  { %v28435_v4 = vpop.permute.xlu1 %22941  ;;  %v28437_v7 = vpop.permute.xlu0 %22936  ;;  %20798 = vmatpush1.bf16.msra.mxu1 %v20797_v17  ;;  %8866 = vmatprep.mubr.f32.mxu1 %v31763_v0  ;;  %v22879_v57 = vunpack.i.h.bf16 %v28271_v63  ;;  %v20833_v49 = vpack.c.bf16 %v9518_v42, %v9511_v46  ;;  %v20809_v16 = vpack.c.bf16 %v8992_v27, %v8985_v37  ;;  %v22893_v17 = vunpack.i.l.bf16 %v28308_v55  ;;  %v28542_v27 = vld [vmem:[%s31642_s3 + $0xf0] sm:$0xff] }
 0x4e7   :  { %19287 = vmatmul.mubr.msk.f32.gmra.mrb[58].mxu0 %vm783_vm6, %v28327_v20  ;;  %20808 = vmatprep.subr.bf16.mxu1 %v20807_v44  ;;  %v9533_v48 = vsel %vm559_vm4, %v22873_v59, %v22874_v6  ;;  %v22939_v30 = vunpack.i.h.bf16 %v28437_v7  ;;  %v22938_v43 = vunpack.i.l.bf16 %v28437_v7  ;;  %v9006_v44 = vsel %vm3709_vm11, %v22794_v22, %v22934_v61  ;;  %v28521_v22 = vld [vmem:[%s31642_s3 + $0xe8] sm:$0xff] }
 0x4e8   :  { %20822 = vmatpush1.bf16.msra.mxu0 %v20821_v25  ;;  %9305 = vmatprep.mubr.f32.mxu0 %v31763_v0  ;;  %v20835_v36 = vpack.c.bf16 %v9533_v48, %v9526_v28  ;;  %v8999_v25 = vsel %vm3709_vm11, %v22789_v2, %v22933_v19  ;;  %v10043_v2 = vsel %vm4768_vm12, %v22898_v35, %v22899_v11  ;;  %v22904_v37 = vunpack.i.h.bf16 %v28337_v54 }
 0x4e9   :  { %20832 = vmatprep.subr.bf16.mxu0 %v20831_v5  ;;  %19272 = vmatmul.mubr.msk.f32.gmra.mrb[60].mxu1 %vm783_vm6, %v28164_v3  ;;  %v22878_v3 = vunpack.i.l.bf16 %v28271_v63  ;;  %v20811_v5 = vpack.c.bf16 %v22934_v61, %v22933_v19  ;;  %v9510_v32 = vsel %vm559_vm4, %v22938_v43, %v22863_v33  ;;  %v9517_v18 = vsel %vm559_vm4, %v22939_v30, %v22864_v34 }
 0x4ea   :  { %v28454_v8 = vpop.permute.xlu1 %22951  ;;  %8872 = vmatprep.mubr.f32.mxu1 %v31763_v0  ;;  %v20823_v34 = vpack.c.bf16 %v9517_v18, %v9510_v32  ;;  %v10036_v28 = vsel %vm4768_vm12, %v22893_v17, %v22894_v51  ;;  %v10042_v18 = vsel %vm4768_vm12, %v22904_v37, %v22898_v35  ;;  %vm18141_vm11 = vcmask 293888  }
 0x4eb   :  { %19288 = vmatmul.mubr.msk.f32.gmra.mrb[60].mxu0 %vm783_vm6, %v28352_v53  ;;  %v28456_v60 = vpop.permute.xlu0 %22946  ;;  %v9525_v52 = vsel %vm559_vm4, %v22878_v3, %v22868_v13  ;;  %v9532_v13 = vsel %vm559_vm4, %v22879_v57, %v22873_v59  ;;  %v20813_v59 = vpack.c.bf16 %v9006_v44, %v8999_v25  ;;  %v20847_v48 = vpack.c.bf16 %v10043_v2, %v10036_v28 }
 0x4ec   :  { %9311 = vmatprep.mubr.f32.mxu0 %v31763_v0  ;;  %v20837_v33 = vpack.c.bf16 %v9532_v13, %v9525_v52  ;;  %v22924_v52 = vunpack.i.h.bf16 %v28381_v31  ;;  %v22919_v25 = vunpack.i.h.bf16 %v28394_v23  ;;  %v22944_v44 = vunpack.i.h.bf16 %v28435_v4 }
 0x4ed   :  { %19273 = vmatmul.mubr.msk.f32.gmra.mrb[62].mxu1 %vm783_vm6, %v28183_v62  ;;  %v28490_v62 = vld [vmem:[%s31642_s3 + $0xe0] sm:$0xff]  ;;  %v9509_v13 = vsel %vm559_vm4, %v22814_v21, %v22938_v43  ;;  %v22953_v35 = vunpack.i.l.bf16 %v28454_v8  ;;  %v22954_v39 = vunpack.i.h.bf16 %v28454_v8  ;;  %v22948_v41 = vunpack.i.l.bf16 %v28456_v60 }
 0x4ee   :  { %9204 = vmatprep.mubr.f32.mxu1 %v31763_v0  ;;  %v28503_v46 = vpop.permute.xlu1 %22961 }
 0x4ef   :  { %19289 = vmatmul.mubr.msk.f32.gmra.mrb[62].mxu0 %vm783_vm6, %v28371_v9  ;;  %v28505_v42 = vpop.permute.xlu0 %22956  ;;  %v28636_v47 = vpack.c.bf16 %v22954_v39, %v22953_v35 }
 0x4f0   :  { %9643 = vmatprep.mubr.f32.mxu0 %v31763_v0  ;;  %v22959_v1 = vunpack.i.h.bf16 %v28505_v42 }
 0x4f1   :  { %19282 = vmatmul.mubr.msk.f32.vlgmr.msra.gmra.mrb[48].mxu1 %vm783_vm6, %v28306_v58 }
 0x4f2   :  { %20810 = vmatpush1.bf16.msra.mxu1 %v20809_v16  ;;  %9210 = vmatprep.mubr.f32.mxu1 %v31763_v0  ;;  %v28535_v61 = vpop.permute.xlu1 %22971  ;;  %v22923_v16 = vunpack.i.l.bf16 %v28381_v31  ;;  %v28564_v31 = vld [vmem:[%s31642_s3 + $0xf8] sm:$0xff] }
 0x4f3   :  { %19298 = vmatmul.mubr.msk.f32.vlgmr.msra.gmra.mrb[48].mxu0 %vm783_vm6, %v28490_v62  ;;  %20812 = vmatprep.subr.bf16.mxu1 %v20811_v5  ;;  %v28537_v19 = vpop.permute.xlu0 %22966  ;;  %v22943_v5 = vunpack.i.l.bf16 %v28435_v4  ;;  %v9516_v4 = vsel %vm559_vm4, %v22819_v40, %v22939_v30  ;;  %v9531_v40 = vsel %vm559_vm4, %v22944_v44, %v22879_v57  ;;  %v9530_v30 = vsel %vm559_vm4, %v22839_v26, %v22944_v44 }
 0x4f4   :  { %20834 = vmatpush1.bf16.msra.mxu0 %v20833_v49  ;;  %9649 = vmatprep.mubr.f32.mxu0 %v31763_v0  ;;  %v22903_v49 = vunpack.i.l.bf16 %v28337_v54  ;;  %v22913_v54 = vunpack.i.l.bf16 %v28356_v12  ;;  %v20825_v43 = vpack.c.bf16 %v9516_v4, %v9509_v13  ;;  %v22974_v13 = vunpack.i.h.bf16 %v28535_v61 }
 0x4f5   :  { %20836 = vmatprep.subr.bf16.mxu0 %v20835_v36  ;;  %19283 = vmatmul.mubr.msk.f32.gmra.mrb[50].mxu1 %vm783_vm6, %v28327_v20  ;;  %v22918_v36 = vunpack.i.l.bf16 %v28394_v23  ;;  %v9524_v50 = vsel %vm559_vm4, %v22943_v5, %v22878_v3  ;;  %v9523_v7 = vsel %vm559_vm4, %v22834_v24, %v22943_v5  ;;  %v22949_v24 = vunpack.i.h.bf16 %v28456_v60 }
 0x4f6   :  { %20814 = vmatpush1.bf16.msra.mxu1 %v20813_v59  ;;  %9216 = vmatprep.mubr.f32.mxu1 %v31763_v0  ;;  %v10035_v32 = vsel %vm4768_vm12, %v22903_v49, %v22893_v17  ;;  %v10049_v2 = vsel %vm4768_vm12, %v22923_v16, %v22913_v54  ;;  %v20827_v26 = vpack.c.bf16 %v9531_v40, %v9524_v50  ;;  %v22973_v4 = vunpack.i.l.bf16 %v28535_v61 }
 0x4f7   :  { %19299 = vmatmul.mubr.msk.f32.gmra.mrb[50].mxu0 %vm783_vm6, %v28521_v22  ;;  %20824 = vmatprep.subr.bf16.mxu1 %v20823_v34  ;;  %v10056_v59 = vsel %vm4768_vm12, %v22924_v52, %v22918_v36  ;;  %v10057_v21 = vsel %vm4768_vm12, %v22918_v36, %v22919_v25  ;;  %v20849_v28 = vpack.c.bf16 %v10042_v18, %v10035_v32  ;;  %v22963_v36 = vunpack.i.l.bf16 %v28503_v46 }
 0x4f8   :  { %20838 = vmatpush1.bf16.msra.mxu0 %v20837_v33  ;;  %9655 = vmatprep.mubr.f32.mxu0 %v31763_v0  ;;  %v28578_v33 = vpop.permute.xlu1 %22981  ;;  %v28580_v34 = vpop.permute.xlu0 %22976  ;;  %v20853_v37 = vpack.c.bf16 %v10056_v59, %v10049_v2  ;;  %v20829_v49 = vpack.c.bf16 %v9530_v30, %v9523_v7  ;;  %v28622_v60 = vsel %vm559_vm4, %v22869_v29, %v22953_v35  ;;  %v22969_v32 = vunpack.i.h.bf16 %v28537_v19 }
 0x4f9   :  { %20848 = vmatprep.subr.bf16.mxu0 %v20847_v48  ;;  %19284 = vmatmul.mubr.msk.f32.gmra.mrb[52].mxu1 %vm783_vm6, %v28352_v53  ;;  %v22984_v63 = vunpack.i.h.bf16 %v28578_v33  ;;  %v22983_v3 = vunpack.i.l.bf16 %v28578_v33  ;;  %v22979_v57 = vunpack.i.h.bf16 %v28580_v34  ;;  %v22978_v17 = vunpack.i.l.bf16 %v28580_v34  ;;  %v23017_v34 = vld [vmem:[%s31644_s5 + $0x1a0] ss:$52 sps:$4 sm:$0xff]  }
 0x4fa   :  { %9222 = vmatprep.mubr.f32.mxu1 %v31763_v0  ;;  %v10050_v48 = vsel %vm4768_vm12, %v22913_v54, %v22914_v56  ;;  %v28634_v16 = vsel %vm559_vm4, %v22874_v6, %v22954_v39  ;;  %v20839_v29 = vpack.c.bf16 %v22949_v24, %v22948_v41  ;;  %v22964_v54 = vunpack.i.h.bf16 %v28503_v46 }
 0x4fb   :  { %19300 = vmatmul.mubr.msk.f32.gmra.mrb[52].mxu0 %vm783_vm6, %v28542_v27  ;;  %v20851_v8 = vpack.c.bf16 %v10057_v21, %v10050_v48  ;;  %v10047_v52 = vsel %vm4768_vm12, %v22983_v3, %v22984_v63  ;;  %v22958_v6 = vunpack.i.l.bf16 %v28505_v42  ;;  %v22968_v18 = vunpack.i.l.bf16 %v28537_v19 }
 0x4fc   :  { %9661 = vmatprep.mubr.f32.mxu0 %v31763_v0  ;;  %v28639_v44 = vpop.permute.xlu1 %22991  ;;  %v28641_v5 = vpop.permute.xlu0 %22986  ;;  %v9520_v61 = vsel %vm559_vm4, %v22854_v14, %v22949_v24  ;;  %v9513_v19 = vsel %vm559_vm4, %v22849_v38, %v22948_v41  ;;  %v28669_v50 = vsel %vm4768_vm12, %v22899_v11, %v22963_v36  ;;  %v28684_v45 = vsel %vm4768_vm12, %v22963_v36, %v22964_v54 }
 0x4fd   :  { %19285 = vmatmul.mubr.msk.f32.gmra.mrb[54].mxu1 %vm783_vm6, %v28371_v9  ;;  %v22994_v46 = vunpack.i.h.bf16 %v28639_v44  ;;  %v22993_v42 = vunpack.i.l.bf16 %v28639_v44  ;;  %v22989_v2 = vunpack.i.h.bf16 %v28641_v5  ;;  %v22988_v59 = vunpack.i.l.bf16 %v28641_v5  ;;  %v23031_v5 = vld [vmem:[%s31644_s5 + $0xc] ss:$52 sps:$4 sm:$0xff]  }
 0x4fe   :  { %9382 = vmatprep.mubr.f32.mxu1 %v31763_v0  ;;  %v28676_v40 = vsel %vm4768_vm12, %v22894_v51, %v22958_v6  ;;  %v28681_v15 = vsel %vm4768_vm12, %v22958_v6, %v22959_v1  ;;  %v10046_v10 = vsel %vm4768_vm12, %v22964_v54, %v22983_v3  ;;  %v10039_v14 = vsel %vm4768_vm12, %v22959_v1, %v22978_v17  ;;  %v31840_v54 = vld [vmem:[#allocation27_spill] sm:$0xff]  ;;  %v31841_v6 = vld [vmem:[#allocation32_spill] sm:$0xff] }
 0x4ff   :  { %19301 = vmatmul.mubr.msk.f32.gmra.mrb[54].mxu0 %vm783_vm6, %v28564_v31  ;;  %v28693_v55 = vsel %vm4768_vm12, %v22968_v18, %v22969_v32  ;;  %v28696_v38 = vsel %vm4768_vm12, %v22973_v4, %v22974_v13  ;;  %v28699_v11 = vsel %vm4768_vm12, %v22974_v13, %v22993_v42  ;;  %v28702_v51 = vsel %vm4768_vm12, %v22969_v32, %v22988_v59 }
 0x500   :  { %9821 = vmatprep.mubr.f32.mxu0 %v31763_v0  ;;  %v28704_v21 = vpop.permute.xlu0 %22996  ;;  %v10054_v7 = vsel %vm4768_vm12, %v22988_v59, %v22989_v2  ;;  %v10061_v30 = vsel %vm4768_vm12, %v22993_v42, %v22994_v46  ;;  %v20841_v35 = vpack.c.bf16 %v9520_v61, %v9513_v19  ;;  %v20857_v3 = vpack.c.bf16 %v28669_v50, %v28676_v40  ;;  %v23008_v50 = vld [vmem:[%s31644_s5 + $0x68] ss:$52 sps:$4 sm:$0xff]  }
 0x501   :  { %19290 = vmatmul.mubr.msk.f32.vlgmr.msra.gmra.mrb[56].mxu1 %vm783_vm6, %v28306_v58  ;;  %v10040_v58 = vsel %vm4768_vm12, %v22978_v17, %v22979_v57  ;;  %v20855_v17 = vpack.c.bf16 %v28684_v45, %v28681_v15  ;;  %v28724_v39 = vsel %vm4768_vm12, %v22919_v25, %v22973_v4  ;;  %v28729_v24 = vsel %vm4768_vm12, %v22914_v56, %v22968_v18  ;;  %v31835_v56 = vld [vmem:[#allocation10_spill] sm:$0xff]  ;;  %v31842_v4 = vld [vmem:[#allocation33_spill] sm:$0xff] }
 0x502   :  { %20826 = vmatpush1.bf16.msra.mxu1 %v20825_v43  ;;  %9388 = vmatprep.mubr.f32.mxu1 %v31763_v0  ;;  %v20845_v43 = vpack.c.bf16 %v28634_v16, %v28622_v60  ;;  %v20865_v41 = vpack.c.bf16 %v10046_v10, %v10039_v14  ;;  %v22998_v23 = vunpack.i.l.bf16 %v28704_v21  ;;  %v20867_v25 = vpack.c.bf16 %v10061_v30, %v10054_v7  ;;  %v28748_v16 = vld [vmem:[%s31642_s3 + $0x100] sm:$0xff]  ;;  %v31851_v15 = vld [vmem:[#allocation18_spill] sm:$0xff] }
 0x503   :  { %20828 = vmatprep.subr.bf16.mxu1 %v20827_v26  ;;  %19306 = vmatmul.mubr.msk.f32.vlgmr.msra.gmra.mrb[56].mxu0 %vm783_vm6, %v28490_v62  ;;  %v20859_v26 = vpack.c.bf16 %v28696_v38, %v28693_v55  ;;  %v31843_v30 = vld [vmem:[#allocation8_spill] sm:$0xff]  ;;  %vm17739_vm4 = vcmask 326656  }
 0x504   :  { %20850 = vmatpush1.bf16.msra.mxu0 %v20849_v28  ;;  %9827 = vmatprep.mubr.f32.mxu0 %v31763_v0  ;;  %v22999_v28 = vunpack.i.h.bf16 %v28704_v21  ;;  %v23013_v55 = vld [vmem:[%s31644_s5 + $0xd4] ss:$52 sps:$4 sm:$0xff]   ;;  %v23011_v38 = vld [vmem:[%s31644_s5 + $0xd0] ss:$52 sps:$4 sm:$0xff]   ;;  %v23022_v21 = vld [vmem:[%s31644_s5 + $0x20c] ss:$52 sps:$4 sm:$0xff]  }
 0x505   :  { %20852 = vmatprep.subr.bf16.mxu0 %v20851_v8  ;;  %19291 = vmatmul.mubr.msk.f32.gmra.mrb[58].mxu1 %vm783_vm6, %v28327_v20  ;;  %v20863_v20 = vpack.c.bf16 %v10047_v52, %v10040_v58  ;;  %v31837_v8 = vld [vmem:[#allocation16_spill] sm:$0xff]  ;;  %v31838_v58 = vld [vmem:[#allocation17_spill] sm:$0xff] }
 0x506   :  { %20830 = vmatpush1.bf16.msra.mxu1 %v20829_v49  ;;  %9394 = vmatprep.mubr.f32.mxu1 %v31763_v0  ;;  %v20871_v40 = vpack.c.bf16 %v22999_v28, %v22998_v23 }
 0x507   :  { %19307 = vmatmul.mubr.msk.f32.gmra.mrb[58].mxu0 %vm783_vm6, %v28521_v22  ;;  %20840 = vmatprep.subr.bf16.mxu1 %v20839_v29  ;;  %v31839_v29 = vld [vmem:[#allocation26_spill] sm:$0xff] }
 0x508   :  { %20854 = vmatpush1.bf16.msra.mxu0 %v20853_v37  ;;  %9833 = vmatprep.mubr.f32.mxu0 %v31763_v0  ;;  %v31836_v37 = vld [vmem:[#allocation11_spill] sm:$0xff] }
 0x509   :  { %20864 = vmatprep.subr.bf16.mxu0 %v20863_v20  ;;  %19292 = vmatmul.mubr.msk.f32.gmra.mrb[60].mxu1 %vm783_vm6, %v28352_v53  ;;  %v28688_v53 = vpop.permute.xlu1 %23001 }
 0x50a   :  { %9400 = vmatprep.mubr.f32.mxu1 %v31763_v0 }
 0x50b   :  { %19308 = vmatmul.mubr.msk.f32.gmra.mrb[60].mxu0 %vm783_vm6, %v28542_v27 }
 0x50c   :  { %9839 = vmatprep.mubr.f32.mxu0 %v31763_v0 }
 0x50d   :  { %19293 = vmatmul.mubr.msk.f32.gmra.mrb[62].mxu1 %vm783_vm6, %v28371_v9  ;;  %v20869_v9 = vpack.c.bf16 %v28699_v11, %v28702_v51  ;;  %v28801_v11 = vld [vmem:[%s31642_s3 + $0x110] sm:$0xff] }
 0x50e   :  { %9732 = vmatprep.mubr.f32.mxu1 %v31763_v0  ;;  %v31855_v51 = vld [vmem:[#allocation34_spill] sm:$0xff] }
 0x50f   :  { %19309 = vmatmul.mubr.msk.f32.gmra.mrb[62].mxu0 %vm783_vm6, %v28564_v31 }
 0x510   :  { %v5241_v12 = vpop.permute.xlu1 %5240  ;;  %10171 = vmatprep.mubr.f32.mxu0 %v31763_v0 }
 0x511   :  { %v5261_v48 = vadd.f32 %v5241_v12, %v31835_v56  ;;  %v5262_v49 = vadd.f32 %v5241_v12, %v31836_v37  ;;  %v5263_v60 = vadd.f32 %v5241_v12, %v31837_v8  ;;  %v5264_v52 = vadd.f32 %v5241_v12, %v31838_v58  ;;  %v5236_v18 = vpop.permute.xlu0 %5235  ;;  %19302 = vmatmul.mubr.msk.f32.vlgmr.msra.gmra.mrb[48].mxu1 %vm783_vm6, %v28490_v62  ;;  %v31844_v56 = vld [vmem:[#allocation9_spill] sm:$0xff]  ;;  %v31847_v58 = vld [vmem:[#allocation22_spill] sm:$0xff] }
 0x512   :  { %v5265_v36 = vadd.f32 %v5241_v12, %v31839_v29  ;;  %v5266_v1 = vadd.f32 %v5241_v12, %v31840_v54  ;;  %v5267_v13 = vadd.f32 %v5241_v12, %v31841_v6  ;;  %v5268_v32 = vadd.f32 %v5241_v12, %v31842_v4  ;;  %20842 = vmatpush1.bf16.msra.mxu1 %v20841_v35  ;;  %v31846_v8 = vld [vmem:[#allocation13_spill] sm:$0xff] }
 0x513   :  { %v5293_v20 = vmax.f32 %v5261_v48, 0.0  ;;  %v5294_v42 = vmax.f32 %v5262_v49, 0.0  ;;  %v5295_v59 = vmax.f32 %v5263_v60, 0.0  ;;  %v5296_v61 = vmax.f32 %v5264_v52, 0.0  ;;  %9738 = vmatprep.mubr.f32.mxu1 %v31763_v0  ;;  %20844 = vmatprep.subr.bf16.mxu1 %v28636_v47  ;;  %v31845_v48 = vld [vmem:[#allocation12_spill] sm:$0xff] }
 0x514   :  { %v5297_v19 = vmax.f32 %v5265_v36, 0.0  ;;  %v5298_v10 = vmax.f32 %v5266_v1, 0.0  ;;  %v5299_v14 = vmax.f32 %v5267_v13, 0.0  ;;  %v5300_v7 = vmax.f32 %v5268_v32, 0.0  ;;  %19318 = vmatmul.mubr.msk.f32.vlgmr.msra.gmra.mrb[48].mxu0 %vm783_vm6, %v28748_v16  ;;  %v28767_v35 = vld [vmem:[%s31642_s3 + $0x108] sm:$0xff] }
 0x515   :  { %v5253_v12 = vadd.f32 %v5236_v18, %v31843_v30  ;;  %v5254_v37 = vadd.f32 %v5236_v18, %v31844_v56  ;;  %v5255_v49 = vadd.f32 %v5236_v18, %v31845_v48  ;;  %v5256_v60 = vadd.f32 %v5236_v18, %v31846_v8  ;;  %20866 = vmatpush1.bf16.msra.mxu0 %v20865_v41  ;;  %v31848_v47 = vld [vmem:[#allocation24_spill] sm:$0xff]  ;;  %v31850_v1 = vld [vmem:[#allocation29_spill] sm:$0xff] }
 0x516   :  { %v5257_v52 = vadd.f32 %v5236_v18, %v31847_v58  ;;  %v5258_v29 = vadd.f32 %v5236_v18, %v31848_v47  ;;  %v31849_v36 = vld [vmem:[#allocation28_spill] sm:$0xff]  ;;  %v5260_v6 = vadd.f32 %v5236_v18, %v31850_v1  ;;  %20868 = vmatprep.subr.bf16.mxu0 %v20867_v25  ;;  %19303 = vmatmul.mubr.msk.f32.gmra.mrb[50].mxu1 %vm783_vm6, %v28521_v22  ;;  %v5251_v58 = vpop.permute.xlu1 %5250  ;;  %v5246_v1 = vpop.permute.xlu0 %5245 }
 0x517   :  { %v5259_v54 = vadd.f32 %v5236_v18, %v31849_v36  ;;  %v5285_v13 = vmax.f32 %v5253_v12, 0.0  ;;  %v5286_v4 = vmax.f32 %v5254_v37, 0.0  ;;  %v5287_v32 = vmax.f32 %v5255_v49, 0.0  ;;  %10177 = vmatprep.mubr.f32.mxu0 %v31763_v0  ;;  %20846 = vmatpush1.bf16.msra.mxu1 %v20845_v43  ;;  %v23007_v43 = vld [vmem:[%s31644_s5 + $0x4] ss:$52 sps:$4 sm:$0xff]  }
 0x518   :  { %v5288_v30 = vmax.f32 %v5256_v60, 0.0  ;;  %v5289_v41 = vmax.f32 %v5257_v52, 0.0  ;;  %v5290_v56 = vmax.f32 %v5258_v29, 0.0  ;;  %v5292_v8 = vmax.f32 %v5260_v6, 0.0  ;;  %19319 = vmatmul.mubr.msk.f32.gmra.mrb[50].mxu0 %vm783_vm6, %v28767_v35  ;;  %20856 = vmatprep.subr.bf16.mxu1 %v20855_v17  ;;  %v31852_v17 = vld [vmem:[#allocation19_spill] sm:$0xff] }
 0x519   :  { %v5291_v48 = vmax.f32 %v5259_v54, 0.0  ;;  %v28778_v18 = vpack.c.bf16 %v5293_v20, %v5285_v13  ;;  %v28780_v25 = vpack.c.bf16 %v5294_v42, %v5286_v4  ;;  %v5319_v12 = vpack.c.bf16 %v5295_v59, %v5287_v32  ;;  %20870 = vmatpush1.bf16.msra.mxu0 %v20869_v9  ;;  %v31853_v42 = vld [vmem:[#allocation23_spill] sm:$0xff]  ;;  %9744 = vmatprep.mubr.f32.mxu1 %v31763_v0 }
 0x51a   :  { %v5320_v37 = vpack.c.bf16 %v5296_v61, %v5288_v30  ;;  %v5321_v49 = vpack.c.bf16 %v5297_v19, %v5289_v41  ;;  %v5322_v60 = vpack.c.bf16 %v5298_v10, %v5290_v56  ;;  %v5324_v47 = vpack.c.bf16 %v5300_v7, %v5292_v8  ;;  %v31854_v61 = vld [vmem:[#allocation25_spill] sm:$0xff]  ;;  %v31856_v10 = vld [vmem:[#allocation35_spill] sm:$0xff]  ;;  %v31857_v7 = vld [vmem:[#allocation38_spill] sm:$0xff]  ;;  %19304 = vmatmul.mubr.msk.f32.gmra.mrb[52].mxu1 %vm783_vm6, %v28542_v27 }
 0x51b   :  { %v5323_v52 = vpack.c.bf16 %v5299_v14, %v5291_v48  ;;  %5333 = vst [vmem:[#allocation3] sm:$0xff] %v28778_v18  ;;  %5334 = vst [vmem:[#allocation3 + $0x8] sm:$0xff] %v28780_v25  ;;  %v5277_v45 = vadd.f32 %v5251_v58, %v31851_v15  ;;  %v5278_v20 = vadd.f32 %v5251_v58, %v31852_v17  ;;  %v31858_v36 = vld [vmem:[#allocation39_spill] sm:$0xff]  ;;  %10183 = vmatprep.mubr.f32.mxu0 %v31763_v0  ;;  %v31859_v8 = vld [vmem:[#allocation14_spill] sm:$0xff] }
 0x51c   :  { %5335 = vst [vmem:[#allocation3 + $0x10] sm:$0xff] %v5319_v12  ;;  %5336 = vst [vmem:[#allocation3 + $0x18] sm:$0xff] %v5320_v37  ;;  %v5279_v59 = vadd.f32 %v5251_v58, %v31853_v42  ;;  %v5280_v19 = vadd.f32 %v5251_v58, %v31854_v61  ;;  %v5281_v9 = vadd.f32 %v5251_v58, %v31855_v51  ;;  %9750 = vmatprep.mubr.f32.mxu1 %v31763_v0  ;;  %v31860_v12 = vld [vmem:[#allocation15_spill] sm:$0xff]  ;;  %v31866_v61 = vld [vmem:[#allocation37_spill] sm:$0xff] }
 0x51d   :  { %5337 = vst [vmem:[#allocation3 + $0x20] sm:$0xff] %v5321_v49  ;;  %5338 = vst [vmem:[#allocation3 + $0x28] sm:$0xff] %v5322_v60  ;;  %v5282_v14 = vadd.f32 %v5251_v58, %v31856_v10  ;;  %v5283_v29 = vadd.f32 %v5251_v58, %v31857_v7  ;;  %v5284_v54 = vadd.f32 %v5251_v58, %v31858_v36  ;;  %v5309_v6 = vmax.f32 %v5277_v45, 0.0  ;;  %v31861_v49 = vld [vmem:[#allocation20_spill] sm:$0xff]  ;;  %v28822_v15 = vld [vmem:[%s31642_s3 + $0x118] sm:$0xff]  ;;  %s24134_s3 = smov 56  }
 0x51e   :  { %5339 = vst [vmem:[#allocation3 + $0x30] sm:$0xff] %v5323_v52  ;;  %5341 = vst.msk [vmem:[#allocation3 + $0x38] sm:$0xff] %vm5340_vm13, %v5324_v47  ;;  %v5310_v13 = vmax.f32 %v5278_v20, 0.0  ;;  %v5311_v4 = vmax.f32 %v5279_v59, 0.0  ;;  %v5312_v32 = vmax.f32 %v5280_v19, 0.0  ;;  %v5313_v30 = vmax.f32 %v5281_v9, 0.0  ;;  %19320 = vmatmul.mubr.msk.f32.gmra.mrb[52].mxu0 %vm783_vm6, %v28801_v11  ;;  %12031 = vmatprep.subr.bf16.mxu0 %v23007_v43 }
 0x51f   :  { %v5314_v41 = vmax.f32 %v5282_v14, 0.0  ;;  %v5315_v56 = vmax.f32 %v5283_v29, 0.0  ;;  %v5316_v48 = vmax.f32 %v5284_v54, 0.0  ;;  %v5269_v58 = vadd.f32 %v5246_v1, %v31859_v8  ;;  %v31862_v52 = vld [vmem:[#allocation21_spill] sm:$0xff]  ;;  %10189 = vmatprep.mubr.f32.mxu0 %v31763_v0  ;;  %v31863_v45 = vld [vmem:[#allocation30_spill] sm:$0xff]  ;;  %v31864_v20 = vld [vmem:[#allocation31_spill] sm:$0xff]  ;;  %19305 = vmatmul.mubr.msk.f32.gmra.mrb[54].mxu1 %vm783_vm6, %v28564_v31 }
 0x520   :  { %v5270_v37 = vadd.f32 %v5246_v1, %v31860_v12  ;;  %v5271_v60 = vadd.f32 %v5246_v1, %v31861_v49  ;;  %v5272_v47 = vadd.f32 %v5246_v1, %v31862_v52  ;;  %v5273_v17 = vadd.f32 %v5246_v1, %v31863_v45  ;;  %v31865_v43 = vld [vmem:[#allocation36_spill] sm:$0xff]  ;;  %9910 = vmatprep.mubr.f32.mxu1 %v31763_v0  ;;  %v23043_v45 = vld [vmem:[%s31644_s5 + $0xdc] ss:$52 sps:$4 sm:$0xff]  }
 0x521   :  { %v5274_v42 = vadd.f32 %v5246_v1, %v31864_v20  ;;  %v5275_v59 = vadd.f32 %v5246_v1, %v31865_v43  ;;  %v5276_v19 = vadd.f32 %v5246_v1, %v31866_v61  ;;  %v5301_v51 = vmax.f32 %v5269_v58, 0.0  ;;  %v23005_v58 = vld [vmem:[%s31644_s5] ss:$52 sps:$4 sm:$0xff]   ;;  %v23041_v20 = vld [vmem:[%s31644_s5 + $0xd8] ss:$52 sps:$4 sm:$0xff]  }
 0x522   :  { %v5302_v9 = vmax.f32 %v5270_v37, 0.0  ;;  %v5303_v10 = vmax.f32 %v5271_v60, 0.0  ;;  %v5304_v14 = vmax.f32 %v5272_v47, 0.0  ;;  %v5305_v7 = vmax.f32 %v5273_v17, 0.0  ;;  %19321 = vmatmul.mubr.msk.f32.gmra.mrb[54].mxu0 %vm783_vm6, %v28822_v15  ;;  %v23046_v17 = vld [vmem:[%s31644_s5 + $0x414] ss:$52 sps:$4 sm:$0xff]  }
 0x523   :  { %v5306_v29 = vmax.f32 %v5274_v42, 0.0  ;;  %v5307_v36 = vmax.f32 %v5275_v59, 0.0  ;;  %v5308_v54 = vmax.f32 %v5276_v19, 0.0  ;;  %v28833_v8 = vpack.c.bf16 %v5309_v6, %v5301_v51  ;;  %10349 = vmatprep.mubr.f32.mxu0 %v31763_v0  ;;  %19310 = vmatmul.mubr.msk.f32.vlgmr.msra.gmra.mrb[56].mxu1 %vm783_vm6, %v28490_v62  ;;  %v23010_v6 = vld [vmem:[%s31644_s5 + $0x6c] ss:$52 sps:$4 sm:$0xff]  }
 0x524   :  { %v28835_v12 = vpack.c.bf16 %v5310_v13, %v5302_v9  ;;  %v5327_v1 = vpack.c.bf16 %v5311_v4, %v5303_v10  ;;  %v5328_v49 = vpack.c.bf16 %v5312_v32, %v5304_v14  ;;  %v5329_v37 = vpack.c.bf16 %v5313_v30, %v5305_v7  ;;  %20858 = vmatpush1.bf16.msra.mxu1 %v20857_v3  ;;  %v23014_v3 = vld [vmem:[%s31644_s5 + $0x138] ss:$52 sps:$4 sm:$0xff]   ;;  %v23029_v32 = vld [vmem:[%s31644_s5 + $0x8] ss:$52 sps:$4 sm:$0xff]   ;;  %v23047_v59 = vld [vmem:[%s31644_s5 + $0x140] ss:$52 sps:$4 sm:$0xff]  }
 0x525   :  { %v5330_v60 = vpack.c.bf16 %v5314_v41, %v5306_v29  ;;  %v5331_v52 = vpack.c.bf16 %v5315_v56, %v5307_v36  ;;  %v5332_v47 = vpack.c.bf16 %v5316_v48, %v5308_v54  ;;  %5342 = vst [vmem:[#allocation3 + $0x40] sm:$0xff] %v28833_v8  ;;  %9916 = vmatprep.mubr.f32.mxu1 %v31763_v0  ;;  %v23026_v13 = vld [vmem:[%s31644_s5 + $0x2d8] ss:$52 sps:$4 sm:$0xff]   ;;  %v23037_v30 = vld [vmem:[%s31644_s5 + $0x74] ss:$52 sps:$4 sm:$0xff]  }
 0x526   :  { %5343 = vst [vmem:[#allocation3 + $0x48] sm:$0xff] %v28835_v12  ;;  %5344 = vst [vmem:[#allocation3 + $0x50] sm:$0xff] %v5327_v1  ;;  %20860 = vmatprep.subr.bf16.mxu1 %v20859_v26  ;;  %19326 = vmatmul.mubr.msk.f32.vlgmr.msra.gmra.mrb[56].mxu0 %vm783_vm6, %v28748_v16  ;;  %v20861_v62 = vpack.c.bf16 %v28724_v39, %v28729_v24  ;;  %v23004_v39 = vunpack.i.h.bf16 %v28688_v53  ;;  %v10048_v24 = vsel %vm4768_vm12, %v22984_v63, %v22999_v28  ;;  %v23023_v28 = vld [vmem:[%s31644_s5 + $0x270] ss:$52 sps:$4 sm:$0xff]   ;;  %v23032_v41 = vld [vmem:[%s31644_s5 + $0x340] ss:$52 sps:$4 sm:$0xff]  }
 0x527   :  { %5345 = vst [vmem:[#allocation3 + $0x58] sm:$0xff] %v5328_v49  ;;  %5346 = vst [vmem:[#allocation3 + $0x60] sm:$0xff] %v5329_v37  ;;  %12032 = vmatpush1.bf16.msra.mxu0 %v23005_v58  ;;  %10355 = vmatprep.mubr.f32.mxu0 %v31763_v0  ;;  %v10041_v26 = vsel %vm4768_vm12, %v22979_v57, %v22998_v23  ;;  %v23028_v23 = vld [vmem:[%s31644_s5 + $0x2dc] ss:$52 sps:$4 sm:$0xff]   ;;  %v23034_v4 = vld [vmem:[%s31644_s5 + $0x344] ss:$52 sps:$4 sm:$0xff]  }
 0x528   :  { %5347 = vst [vmem:[#allocation3 + $0x68] sm:$0xff] %v5330_v60  ;;  %5348 = vst [vmem:[#allocation3 + $0x70] sm:$0xff] %v5331_v52  ;;  %19311 = vmatmul.mubr.msk.f32.gmra.mrb[58].mxu1 %vm783_vm6, %v28521_v22  ;;  %12033 = vmatprep.subr.bf16.mxu0 %v23010_v6  ;;  %v23016_v22 = vld [vmem:[%s31644_s5 + $0x13c] ss:$52 sps:$4 sm:$0xff]   ;;  %v20873_v33 = vpack.c.bf16 %v10048_v24, %v10041_v26  ;;  %v10062_v63 = vsel %vm4768_vm12, %v22994_v46, %v23004_v39  ;;  %v23040_v56 = vld [vmem:[%s31644_s5 + $0x3ac] ss:$52 sps:$4 sm:$0xff]  }
 0x529   :  { %5349 = vst.msk [vmem:[#allocation3 + $0x78] sm:$0xff] %vm5340_vm13, %v5332_v47  ;;  %20862 = vmatpush1.bf16.msra.mxu1 %v20861_v62  ;;  %9922 = vmatprep.mubr.f32.mxu1 %v31763_v0  ;;  %v23020_v46 = vld [vmem:[%s31644_s5 + $0x208] ss:$52 sps:$4 sm:$0xff]   ;;  %v23035_v48 = vld [vmem:[%s31644_s5 + $0x70] ss:$52 sps:$4 sm:$0xff]  }
 0x52a   :  { %19327 = vmatmul.mubr.msk.f32.gmra.mrb[58].mxu0 %vm783_vm6, %v28767_v35  ;;  %20872 = vmatprep.subr.bf16.mxu1 %v20871_v40  ;;  %v23049_v42 = vld [vmem:[%s31644_s5 + $0x144] ss:$52 sps:$4 sm:$0xff]   ;;  %v23052_v43 = vld [vmem:[%s31644_s5 + $0x47c] ss:$52 sps:$4 sm:$0xff]   ;;  %v23055_v61 = vld [vmem:[%s31644_s5 + $0x1ac] ss:$52 sps:$4 sm:$0xff]  }
 0x52b   :  { %12034 = vmatpush1.bf16.msra.mxu0 %v23008_v50  ;;  %10361 = vmatprep.mubr.f32.mxu0 %v31763_v0  ;;  %v23053_v19 = vld [vmem:[%s31644_s5 + $0x1a8] ss:$52 sps:$4 sm:$0xff]   ;;  %v23064_v9 = vld [vmem:[%s31644_s5 + $0x54c] ss:$52 sps:$4 sm:$0xff]   ;;  %v23073_v36 = vld [vmem:[%s31644_s5 + $0x2e4] ss:$52 sps:$4 sm:$0xff]  }
 0x52c   :  { %19312 = vmatmul.mubr.msk.f32.gmra.mrb[60].mxu1 %vm783_vm6, %v28542_v27  ;;  %12035 = vmatprep.subr.bf16.mxu0 %v23013_v55  ;;  %v23003_v27 = vunpack.i.l.bf16 %v28688_v53  ;;  %v23019_v53 = vld [vmem:[%s31644_s5 + $0x1a4] ss:$52 sps:$4 sm:$0xff]   ;;  %v23061_v51 = vld [vmem:[%s31644_s5 + $0x214] ss:$52 sps:$4 sm:$0xff]   ;;  %v23067_v10 = vld [vmem:[%s31644_s5 + $0x27c] ss:$52 sps:$4 sm:$0xff]  }
 0x52d   :  { %9928 = vmatprep.mubr.f32.mxu1 %v31763_v0  ;;  %v23062_v14 = vld [vmem:[%s31644_s5 + $0x548] ss:$52 sps:$4 sm:$0xff]   ;;  %v23065_v29 = vld [vmem:[%s31644_s5 + $0x278] ss:$52 sps:$4 sm:$0xff]   ;;  %v23068_v54 = vld [vmem:[%s31644_s5 + $0x5b0] ss:$52 sps:$4 sm:$0xff]  }
 0x52e   :  { %19328 = vmatmul.mubr.msk.f32.gmra.mrb[60].mxu0 %vm783_vm6, %v28801_v11  ;;  %v20875_v57 = vpack.c.bf16 %v23004_v39, %v23003_v27  ;;  %v23070_v7 = vld [vmem:[%s31644_s5 + $0x5b4] ss:$52 sps:$4 sm:$0xff]   ;;  %v23076_v1 = vld [vmem:[%s31644_s5 + $0x61c] ss:$52 sps:$4 sm:$0xff]   ;;  %v23079_v58 = vld [vmem:[%s31644_s5 + $0x34c] ss:$52 sps:$4 sm:$0xff]  }
 0x52f   :  { %12036 = vmatpush1.bf16.msra.mxu0 %v23011_v38  ;;  %10367 = vmatprep.mubr.f32.mxu0 %v31763_v0  ;;  %v23071_v49 = vld [vmem:[%s31644_s5 + $0x2e0] ss:$52 sps:$4 sm:$0xff]   ;;  %v23074_v37 = vld [vmem:[%s31644_s5 + $0x618] ss:$52 sps:$4 sm:$0xff]   ;;  %v23077_v52 = vld [vmem:[%s31644_s5 + $0x348] ss:$52 sps:$4 sm:$0xff]  }
 0x530   :  { %19313 = vmatmul.mubr.msk.f32.gmra.mrb[62].mxu1 %vm783_vm6, %v28564_v31  ;;  %12037 = vmatprep.subr.bf16.mxu0 %v23016_v22  ;;  %v10055_v31 = vsel %vm4768_vm12, %v22989_v2, %v23003_v27  ;;  %v23025_v2 = vld [vmem:[%s31644_s5 + $0x274] ss:$52 sps:$4 sm:$0xff]   ;;  %v23103_v60 = vld [vmem:[%s31644_s5 + $0x684] ss:$52 sps:$4 sm:$0xff]   ;;  %v23109_v62 = vld [vmem:[%s31644_s5 + $0x6ec] ss:$52 sps:$4 sm:$0xff]  }
 0x531   :  { %10260 = vmatprep.mubr.f32.mxu1 %v31763_v0  ;;  %v20877_v44 = vpack.c.bf16 %v10062_v63, %v10055_v31  ;;  %v23082_v47 = vld [vmem:[%s31644_s5 + $0x3b4] ss:$52 sps:$4 sm:$0xff]   ;;  %v23080_v50 = vld [vmem:[%s31644_s5 + $0x3b0] ss:$52 sps:$4 sm:$0xff]   ;;  %v23083_v22 = vld [vmem:[%s31644_s5 + $0x418] ss:$52 sps:$4 sm:$0xff]  }
 0x532   :  { %19329 = vmatmul.mubr.msk.f32.gmra.mrb[62].mxu0 %vm783_vm6, %v28822_v15  ;;  %v23101_v6 = vld [vmem:[%s31644_s5 + $0x680] ss:$52 sps:$4 sm:$0xff]   ;;  %v23085_v40 = vld [vmem:[%s31644_s5 + $0x41c] ss:$52 sps:$4 sm:$0xff]  }
 0x533   :  { %12038 = vmatpush1.bf16.msra.mxu0 %v23014_v3  ;;  %12063 = vmatprep.mubr.bf16.mxu0 %v28780_v25  ;;  %v23107_v55 = vld [vmem:[%s31644_s5 + $0x6e8] ss:$52 sps:$4 sm:$0xff]   ;;  %v23088_v3 = vld [vmem:[%s31644_s5 + $0x484] ss:$52 sps:$4 sm:$0xff]   ;;  %v23086_v24 = vld [vmem:[%s31644_s5 + $0x480] ss:$52 sps:$4 sm:$0xff]  }
 0x534   :  { %19322 = vmatmul.mubr.msk.f32.vlgmr.msra.gmra.mrb[48].mxu1 %vm783_vm6, %v28748_v16  ;;  %12039 = vmatprep.subr.bf16.mxu0 %v23019_v53  ;;  %v23115_v38 = vld [vmem:[%s31644_s5 + $0x754] ss:$52 sps:$4 sm:$0xff]   ;;  %v23113_v39 = vld [vmem:[%s31644_s5 + $0x750] ss:$52 sps:$4 sm:$0xff]   ;;  %v23091_v26 = vld [vmem:[%s31644_s5 + $0x4ec] ss:$52 sps:$4 sm:$0xff]  }
 0x535   :  { %20874 = vmatpush1.bf16.msra.mxu1 %v20873_v33  ;;  %10266 = vmatprep.mubr.f32.mxu1 %v31763_v0  ;;  %v23121_v27 = vld [vmem:[%s31644_s5 + $0x7bc] ss:$52 sps:$4 sm:$0xff]   ;;  %v23119_v53 = vld [vmem:[%s31644_s5 + $0x7b8] ss:$52 sps:$4 sm:$0xff]   ;;  %v23094_v31 = vld [vmem:[%s31644_s5 + $0x554] ss:$52 sps:$4 sm:$0xff]  }
 0x536   :  { %20876 = vmatprep.subr.bf16.mxu1 %v20875_v57  ;;  %v23127_v33 = vld [vmem:[%s31644_s5 + $0x824] ss:$52 sps:$4 sm:$0xff]   ;;  %v23125_v63 = vld [vmem:[%s31644_s5 + $0x820] ss:$52 sps:$4 sm:$0xff]  }
 0x537   :  { %12040 = vmatpush1.bf16.msra.mxu0 %v23017_v34  ;;  %v23089_v34 = vld [vmem:[%s31644_s5 + $0x4e8] ss:$52 sps:$4 sm:$0xff]   ;;  %v23133_v57 = vld [vmem:[%s31644_s5 + $0x88c] ss:$52 sps:$4 sm:$0xff]  }
 0x538   :  { %19323 = vmatmul.mubr.msk.f32.gmra.mrb[50].mxu1 %vm783_vm6, %v28767_v35  ;;  %12041 = vmatprep.subr.bf16.mxu0 %v23022_v21  ;;  %v23092_v21 = vld [vmem:[%s31644_s5 + $0x550] ss:$52 sps:$4 sm:$0xff]  }
 0x539   :  { %20878 = vmatpush1.bf16.msra.mxu1 %v20877_v44  ;;  %10272 = vmatprep.mubr.f32.mxu1 %v31763_v0  ;;  %v23131_v44 = vld [vmem:[%s31644_s5 + $0x888] ss:$52 sps:$4 sm:$0xff]  }
 0x53a   :  { %12323 = vmatprep.subr.bf16.mxu1 %v23031_v5  ;;  %v23097_v5 = vld [vmem:[%s31644_s5 + $0x5bc] ss:$52 sps:$4 sm:$0xff]  }
 0x53b   :  { %12042 = vmatpush1.bf16.msra.mxu0 %v23020_v46  ;;  %v23139_v46 = vld [vmem:[%s31644_s5 + $0x8f4] ss:$52 sps:$4 sm:$0xff]  }
 0x53c   :  { %19324 = vmatmul.mubr.msk.f32.gmra.mrb[52].mxu1 %vm783_vm6, %v28801_v11  ;;  %12043 = vmatprep.subr.bf16.mxu0 %v23025_v2  ;;  %v23095_v2 = vld [vmem:[%s31644_s5 + $0x5b8] ss:$52 sps:$4 sm:$0xff]  }
 0x53d   :  { %10278 = vmatprep.mubr.f32.mxu1 %v31763_v0 }
 0x53f   :  { %12044 = vmatpush1.bf16.msra.mxu0 %v23023_v28  ;;  %v23100_v28 = vld [vmem:[%s31644_s5 + $0x624] ss:$52 sps:$4 sm:$0xff]  }
 0x540   :  { %19325 = vmatmul.mubr.msk.f32.gmra.mrb[54].mxu1 %vm783_vm6, %v28822_v15  ;;  %12045 = vmatprep.subr.bf16.mxu0 %v23028_v23  ;;  %v23137_v23 = vld [vmem:[%s31644_s5 + $0x8f0] ss:$52 sps:$4 sm:$0xff]  }
 0x541   :  { %10438 = vmatprep.mubr.f32.mxu1 %v31763_v0 }
 0x543   :  { %12046 = vmatpush1.bf16.msra.mxu0 %v23026_v13  ;;  %v23145_v13 = vld [vmem:[%s31644_s5 + $0x95c] ss:$52 sps:$4 sm:$0xff]  }
 0x544   :  { %19330 = vmatmul.mubr.msk.f32.vlgmr.msra.gmra.mrb[56].mxu1 %vm783_vm6, %v28748_v16  ;;  %12047 = vmatprep.subr.bf16.mxu0 %v23034_v4  ;;  %v23038_v16 = vld [vmem:[%s31644_s5 + $0x3a8] ss:$52 sps:$4 sm:$0xff]   ;;  %v23098_v4 = vld [vmem:[%s31644_s5 + $0x620] ss:$52 sps:$4 sm:$0xff]  }
 0x545   :  { %12324 = vmatpush1.bf16.msra.mxu1 %v23029_v32  ;;  %10444 = vmatprep.mubr.f32.mxu1 %v31763_v0  ;;  %v23106_v32 = vld [vmem:[%s31644_s5 + $0x68c] ss:$52 sps:$4 sm:$0xff]  }
 0x546   :  { %12325 = vmatprep.subr.bf16.mxu1 %v23037_v30  ;;  %v23143_v30 = vld [vmem:[%s31644_s5 + $0x958] ss:$52 sps:$4 sm:$0xff]  }
 0x547   :  { %12048 = vmatpush1.bf16.msra.mxu0 %v23032_v41  ;;  %v23151_v41 = vld [vmem:[%s31644_s5 + $0x9c4] ss:$52 sps:$4 sm:$0xff]  }
 0x548   :  { %19331 = vmatmul.mubr.msk.f32.gmra.mrb[58].mxu1 %vm783_vm6, %v28767_v35  ;;  %12049 = vmatprep.subr.bf16.mxu0 %v23040_v56  ;;  %v23044_v35 = vld [vmem:[%s31644_s5 + $0x410] ss:$52 sps:$4 sm:$0xff]   ;;  %v23104_v56 = vld [vmem:[%s31644_s5 + $0x688] ss:$52 sps:$4 sm:$0xff]  }
 0x549   :  { %12326 = vmatpush1.bf16.msra.mxu1 %v23035_v48  ;;  %10450 = vmatprep.mubr.f32.mxu1 %v31763_v0  ;;  %v23112_v48 = vld [vmem:[%s31644_s5 + $0x6f4] ss:$52 sps:$4 sm:$0xff]  }
 0x54a   :  { %12327 = vmatprep.subr.bf16.mxu1 %v23043_v45  ;;  %v23149_v45 = vld [vmem:[%s31644_s5 + $0x9c0] ss:$52 sps:$4 sm:$0xff]  }
 0x54b   :  { %12050 = vmatpush1.bf16.msra.mxu0 %v23038_v16  ;;  %v23157_v16 = vld [vmem:[%s31644_s5 + $0xa2c] ss:$52 sps:$4 sm:$0xff]  }
 0x54c   :  { %19332 = vmatmul.mubr.msk.f32.gmra.mrb[60].mxu1 %vm783_vm6, %v28801_v11  ;;  %12051 = vmatprep.subr.bf16.mxu0 %v23046_v17  ;;  %v23050_v11 = vld [vmem:[%s31644_s5 + $0x478] ss:$52 sps:$4 sm:$0xff]   ;;  %v23110_v17 = vld [vmem:[%s31644_s5 + $0x6f0] ss:$52 sps:$4 sm:$0xff]  }
 0x54d   :  { %12328 = vmatpush1.bf16.msra.mxu1 %v23041_v20  ;;  %10456 = vmatprep.mubr.f32.mxu1 %v31763_v0  ;;  %v23058_v0 = vld [vmem:[%s31644_s5 + $0x4e4] ss:$52 sps:$4 sm:$0xff]   ;;  %v23118_v20 = vld [vmem:[%s31644_s5 + $0x75c] ss:$52 sps:$4 sm:$0xff]  }
 0x54e   :  { %12329 = vmatprep.subr.bf16.mxu1 %v23049_v42  ;;  %v23116_v42 = vld [vmem:[%s31644_s5 + $0x758] ss:$52 sps:$4 sm:$0xff]  }
 0x54f   :  { %12052 = vmatpush1.bf16.msra.mxu0 %v23044_v35  ;;  %v23124_v35 = vld [vmem:[%s31644_s5 + $0x7c4] ss:$52 sps:$4 sm:$0xff]  }
 0x550   :  { %19333 = vmatmul.mubr.msk.f32.gmra.mrb[62].mxu1 %vm783_vm6, %v28822_v15  ;;  %12053 = vmatprep.subr.bf16.mxu0 %v23052_v43  ;;  %v23056_v15 = vld [vmem:[%s31644_s5 + $0x4e0] ss:$52 sps:$4 sm:$0xff]   ;;  %v23161_v43 = vld [vmem:[%s31644_s5 + $0xa90] ss:$52 sps:$4 sm:$0xff]   ;;  %vm17851_vm6 = vcmask 375808  }
 0x551   :  { %12330 = vmatpush1.bf16.msra.mxu1 %v23047_v59  ;;  %12355 = vmatprep.mubr.bf16.mxu1 %v28780_v25  ;;  %v23059_v25 = vld [vmem:[%s31644_s5 + $0x210] ss:$52 sps:$4 sm:$0xff]  }
 0x552   :  { %12331 = vmatprep.subr.bf16.mxu1 %v23055_v61  ;;  %v23169_v59 = vld [vmem:[%s31644_s5 + $0xafc] ss:$52 sps:$4 sm:$0xff]   ;;  %v23122_v61 = vld [vmem:[%s31644_s5 + $0x7c0] ss:$52 sps:$4 sm:$0xff]  }
 0x553   :  { %12054 = vmatpush1.bf16.msra.mxu0 %v23050_v11  ;;  %v23130_v11 = vld [vmem:[%s31644_s5 + $0x82c] ss:$52 sps:$4 sm:$0xff]  }
 0x554   :  { %12055 = vmatprep.subr.bf16.mxu0 %v23058_v0  ;;  %v23175_v0 = vld [vmem:[%s31644_s5 + $0xb64] ss:$52 sps:$4 sm:$0xff]  }
 0x555   :  { %12332 = vmatpush1.bf16.msra.mxu1 %v23053_v19  ;;  %v23128_v19 = vld [vmem:[%s31644_s5 + $0x828] ss:$52 sps:$4 sm:$0xff]  }
 0x556   :  { %12333 = vmatprep.subr.bf16.mxu1 %v23061_v51  ;;  %v23136_v51 = vld [vmem:[%s31644_s5 + $0x894] ss:$52 sps:$4 sm:$0xff]  }
 0x557   :  { %12056 = vmatpush1.bf16.msra.mxu0 %v23056_v15  ;;  %v23173_v15 = vld [vmem:[%s31644_s5 + $0xb60] ss:$52 sps:$4 sm:$0xff]  }
 0x558   :  { %12057 = vmatprep.subr.bf16.mxu0 %v23064_v9  ;;  %v23181_v9 = vld [vmem:[%s31644_s5 + $0xbcc] ss:$52 sps:$4 sm:$0xff]  }
 0x559   :  { %12334 = vmatpush1.bf16.msra.mxu1 %v23059_v25  ;;  %v23134_v25 = vld [vmem:[%s31644_s5 + $0x890] ss:$52 sps:$4 sm:$0xff]  }
 0x55a   :  { %12335 = vmatprep.subr.bf16.mxu1 %v23067_v10  ;;  %v23142_v10 = vld [vmem:[%s31644_s5 + $0x8fc] ss:$52 sps:$4 sm:$0xff]  }
 0x55b   :  { %12058 = vmatpush1.bf16.msra.mxu0 %v23062_v14  ;;  %v23179_v14 = vld [vmem:[%s31644_s5 + $0xbc8] ss:$52 sps:$4 sm:$0xff]  }
 0x55c   :  { %12059 = vmatprep.subr.bf16.mxu0 %v23070_v7  ;;  %v23187_v7 = vld [vmem:[%s31644_s5 + $0xc34] ss:$52 sps:$4 sm:$0xff]  }
 0x55d   :  { %12336 = vmatpush1.bf16.msra.mxu1 %v23065_v29  ;;  %v23140_v29 = vld [vmem:[%s31644_s5 + $0x8f8] ss:$52 sps:$4 sm:$0xff]  }
 0x55e   :  { %12337 = vmatprep.subr.bf16.mxu1 %v23073_v36  ;;  %v23148_v36 = vld [vmem:[%s31644_s5 + $0x964] ss:$52 sps:$4 sm:$0xff]  }
 0x55f   :  { %12060 = vmatpush1.bf16.msra.mxu0 %v23068_v54  ;;  %v23185_v54 = vld [vmem:[%s31644_s5 + $0xc30] ss:$52 sps:$4 sm:$0xff]  }
 0x560   :  { %12061 = vmatprep.subr.bf16.mxu0 %v23076_v1  ;;  %v23193_v1 = vld [vmem:[%s31644_s5 + $0xc9c] ss:$52 sps:$4 sm:$0xff]  }
 0x561   :  { %12338 = vmatpush1.bf16.msra.mxu1 %v23071_v49  ;;  %v23146_v49 = vld [vmem:[%s31644_s5 + $0x960] ss:$52 sps:$4 sm:$0xff]  }
 0x562   :  { %12339 = vmatprep.subr.bf16.mxu1 %v23079_v58  ;;  %v23154_v58 = vld [vmem:[%s31644_s5 + $0x9cc] ss:$52 sps:$4 sm:$0xff]  }
 0x563   :  { %12062 = vmatpush1.bf16.msra.mxu0 %v23074_v37  ;;  %v23191_v37 = vld [vmem:[%s31644_s5 + $0xc98] ss:$52 sps:$4 sm:$0xff]  }
 0x564   :  { %12104 = vmatprep.subr.bf16.mxu0 %v23103_v60  ;;  %v23199_v60 = vld [vmem:[%s31644_s5 + $0xd04] ss:$52 sps:$4 sm:$0xff]  }
 0x565   :  { %12340 = vmatpush1.bf16.msra.mxu1 %v23077_v52  ;;  %v23152_v52 = vld [vmem:[%s31644_s5 + $0x9c8] ss:$52 sps:$4 sm:$0xff]  }
 0x566   :  { %12064 = vmatmul.mubr.bf16.vlgmr.msra.gmra.mrb[64].mxu0 %v28778_v18  ;;  %12341 = vmatprep.subr.bf16.mxu1 %v23082_v47  ;;  %v23160_v47 = vld [vmem:[%s31644_s5 + $0xa34] ss:$52 sps:$4 sm:$0xff]  }
 0x567   :  { %12073 = vmatprep.mubr.bf16.mxu0 %v28835_v12  ;;  %12105 = vmatpush1.bf16.msra.mxu0 %v23101_v6  ;;  %v23158_v6 = vld [vmem:[%s31644_s5 + $0xa30] ss:$52 sps:$4 sm:$0xff]  }
 0x568   :  { %12106 = vmatprep.subr.bf16.mxu0 %v23109_v62  ;;  %v23166_v62 = vld [vmem:[%s31644_s5 + $0xa9c] ss:$52 sps:$4 sm:$0xff]  }
 0x569   :  { %12342 = vmatpush1.bf16.msra.mxu1 %v23080_v50  ;;  %v23164_v50 = vld [vmem:[%s31644_s5 + $0xa98] ss:$52 sps:$4 sm:$0xff]  }
 0x56a   :  { %12343 = vmatprep.subr.bf16.mxu1 %v23085_v40  ;;  %v23172_v40 = vld [vmem:[%s31644_s5 + $0xb04] ss:$52 sps:$4 sm:$0xff]  }
 0x56b   :  { %12107 = vmatpush1.bf16.msra.mxu0 %v23107_v55  ;;  %v23170_v55 = vld [vmem:[%s31644_s5 + $0xb00] ss:$52 sps:$4 sm:$0xff]  }
 0x56c   :  { %12108 = vmatprep.subr.bf16.mxu0 %v23115_v38  ;;  %v23178_v38 = vld [vmem:[%s31644_s5 + $0xb6c] ss:$52 sps:$4 sm:$0xff]  }
 0x56d   :  { %12344 = vmatpush1.bf16.msra.mxu1 %v23083_v22  ;;  %v23176_v22 = vld [vmem:[%s31644_s5 + $0xb68] ss:$52 sps:$4 sm:$0xff]  }
 0x56e   :  { %12074 = vmatmul.mubr.bf16.gmra.mrb[68].mxu0 %v28833_v8  ;;  %12345 = vmatprep.subr.bf16.mxu1 %v23088_v3  ;;  %v23184_v3 = vld [vmem:[%s31644_s5 + $0xbd4] ss:$52 sps:$4 sm:$0xff]  }
 0x56f   :  { %12109 = vmatpush1.bf16.msra.mxu0 %v23113_v39  ;;  %v23182_v39 = vld [vmem:[%s31644_s5 + $0xbd0] ss:$52 sps:$4 sm:$0xff]  }
 0x570   :  { %12110 = vmatprep.subr.bf16.mxu0 %v23121_v27  ;;  %v23190_v27 = vld [vmem:[%s31644_s5 + $0xc3c] ss:$52 sps:$4 sm:$0xff]  }
 0x571   :  { %12346 = vmatpush1.bf16.msra.mxu1 %v23086_v24  ;;  %v23188_v24 = vld [vmem:[%s31644_s5 + $0xc38] ss:$52 sps:$4 sm:$0xff]  }
 0x572   :  { %12347 = vmatprep.subr.bf16.mxu1 %v23091_v26  ;;  %v23196_v26 = vld [vmem:[%s31644_s5 + $0xca4] ss:$52 sps:$4 sm:$0xff]  }
 0x573   :  { %12111 = vmatpush1.bf16.msra.mxu0 %v23119_v53  ;;  %v23194_v53 = vld [vmem:[%s31644_s5 + $0xca0] ss:$52 sps:$4 sm:$0xff]  }
 0x574   :  { %12112 = vmatprep.subr.bf16.mxu0 %v23127_v33  ;;  %v23202_v33 = vld [vmem:[%s31644_s5 + $0xd0c] ss:$52 sps:$4 sm:$0xff]  }
 0x575   :  { %12348 = vmatpush1.bf16.msra.mxu1 %v23089_v34 }
 0x576   :  { %12349 = vmatprep.subr.bf16.mxu1 %v23094_v31 }
 0x577   :  { %12113 = vmatpush1.bf16.msra.mxu0 %v23125_v63  ;;  %v29312_v63 = vpop.permute.xlu0 %10501 }
 0x578   :  { %12114 = vmatprep.subr.bf16.mxu0 %v23133_v57 }
 0x579   :  { %12350 = vmatpush1.bf16.msra.mxu1 %v23092_v21  ;;  %v29315_v21 = vpop.permute.xlu1 %10506 }
 0x57a   :  { %12351 = vmatprep.subr.bf16.mxu1 %v23097_v5 }
 0x57b   :  { %12115 = vmatpush1.bf16.msra.mxu0 %v23131_v44 }
 0x57c   :  { %12116 = vmatprep.subr.bf16.mxu0 %v23139_v46 }
 0x57d   :  { %12352 = vmatpush1.bf16.msra.mxu1 %v23095_v2 }
 0x57e   :  { %12353 = vmatprep.subr.bf16.mxu1 %v23100_v28 }
 0x57f   :  { %12117 = vmatpush1.bf16.msra.mxu0 %v23137_v23 }
 0x580   :  { %12118 = vmatprep.subr.bf16.mxu0 %v23145_v13 }
 0x581   :  { %12354 = vmatpush1.bf16.msra.mxu1 %v23098_v4 }
 0x582   :  { %12396 = vmatprep.subr.bf16.mxu1 %v23106_v32 }
 0x583   :  { %12119 = vmatpush1.bf16.msra.mxu0 %v23143_v30 }
 0x584   :  { %12356 = vmatmul.mubr.bf16.vlgmr.msra.gmra.mrb[64].mxu1 %v28778_v18  ;;  %12120 = vmatprep.subr.bf16.mxu0 %v23151_v41  ;;  %v23155_v18 = vld [vmem:[%s31644_s5 + $0xa28] ss:$52 sps:$4 sm:$0xff]  }
 0x585   :  { %12365 = vmatprep.mubr.bf16.mxu1 %v28835_v12  ;;  %12397 = vmatpush1.bf16.msra.mxu1 %v23104_v56  ;;  %v23163_v12 = vld [vmem:[%s31644_s5 + $0xa94] ss:$52 sps:$4 sm:$0xff]  }
 0x586   :  { %12398 = vmatprep.subr.bf16.mxu1 %v23112_v48 }
 0x587   :  { %12121 = vmatpush1.bf16.msra.mxu0 %v23149_v45  ;;  %v29320_v45 = vpop.permute.xlu0 %10511 }
 0x588   :  { %12122 = vmatprep.subr.bf16.mxu0 %v23157_v16 }
 0x589   :  { %12399 = vmatpush1.bf16.msra.mxu1 %v23110_v17  ;;  %v29323_v17 = vpop.permute.xlu1 %10516 }
 0x58a   :  { %12400 = vmatprep.subr.bf16.mxu1 %v23118_v20 }
 0x58b   :  { %12123 = vmatpush1.bf16.msra.mxu0 %v23155_v18 }
 0x58c   :  { %12366 = vmatmul.mubr.bf16.gmra.mrb[68].mxu1 %v28833_v8  ;;  %12124 = vmatprep.subr.bf16.mxu0 %v23163_v12  ;;  %v23167_v8 = vld [vmem:[%s31644_s5 + $0xaf8] ss:$52 sps:$4 sm:$0xff]  }
 0x58d   :  { %12401 = vmatpush1.bf16.msra.mxu1 %v23116_v42 }
 0x58e   :  { %12402 = vmatprep.subr.bf16.mxu1 %v23124_v35 }
 0x58f   :  { %12125 = vmatpush1.bf16.msra.mxu0 %v23161_v43 }
 0x590   :  { %12126 = vmatprep.subr.bf16.mxu0 %v23169_v59 }
 0x591   :  { %12403 = vmatpush1.bf16.msra.mxu1 %v23122_v61 }
 0x592   :  { %12404 = vmatprep.subr.bf16.mxu1 %v23130_v11 }
 0x593   :  { %12127 = vmatpush1.bf16.msra.mxu0 %v23167_v8 }
 0x594   :  { %12128 = vmatprep.subr.bf16.mxu0 %v23175_v0 }
 0x595   :  { %12405 = vmatpush1.bf16.msra.mxu1 %v23128_v19 }
 0x596   :  { %12406 = vmatprep.subr.bf16.mxu1 %v23136_v51 }
 0x597   :  { %12129 = vmatpush1.bf16.msra.mxu0 %v23173_v15 }
 0x598   :  { %12130 = vmatprep.subr.bf16.mxu0 %v23181_v9 }
 0x599   :  { %12407 = vmatpush1.bf16.msra.mxu1 %v23134_v25 }
 0x59a   :  { %12408 = vmatprep.subr.bf16.mxu1 %v23142_v10 }
 0x59b   :  { %12131 = vmatpush1.bf16.msra.mxu0 %v23179_v14 }
 0x59c   :  { %12132 = vmatprep.subr.bf16.mxu0 %v23187_v7  ;;  %v10618_v7 = vld [vmem:[#allocation3 + $0x18] sm:$0xff] }
 0x59d   :  { %12409 = vmatpush1.bf16.msra.mxu1 %v23140_v29 }
 0x59e   :  { %12410 = vmatprep.subr.bf16.mxu1 %v23148_v36 }
 0x59f   :  { %12133 = vmatpush1.bf16.msra.mxu0 %v23185_v54 }
 0x5a0   :  { %12134 = vmatprep.subr.bf16.mxu0 %v23193_v1 }
 0x5a1   :  { %12411 = vmatpush1.bf16.msra.mxu1 %v23146_v49 }
 0x5a2   :  { %12412 = vmatprep.subr.bf16.mxu1 %v23154_v58 }
 0x5a3   :  { %12135 = vmatpush1.bf16.msra.mxu0 %v23191_v37 }
 0x5a4   :  { %12177 = vmatprep.subr.bf16.mxu0 %v23199_v60 }
 0x5a5   :  { %12413 = vmatpush1.bf16.msra.mxu1 %v23152_v52 }
 0x5a6   :  { %12414 = vmatprep.subr.bf16.mxu1 %v23160_v47  ;;  %v23197_v47 = vld [vmem:[%s31644_s5 + $0xd00] ss:$52 sps:$4 sm:$0xff]  }
 0x5a9   :  { %12415 = vmatpush1.bf16.msra.mxu1 %v23158_v6  ;;  %v23200_v6 = vld [vmem:[%s31644_s5 + $0xd08] ss:$52 sps:$4 sm:$0xff]  }
 0x5aa   :  { %12416 = vmatprep.subr.bf16.mxu1 %v23166_v62 }
 0x5ad   :  { %12417 = vmatpush1.bf16.msra.mxu1 %v23164_v50 }
 0x5ae   :  { %12418 = vmatprep.subr.bf16.mxu1 %v23172_v40 }
 0x5b1   :  { %12419 = vmatpush1.bf16.msra.mxu1 %v23170_v55  ;;  %v10617_v55 = vld [vmem:[#allocation3 + $0x10] sm:$0xff] }
 0x5b2   :  { %12420 = vmatprep.subr.bf16.mxu1 %v23178_v38  ;;  %v23205_v38 = vld [vmem:[%s31644_s5 + $0xd6c] ss:$52 sps:$4 sm:$0xff]  }
 0x5b5   :  { %12421 = vmatpush1.bf16.msra.mxu1 %v23176_v22  ;;  %v23208_v22 = vld [vmem:[%s31644_s5 + $0xd74] ss:$52 sps:$4 sm:$0xff]  }
 0x5b6   :  { %12422 = vmatprep.subr.bf16.mxu1 %v23184_v3 }
 0x5b9   :  { %12423 = vmatpush1.bf16.msra.mxu1 %v23182_v39 }
 0x5ba   :  { %12424 = vmatprep.subr.bf16.mxu1 %v23190_v27  ;;  %v23203_v27 = vld [vmem:[%s31644_s5 + $0xd68] ss:$52 sps:$4 sm:$0xff]  }
 0x5bd   :  { %12425 = vmatpush1.bf16.msra.mxu1 %v23188_v24 }
 0x5be   :  { %12426 = vmatprep.subr.bf16.mxu1 %v23196_v26 }
 0x5c1   :  { %12427 = vmatpush1.bf16.msra.mxu1 %v23194_v53  ;;  %v10626_v53 = vld [vmem:[#allocation3 + $0x58] sm:$0xff] }
 0x5c2   :  { %12469 = vmatprep.subr.bf16.mxu1 %v23202_v33  ;;  %v23206_v33 = vld [vmem:[%s31644_s5 + $0xd70] ss:$52 sps:$4 sm:$0xff]  }
 0x5e7   :  { %v10173_v34 = vpop.f32.mrb[48].mxu0 }
 0x5e8   :  { %v10175_v31 = vpop.f32.mrb[49].mxu0  ;;  %v10519_v57 = vadd.f32 %v29312_v63, %v10173_v34  ;;  %v23211_v34 = vld [vmem:[%s31644_s5 + $0xdd4] ss:$52 sps:$4 sm:$0xff]  }
 0x5e9   :  { %v10520_v5 = vadd.f32 %v29312_v63, %v10175_v31 }
 0x5ea   :  { %v10551_v23 = vmax.f32 %v10519_v57, 0.0 }
 0x5eb   :  { %v10179_v44 = vpop.f32.mrb[50].mxu0  ;;  %v10552_v4 = vmax.f32 %v10520_v5, 0.0 }
 0x5ec   :  { %v10527_v46 = vadd.f32 %v29315_v21, %v10179_v44  ;;  %v10181_v2 = vpop.f32.mrb[51].mxu0  ;;  %v23214_v44 = vld [vmem:[%s31644_s5 + $0xddc] ss:$52 sps:$4 sm:$0xff]  }
 0x5ed   :  { %v10528_v28 = vadd.f32 %v29315_v21, %v10181_v2 }
 0x5ee   :  { %v10559_v13 = vmax.f32 %v10527_v46, 0.0 }
 0x5ef   :  { %v10560_v32 = vmax.f32 %v10528_v28, 0.0 }
 0x5f0   :  { %v10583_v30 = vpack.c.bf16 %v10559_v13, %v10551_v23 }
 0x5f1   :  { %v10584_v41 = vpack.c.bf16 %v10560_v32, %v10552_v4  ;;  %v10185_v56 = vpop.f32.mrb[52].mxu0 }
 0x5f2   :  { %10599 = vst [vmem:[#allocation3 + $0x80] sm:$0xff] %v10583_v30  ;;  %v10187_v48 = vpop.f32.mrb[53].mxu0  ;;  %v10535_v16 = vadd.f32 %v29320_v45, %v10185_v56 }
 0x5f3   :  { %10600 = vst [vmem:[#allocation3 + $0x88] sm:$0xff] %v10584_v41  ;;  %12083 = vmatprep.mubr.bf16.mxu0 %v10584_v41  ;;  %12375 = vmatprep.mubr.bf16.mxu1 %v10584_v41  ;;  %v10536_v20 = vadd.f32 %v29320_v45, %v10187_v48  ;;  %v23212_v41 = vld [vmem:[%s31644_s5 + $0xdd8] ss:$52 sps:$4 sm:$0xff]  }
 0x5f4   :  { %12084 = vmatmul.mubr.bf16.gmra.mrb[72].mxu0 %v10583_v30  ;;  %12376 = vmatmul.mubr.bf16.gmra.mrb[72].mxu1 %v10583_v30  ;;  %v10567_v43 = vmax.f32 %v10535_v16, 0.0  ;;  %v23209_v30 = vld [vmem:[%s31644_s5 + $0xdd0] ss:$52 sps:$4 sm:$0xff]  }
 0x5f5   :  { %v10191_v18 = vpop.f32.mrb[54].mxu0  ;;  %v10568_v61 = vmax.f32 %v10536_v20, 0.0  ;;  %v23217_v16 = vld [vmem:[%s31644_s5 + $0xe3c] ss:$52 sps:$4 sm:$0xff]   ;;  %v23220_v20 = vld [vmem:[%s31644_s5 + $0xe44] ss:$52 sps:$4 sm:$0xff]  }
 0x5f6   :  { %v10543_v12 = vadd.f32 %v29323_v17, %v10191_v18  ;;  %v10193_v42 = vpop.f32.mrb[55].mxu0 }
 0x5f7   :  { %v10544_v35 = vadd.f32 %v29323_v17, %v10193_v42 }
 0x5f8   :  { %v10575_v59 = vmax.f32 %v10543_v12, 0.0  ;;  %v10625_v12 = vld [vmem:[#allocation3 + $0x50] sm:$0xff] }
 0x5f9   :  { %v10576_v11 = vmax.f32 %v10544_v35, 0.0  ;;  %v10351_v8 = vpop.f32.mrb[56].mxu0 }
 0x5fa   :  { %v10591_v0 = vpack.c.bf16 %v10575_v59, %v10567_v43  ;;  %v10353_v19 = vpop.f32.mrb[57].mxu0  ;;  %v10523_v15 = vadd.f32 %v29312_v63, %v10351_v8  ;;  %v23215_v43 = vld [vmem:[%s31644_s5 + $0xe38] ss:$52 sps:$4 sm:$0xff]   ;;  %v23218_v8 = vld [vmem:[%s31644_s5 + $0xe40] ss:$52 sps:$4 sm:$0xff]  }
 0x5fb   :  { %v10592_v51 = vpack.c.bf16 %v10576_v11, %v10568_v61  ;;  %v10524_v9 = vadd.f32 %v29312_v63, %v10353_v19 }
 0x5fc   :  { %10607 = vst [vmem:[#allocation3 + $0xc0] sm:$0xff] %v10591_v0  ;;  %v10555_v36 = vmax.f32 %v10523_v15, 0.0  ;;  %v23223_v15 = vld [vmem:[%s31644_s5 + $0xea4] ss:$52 sps:$4 sm:$0xff]  }
 0x5fd   :  { %10608 = vst [vmem:[#allocation3 + $0xc8] sm:$0xff] %v10592_v51  ;;  %v10357_v25 = vpop.f32.mrb[58].mxu0  ;;  %12093 = vmatprep.mubr.bf16.mxu0 %v10592_v51  ;;  %12385 = vmatprep.mubr.bf16.mxu1 %v10592_v51  ;;  %v10556_v1 = vmax.f32 %v10524_v9, 0.0  ;;  %v23226_v9 = vld [vmem:[%s31644_s5 + $0xeac] ss:$52 sps:$4 sm:$0xff]  }
 0x5fe   :  { %v10531_v10 = vadd.f32 %v29315_v21, %v10357_v25  ;;  %v10359_v14 = vpop.f32.mrb[59].mxu0  ;;  %12094 = vmatmul.mubr.bf16.gmra.mrb[76].mxu0 %v10591_v0  ;;  %12386 = vmatmul.mubr.bf16.gmra.mrb[76].mxu1 %v10591_v0 }
 0x5ff   :  { %v10532_v29 = vadd.f32 %v29315_v21, %v10359_v14  ;;  %12136 = vmatprep.mubr.bf16.mxu0 %v10618_v7  ;;  %12428 = vmatprep.mubr.bf16.mxu1 %v10618_v7  ;;  %v23221_v7 = vld [vmem:[%s31644_s5 + $0xea0] ss:$52 sps:$4 sm:$0xff]  }
 0x600   :  { %v10563_v54 = vmax.f32 %v10531_v10, 0.0 }
 0x601   :  { %v10564_v49 = vmax.f32 %v10532_v29, 0.0  ;;  %v10363_v58 = vpop.f32.mrb[60].mxu0  ;;  %v23224_v29 = vld [vmem:[%s31644_s5 + $0xea8] ss:$52 sps:$4 sm:$0xff]  }
 0x602   :  { %v29332_v37 = vpack.c.bf16 %v10563_v54, %v10555_v36  ;;  %v10365_v60 = vpop.f32.mrb[61].mxu0  ;;  %v10539_v62 = vadd.f32 %v29320_v45, %v10363_v58 }
 0x603   :  { %v29334_v52 = vpack.c.bf16 %v10564_v49, %v10556_v1  ;;  %v10540_v50 = vadd.f32 %v29320_v45, %v10365_v60  ;;  %v23229_v1 = vld [vmem:[%s31644_s5 + $0xf0c] ss:$52 sps:$4 sm:$0xff]   ;;  %v23232_v49 = vld [vmem:[%s31644_s5 + $0xf14] ss:$52 sps:$4 sm:$0xff]  }
 0x604   :  { %10603 = vst [vmem:[#allocation3 + $0xa0] sm:$0xff] %v29332_v37  ;;  %v10571_v31 = vmax.f32 %v10539_v62, 0.0 }
 0x605   :  { %10604 = vst [vmem:[#allocation3 + $0xa8] sm:$0xff] %v29334_v52  ;;  %v10369_v40 = vpop.f32.mrb[62].mxu0  ;;  %v10572_v46 = vmax.f32 %v10540_v50, 0.0 }
 0x606   :  { %v10547_v3 = vadd.f32 %v29323_v17, %v10369_v40  ;;  %v10371_v39 = vpop.f32.mrb[63].mxu0  ;;  %12137 = vmatmul.mubr.bf16.vlgmr.msra.gmra.mrb[64].mxu0 %v10617_v55  ;;  %12429 = vmatmul.mubr.bf16.vlgmr.msra.gmra.mrb[64].mxu1 %v10617_v55  ;;  %v23230_v55 = vld [vmem:[%s31644_s5 + $0xf10] ss:$52 sps:$4 sm:$0xff]  }
 0x607   :  { %v10548_v24 = vadd.f32 %v29323_v17, %v10371_v39  ;;  %v10262_v26 = vpop.f32.mrb[48].mxu1  ;;  %12178 = vmatpush1.bf16.msra.mxu0 %v23197_v47  ;;  %12470 = vmatpush1.bf16.msra.mxu1 %v23200_v6  ;;  %v23227_v6 = vld [vmem:[%s31644_s5 + $0xf08] ss:$52 sps:$4 sm:$0xff]  }
 0x608   :  { %v10579_v57 = vmax.f32 %v10547_v3, 0.0  ;;  %v10264_v5 = vpop.f32.mrb[49].mxu1  ;;  %12146 = vmatprep.mubr.bf16.mxu0 %v10626_v53  ;;  %12438 = vmatprep.mubr.bf16.mxu1 %v10626_v53  ;;  %v10521_v23 = vadd.f32 %v29312_v63, %v10262_v26  ;;  %v23235_v39 = vld [vmem:[%s31644_s5 + $0xf74] ss:$52 sps:$4 sm:$0xff]  }
 0x609   :  { %v10580_v2 = vmax.f32 %v10548_v24, 0.0  ;;  %12179 = vmatprep.subr.bf16.mxu0 %v23205_v38  ;;  %12471 = vmatprep.subr.bf16.mxu1 %v23208_v22  ;;  %v10522_v4 = vadd.f32 %v29312_v63, %v10264_v5 }
 0x60a   :  { %v29366_v28 = vpack.c.bf16 %v10579_v57, %v10571_v31  ;;  %v10553_v42 = vmax.f32 %v10521_v23, 0.0  ;;  %v23239_v23 = vld [vmem:[%s31644_s5 + $0xfd8] ss:$52 sps:$4 sm:$0xff]  }
 0x60b   :  { %v29369_v13 = vpack.c.bf16 %v10580_v2, %v10572_v46  ;;  %v10268_v32 = vpop.f32.mrb[50].mxu1  ;;  %12180 = vmatpush1.bf16.msra.mxu0 %v23203_v27  ;;  %12472 = vmatpush1.bf16.msra.mxu1 %v23206_v33  ;;  %v10554_v59 = vmax.f32 %v10522_v4, 0.0  ;;  %v23238_v27 = vld [vmem:[%s31644_s5 + $0xf7c] ss:$52 sps:$4 sm:$0xff]  }
 0x60c   :  { %10611 = vst [vmem:[#allocation3 + $0xe0] sm:$0xff] %v29366_v28  ;;  %v10529_v56 = vadd.f32 %v29315_v21, %v10268_v32  ;;  %v10270_v48 = vpop.f32.mrb[51].mxu1  ;;  %12181 = vmatprep.subr.bf16.mxu0 %v23211_v34  ;;  %12473 = vmatprep.subr.bf16.mxu1 %v23214_v44  ;;  %v23233_v33 = vld [vmem:[%s31644_s5 + $0xf70] ss:$52 sps:$4 sm:$0xff]   ;;  %v23236_v34 = vld [vmem:[%s31644_s5 + $0xf78] ss:$52 sps:$4 sm:$0xff]  }
 0x60d   :  { %10612 = vst [vmem:[#allocation3 + $0xe8] sm:$0xff] %v29369_v13  ;;  %v10530_v18 = vadd.f32 %v29315_v21, %v10270_v48  ;;  %v23244_v44 = vld [vmem:[%s31644_s5 + $0xfe4] ss:$52 sps:$4 sm:$0xff]  }
 0x60e   :  { %v10561_v35 = vmax.f32 %v10529_v56, 0.0  ;;  %12147 = vmatmul.mubr.bf16.gmra.mrb[68].mxu0 %v10625_v12  ;;  %12439 = vmatmul.mubr.bf16.gmra.mrb[68].mxu1 %v10625_v12 }
 0x60f   :  { %v10562_v61 = vmax.f32 %v10530_v18, 0.0  ;;  %v10274_v11 = vpop.f32.mrb[52].mxu1  ;;  %12182 = vmatpush1.bf16.msra.mxu0 %v23209_v30  ;;  %12474 = vmatpush1.bf16.msra.mxu1 %v23212_v41  ;;  %v10620_v30 = vld [vmem:[#allocation3 + $0x28] sm:$0xff]  ;;  %v23242_v41 = vld [vmem:[%s31644_s5 + $0xfe0] ss:$52 sps:$4 sm:$0xff]  }
 0x610   :  { %v10585_v0 = vpack.c.bf16 %v10561_v35, %v10553_v42  ;;  %v10276_v19 = vpop.f32.mrb[53].mxu1  ;;  %12183 = vmatprep.subr.bf16.mxu0 %v23217_v16  ;;  %12475 = vmatprep.subr.bf16.mxu1 %v23220_v20  ;;  %v10537_v25 = vadd.f32 %v29320_v45, %v10274_v11  ;;  %v23247_v16 = vld [vmem:[%s31644_s5 + $0x1044] ss:$52 sps:$4 sm:$0xff]   ;;  %v23250_v20 = vld [vmem:[%s31644_s5 + $0x104c] ss:$52 sps:$4 sm:$0xff]  }
 0x611   :  { %v10586_v51 = vpack.c.bf16 %v10562_v61, %v10554_v59  ;;  %v10538_v10 = vadd.f32 %v29320_v45, %v10276_v19  ;;  %v23248_v59 = vld [vmem:[%s31644_s5 + $0x1048] ss:$52 sps:$4 sm:$0xff]  }
 0x612   :  { %10601 = vst [vmem:[#allocation3 + $0x90] sm:$0xff] %v10585_v0  ;;  %v10569_v60 = vmax.f32 %v10537_v25, 0.0  ;;  %v23251_v25 = vld [vmem:[%s31644_s5 + $0x10a8] ss:$52 sps:$4 sm:$0xff]  }
 0x613   :  { %10602 = vst [vmem:[#allocation3 + $0x98] sm:$0xff] %v10586_v51  ;;  %v10280_v14 = vpop.f32.mrb[54].mxu1  ;;  %12184 = vmatpush1.bf16.msra.mxu0 %v23215_v43  ;;  %12476 = vmatpush1.bf16.msra.mxu1 %v23218_v8  ;;  %v10570_v62 = vmax.f32 %v10538_v10, 0.0  ;;  %v23245_v43 = vld [vmem:[%s31644_s5 + $0x1040] ss:$52 sps:$4 sm:$0xff]  }
 0x614   :  { %v10545_v36 = vadd.f32 %v29323_v17, %v10280_v14  ;;  %v10282_v54 = vpop.f32.mrb[55].mxu1  ;;  %12156 = vmatprep.mubr.bf16.mxu0 %v10586_v51  ;;  %12448 = vmatprep.mubr.bf16.mxu1 %v10586_v51  ;;  %v23256_v8 = vld [vmem:[%s31644_s5 + $0x10b4] ss:$52 sps:$4 sm:$0xff]   ;;  %v23254_v10 = vld [vmem:[%s31644_s5 + $0x10b0] ss:$52 sps:$4 sm:$0xff]  }
 0x615   :  { %v10546_v58 = vadd.f32 %v29323_v17, %v10282_v54  ;;  %12185 = vmatprep.subr.bf16.mxu0 %v23223_v15  ;;  %12477 = vmatprep.subr.bf16.mxu1 %v23226_v9  ;;  %v23260_v54 = vld [vmem:[%s31644_s5 + $0x1118] ss:$52 sps:$4 sm:$0xff]  }
 0x616   :  { %v10577_v47 = vmax.f32 %v10545_v36, 0.0  ;;  %12157 = vmatmul.mubr.bf16.gmra.mrb[72].mxu0 %v10585_v0  ;;  %12449 = vmatmul.mubr.bf16.gmra.mrb[72].mxu1 %v10585_v0  ;;  %v23257_v36 = vld [vmem:[%s31644_s5 + $0x1110] ss:$52 sps:$4 sm:$0xff]  }
 0x617   :  { %v10578_v50 = vmax.f32 %v10546_v58, 0.0  ;;  %v10440_v40 = vpop.f32.mrb[56].mxu1  ;;  %12186 = vmatpush1.bf16.msra.mxu0 %v23221_v7  ;;  %12478 = vmatpush1.bf16.msra.mxu1 %v23224_v29  ;;  %v23262_v7 = vld [vmem:[%s31644_s5 + $0x111c] ss:$52 sps:$4 sm:$0xff]   ;;  %v23263_v58 = vld [vmem:[%s31644_s5 + $0x1178] ss:$52 sps:$4 sm:$0xff]  }
 0x618   :  { %v10593_v38 = vpack.c.bf16 %v10577_v47, %v10569_v60  ;;  %v10442_v22 = vpop.f32.mrb[57].mxu1  ;;  %12187 = vmatprep.subr.bf16.mxu0 %v23229_v1  ;;  %12479 = vmatprep.subr.bf16.mxu1 %v23232_v49  ;;  %v10525_v24 = vadd.f32 %v29312_v63, %v10440_v40  ;;  %v23265_v1 = vld [vmem:[%s31644_s5 + $0x117c] ss:$52 sps:$4 sm:$0xff]   ;;  %v23268_v49 = vld [vmem:[%s31644_s5 + $0x1184] ss:$52 sps:$4 sm:$0xff]  }
 0x619   :  { %v10594_v3 = vpack.c.bf16 %v10578_v50, %v10570_v62  ;;  %v10526_v26 = vadd.f32 %v29312_v63, %v10442_v22  ;;  %v23241_v63 = vld [vmem:[%s31644_s5 + $0xfdc] ss:$52 sps:$4 sm:$0xff]   ;;  %v23266_v60 = vld [vmem:[%s31644_s5 + $0x1180] ss:$52 sps:$4 sm:$0xff]   ;;  %v23271_v47 = vld [vmem:[%s31644_s5 + $0x11e4] ss:$52 sps:$4 sm:$0xff]  }
 0x61a   :  { %10609 = vst [vmem:[#allocation3 + $0xd0] sm:$0xff] %v10593_v38  ;;  %v10557_v46 = vmax.f32 %v10525_v24, 0.0  ;;  %v23269_v62 = vld [vmem:[%s31644_s5 + $0x11e0] ss:$52 sps:$4 sm:$0xff]   ;;  %v23272_v50 = vld [vmem:[%s31644_s5 + $0x11e8] ss:$52 sps:$4 sm:$0xff]  }
 0x61b   :  { %10610 = vst [vmem:[#allocation3 + $0xd8] sm:$0xff] %v10594_v3  ;;  %v10446_v53 = vpop.f32.mrb[58].mxu1  ;;  %12188 = vmatpush1.bf16.msra.mxu0 %v23227_v6  ;;  %12480 = vmatpush1.bf16.msra.mxu1 %v23230_v55  ;;  %v10558_v4 = vmax.f32 %v10526_v26, 0.0  ;;  %v23274_v6 = vld [vmem:[%s31644_s5 + $0x11ec] ss:$52 sps:$4 sm:$0xff]  }
 0x61c   :  { %v10533_v31 = vadd.f32 %v29315_v21, %v10446_v53  ;;  %v10448_v57 = vpop.f32.mrb[59].mxu1  ;;  %12166 = vmatprep.mubr.bf16.mxu0 %v10594_v3  ;;  %12458 = vmatprep.mubr.bf16.mxu1 %v10594_v3  ;;  %v23277_v40 = vld [vmem:[%s31644_s5 + $0x124c] ss:$52 sps:$4 sm:$0xff]   ;;  %v23280_v55 = vld [vmem:[%s31644_s5 + $0x1254] ss:$52 sps:$4 sm:$0xff]  }
 0x61d   :  { %v10534_v5 = vadd.f32 %v29315_v21, %v10448_v57  ;;  %12189 = vmatprep.subr.bf16.mxu0 %v23235_v39  ;;  %12481 = vmatprep.subr.bf16.mxu1 %v23238_v27  ;;  %v23278_v22 = vld [vmem:[%s31644_s5 + $0x1250] ss:$52 sps:$4 sm:$0xff]   ;;  %v23283_v3 = vld [vmem:[%s31644_s5 + $0x12b4] ss:$52 sps:$4 sm:$0xff]   ;;  %v23284_v24 = vld [vmem:[%s31644_s5 + $0x12b8] ss:$52 sps:$4 sm:$0xff]  }
 0x61e   :  { %v10565_v2 = vmax.f32 %v10533_v31, 0.0  ;;  %12167 = vmatmul.mubr.bf16.gmra.mrb[76].mxu0 %v10593_v38  ;;  %12459 = vmatmul.mubr.bf16.gmra.mrb[76].mxu1 %v10593_v38  ;;  %v23275_v38 = vld [vmem:[%s31644_s5 + $0x1248] ss:$52 sps:$4 sm:$0xff]   ;;  %v23281_v27 = vld [vmem:[%s31644_s5 + $0x12b0] ss:$52 sps:$4 sm:$0xff]  }
 0x61f   :  { %v10566_v21 = vmax.f32 %v10534_v5, 0.0  ;;  %v10452_v32 = vpop.f32.mrb[60].mxu1  ;;  %12190 = vmatpush1.bf16.msra.mxu0 %v23233_v33  ;;  %12482 = vmatpush1.bf16.msra.mxu1 %v23236_v34  ;;  %v23286_v39 = vld [vmem:[%s31644_s5 + $0x12bc] ss:$52 sps:$4 sm:$0xff]   ;;  %v23292_v53 = vld [vmem:[%s31644_s5 + $0x1324] ss:$52 sps:$4 sm:$0xff]  }
 0x620   :  { %v29450_v56 = vpack.c.bf16 %v10565_v2, %v10557_v46  ;;  %v10454_v48 = vpop.f32.mrb[61].mxu1  ;;  %12209 = vmatprep.mubr.bf16.mxu0 %v10620_v30  ;;  %12501 = vmatprep.mubr.bf16.mxu1 %v10620_v30  ;;  %v10541_v12 = vadd.f32 %v29320_v45, %v10452_v32  ;;  %v23289_v26 = vld [vmem:[%s31644_s5 + $0x131c] ss:$52 sps:$4 sm:$0xff]   ;;  %v23287_v33 = vld [vmem:[%s31644_s5 + $0x1318] ss:$52 sps:$4 sm:$0xff]  }
 0x621   :  { %v10590_v18 = vpack.c.bf16 %v10566_v21, %v10558_v4  ;;  %12191 = vmatprep.subr.bf16.mxu0 %v23241_v63  ;;  %12483 = vmatprep.subr.bf16.mxu1 %v23244_v44  ;;  %v10542_v42 = vadd.f32 %v29320_v45, %v10454_v48  ;;  %v23253_v45 = vld [vmem:[%s31644_s5 + $0x10ac] ss:$52 sps:$4 sm:$0xff]   ;;  %v23295_v31 = vld [vmem:[%s31644_s5 + $0x1384] ss:$52 sps:$4 sm:$0xff]   ;;  %v23296_v63 = vld [vmem:[%s31644_s5 + $0x1388] ss:$52 sps:$4 sm:$0xff]  }
 0x622   :  { %10605 = vst [vmem:[#allocation3 + $0xb0] sm:$0xff] %v29450_v56  ;;  %v10573_v19 = vmax.f32 %v10541_v12, 0.0  ;;  %v23290_v34 = vld [vmem:[%s31644_s5 + $0x1320] ss:$52 sps:$4 sm:$0xff]   ;;  %v23299_v4 = vld [vmem:[%s31644_s5 + $0x13e8] ss:$52 sps:$4 sm:$0xff]  }
 0x623   :  { %10606 = vst.msk [vmem:[#allocation3 + $0xb8] sm:$0xff] %vm5340_vm13, %v10590_v18  ;;  %v10458_v35 = vpop.f32.mrb[62].mxu1  ;;  %12192 = vmatpush1.bf16.msra.mxu0 %v23239_v23  ;;  %12484 = vmatpush1.bf16.msra.mxu1 %v23242_v41  ;;  %v10574_v15 = vmax.f32 %v10542_v42, 0.0  ;;  %v23298_v57 = vld [vmem:[%s31644_s5 + $0x138c] ss:$52 sps:$4 sm:$0xff]  }
 0x624   :  { %v10549_v61 = vadd.f32 %v29323_v17, %v10458_v35  ;;  %v10460_v11 = vpop.f32.mrb[63].mxu1  ;;  %12193 = vmatprep.subr.bf16.mxu0 %v23247_v16  ;;  %12485 = vmatprep.subr.bf16.mxu1 %v23250_v20  ;;  %v23293_v5 = vld [vmem:[%s31644_s5 + $0x1380] ss:$52 sps:$4 sm:$0xff]   ;;  %v10628_v23 = vld [vmem:[#allocation3 + $0x68] sm:$0xff]  ;;  %v23302_v21 = vld [vmem:[%s31644_s5 + $0x13f0] ss:$52 sps:$4 sm:$0xff]  }
 0x625   :  { %v10550_v0 = vadd.f32 %v29323_v17, %v10460_v11  ;;  %v23259_v17 = vld [vmem:[%s31644_s5 + $0x1114] ss:$52 sps:$4 sm:$0xff]   ;;  %v10619_v44 = vld [vmem:[#allocation3 + $0x20] sm:$0xff]  ;;  %v23310_v30 = vld [vmem:[%s31644_s5 + $0x145c] ss:$52 sps:$4 sm:$0xff]  }
 0x626   :  { %v10581_v51 = vmax.f32 %v10549_v61, 0.0  ;;  %v23301_v46 = vld [vmem:[%s31644_s5 + $0x13ec] ss:$52 sps:$4 sm:$0xff]   ;;  %v23304_v2 = vld [vmem:[%s31644_s5 + $0x13f4] ss:$52 sps:$4 sm:$0xff]  }
 0x627   :  { %v10582_v9 = vmax.f32 %v10550_v0, 0.0  ;;  %12194 = vmatpush1.bf16.msra.mxu0 %v23245_v43  ;;  %12486 = vmatpush1.bf16.msra.mxu1 %v23248_v59  ;;  %v23307_v32 = vld [vmem:[%s31644_s5 + $0x1454] ss:$52 sps:$4 sm:$0xff]   ;;  %v23305_v41 = vld [vmem:[%s31644_s5 + $0x1450] ss:$52 sps:$4 sm:$0xff]  }
 0x628   :  { %v29482_v14 = vpack.c.bf16 %v10581_v51, %v10573_v19  ;;  %12195 = vmatprep.subr.bf16.mxu0 %v23253_v45  ;;  %12487 = vmatprep.subr.bf16.mxu1 %v23256_v8  ;;  %v23308_v48 = vld [vmem:[%s31644_s5 + $0x1458] ss:$52 sps:$4 sm:$0xff]   ;;  %v10627_v16 = vld [vmem:[#allocation3 + $0x60] sm:$0xff]  ;;  %v23313_v20 = vld [vmem:[%s31644_s5 + $0x14bc] ss:$52 sps:$4 sm:$0xff]  }
 0x629   :  { %v10598_v29 = vpack.c.bf16 %v10582_v9, %v10574_v15  ;;  %v23316_v18 = vld [vmem:[%s31644_s5 + $0x14c4] ss:$52 sps:$4 sm:$0xff]   ;;  %v23314_v42 = vld [vmem:[%s31644_s5 + $0x14c0] ss:$52 sps:$4 sm:$0xff]   ;;  %v23320_v59 = vld [vmem:[%s31644_s5 + $0x1528] ss:$52 sps:$4 sm:$0xff]  }
 0x62a   :  { %10613 = vst [vmem:[#allocation3 + $0xf0] sm:$0xff] %v29482_v14  ;;  %v23311_v12 = vld [vmem:[%s31644_s5 + $0x14b8] ss:$52 sps:$4 sm:$0xff]   ;;  %v23328_v11 = vld [vmem:[%s31644_s5 + $0x1594] ss:$52 sps:$4 sm:$0xff]  }
 0x62b   :  { %10614 = vst.msk [vmem:[#allocation3 + $0xf8] sm:$0xff] %vm5340_vm13, %v10598_v29  ;;  %12196 = vmatpush1.bf16.msra.mxu0 %v23251_v25  ;;  %12488 = vmatpush1.bf16.msra.mxu1 %v23254_v10  ;;  %v23319_v35 = vld [vmem:[%s31644_s5 + $0x1524] ss:$52 sps:$4 sm:$0xff]   ;;  %v23322_v43 = vld [vmem:[%s31644_s5 + $0x152c] ss:$52 sps:$4 sm:$0xff]  }
 0x62c   :  { %12197 = vmatprep.subr.bf16.mxu0 %v23259_v17  ;;  %12489 = vmatprep.subr.bf16.mxu1 %v23262_v7  ;;  %v23325_v61 = vld [vmem:[%s31644_s5 + $0x158c] ss:$52 sps:$4 sm:$0xff]   ;;  %v23323_v45 = vld [vmem:[%s31644_s5 + $0x1588] ss:$52 sps:$4 sm:$0xff]   ;;  %v23326_v8 = vld [vmem:[%s31644_s5 + $0x1590] ss:$52 sps:$4 sm:$0xff]  }
 0x62d   :  { %v23331_v0 = vld [vmem:[%s31644_s5 + $0x15f4] ss:$52 sps:$4 sm:$0xff]   ;;  %v10871_v19 = vld [vmem:[%s31644_s5 + $0x16c0] sm:$0x33]  ;;  %v23332_v25 = vld [vmem:[%s31644_s5 + $0x15f8] ss:$52 sps:$4 sm:$0xff]  }
 0x62e   :  { %v10872_v15 = vld [vmem:[%s31644_s5 + $0x16c8] sm:$0x33]  ;;  %v23329_v9 = vld [vmem:[%s31644_s5 + $0x15f0] ss:$52 sps:$4 sm:$0xff]   ;;  %v19559_v10 = vcombine.high %v10871_v19, %v10871_v19 }
 0x62f   :  { %12198 = vmatpush1.bf16.msra.mxu0 %v23257_v36  ;;  %12490 = vmatpush1.bf16.msra.mxu1 %v23260_v54  ;;  %v23337_v17 = vld [vmem:[%s31644_s5 + $0x165c] ss:$52 sps:$4 sm:$0xff]   ;;  %v23340_v7 = vld [vmem:[%s31644_s5 + $0x1664] ss:$52 sps:$4 sm:$0xff]   ;;  %v19561_v36 = vcombine.high %v10872_v15, %v10872_v15 }
 0x630   :  { %12199 = vmatprep.subr.bf16.mxu0 %v23265_v1  ;;  %12491 = vmatprep.subr.bf16.mxu1 %v23268_v49  ;;  %v10622_v54 = vld [vmem:[#allocation3 + $0x38] sm:$0xff]  ;;  %v19558_v49 = vcombine.low %v10871_v19, %v10871_v19 }
 0x631   :  { %v23335_v1 = vld [vmem:[%s31644_s5 + $0x1658] ss:$52 sps:$4 sm:$0xff]  }
 0x632   :  { %v23399_v19 = vld [vmem:[%s31644_s5 + $0x3b8] ss:$52 sps:$4 sm:$0xff]  }
 0x633   :  { %12200 = vmatpush1.bf16.msra.mxu0 %v23263_v58  ;;  %12492 = vmatpush1.bf16.msra.mxu1 %v23266_v60  ;;  %v23338_v58 = vld [vmem:[%s31644_s5 + $0x1660] ss:$52 sps:$4 sm:$0xff]  }
 0x634   :  { %12201 = vmatprep.subr.bf16.mxu0 %v23271_v47  ;;  %12493 = vmatprep.subr.bf16.mxu1 %v23274_v6  ;;  %v19560_v47 = vcombine.low %v10872_v15, %v10872_v15  ;;  %v23410_v15 = vld [vmem:[%s31644_s5 + $0x42c] ss:$52 sps:$4 sm:$0xff]  }
 0x637   :  { %12202 = vmatpush1.bf16.msra.mxu0 %v23269_v62  ;;  %12494 = vmatpush1.bf16.msra.mxu1 %v23272_v50  ;;  %v23347_v50 = vld [vmem:[%s31644_s5 + $0x14] ss:$52 sps:$4 sm:$0xff]  }
 0x638   :  { %12203 = vmatprep.subr.bf16.mxu0 %v23277_v40  ;;  %12495 = vmatprep.subr.bf16.mxu1 %v23280_v55  ;;  %v23350_v40 = vld [vmem:[%s31644_s5 + $0x1c] ss:$52 sps:$4 sm:$0xff]  }
 0x639   :  { %v23345_v55 = vld [vmem:[%s31644_s5 + $0x10] ss:$52 sps:$4 sm:$0xff]  }
 0x63b   :  { %12204 = vmatpush1.bf16.msra.mxu0 %v23275_v38  ;;  %12496 = vmatpush1.bf16.msra.mxu1 %v23278_v22  ;;  %v10621_v38 = vld [vmem:[#allocation3 + $0x30] sm:$0xff]  ;;  %v23348_v22 = vld [vmem:[%s31644_s5 + $0x18] ss:$52 sps:$4 sm:$0xff]  }
 0x63c   :  { %12205 = vmatprep.subr.bf16.mxu0 %v23283_v3  ;;  %12497 = vmatprep.subr.bf16.mxu1 %v23286_v39  ;;  %v23353_v3 = vld [vmem:[%s31644_s5 + $0x7c] ss:$52 sps:$4 sm:$0xff]  }
 0x63d   :  { %v10630_v39 = vld [vmem:[#allocation3 + $0x78] sm:$0xff] }
 0x63f   :  { %12206 = vmatpush1.bf16.msra.mxu0 %v23281_v27  ;;  %12498 = vmatpush1.bf16.msra.mxu1 %v23284_v24  ;;  %v23356_v27 = vld [vmem:[%s31644_s5 + $0x84] ss:$52 sps:$4 sm:$0xff]  }
 0x640   :  { %12207 = vmatprep.subr.bf16.mxu0 %v23289_v26  ;;  %12499 = vmatprep.subr.bf16.mxu1 %v23292_v53  ;;  %v23351_v24 = vld [vmem:[%s31644_s5 + $0x78] ss:$52 sps:$4 sm:$0xff]   ;;  %v23354_v26 = vld [vmem:[%s31644_s5 + $0x80] ss:$52 sps:$4 sm:$0xff]  }
 0x641   :  { %v23359_v53 = vld [vmem:[%s31644_s5 + $0xe4] ss:$52 sps:$4 sm:$0xff]  }
 0x643   :  { %12208 = vmatpush1.bf16.msra.mxu0 %v23287_v33  ;;  %12500 = vmatpush1.bf16.msra.mxu1 %v23290_v34  ;;  %v23362_v33 = vld [vmem:[%s31644_s5 + $0xec] ss:$52 sps:$4 sm:$0xff]  }
 0x644   :  { %12250 = vmatprep.subr.bf16.mxu0 %v23295_v31  ;;  %12542 = vmatprep.subr.bf16.mxu1 %v23298_v57  ;;  %v23357_v34 = vld [vmem:[%s31644_s5 + $0xe0] ss:$52 sps:$4 sm:$0xff]   ;;  %v23360_v57 = vld [vmem:[%s31644_s5 + $0xe8] ss:$52 sps:$4 sm:$0xff]  }
 0x645   :  { %v10629_v31 = vld [vmem:[#allocation3 + $0x70] sm:$0xff] }
 0x646   :  { %12210 = vmatmul.mubr.bf16.vlgmr.msra.gmra.mrb[64].mxu0 %v10619_v44  ;;  %12502 = vmatmul.mubr.bf16.vlgmr.msra.gmra.mrb[64].mxu1 %v10619_v44  ;;  %v23368_v44 = vld [vmem:[%s31644_s5 + $0x154] ss:$52 sps:$4 sm:$0xff]  }
 0x647   :  { %12219 = vmatprep.mubr.bf16.mxu0 %v10628_v23  ;;  %12251 = vmatpush1.bf16.msra.mxu0 %v23293_v5  ;;  %v23365_v5 = vld [vmem:[%s31644_s5 + $0x14c] ss:$52 sps:$4 sm:$0xff]  }
 0x648   :  { %12511 = vmatprep.mubr.bf16.mxu1 %v10628_v23  ;;  %12543 = vmatpush1.bf16.msra.mxu1 %v23296_v63  ;;  %v10638_v63 = vld [vmem:[#allocation3 + $0xb8] sm:$0xff]  ;;  %v23371_v23 = vld [vmem:[%s31644_s5 + $0x1b4] ss:$52 sps:$4 sm:$0xff]  }
 0x649   :  { %12252 = vmatprep.subr.bf16.mxu0 %v23301_v46  ;;  %12544 = vmatprep.subr.bf16.mxu1 %v23304_v2  ;;  %v23363_v46 = vld [vmem:[%s31644_s5 + $0x148] ss:$52 sps:$4 sm:$0xff]   ;;  %v23366_v2 = vld [vmem:[%s31644_s5 + $0x150] ss:$52 sps:$4 sm:$0xff]  }
 0x64b   :  { %12253 = vmatpush1.bf16.msra.mxu0 %v23299_v4  ;;  %v23374_v4 = vld [vmem:[%s31644_s5 + $0x1bc] ss:$52 sps:$4 sm:$0xff]  }
 0x64c   :  { %12545 = vmatpush1.bf16.msra.mxu1 %v23302_v21  ;;  %12254 = vmatprep.subr.bf16.mxu0 %v23307_v32  ;;  %v23369_v21 = vld [vmem:[%s31644_s5 + $0x1b0] ss:$52 sps:$4 sm:$0xff]   ;;  %v23372_v32 = vld [vmem:[%s31644_s5 + $0x1b8] ss:$52 sps:$4 sm:$0xff]  }
 0x64d   :  { %12546 = vmatprep.subr.bf16.mxu1 %v23310_v30  ;;  %v23377_v30 = vld [vmem:[%s31644_s5 + $0x21c] ss:$52 sps:$4 sm:$0xff]  }
 0x64e   :  { %12220 = vmatmul.mubr.bf16.gmra.mrb[68].mxu0 %v10627_v16  ;;  %12512 = vmatmul.mubr.bf16.gmra.mrb[68].mxu1 %v10627_v16  ;;  %v23375_v16 = vld [vmem:[%s31644_s5 + $0x218] ss:$52 sps:$4 sm:$0xff]  }
 0x64f   :  { %12229 = vmatprep.mubr.bf16.mxu0 %v29334_v52  ;;  %12255 = vmatpush1.bf16.msra.mxu0 %v23305_v41  ;;  %v10646_v41 = vld [vmem:[#allocation3 + $0xf8] sm:$0xff] }
 0x650   :  { %12521 = vmatprep.mubr.bf16.mxu1 %v29334_v52  ;;  %12547 = vmatpush1.bf16.msra.mxu1 %v23308_v48  ;;  %v23317_v52 = vld [vmem:[%s31644_s5 + $0x1520] ss:$52 sps:$4 sm:$0xff]   ;;  %v23380_v48 = vld [vmem:[%s31644_s5 + $0x224] ss:$52 sps:$4 sm:$0xff]  }
 0x651   :  { %12256 = vmatprep.subr.bf16.mxu0 %v23313_v20  ;;  %12548 = vmatprep.subr.bf16.mxu1 %v23316_v18  ;;  %v23378_v20 = vld [vmem:[%s31644_s5 + $0x220] ss:$52 sps:$4 sm:$0xff]   ;;  %v23383_v18 = vld [vmem:[%s31644_s5 + $0x284] ss:$52 sps:$4 sm:$0xff]  }
 0x653   :  { %12257 = vmatpush1.bf16.msra.mxu0 %v23311_v12  ;;  %v23381_v12 = vld [vmem:[%s31644_s5 + $0x280] ss:$52 sps:$4 sm:$0xff]  }
 0x654   :  { %12549 = vmatpush1.bf16.msra.mxu1 %v23314_v42  ;;  %12258 = vmatprep.subr.bf16.mxu0 %v23319_v35  ;;  %v23384_v42 = vld [vmem:[%s31644_s5 + $0x288] ss:$52 sps:$4 sm:$0xff]   ;;  %v23389_v35 = vld [vmem:[%s31644_s5 + $0x2ec] ss:$52 sps:$4 sm:$0xff]  }
 0x655   :  { %12550 = vmatprep.subr.bf16.mxu1 %v23322_v43  ;;  %v12648_v43 = vld [vmem:[#allocation3 + $0x8] sm:$0xff] }
 0x656   :  { %12230 = vmatmul.mubr.bf16.gmra.mrb[72].mxu0 %v29332_v37  ;;  %12522 = vmatmul.mubr.bf16.gmra.mrb[72].mxu1 %v29332_v37  ;;  %v23334_v37 = vld [vmem:[%s31644_s5 + $0x15fc] ss:$52 sps:$4 sm:$0xff]  }
 0x657   :  { %12239 = vmatprep.mubr.bf16.mxu0 %v29369_v13  ;;  %12259 = vmatpush1.bf16.msra.mxu0 %v23317_v52  ;;  %v23392_v52 = vld [vmem:[%s31644_s5 + $0x2f4] ss:$52 sps:$4 sm:$0xff]  }
 0x658   :  { %12531 = vmatprep.mubr.bf16.mxu1 %v29369_v13  ;;  %12551 = vmatpush1.bf16.msra.mxu1 %v23320_v59  ;;  %v24129_v13 = vmov 65535   ;;  %v23387_v59 = vld [vmem:[%s31644_s5 + $0x2e8] ss:$52 sps:$4 sm:$0xff]  }
 0x659   :  { %12260 = vmatprep.subr.bf16.mxu0 %v23325_v61  ;;  %12552 = vmatprep.subr.bf16.mxu1 %v23328_v11  ;;  %v12017_v51 = vsel %vm12015_vm14, 4294967295, %v24129_v13  ;;  %v23390_v61 = vld [vmem:[%s31644_s5 + $0x2f0] ss:$52 sps:$4 sm:$0xff]   ;;  %v23395_v11 = vld [vmem:[%s31644_s5 + $0x354] ss:$52 sps:$4 sm:$0xff]  }
 0x65a   :  { %v29660_v29 = vsel %vm12016_vm15, %v12017_v51, 0  ;;  %v23402_v13 = vld [vmem:[%s31644_s5 + $0x3c0] ss:$52 sps:$4 sm:$0xff]   ;;  %v23407_v51 = vld [vmem:[%s31644_s5 + $0x424] ss:$52 sps:$4 sm:$0xff]  }
 0x65b   :  { %12261 = vmatpush1.bf16.msra.mxu0 %v23323_v45  ;;  %v12023_v60 = vand.u32 %v19559_v10, %v29660_v29  ;;  %v12020_v6 = vand.u32 %v19558_v49, %v29660_v29  ;;  %v12026_v62 = vand.u32 %v19560_v47, %v29660_v29  ;;  %v23393_v45 = vld [vmem:[%s31644_s5 + $0x350] ss:$52 sps:$4 sm:$0xff]   ;;  %v23413_v10 = vld [vmem:[%s31644_s5 + $0x48c] ss:$52 sps:$4 sm:$0xff]  }
 0x65c   :  { %12553 = vmatpush1.bf16.msra.mxu1 %v23326_v8  ;;  %12262 = vmatprep.subr.bf16.mxu0 %v23331_v0  ;;  %v23396_v8 = vld [vmem:[%s31644_s5 + $0x358] ss:$52 sps:$4 sm:$0xff]   ;;  %v23401_v0 = vld [vmem:[%s31644_s5 + $0x3bc] ss:$52 sps:$4 sm:$0xff]  }
 0x65d   :  { %12554 = vmatprep.subr.bf16.mxu1 %v23334_v37  ;;  %v23404_v37 = vld [vmem:[%s31644_s5 + $0x3c4] ss:$52 sps:$4 sm:$0xff]  }
 0x65e   :  { %12240 = vmatmul.mubr.bf16.gmra.mrb[76].mxu0 %v29366_v28  ;;  %12532 = vmatmul.mubr.bf16.gmra.mrb[76].mxu1 %v29366_v28  ;;  %v12029_v28 = vand.u32 %v19561_v36, %v29660_v29  ;;  %v23414_v36 = vld [vmem:[%s31644_s5 + $0x490] ss:$52 sps:$4 sm:$0xff]  }
 0x65f   :  { %12263 = vmatpush1.bf16.msra.mxu0 %v23329_v9  ;;  %19562 = vmatprep.mubr.msk.bf16.mxu0 %vm5340_vm13, %v10622_v54  ;;  %v23405_v9 = vld [vmem:[%s31644_s5 + $0x420] ss:$52 sps:$4 sm:$0xff]   ;;  %v23417_v49 = vld [vmem:[%s31644_s5 + $0x4f0] ss:$52 sps:$4 sm:$0xff]  }
 0x660   :  { %12555 = vmatpush1.bf16.msra.mxu1 %v23332_v25  ;;  %19566 = vmatprep.mubr.msk.bf16.mxu1 %vm5340_vm13, %v10622_v54  ;;  %v23408_v25 = vld [vmem:[%s31644_s5 + $0x428] ss:$52 sps:$4 sm:$0xff]   ;;  %v23428_v47 = vld [vmem:[%s31644_s5 + $0x564] ss:$52 sps:$4 sm:$0xff]  }
 0x661   :  { %12264 = vmatprep.subr.bf16.mxu0 %v23337_v17  ;;  %12556 = vmatprep.subr.bf16.mxu1 %v23340_v7  ;;  %v23416_v17 = vld [vmem:[%s31644_s5 + $0x494] ss:$52 sps:$4 sm:$0xff]  }
 0x662   :  { %v23411_v7 = vld [vmem:[%s31644_s5 + $0x488] ss:$52 sps:$4 sm:$0xff]  }
 0x663   :  { %12265 = vmatpush1.bf16.msra.mxu0 %v23335_v1  ;;  %v23419_v54 = vld [vmem:[%s31644_s5 + $0x4f4] ss:$52 sps:$4 sm:$0xff]   ;;  %v23422_v1 = vld [vmem:[%s31644_s5 + $0x4fc] ss:$52 sps:$4 sm:$0xff]  }
 0x664   :  { %12557 = vmatpush1.bf16.msra.mxu1 %v23338_v58  ;;  %12266 = vmatprep.subr.bf16.mxu0 %v12023_v60  ;;  %v23420_v58 = vld [vmem:[%s31644_s5 + $0x4f8] ss:$52 sps:$4 sm:$0xff]   ;;  %v23425_v60 = vld [vmem:[%s31644_s5 + $0x55c] ss:$52 sps:$4 sm:$0xff]  }
 0x665   :  { %12558 = vmatprep.subr.bf16.mxu1 %v12029_v28  ;;  %v23423_v28 = vld [vmem:[%s31644_s5 + $0x558] ss:$52 sps:$4 sm:$0xff]  }
 0x667   :  { %12267 = vmatpush1.bf16.msra.mxu0 %v12020_v6  ;;  %v23426_v6 = vld [vmem:[%s31644_s5 + $0x560] ss:$52 sps:$4 sm:$0xff]  }
 0x668   :  { %12559 = vmatpush1.bf16.msra.mxu1 %v12026_v62  ;;  %14059 = vmatprep.subr.bf16.mxu0 %v23347_v50  ;;  %v23431_v62 = vld [vmem:[%s31644_s5 + $0x5c4] ss:$52 sps:$4 sm:$0xff]   ;;  %v23434_v50 = vld [vmem:[%s31644_s5 + $0x5cc] ss:$52 sps:$4 sm:$0xff]  }
 0x669   :  { %14351 = vmatprep.subr.bf16.mxu1 %v23350_v40  ;;  %v23429_v40 = vld [vmem:[%s31644_s5 + $0x5c0] ss:$52 sps:$4 sm:$0xff]  }
 0x66a   :  { %12283 = vmatmul.mubr.bf16.vlgmr.msra.gmra.mrb[64].mxu0 %v10621_v38 }
 0x66b   :  { %12575 = vmatmul.mubr.bf16.vlgmr.msra.gmra.mrb[64].mxu1 %v10621_v38  ;;  %19563 = vmatprep.mubr.msk.bf16.mxu0 %vm5340_vm13, %v10630_v39  ;;  %v23437_v38 = vld [vmem:[%s31644_s5 + $0x62c] ss:$52 sps:$4 sm:$0xff]  }
 0x66c   :  { %19567 = vmatprep.mubr.msk.bf16.mxu1 %vm5340_vm13, %v10630_v39  ;;  %14060 = vmatpush1.bf16.msra.mxu0 %v23345_v55  ;;  %v23432_v55 = vld [vmem:[%s31644_s5 + $0x5c8] ss:$52 sps:$4 sm:$0xff]   ;;  %v23438_v39 = vld [vmem:[%s31644_s5 + $0x630] ss:$52 sps:$4 sm:$0xff]  }
 0x66d   :  { %14352 = vmatpush1.bf16.msra.mxu1 %v23348_v22  ;;  %14061 = vmatprep.subr.bf16.mxu0 %v23353_v3  ;;  %v23440_v22 = vld [vmem:[%s31644_s5 + $0x634] ss:$52 sps:$4 sm:$0xff]  }
 0x66e   :  { %14353 = vmatprep.subr.bf16.mxu1 %v23356_v27  ;;  %v23435_v3 = vld [vmem:[%s31644_s5 + $0x628] ss:$52 sps:$4 sm:$0xff]  }
 0x66f   :  { %v23443_v27 = vld [vmem:[%s31644_s5 + $0x694] ss:$52 sps:$4 sm:$0xff]  }
 0x670   :  { %14062 = vmatpush1.bf16.msra.mxu0 %v23351_v24  ;;  %v23446_v24 = vld [vmem:[%s31644_s5 + $0x69c] ss:$52 sps:$4 sm:$0xff]  }
 0x671   :  { %14354 = vmatpush1.bf16.msra.mxu1 %v23354_v26  ;;  %14063 = vmatprep.subr.bf16.mxu0 %v23359_v53  ;;  %v23441_v26 = vld [vmem:[%s31644_s5 + $0x690] ss:$52 sps:$4 sm:$0xff]  }
 0x672   :  { %12293 = vmatmul.mubr.bf16.gmra.mrb[68].mxu0 %v10629_v31  ;;  %14355 = vmatprep.subr.bf16.mxu1 %v23362_v33  ;;  %v12647_v53 = vld [vmem:[#allocation3] sm:$0xff]  ;;  %v23444_v33 = vld [vmem:[%s31644_s5 + $0x698] ss:$52 sps:$4 sm:$0xff]  }
 0x673   :  { %12585 = vmatmul.mubr.bf16.gmra.mrb[68].mxu1 %v10629_v31  ;;  %19564 = vmatprep.mubr.msk.bf16.mxu0 %vm5340_vm13, %v10638_v63  ;;  %v12656_v31 = vld [vmem:[#allocation3 + $0x48] sm:$0xff] }
 0x674   :  { %19568 = vmatprep.mubr.msk.bf16.mxu1 %vm5340_vm13, %v10638_v63  ;;  %14064 = vmatpush1.bf16.msra.mxu0 %v23357_v34  ;;  %v23449_v34 = vld [vmem:[%s31644_s5 + $0x6fc] ss:$52 sps:$4 sm:$0xff]   ;;  %v23450_v63 = vld [vmem:[%s31644_s5 + $0x700] ss:$52 sps:$4 sm:$0xff]  }
 0x675   :  { %14356 = vmatpush1.bf16.msra.mxu1 %v23360_v57  ;;  %14065 = vmatprep.subr.bf16.mxu0 %v23365_v5  ;;  %v23452_v57 = vld [vmem:[%s31644_s5 + $0x704] ss:$52 sps:$4 sm:$0xff]  }
 0x676   :  { %14357 = vmatprep.subr.bf16.mxu1 %v23368_v44  ;;  %v23447_v5 = vld [vmem:[%s31644_s5 + $0x6f8] ss:$52 sps:$4 sm:$0xff]  }
 0x677   :  { %v23455_v44 = vld [vmem:[%s31644_s5 + $0x764] ss:$52 sps:$4 sm:$0xff]  }
 0x678   :  { %14066 = vmatpush1.bf16.msra.mxu0 %v23363_v46  ;;  %v23458_v46 = vld [vmem:[%s31644_s5 + $0x76c] ss:$52 sps:$4 sm:$0xff]  }
 0x679   :  { %14358 = vmatpush1.bf16.msra.mxu1 %v23366_v2  ;;  %14067 = vmatprep.subr.bf16.mxu0 %v23371_v23  ;;  %v23453_v2 = vld [vmem:[%s31644_s5 + $0x760] ss:$52 sps:$4 sm:$0xff]  }
 0x67a   :  { %12303 = vmatmul.mubr.bf16.gmra.mrb[72].mxu0 %v29450_v56  ;;  %14359 = vmatprep.subr.bf16.mxu1 %v23374_v4  ;;  %v12655_v23 = vld [vmem:[#allocation3 + $0x40] sm:$0xff]  ;;  %v23456_v4 = vld [vmem:[%s31644_s5 + $0x768] ss:$52 sps:$4 sm:$0xff]  }
 0x67b   :  { %12595 = vmatmul.mubr.bf16.gmra.mrb[72].mxu1 %v29450_v56  ;;  %19565 = vmatprep.mubr.msk.bf16.mxu0 %vm5340_vm13, %v10646_v41  ;;  %v23386_v56 = vld [vmem:[%s31644_s5 + $0x28c] ss:$52 sps:$4 sm:$0xff]  }
 0x67c   :  { %19569 = vmatprep.mubr.msk.bf16.mxu1 %vm5340_vm13, %v10646_v41  ;;  %14068 = vmatpush1.bf16.msra.mxu0 %v23369_v21  ;;  %v23461_v21 = vld [vmem:[%s31644_s5 + $0x7cc] ss:$52 sps:$4 sm:$0xff]   ;;  %v23459_v41 = vld [vmem:[%s31644_s5 + $0x7c8] ss:$52 sps:$4 sm:$0xff]  }
 0x67d   :  { %14360 = vmatpush1.bf16.msra.mxu1 %v23372_v32  ;;  %14069 = vmatprep.subr.bf16.mxu0 %v23377_v30  ;;  %v12664_v32 = vld [vmem:[#allocation3 + $0x88] sm:$0xff] }
 0x67e   :  { %14361 = vmatprep.subr.bf16.mxu1 %v23380_v48  ;;  %v23464_v30 = vld [vmem:[%s31644_s5 + $0x7d4] ss:$52 sps:$4 sm:$0xff]   ;;  %v23462_v48 = vld [vmem:[%s31644_s5 + $0x7d0] ss:$52 sps:$4 sm:$0xff]  }
 0x680   :  { %14070 = vmatpush1.bf16.msra.mxu0 %v23375_v16  ;;  %v23467_v16 = vld [vmem:[%s31644_s5 + $0x834] ss:$52 sps:$4 sm:$0xff]  }
 0x681   :  { %14362 = vmatpush1.bf16.msra.mxu1 %v23378_v20  ;;  %14071 = vmatprep.subr.bf16.mxu0 %v23383_v18  ;;  %v23470_v20 = vld [vmem:[%s31644_s5 + $0x83c] ss:$52 sps:$4 sm:$0xff]  }
 0x682   :  { %12313 = vmatmul.mubr.bf16.gmra.mrb[76].mxu0 %v29482_v14  ;;  %14363 = vmatprep.subr.bf16.mxu1 %v23386_v56  ;;  %v23465_v18 = vld [vmem:[%s31644_s5 + $0x830] ss:$52 sps:$4 sm:$0xff]  }
 0x683   :  { %12605 = vmatmul.mubr.bf16.gmra.mrb[76].mxu1 %v29482_v14  ;;  %14091 = vmatprep.mubr.bf16.mxu0 %v12648_v43  ;;  %v23398_v14 = vld [vmem:[%s31644_s5 + $0x35c] ss:$52 sps:$4 sm:$0xff]   ;;  %v12663_v56 = vld [vmem:[#allocation3 + $0x80] sm:$0xff] }
 0x684   :  { %14072 = vmatpush1.bf16.msra.mxu0 %v23381_v12  ;;  %14383 = vmatprep.mubr.bf16.mxu1 %v12648_v43  ;;  %v23468_v12 = vld [vmem:[%s31644_s5 + $0x838] ss:$52 sps:$4 sm:$0xff]  }
 0x685   :  { %14364 = vmatpush1.bf16.msra.mxu1 %v23384_v42  ;;  %14073 = vmatprep.subr.bf16.mxu0 %v23389_v35  ;;  %v23473_v42 = vld [vmem:[%s31644_s5 + $0x89c] ss:$52 sps:$4 sm:$0xff]   ;;  %v12672_v35 = vld [vmem:[#allocation3 + $0xc8] sm:$0xff]  ;;  %v23476_v43 = vld [vmem:[%s31644_s5 + $0x8a4] ss:$52 sps:$4 sm:$0xff]  }
 0x686   :  { %14365 = vmatprep.subr.bf16.mxu1 %v23392_v52  ;;  %v23471_v52 = vld [vmem:[%s31644_s5 + $0x898] ss:$52 sps:$4 sm:$0xff]  }
 0x688   :  { %14074 = vmatpush1.bf16.msra.mxu0 %v23387_v59  ;;  %v23474_v59 = vld [vmem:[%s31644_s5 + $0x8a0] ss:$52 sps:$4 sm:$0xff]  }
 0x689   :  { %14366 = vmatpush1.bf16.msra.mxu1 %v23390_v61  ;;  %14075 = vmatprep.subr.bf16.mxu0 %v23395_v11  ;;  %v23479_v61 = vld [vmem:[%s31644_s5 + $0x904] ss:$52 sps:$4 sm:$0xff]   ;;  %v23482_v11 = vld [vmem:[%s31644_s5 + $0x90c] ss:$52 sps:$4 sm:$0xff]  }
 0x68a   :  { %14367 = vmatprep.subr.bf16.mxu1 %v23398_v14  ;;  %v23477_v14 = vld [vmem:[%s31644_s5 + $0x900] ss:$52 sps:$4 sm:$0xff]  }
 0x68c   :  { %14076 = vmatpush1.bf16.msra.mxu0 %v23393_v45  ;;  %v12671_v45 = vld [vmem:[#allocation3 + $0xc0] sm:$0xff] }
 0x68d   :  { %14368 = vmatpush1.bf16.msra.mxu1 %v23396_v8  ;;  %14077 = vmatprep.subr.bf16.mxu0 %v23401_v0  ;;  %v23480_v8 = vld [vmem:[%s31644_s5 + $0x908] ss:$52 sps:$4 sm:$0xff]   ;;  %v23485_v0 = vld [vmem:[%s31644_s5 + $0x96c] ss:$52 sps:$4 sm:$0xff]  }
 0x68e   :  { %14369 = vmatprep.subr.bf16.mxu1 %v23404_v37  ;;  %v12650_v37 = vld [vmem:[#allocation3 + $0x18] sm:$0xff] }
 0x690   :  { %14078 = vmatpush1.bf16.msra.mxu0 %v23399_v19  ;;  %v23488_v19 = vld [vmem:[%s31644_s5 + $0x974] ss:$52 sps:$4 sm:$0xff]  }
 0x691   :  { %14370 = vmatpush1.bf16.msra.mxu1 %v23402_v13  ;;  %14079 = vmatprep.subr.bf16.mxu0 %v23407_v51  ;;  %v23483_v13 = vld [vmem:[%s31644_s5 + $0x968] ss:$52 sps:$4 sm:$0xff]   ;;  %v23486_v51 = vld [vmem:[%s31644_s5 + $0x970] ss:$52 sps:$4 sm:$0xff]  }
 0x692   :  { %14371 = vmatprep.subr.bf16.mxu1 %v23410_v15  ;;  %v23491_v15 = vld [vmem:[%s31644_s5 + $0x9d4] ss:$52 sps:$4 sm:$0xff]  }
 0x694   :  { %14080 = vmatpush1.bf16.msra.mxu0 %v23405_v9  ;;  %v23494_v9 = vld [vmem:[%s31644_s5 + $0x9dc] ss:$52 sps:$4 sm:$0xff]  }
 0x695   :  { %14372 = vmatpush1.bf16.msra.mxu1 %v23408_v25  ;;  %14081 = vmatprep.subr.bf16.mxu0 %v23413_v10  ;;  %v23489_v25 = vld [vmem:[%s31644_s5 + $0x9d0] ss:$52 sps:$4 sm:$0xff]   ;;  %v23492_v10 = vld [vmem:[%s31644_s5 + $0x9d8] ss:$52 sps:$4 sm:$0xff]  }
 0x696   :  { %14373 = vmatprep.subr.bf16.mxu1 %v23416_v17  ;;  %v23497_v17 = vld [vmem:[%s31644_s5 + $0xa3c] ss:$52 sps:$4 sm:$0xff]  }
 0x698   :  { %14082 = vmatpush1.bf16.msra.mxu0 %v23411_v7  ;;  %v23500_v7 = vld [vmem:[%s31644_s5 + $0xa44] ss:$52 sps:$4 sm:$0xff]  }
 0x699   :  { %14374 = vmatpush1.bf16.msra.mxu1 %v23414_v36  ;;  %14083 = vmatprep.subr.bf16.mxu0 %v23419_v54  ;;  %v23495_v36 = vld [vmem:[%s31644_s5 + $0xa38] ss:$52 sps:$4 sm:$0xff]   ;;  %v23498_v54 = vld [vmem:[%s31644_s5 + $0xa40] ss:$52 sps:$4 sm:$0xff]  }
 0x69a   :  { %14375 = vmatprep.subr.bf16.mxu1 %v23422_v1  ;;  %v23503_v1 = vld [vmem:[%s31644_s5 + $0xaa4] ss:$52 sps:$4 sm:$0xff]  }
 0x69c   :  { %14084 = vmatpush1.bf16.msra.mxu0 %v23417_v49  ;;  %v23506_v49 = vld [vmem:[%s31644_s5 + $0xaac] ss:$52 sps:$4 sm:$0xff]  }
 0x69d   :  { %14376 = vmatpush1.bf16.msra.mxu1 %v23420_v58  ;;  %14085 = vmatprep.subr.bf16.mxu0 %v23425_v60  ;;  %v23501_v58 = vld [vmem:[%s31644_s5 + $0xaa0] ss:$52 sps:$4 sm:$0xff]   ;;  %v23504_v60 = vld [vmem:[%s31644_s5 + $0xaa8] ss:$52 sps:$4 sm:$0xff]  }
 0x69e   :  { %14377 = vmatprep.subr.bf16.mxu1 %v23428_v47  ;;  %v23509_v47 = vld [vmem:[%s31644_s5 + $0xb0c] ss:$52 sps:$4 sm:$0xff]  }
 0x6a0   :  { %14086 = vmatpush1.bf16.msra.mxu0 %v23423_v28  ;;  %v23512_v28 = vld [vmem:[%s31644_s5 + $0xb14] ss:$52 sps:$4 sm:$0xff]  }
 0x6a1   :  { %14378 = vmatpush1.bf16.msra.mxu1 %v23426_v6  ;;  %14087 = vmatprep.subr.bf16.mxu0 %v23431_v62  ;;  %v23507_v6 = vld [vmem:[%s31644_s5 + $0xb08] ss:$52 sps:$4 sm:$0xff]   ;;  %v23510_v62 = vld [vmem:[%s31644_s5 + $0xb10] ss:$52 sps:$4 sm:$0xff]  }
 0x6a2   :  { %14379 = vmatprep.subr.bf16.mxu1 %v23434_v50  ;;  %v23515_v50 = vld [vmem:[%s31644_s5 + $0xb74] ss:$52 sps:$4 sm:$0xff]  }
 0x6a4   :  { %14088 = vmatpush1.bf16.msra.mxu0 %v23429_v40  ;;  %v23518_v40 = vld [vmem:[%s31644_s5 + $0xb7c] ss:$52 sps:$4 sm:$0xff]  }
 0x6a5   :  { %14380 = vmatpush1.bf16.msra.mxu1 %v23432_v55  ;;  %14089 = vmatprep.subr.bf16.mxu0 %v23437_v38  ;;  %v23513_v55 = vld [vmem:[%s31644_s5 + $0xb70] ss:$52 sps:$4 sm:$0xff]   ;;  %v23516_v38 = vld [vmem:[%s31644_s5 + $0xb78] ss:$52 sps:$4 sm:$0xff]  }
 0x6a6   :  { %14381 = vmatprep.subr.bf16.mxu1 %v23440_v22  ;;  %v23521_v22 = vld [vmem:[%s31644_s5 + $0xbdc] ss:$52 sps:$4 sm:$0xff]  }
 0x6a8   :  { %14090 = vmatpush1.bf16.msra.mxu0 %v23435_v3  ;;  %v23524_v3 = vld [vmem:[%s31644_s5 + $0xbe4] ss:$52 sps:$4 sm:$0xff]  }
 0x6a9   :  { %14382 = vmatpush1.bf16.msra.mxu1 %v23438_v39  ;;  %14132 = vmatprep.subr.bf16.mxu0 %v23443_v27  ;;  %v23519_v39 = vld [vmem:[%s31644_s5 + $0xbd8] ss:$52 sps:$4 sm:$0xff]   ;;  %v23522_v27 = vld [vmem:[%s31644_s5 + $0xbe0] ss:$52 sps:$4 sm:$0xff]  }
 0x6aa   :  { %14424 = vmatprep.subr.bf16.mxu1 %v23446_v24  ;;  %v23527_v24 = vld [vmem:[%s31644_s5 + $0xc44] ss:$52 sps:$4 sm:$0xff]  }
 0x6ab   :  { %14092 = vmatmul.mubr.bf16.vlgmr.msra.gmra.mrb[80].mxu0 %v12647_v53 }
 0x6ac   :  { %14384 = vmatmul.mubr.bf16.vlgmr.msra.gmra.mrb[80].mxu1 %v12647_v53  ;;  %14101 = vmatprep.mubr.bf16.mxu0 %v12656_v31  ;;  %v23525_v53 = vld [vmem:[%s31644_s5 + $0xc40] ss:$52 sps:$4 sm:$0xff]  }
 0x6ad   :  { %14133 = vmatpush1.bf16.msra.mxu0 %v23441_v26  ;;  %14393 = vmatprep.mubr.bf16.mxu1 %v12656_v31  ;;  %v23530_v26 = vld [vmem:[%s31644_s5 + $0xc4c] ss:$52 sps:$4 sm:$0xff]   ;;  %v23536_v31 = vld [vmem:[%s31644_s5 + $0xcb4] ss:$52 sps:$4 sm:$0xff]  }
 0x6ae   :  { %14425 = vmatpush1.bf16.msra.mxu1 %v23444_v33  ;;  %14134 = vmatprep.subr.bf16.mxu0 %v23449_v34  ;;  %v23528_v33 = vld [vmem:[%s31644_s5 + $0xc48] ss:$52 sps:$4 sm:$0xff]   ;;  %v23533_v34 = vld [vmem:[%s31644_s5 + $0xcac] ss:$52 sps:$4 sm:$0xff]  }
 0x6af   :  { %14426 = vmatprep.subr.bf16.mxu1 %v23452_v57  ;;  %v23531_v57 = vld [vmem:[%s31644_s5 + $0xca8] ss:$52 sps:$4 sm:$0xff]  }
 0x6b1   :  { %14135 = vmatpush1.bf16.msra.mxu0 %v23447_v5  ;;  %v23534_v5 = vld [vmem:[%s31644_s5 + $0xcb0] ss:$52 sps:$4 sm:$0xff]  }
 0x6b2   :  { %14427 = vmatpush1.bf16.msra.mxu1 %v23450_v63  ;;  %14136 = vmatprep.subr.bf16.mxu0 %v23455_v44  ;;  %v23539_v63 = vld [vmem:[%s31644_s5 + $0xd14] ss:$52 sps:$4 sm:$0xff]   ;;  %v23542_v44 = vld [vmem:[%s31644_s5 + $0xd1c] ss:$52 sps:$4 sm:$0xff]  }
 0x6b3   :  { %14102 = vmatmul.mubr.bf16.gmra.mrb[84].mxu0 %v12655_v23  ;;  %14428 = vmatprep.subr.bf16.mxu1 %v23458_v46  ;;  %v23537_v46 = vld [vmem:[%s31644_s5 + $0xd10] ss:$52 sps:$4 sm:$0xff]  }
 0x6b4   :  { %14394 = vmatmul.mubr.bf16.gmra.mrb[84].mxu1 %v12655_v23  ;;  %14111 = vmatprep.mubr.bf16.mxu0 %v12664_v32  ;;  %v23540_v23 = vld [vmem:[%s31644_s5 + $0xd18] ss:$52 sps:$4 sm:$0xff]  }
 0x6b5   :  { %14137 = vmatpush1.bf16.msra.mxu0 %v23453_v2  ;;  %14403 = vmatprep.mubr.bf16.mxu1 %v12664_v32  ;;  %v12649_v2 = vld [vmem:[#allocation3 + $0x10] sm:$0xff]  ;;  %v23548_v32 = vld [vmem:[%s31644_s5 + $0xd84] ss:$52 sps:$4 sm:$0xff]  }
 0x6b6   :  { %14429 = vmatpush1.bf16.msra.mxu1 %v23456_v4  ;;  %14138 = vmatprep.subr.bf16.mxu0 %v23461_v21  ;;  %v23545_v4 = vld [vmem:[%s31644_s5 + $0xd7c] ss:$52 sps:$4 sm:$0xff]  }
 0x6b7   :  { %14430 = vmatprep.subr.bf16.mxu1 %v23464_v30  ;;  %v12658_v21 = vld [vmem:[#allocation3 + $0x58] sm:$0xff] }
 0x6b8   :  { %v23543_v30 = vld [vmem:[%s31644_s5 + $0xd78] ss:$52 sps:$4 sm:$0xff]  }
 0x6b9   :  { %14139 = vmatpush1.bf16.msra.mxu0 %v23459_v41  ;;  %v23546_v41 = vld [vmem:[%s31644_s5 + $0xd80] ss:$52 sps:$4 sm:$0xff]  }
 0x6ba   :  { %14431 = vmatpush1.bf16.msra.mxu1 %v23462_v48  ;;  %14140 = vmatprep.subr.bf16.mxu0 %v23467_v16  ;;  %v23551_v48 = vld [vmem:[%s31644_s5 + $0xde4] ss:$52 sps:$4 sm:$0xff]   ;;  %v23554_v16 = vld [vmem:[%s31644_s5 + $0xdec] ss:$52 sps:$4 sm:$0xff]  }
 0x6bb   :  { %14112 = vmatmul.mubr.bf16.gmra.mrb[88].mxu0 %v12663_v56  ;;  %14432 = vmatprep.subr.bf16.mxu1 %v23470_v20  ;;  %v23549_v20 = vld [vmem:[%s31644_s5 + $0xde0] ss:$52 sps:$4 sm:$0xff]  }
 0x6bc   :  { %14404 = vmatmul.mubr.bf16.gmra.mrb[88].mxu1 %v12663_v56  ;;  %14121 = vmatprep.mubr.bf16.mxu0 %v12672_v35  ;;  %v23552_v56 = vld [vmem:[%s31644_s5 + $0xde8] ss:$52 sps:$4 sm:$0xff]  }
 0x6bd   :  { %14141 = vmatpush1.bf16.msra.mxu0 %v23465_v18  ;;  %14413 = vmatprep.mubr.bf16.mxu1 %v12672_v35  ;;  %v12657_v18 = vld [vmem:[#allocation3 + $0x50] sm:$0xff] }
 0x6be   :  { %14433 = vmatpush1.bf16.msra.mxu1 %v23468_v12  ;;  %14142 = vmatprep.subr.bf16.mxu0 %v23473_v42  ;;  %v23557_v12 = vld [vmem:[%s31644_s5 + $0xe4c] ss:$52 sps:$4 sm:$0xff]   ;;  %v12666_v42 = vld [vmem:[#allocation3 + $0x98] sm:$0xff]  ;;  %v23560_v35 = vld [vmem:[%s31644_s5 + $0xe54] ss:$52 sps:$4 sm:$0xff]  }
 0x6bf   :  { %14434 = vmatprep.subr.bf16.mxu1 %v23476_v43  ;;  %v23555_v43 = vld [vmem:[%s31644_s5 + $0xe48] ss:$52 sps:$4 sm:$0xff]  }
 0x6c1   :  { %14143 = vmatpush1.bf16.msra.mxu0 %v23471_v52  ;;  %v23558_v52 = vld [vmem:[%s31644_s5 + $0xe50] ss:$52 sps:$4 sm:$0xff]  }
 0x6c2   :  { %14435 = vmatpush1.bf16.msra.mxu1 %v23474_v59  ;;  %14144 = vmatprep.subr.bf16.mxu0 %v23479_v61  ;;  %v23563_v59 = vld [vmem:[%s31644_s5 + $0xeb4] ss:$52 sps:$4 sm:$0xff]   ;;  %v23566_v61 = vld [vmem:[%s31644_s5 + $0xebc] ss:$52 sps:$4 sm:$0xff]  }
 0x6c3   :  { %14122 = vmatmul.mubr.bf16.gmra.mrb[92].mxu0 %v12671_v45  ;;  %14436 = vmatprep.subr.bf16.mxu1 %v23482_v11  ;;  %v23561_v11 = vld [vmem:[%s31644_s5 + $0xeb0] ss:$52 sps:$4 sm:$0xff]  }
 0x6c4   :  { %14414 = vmatmul.mubr.bf16.gmra.mrb[92].mxu1 %v12671_v45  ;;  %14164 = vmatprep.mubr.bf16.mxu0 %v12650_v37  ;;  %v23564_v45 = vld [vmem:[%s31644_s5 + $0xeb8] ss:$52 sps:$4 sm:$0xff]  }
 0x6c5   :  { %14145 = vmatpush1.bf16.msra.mxu0 %v23477_v14  ;;  %14456 = vmatprep.mubr.bf16.mxu1 %v12650_v37  ;;  %v12665_v14 = vld [vmem:[#allocation3 + $0x90] sm:$0xff]  ;;  %v23572_v37 = vld [vmem:[%s31644_s5 + $0xf24] ss:$52 sps:$4 sm:$0xff]  }
 0x6c6   :  { %14437 = vmatpush1.bf16.msra.mxu1 %v23480_v8  ;;  %14146 = vmatprep.subr.bf16.mxu0 %v23485_v0  ;;  %v23569_v8 = vld [vmem:[%s31644_s5 + $0xf1c] ss:$52 sps:$4 sm:$0xff]  }
 0x6c7   :  { %14438 = vmatprep.subr.bf16.mxu1 %v23488_v19  ;;  %v12674_v0 = vld [vmem:[#allocation3 + $0xd8] sm:$0xff] }
 0x6c8   :  { %v23567_v19 = vld [vmem:[%s31644_s5 + $0xf18] ss:$52 sps:$4 sm:$0xff]  }
 0x6c9   :  { %14147 = vmatpush1.bf16.msra.mxu0 %v23483_v13  ;;  %v23570_v13 = vld [vmem:[%s31644_s5 + $0xf20] ss:$52 sps:$4 sm:$0xff]  }
 0x6ca   :  { %14439 = vmatpush1.bf16.msra.mxu1 %v23486_v51  ;;  %14148 = vmatprep.subr.bf16.mxu0 %v23491_v15  ;;  %v23575_v51 = vld [vmem:[%s31644_s5 + $0xf84] ss:$52 sps:$4 sm:$0xff]   ;;  %v23578_v15 = vld [vmem:[%s31644_s5 + $0xf8c] ss:$52 sps:$4 sm:$0xff]  }
 0x6cb   :  { %14440 = vmatprep.subr.bf16.mxu1 %v23494_v9  ;;  %v23573_v9 = vld [vmem:[%s31644_s5 + $0xf80] ss:$52 sps:$4 sm:$0xff]  }
 0x6cd   :  { %14149 = vmatpush1.bf16.msra.mxu0 %v23489_v25  ;;  %v12673_v25 = vld [vmem:[#allocation3 + $0xd0] sm:$0xff] }
 0x6ce   :  { %14441 = vmatpush1.bf16.msra.mxu1 %v23492_v10  ;;  %14150 = vmatprep.subr.bf16.mxu0 %v23497_v17  ;;  %v23576_v10 = vld [vmem:[%s31644_s5 + $0xf88] ss:$52 sps:$4 sm:$0xff]   ;;  %v23581_v17 = vld [vmem:[%s31644_s5 + $0xfec] ss:$52 sps:$4 sm:$0xff]  }
 0x6cf   :  { %14442 = vmatprep.subr.bf16.mxu1 %v23500_v7  ;;  %v12652_v7 = vld [vmem:[#allocation3 + $0x28] sm:$0xff] }
 0x6d1   :  { %14151 = vmatpush1.bf16.msra.mxu0 %v23495_v36  ;;  %v23584_v36 = vld [vmem:[%s31644_s5 + $0xff4] ss:$52 sps:$4 sm:$0xff]  }
 0x6d2   :  { %14443 = vmatpush1.bf16.msra.mxu1 %v23498_v54  ;;  %14152 = vmatprep.subr.bf16.mxu0 %v23503_v1  ;;  %v23579_v54 = vld [vmem:[%s31644_s5 + $0xfe8] ss:$52 sps:$4 sm:$0xff]   ;;  %v23582_v1 = vld [vmem:[%s31644_s5 + $0xff0] ss:$52 sps:$4 sm:$0xff]  }
 0x6d3   :  { %14444 = vmatprep.subr.bf16.mxu1 %v23506_v49  ;;  %v23587_v49 = vld [vmem:[%s31644_s5 + $0x1054] ss:$52 sps:$4 sm:$0xff]  }
 0x6d5   :  { %14153 = vmatpush1.bf16.msra.mxu0 %v23501_v58  ;;  %v23590_v58 = vld [vmem:[%s31644_s5 + $0x105c] ss:$52 sps:$4 sm:$0xff]  }
 0x6d6   :  { %14445 = vmatpush1.bf16.msra.mxu1 %v23504_v60  ;;  %14154 = vmatprep.subr.bf16.mxu0 %v23509_v47  ;;  %v23585_v60 = vld [vmem:[%s31644_s5 + $0x1050] ss:$52 sps:$4 sm:$0xff]   ;;  %v23588_v47 = vld [vmem:[%s31644_s5 + $0x1058] ss:$52 sps:$4 sm:$0xff]  }
 0x6d7   :  { %14446 = vmatprep.subr.bf16.mxu1 %v23512_v28  ;;  %v23593_v28 = vld [vmem:[%s31644_s5 + $0x10bc] ss:$52 sps:$4 sm:$0xff]  }
 0x6d9   :  { %14155 = vmatpush1.bf16.msra.mxu0 %v23507_v6  ;;  %v23596_v6 = vld [vmem:[%s31644_s5 + $0x10c4] ss:$52 sps:$4 sm:$0xff]  }
 0x6da   :  { %14447 = vmatpush1.bf16.msra.mxu1 %v23510_v62  ;;  %14156 = vmatprep.subr.bf16.mxu0 %v23515_v50  ;;  %v23591_v62 = vld [vmem:[%s31644_s5 + $0x10b8] ss:$52 sps:$4 sm:$0xff]   ;;  %v23594_v50 = vld [vmem:[%s31644_s5 + $0x10c0] ss:$52 sps:$4 sm:$0xff]  }
 0x6db   :  { %14448 = vmatprep.subr.bf16.mxu1 %v23518_v40  ;;  %v23599_v40 = vld [vmem:[%s31644_s5 + $0x1124] ss:$52 sps:$4 sm:$0xff]  }
 0x6dd   :  { %14157 = vmatpush1.bf16.msra.mxu0 %v23513_v55  ;;  %v23602_v55 = vld [vmem:[%s31644_s5 + $0x112c] ss:$52 sps:$4 sm:$0xff]  }
 0x6de   :  { %14449 = vmatpush1.bf16.msra.mxu1 %v23516_v38  ;;  %14158 = vmatprep.subr.bf16.mxu0 %v23521_v22  ;;  %v23597_v38 = vld [vmem:[%s31644_s5 + $0x1120] ss:$52 sps:$4 sm:$0xff]   ;;  %v23600_v22 = vld [vmem:[%s31644_s5 + $0x1128] ss:$52 sps:$4 sm:$0xff]  }
 0x6df   :  { %14450 = vmatprep.subr.bf16.mxu1 %v23524_v3  ;;  %v23605_v3 = vld [vmem:[%s31644_s5 + $0x118c] ss:$52 sps:$4 sm:$0xff]  }
 0x6e1   :  { %14159 = vmatpush1.bf16.msra.mxu0 %v23519_v39  ;;  %v23608_v39 = vld [vmem:[%s31644_s5 + $0x1194] ss:$52 sps:$4 sm:$0xff]  }
 0x6e2   :  { %14451 = vmatpush1.bf16.msra.mxu1 %v23522_v27  ;;  %14160 = vmatprep.subr.bf16.mxu0 %v23527_v24  ;;  %v23603_v27 = vld [vmem:[%s31644_s5 + $0x1188] ss:$52 sps:$4 sm:$0xff]   ;;  %v23606_v24 = vld [vmem:[%s31644_s5 + $0x1190] ss:$52 sps:$4 sm:$0xff]  }
 0x6e3   :  { %14452 = vmatprep.subr.bf16.mxu1 %v23530_v26  ;;  %v23611_v26 = vld [vmem:[%s31644_s5 + $0x11f4] ss:$52 sps:$4 sm:$0xff]  }
 0x6e5   :  { %14161 = vmatpush1.bf16.msra.mxu0 %v23525_v53  ;;  %v23614_v53 = vld [vmem:[%s31644_s5 + $0x11fc] ss:$52 sps:$4 sm:$0xff]  }
 0x6e6   :  { %14453 = vmatpush1.bf16.msra.mxu1 %v23528_v33  ;;  %14162 = vmatprep.subr.bf16.mxu0 %v23533_v34  ;;  %v23609_v33 = vld [vmem:[%s31644_s5 + $0x11f0] ss:$52 sps:$4 sm:$0xff]   ;;  %v23612_v34 = vld [vmem:[%s31644_s5 + $0x11f8] ss:$52 sps:$4 sm:$0xff]  }
 0x6e7   :  { %14454 = vmatprep.subr.bf16.mxu1 %v23536_v31  ;;  %v23617_v31 = vld [vmem:[%s31644_s5 + $0x125c] ss:$52 sps:$4 sm:$0xff]  }
 0x6e9   :  { %14163 = vmatpush1.bf16.msra.mxu0 %v23531_v57  ;;  %v23620_v57 = vld [vmem:[%s31644_s5 + $0x1264] ss:$52 sps:$4 sm:$0xff]  }
 0x6ea   :  { %14455 = vmatpush1.bf16.msra.mxu1 %v23534_v5  ;;  %14205 = vmatprep.subr.bf16.mxu0 %v23539_v63  ;;  %v23615_v5 = vld [vmem:[%s31644_s5 + $0x1258] ss:$52 sps:$4 sm:$0xff]   ;;  %v23618_v63 = vld [vmem:[%s31644_s5 + $0x1260] ss:$52 sps:$4 sm:$0xff]  }
 0x6eb   :  { %14497 = vmatprep.subr.bf16.mxu1 %v23542_v44  ;;  %v23623_v44 = vld [vmem:[%s31644_s5 + $0x12c4] ss:$52 sps:$4 sm:$0xff]  }
 0x6ec   :  { %14165 = vmatmul.mubr.bf16.vlgmr.msra.gmra.mrb[80].mxu0 %v12649_v2 }
 0x6ed   :  { %14457 = vmatmul.mubr.bf16.vlgmr.msra.gmra.mrb[80].mxu1 %v12649_v2  ;;  %14174 = vmatprep.mubr.bf16.mxu0 %v12658_v21  ;;  %v23621_v2 = vld [vmem:[%s31644_s5 + $0x12c0] ss:$52 sps:$4 sm:$0xff]  }
 0x6ee   :  { %14206 = vmatpush1.bf16.msra.mxu0 %v23537_v46  ;;  %14466 = vmatprep.mubr.bf16.mxu1 %v12658_v21  ;;  %v23626_v46 = vld [vmem:[%s31644_s5 + $0x12cc] ss:$52 sps:$4 sm:$0xff]   ;;  %v23632_v21 = vld [vmem:[%s31644_s5 + $0x1334] ss:$52 sps:$4 sm:$0xff]  }
 0x6ef   :  { %14498 = vmatpush1.bf16.msra.mxu1 %v23540_v23  ;;  %14207 = vmatprep.subr.bf16.mxu0 %v23545_v4  ;;  %v23624_v23 = vld [vmem:[%s31644_s5 + $0x12c8] ss:$52 sps:$4 sm:$0xff]   ;;  %v23629_v4 = vld [vmem:[%s31644_s5 + $0x132c] ss:$52 sps:$4 sm:$0xff]  }
 0x6f0   :  { %14499 = vmatprep.subr.bf16.mxu1 %v23548_v32  ;;  %v23627_v32 = vld [vmem:[%s31644_s5 + $0x1328] ss:$52 sps:$4 sm:$0xff]  }
 0x6f2   :  { %14208 = vmatpush1.bf16.msra.mxu0 %v23543_v30  ;;  %v23630_v30 = vld [vmem:[%s31644_s5 + $0x1330] ss:$52 sps:$4 sm:$0xff]  }
 0x6f3   :  { %14500 = vmatpush1.bf16.msra.mxu1 %v23546_v41  ;;  %14209 = vmatprep.subr.bf16.mxu0 %v23551_v48  ;;  %v23635_v41 = vld [vmem:[%s31644_s5 + $0x1394] ss:$52 sps:$4 sm:$0xff]   ;;  %v23638_v48 = vld [vmem:[%s31644_s5 + $0x139c] ss:$52 sps:$4 sm:$0xff]  }
 0x6f4   :  { %14175 = vmatmul.mubr.bf16.gmra.mrb[84].mxu0 %v12657_v18  ;;  %14501 = vmatprep.subr.bf16.mxu1 %v23554_v16  ;;  %v23633_v16 = vld [vmem:[%s31644_s5 + $0x1390] ss:$52 sps:$4 sm:$0xff]  }
 0x6f5   :  { %14467 = vmatmul.mubr.bf16.gmra.mrb[84].mxu1 %v12657_v18  ;;  %14184 = vmatprep.mubr.bf16.mxu0 %v12666_v42  ;;  %v23636_v18 = vld [vmem:[%s31644_s5 + $0x1398] ss:$52 sps:$4 sm:$0xff]  }
 0x6f6   :  { %14210 = vmatpush1.bf16.msra.mxu0 %v23549_v20  ;;  %14476 = vmatprep.mubr.bf16.mxu1 %v12666_v42  ;;  %v12651_v20 = vld [vmem:[#allocation3 + $0x20] sm:$0xff] }
 0x6f7   :  { %14502 = vmatpush1.bf16.msra.mxu1 %v23552_v56  ;;  %14211 = vmatprep.subr.bf16.mxu0 %v23557_v12  ;;  %v23641_v56 = vld [vmem:[%s31644_s5 + $0x13fc] ss:$52 sps:$4 sm:$0xff]   ;;  %v12660_v12 = vld [vmem:[#allocation3 + $0x68] sm:$0xff]  ;;  %v23644_v42 = vld [vmem:[%s31644_s5 + $0x1404] ss:$52 sps:$4 sm:$0xff]  }
 0x6f8   :  { %14503 = vmatprep.subr.bf16.mxu1 %v23560_v35  ;;  %v23639_v35 = vld [vmem:[%s31644_s5 + $0x13f8] ss:$52 sps:$4 sm:$0xff]  }
 0x6fa   :  { %14212 = vmatpush1.bf16.msra.mxu0 %v23555_v43  ;;  %v23642_v43 = vld [vmem:[%s31644_s5 + $0x1400] ss:$52 sps:$4 sm:$0xff]  }
 0x6fb   :  { %14504 = vmatpush1.bf16.msra.mxu1 %v23558_v52  ;;  %14213 = vmatprep.subr.bf16.mxu0 %v23563_v59  ;;  %v23647_v52 = vld [vmem:[%s31644_s5 + $0x1464] ss:$52 sps:$4 sm:$0xff]   ;;  %v23650_v59 = vld [vmem:[%s31644_s5 + $0x146c] ss:$52 sps:$4 sm:$0xff]  }
 0x6fc   :  { %14185 = vmatmul.mubr.bf16.gmra.mrb[88].mxu0 %v12665_v14  ;;  %14505 = vmatprep.subr.bf16.mxu1 %v23566_v61  ;;  %v23645_v61 = vld [vmem:[%s31644_s5 + $0x1460] ss:$52 sps:$4 sm:$0xff]  }
 0x6fd   :  { %14477 = vmatmul.mubr.bf16.gmra.mrb[88].mxu1 %v12665_v14  ;;  %14194 = vmatprep.mubr.bf16.mxu0 %v12674_v0  ;;  %v23648_v14 = vld [vmem:[%s31644_s5 + $0x1468] ss:$52 sps:$4 sm:$0xff]  }
 0x6fe   :  { %14214 = vmatpush1.bf16.msra.mxu0 %v23561_v11  ;;  %14486 = vmatprep.mubr.bf16.mxu1 %v12674_v0  ;;  %v12659_v11 = vld [vmem:[#allocation3 + $0x60] sm:$0xff]  ;;  %v23656_v0 = vld [vmem:[%s31644_s5 + $0x14d4] ss:$52 sps:$4 sm:$0xff]  }
 0x6ff   :  { %14506 = vmatpush1.bf16.msra.mxu1 %v23564_v45  ;;  %14215 = vmatprep.subr.bf16.mxu0 %v23569_v8  ;;  %v23653_v45 = vld [vmem:[%s31644_s5 + $0x14cc] ss:$52 sps:$4 sm:$0xff]  }
 0x700   :  { %14507 = vmatprep.subr.bf16.mxu1 %v23572_v37  ;;  %v12668_v8 = vld [vmem:[#allocation3 + $0xa8] sm:$0xff] }
 0x701   :  { %v23651_v37 = vld [vmem:[%s31644_s5 + $0x14c8] ss:$52 sps:$4 sm:$0xff]  }
 0x702   :  { %14216 = vmatpush1.bf16.msra.mxu0 %v23567_v19  ;;  %v23654_v19 = vld [vmem:[%s31644_s5 + $0x14d0] ss:$52 sps:$4 sm:$0xff]  }
 0x703   :  { %14508 = vmatpush1.bf16.msra.mxu1 %v23570_v13  ;;  %14217 = vmatprep.subr.bf16.mxu0 %v23575_v51  ;;  %v23659_v13 = vld [vmem:[%s31644_s5 + $0x1534] ss:$52 sps:$4 sm:$0xff]   ;;  %v23662_v51 = vld [vmem:[%s31644_s5 + $0x153c] ss:$52 sps:$4 sm:$0xff]  }
 0x704   :  { %14195 = vmatmul.mubr.bf16.gmra.mrb[92].mxu0 %v12673_v25  ;;  %14509 = vmatprep.subr.bf16.mxu1 %v23578_v15  ;;  %v24130_v15 = vmov 1966171168  }
 0x705   :  { %14487 = vmatmul.mubr.bf16.gmra.mrb[92].mxu1 %v12673_v25  ;;  %14237 = vmatprep.mubr.bf16.mxu0 %v12652_v7  ;;  %v17478_v25 = vlaneseq }
 0x706   :  { %14218 = vmatpush1.bf16.msra.mxu0 %v23573_v9  ;;  %14529 = vmatprep.mubr.bf16.mxu1 %v12652_v7  ;;  %v17476_v9 = vunpack.c.l.s4 %v24130_v15  ;;  %v23660_v7 = vld [vmem:[%s31644_s5 + $0x1538] ss:$52 sps:$4 sm:$0xff]  }
 0x707   :  { %14510 = vmatpush1.bf16.msra.mxu1 %v23576_v10  ;;  %14219 = vmatprep.subr.bf16.mxu0 %v23581_v17  ;;  %v23657_v10 = vld [vmem:[%s31644_s5 + $0x1530] ss:$52 sps:$4 sm:$0xff]  }
 0x708   :  { %14511 = vmatprep.subr.bf16.mxu1 %v23584_v36  ;;  %v12667_v17 = vld [vmem:[#allocation3 + $0xa0] sm:$0xff]  ;;  %v23665_v36 = vld [vmem:[%s31644_s5 + $0x159c] ss:$52 sps:$4 sm:$0xff]  }
 0x70a   :  { %14220 = vmatpush1.bf16.msra.mxu0 %v23579_v54  ;;  %v12676_v54 = vld [vmem:[#allocation3 + $0xe8] sm:$0xff] }
 0x70b   :  { %14512 = vmatpush1.bf16.msra.mxu1 %v23582_v1  ;;  %14221 = vmatprep.subr.bf16.mxu0 %v23587_v49  ;;  %v23668_v49 = vld [vmem:[%s31644_s5 + $0x15a4] ss:$52 sps:$4 sm:$0xff]  }
 0x70c   :  { %14513 = vmatprep.subr.bf16.mxu1 %v23590_v58 }
 0x70e   :  { %14222 = vmatpush1.bf16.msra.mxu0 %v23585_v60 }
 0x70f   :  { %14514 = vmatpush1.bf16.msra.mxu1 %v23588_v47  ;;  %14223 = vmatprep.subr.bf16.mxu0 %v23593_v28  ;;  %v17477_v47 = vunpack.c.0.s8 %v17476_v9  ;;  %v17479_v28 = vshrl.u32 %v17478_v25, 7  ;;  %v23685_v25 = vld [vmem:[%s31644_s5 + $0x20] ss:$52 sps:$4 sm:$0xff]  }
 0x710   :  { %14515 = vmatprep.subr.bf16.mxu1 %v23596_v6 }
 0x712   :  { %14224 = vmatpush1.bf16.msra.mxu0 %v23591_v62  ;;  %v23663_v62 = vld [vmem:[%s31644_s5 + $0x1598] ss:$52 sps:$4 sm:$0xff]  }
 0x713   :  { %14516 = vmatpush1.bf16.msra.mxu1 %v23594_v50  ;;  %14225 = vmatprep.subr.bf16.mxu0 %v23599_v40  ;;  %v23666_v40 = vld [vmem:[%s31644_s5 + $0x15a0] ss:$52 sps:$4 sm:$0xff]  }
 0x714   :  { %14517 = vmatprep.subr.bf16.mxu1 %v23602_v55 }
 0x716   :  { %14226 = vmatpush1.bf16.msra.mxu0 %v23597_v38 }
 0x717   :  { %14518 = vmatpush1.bf16.msra.mxu1 %v23600_v22  ;;  %14227 = vmatprep.subr.bf16.mxu0 %v23605_v3  ;;  %v23671_v22 = vld [vmem:[%s31644_s5 + $0x1604] ss:$52 sps:$4 sm:$0xff]  }
 0x718   :  { %14519 = vmatprep.subr.bf16.mxu1 %v23608_v39  ;;  %v23674_v39 = vld [vmem:[%s31644_s5 + $0x160c] ss:$52 sps:$4 sm:$0xff]  }
 0x71a   :  { %14228 = vmatpush1.bf16.msra.mxu0 %v23603_v27  ;;  %v12903_v27 = vld [vmem:[%s31644_s5 + $0x16d0] sm:$0x33] }
 0x71b   :  { %14520 = vmatpush1.bf16.msra.mxu1 %v23606_v24  ;;  %14229 = vmatprep.subr.bf16.mxu0 %v23611_v26  ;;  %v12904_v24 = vld [vmem:[%s31644_s5 + $0x16d8] sm:$0x33]  ;;  %v30346_v26 = vsub.s32 %v17477_v47, %v17479_v28 }
 0x71c   :  { %14521 = vmatprep.subr.bf16.mxu1 %v23614_v53  ;;  %v23669_v53 = vld [vmem:[%s31644_s5 + $0x1600] ss:$52 sps:$4 sm:$0xff]  }
 0x71e   :  { %14230 = vmatpush1.bf16.msra.mxu0 %v23609_v33  ;;  %v12675_v33 = vld [vmem:[#allocation3 + $0xe0] sm:$0xff] }
 0x71f   :  { %14522 = vmatpush1.bf16.msra.mxu1 %v23612_v34  ;;  %14231 = vmatprep.subr.bf16.mxu0 %v23617_v31  ;;  %v23672_v34 = vld [vmem:[%s31644_s5 + $0x1608] ss:$52 sps:$4 sm:$0xff]   ;;  %v23677_v31 = vld [vmem:[%s31644_s5 + $0x166c] ss:$52 sps:$4 sm:$0xff]  }
 0x720   :  { %14523 = vmatprep.subr.bf16.mxu1 %v23620_v57  ;;  %v19795_v57 = vcombine.high %v12903_v27, %v12903_v27 }
 0x722   :  { %14232 = vmatpush1.bf16.msra.mxu0 %v23615_v5  ;;  %v12654_v5 = vld [vmem:[#allocation3 + $0x38] sm:$0xff] }
 0x723   :  { %14524 = vmatpush1.bf16.msra.mxu1 %v23618_v63  ;;  %14233 = vmatprep.subr.bf16.mxu0 %v23623_v44  ;;  %v23680_v44 = vld [vmem:[%s31644_s5 + $0x1674] ss:$52 sps:$4 sm:$0xff]  }
 0x724   :  { %14525 = vmatprep.subr.bf16.mxu1 %v23626_v46  ;;  %v19797_v46 = vcombine.high %v12904_v24, %v12904_v24 }
 0x726   :  { %14234 = vmatpush1.bf16.msra.mxu0 %v23621_v2 }
 0x727   :  { %14526 = vmatpush1.bf16.msra.mxu1 %v23624_v23  ;;  %14235 = vmatprep.subr.bf16.mxu0 %v23629_v4 }
 0x728   :  { %14527 = vmatprep.subr.bf16.mxu1 %v23632_v21 }
 0x72a   :  { %14236 = vmatpush1.bf16.msra.mxu0 %v23627_v32 }
 0x72b   :  { %14528 = vmatpush1.bf16.msra.mxu1 %v23630_v30  ;;  %14278 = vmatprep.subr.bf16.mxu0 %v23635_v41  ;;  %v23675_v41 = vld [vmem:[%s31644_s5 + $0x1668] ss:$52 sps:$4 sm:$0xff]  }
 0x72c   :  { %14570 = vmatprep.subr.bf16.mxu1 %v23638_v48 }
 0x72d   :  { %14238 = vmatmul.mubr.bf16.vlgmr.msra.gmra.mrb[80].mxu0 %v12651_v20 }
 0x72e   :  { %14530 = vmatmul.mubr.bf16.vlgmr.msra.gmra.mrb[80].mxu1 %v12651_v20  ;;  %14247 = vmatprep.mubr.bf16.mxu0 %v12660_v12  ;;  %v19796_v20 = vcombine.low %v12904_v24, %v12904_v24 }
 0x72f   :  { %14279 = vmatpush1.bf16.msra.mxu0 %v23633_v16  ;;  %14539 = vmatprep.mubr.bf16.mxu1 %v12660_v12  ;;  %v19794_v16 = vcombine.low %v12903_v27, %v12903_v27 }
 0x730   :  { %14571 = vmatpush1.bf16.msra.mxu1 %v23636_v18  ;;  %14280 = vmatprep.subr.bf16.mxu0 %v23641_v56  ;;  %v23678_v18 = vld [vmem:[%s31644_s5 + $0x1670] ss:$52 sps:$4 sm:$0xff]  }
 0x731   :  { %14572 = vmatprep.subr.bf16.mxu1 %v23644_v42  ;;  %v14051_v42 = vand.u32 %v19795_v57, %v29660_v29 }
 0x733   :  { %14281 = vmatpush1.bf16.msra.mxu0 %v23639_v35 }
 0x734   :  { %14573 = vmatpush1.bf16.msra.mxu1 %v23642_v43  ;;  %14282 = vmatprep.subr.bf16.mxu0 %v23647_v52 }
 0x735   :  { %14248 = vmatmul.mubr.bf16.gmra.mrb[84].mxu0 %v12659_v11  ;;  %14574 = vmatprep.subr.bf16.mxu1 %v23650_v59  ;;  %v14057_v59 = vand.u32 %v19797_v46, %v29660_v29 }
 0x736   :  { %14540 = vmatmul.mubr.bf16.gmra.mrb[84].mxu1 %v12659_v11  ;;  %14257 = vmatprep.mubr.bf16.mxu0 %v12668_v8  ;;  %v14048_v11 = vand.u32 %v19794_v16, %v29660_v29 }
 0x737   :  { %14283 = vmatpush1.bf16.msra.mxu0 %v23645_v61  ;;  %14549 = vmatprep.mubr.bf16.mxu1 %v12668_v8 }
 0x738   :  { %14575 = vmatpush1.bf16.msra.mxu1 %v23648_v14  ;;  %14284 = vmatprep.subr.bf16.mxu0 %v23653_v45  ;;  %v14054_v14 = vand.u32 %v19796_v20, %v29660_v29  ;;  %v23687_v45 = vld [vmem:[%s31644_s5 + $0x24] ss:$52 sps:$4 sm:$0xff]  }
 0x739   :  { %14576 = vmatprep.subr.bf16.mxu1 %v23656_v0 }
 0x73b   :  { %14285 = vmatpush1.bf16.msra.mxu0 %v23651_v37 }
 0x73c   :  { %14577 = vmatpush1.bf16.msra.mxu1 %v23654_v19  ;;  %14286 = vmatprep.subr.bf16.mxu0 %v23659_v13  ;;  %v23690_v19 = vld [vmem:[%s31644_s5 + $0x2c] ss:$52 sps:$4 sm:$0xff]  }
 0x73d   :  { %14258 = vmatmul.mubr.bf16.gmra.mrb[88].mxu0 %v12667_v17  ;;  %14578 = vmatprep.subr.bf16.mxu1 %v23662_v51  ;;  %v12284_v1 = vpop.f32.mrb[64].mxu0 }
 0x73e   :  { %14550 = vmatmul.mubr.bf16.gmra.mrb[88].mxu1 %v12667_v17  ;;  %14267 = vmatprep.mubr.bf16.mxu0 %v12676_v54  ;;  %12615 = vst [vmem:[#allocation4] sm:$0xff] %v12284_v1  ;;  %v12576_v58 = vpop.f32.mrb[64].mxu1  ;;  %v12286_v60 = vpop.f32.mrb[65].mxu0  ;;  %v23688_v17 = vld [vmem:[%s31644_s5 + $0x28] ss:$52 sps:$4 sm:$0xff]  }
 0x73f   :  { %14287 = vmatpush1.bf16.msra.mxu0 %v23657_v10  ;;  %14559 = vmatprep.mubr.bf16.mxu1 %v12676_v54  ;;  %12617 = vst [vmem:[#allocation4 + $0x10] sm:$0xff] %v12576_v58  ;;  %12616 = vst [vmem:[#allocation4 + $0x8] sm:$0xff] %v12286_v60  ;;  %v12578_v6 = vpop.f32.mrb[65].mxu1  ;;  %v12288_v50 = vpop.f32.mrb[66].mxu0  ;;  %v23693_v54 = vld [vmem:[%s31644_s5 + $0x8c] ss:$52 sps:$4 sm:$0xff]  }
 0x740   :  { %14579 = vmatpush1.bf16.msra.mxu1 %v23660_v7  ;;  %12618 = vst [vmem:[#allocation4 + $0x18] sm:$0xff] %v12578_v6  ;;  %14288 = vmatprep.subr.bf16.mxu0 %v23665_v36  ;;  %v12580_v55 = vpop.f32.mrb[66].mxu1  ;;  %v12290_v38 = vpop.f32.mrb[67].mxu0  ;;  %v12653_v58 = vld [vmem:[#allocation3 + $0x30] sm:$0xff]  ;;  %v12662_v6 = vld [vmem:[#allocation3 + $0x78] sm:$0xff] }
 0x741   :  { %14580 = vmatprep.subr.bf16.mxu1 %v23668_v49  ;;  %v12582_v3 = vpop.f32.mrb[67].mxu1  ;;  %v23691_v50 = vld [vmem:[%s31644_s5 + $0x88] ss:$52 sps:$4 sm:$0xff]  }
 0x742   :  { %12622 = vst [vmem:[#allocation4 + $0x80] sm:$0xff] %v12582_v3  ;;  %v23699_v55 = vld [vmem:[%s31644_s5 + $0xf4] ss:$52 sps:$4 sm:$0xff]  }
 0x743   :  { %14289 = vmatpush1.bf16.msra.mxu0 %v23663_v62  ;;  %v23696_v62 = vld [vmem:[%s31644_s5 + $0x94] ss:$52 sps:$4 sm:$0xff]  }
 0x744   :  { %14581 = vmatpush1.bf16.msra.mxu1 %v23666_v40  ;;  %14290 = vmatprep.subr.bf16.mxu0 %v23671_v22  ;;  %v23694_v40 = vld [vmem:[%s31644_s5 + $0x90] ss:$52 sps:$4 sm:$0xff]  }
 0x745   :  { %14268 = vmatmul.mubr.bf16.gmra.mrb[92].mxu0 %v12675_v33  ;;  %14582 = vmatprep.subr.bf16.mxu1 %v23674_v39  ;;  %v12294_v63 = vpop.f32.mrb[68].mxu0  ;;  %v17473_v2 = vld [vmem:[#allocation4 + $0x1] ss:$0 sm:$0xff]  ;;  %v17493_v47 = vld [vmem:[#allocation4 + $0x2] ss:$0 sm:$0xff] }
 0x746   :  { %14560 = vmatmul.mubr.bf16.gmra.mrb[92].mxu1 %v12675_v33  ;;  %19798 = vmatprep.mubr.msk.bf16.mxu0 %vm5340_vm13, %v12654_v5  ;;  %v12586_v23 = vpop.f32.mrb[68].mxu1  ;;  %v12296_v4 = vpop.f32.mrb[69].mxu0  ;;  %v17481_v21 = vrot.slane %v17473_v2, %v30346_v26  ;;  %v17585_v32 = vld [vmem:[#allocation4 + $0x16] ss:$0 sm:$0xff]  ;;  %v17519_v61 = vld [vmem:[#allocation4 + $0xb] ss:$0 sm:$0xff] }
 0x747   :  { %14291 = vmatpush1.bf16.msra.mxu0 %v23669_v53  ;;  %19802 = vmatprep.mubr.msk.bf16.mxu1 %vm5340_vm13, %v12654_v5  ;;  %v12588_v30 = vpop.f32.mrb[69].mxu1  ;;  %v12298_v48 = vpop.f32.mrb[70].mxu0  ;;  %v17593_v43 = vrot.slane %v17585_v32, %v30346_v26  ;;  %v17527_v0 = vrot.slane %v17519_v61, %v30346_v26  ;;  %v17539_v13 = vld [vmem:[#allocation4 + $0xc] ss:$0 sm:$0xff]  ;;  %v17494_v28 = vld [vmem:[#allocation4 + $0xa] ss:$0 sm:$0xff] }
 0x748   :  { %14583 = vmatpush1.bf16.msra.mxu1 %v23672_v34  ;;  %14292 = vmatprep.subr.bf16.mxu0 %v23677_v31  ;;  %v12590_v56 = vpop.f32.mrb[70].mxu1  ;;  %v12300_v12 = vpop.f32.mrb[71].mxu0  ;;  %v17488_v35 = vrot.slane %v17481_v21, %v30346_v26  ;;  %v17547_v49 = vrot.slane %v17539_v13, %v30346_v26  ;;  %v17497_v22 = vcombine.low %v17493_v47, %v17494_v28  ;;  %v23702_v39 = vld [vmem:[%s31644_s5 + $0xfc] ss:$52 sps:$4 sm:$0xff]   ;;  %v17559_v33 = vld [vmem:[#allocation4 + $0xd] ss:$0 sm:$0xff] }
 0x749   :  { %14584 = vmatprep.subr.bf16.mxu1 %v23680_v44  ;;  %v12592_v52 = vpop.f32.mrb[71].mxu1  ;;  %v17600_v8 = vrot.slane %v17593_v43, %v30346_v26  ;;  %v17534_v1 = vrot.slane %v17527_v0, %v30346_v26  ;;  %v17560_v34 = vld [vmem:[#allocation4 + $0x15] ss:$0 sm:$0xff]  ;;  %v23697_v44 = vld [vmem:[%s31644_s5 + $0xf0] ss:$52 sps:$4 sm:$0xff]   ;;  %v12670_v21 = vld [vmem:[#allocation3 + $0xb8] sm:$0xff] }
 0x74a   :  { %17489 = vrot.lane.b32.xlu0 %v17488_v35, %s24131_s16  ;;  %v17554_v38 = vrot.slane %v17547_v49, %v30346_v26  ;;  %v12661_v63 = vld [vmem:[#allocation3 + $0x70] sm:$0xff]  ;;  %v17504_v23 = vrot.slane %v17497_v22, %v30346_v26  ;;  %v23700_v4 = vld [vmem:[%s31644_s5 + $0xf8] ss:$52 sps:$4 sm:$0xff]   ;;  %v17606_v20 = vld [vmem:[#allocation4 + $0x1f] ss:$0 sm:$0xff] }
 0x74b   :  { %14293 = vmatpush1.bf16.msra.mxu0 %v23675_v41  ;;  %v23705_v30 = vld [vmem:[%s31644_s5 + $0x15c] ss:$52 sps:$4 sm:$0xff]   ;;  %v17563_v41 = vcombine.low %v17559_v33, %v17560_v34  ;;  %v23708_v48 = vld [vmem:[%s31644_s5 + $0x164] ss:$52 sps:$4 sm:$0xff]   ;;  %v17605_v16 = vld [vmem:[#allocation4 + $0x17] ss:$0 sm:$0xff] }
 0x74c   :  { %14585 = vmatpush1.bf16.msra.mxu1 %v23678_v18  ;;  %14294 = vmatprep.subr.bf16.mxu0 %v14051_v42  ;;  %v23703_v12 = vld [vmem:[%s31644_s5 + $0x158] ss:$52 sps:$4 sm:$0xff]   ;;  %v17511_v42 = vrot.slane %v17504_v23, %v30346_v26  ;;  %v23706_v35 = vld [vmem:[%s31644_s5 + $0x160] ss:$52 sps:$4 sm:$0xff]   ;;  %v23718_v49 = vld [vmem:[%s31644_s5 + $0x230] ss:$52 sps:$4 sm:$0xff]  }
 0x74d   :  { %14586 = vmatprep.subr.bf16.mxu1 %v14057_v59  ;;  %v12304_v37 = vpop.f32.mrb[72].mxu0  ;;  %v23711_v43 = vld [vmem:[%s31644_s5 + $0x1c4] ss:$52 sps:$4 sm:$0xff]   ;;  %v17570_v52 = vrot.slane %v17563_v41, %v30346_v26  ;;  %v17609_v59 = vcombine.low %v17605_v16, %v17606_v20  ;;  %v23714_v61 = vld [vmem:[%s31644_s5 + $0x1cc] ss:$52 sps:$4 sm:$0xff]  }
 0x74e   :  { %12631 = vst [vmem:[#allocation4 + $0x1a0] sm:$0xff] %v12304_v37  ;;  %v12596_v51 = vpop.f32.mrb[72].mxu1  ;;  %17601 = vrot.lane.b32.xlu0 %v17600_v8, %s24132_s0  ;;  %v12306_v15 = vpop.f32.mrb[73].mxu0  ;;  %v23709_v8 = vld [vmem:[%s31644_s5 + $0x1c0] ss:$52 sps:$4 sm:$0xff]  }
 0x74f   :  { %14295 = vmatpush1.bf16.msra.mxu0 %v14048_v11  ;;  %12633 = vst [vmem:[#allocation4 + $0x1b0] sm:$0xff] %v12596_v51  ;;  %v12598_v9 = vpop.f32.mrb[73].mxu1  ;;  %12632 = vst [vmem:[#allocation4 + $0x1a8] sm:$0xff] %v12306_v15  ;;  %v12308_v10 = vpop.f32.mrb[74].mxu0  ;;  %v17577_v0 = vrot.slane %v17570_v52, %v30346_v26  ;;  %v17616_v37 = vrot.slane %v17609_v59, %v30346_v26  ;;  %v23717_v51 = vld [vmem:[%s31644_s5 + $0x22c] ss:$52 sps:$4 sm:$0xff]  }
 0x750   :  { %14587 = vmatpush1.bf16.msra.mxu1 %v14054_v14  ;;  %12634 = vst [vmem:[#allocation4 + $0x1b8] sm:$0xff] %v12598_v9  ;;  %16087 = vmatprep.subr.bf16.mxu0 %v23687_v45  ;;  %v12600_v7 = vpop.f32.mrb[74].mxu1  ;;  %v12310_v36 = vpop.f32.mrb[75].mxu0  ;;  %v12669_v45 = vld [vmem:[#allocation3 + $0xb0] sm:$0xff]  ;;  %v12678_v9 = vld [vmem:[#allocation3 + $0xf8] sm:$0xff] }
 0x751   :  { %16379 = vmatprep.subr.bf16.mxu1 %v23690_v19  ;;  %v12602_v60 = vpop.f32.mrb[75].mxu1  ;;  %v23712_v19 = vld [vmem:[%s31644_s5 + $0x1c8] ss:$52 sps:$4 sm:$0xff]   ;;  %v17631_v10 = vld [vmem:[#allocation4 + $0x80] ss:$0 sm:$0xff] }
 0x752   :  { %14311 = vmatmul.mubr.bf16.vlgmr.msra.gmra.mrb[80].mxu0 %v12653_v58  ;;  %12638 = vst [vmem:[#allocation4 + $0x220] sm:$0xff] %v12602_v60  ;;  %17535 = vrot.lane.b32.xlu0 %v17534_v1, %s24133_s25  ;;  %v17623_v1 = vrot.slane %v17616_v37, %v30346_v26  ;;  %v17639_v60 = vrot.slane %v17631_v10, %v30346_v26  ;;  %v23723_v47 = vld [vmem:[%s31644_s5 + $0x294] ss:$52 sps:$4 sm:$0xff]   ;;  %v23721_v22 = vld [vmem:[%s31644_s5 + $0x290] ss:$52 sps:$4 sm:$0xff]  }
 0x753   :  { %14603 = vmatmul.mubr.bf16.vlgmr.msra.gmra.mrb[80].mxu1 %v12653_v58  ;;  %19799 = vmatprep.mubr.msk.bf16.mxu0 %vm5340_vm13, %v12662_v6  ;;  %v23735_v23 = vld [vmem:[%s31644_s5 + $0x364] ss:$52 sps:$4 sm:$0xff]   ;;  %v23733_v41 = vld [vmem:[%s31644_s5 + $0x360] ss:$52 sps:$4 sm:$0xff]   ;;  %v23750_v59 = vld [vmem:[%s31644_s5 + $0x43c] ss:$52 sps:$4 sm:$0xff]  }
 0x754   :  { %19803 = vmatprep.mubr.msk.bf16.mxu1 %vm5340_vm13, %v12662_v6  ;;  %16088 = vmatpush1.bf16.msra.mxu0 %v23685_v25  ;;  %v23720_v25 = vld [vmem:[%s31644_s5 + $0x234] ss:$52 sps:$4 sm:$0xff]   ;;  %v17651_v6 = vld [vmem:[#allocation4 + $0x81] ss:$0 sm:$0xff]  ;;  %v23756_v37 = vld [vmem:[%s31644_s5 + $0x4a4] ss:$52 sps:$4 sm:$0xff]  }
 0x755   :  { %16380 = vmatpush1.bf16.msra.mxu1 %v23688_v17  ;;  %16089 = vmatprep.subr.bf16.mxu0 %v23693_v54  ;;  %v12314_v3 = vpop.f32.mrb[76].mxu0  ;;  %v18189_v27 = vld [vmem:[#allocation4 + $0x1a1] ss:$0 sm:$0xff]  ;;  %v18209_v7 = vld [vmem:[#allocation4 + $0x1a2] ss:$0 sm:$0xff] }
 0x756   :  { %16381 = vmatprep.subr.bf16.mxu1 %v23696_v62  ;;  %v12606_v24 = vpop.f32.mrb[76].mxu1  ;;  %17555 = vrot.lane.b32.xlu0 %v17554_v38, %s24134_s3  ;;  %v12316_v53 = vpop.f32.mrb[77].mxu0  ;;  %v18197_v5 = vrot.slane %v18189_v27, %v30346_v26  ;;  %v18299_v56 = vld [vmem:[#allocation4 + $0x1b6] ss:$0 sm:$0xff]  ;;  %v18234_v14 = vld [vmem:[#allocation4 + $0x1ab] ss:$0 sm:$0xff]  ;;  %v17659_v27 = vrot.slane %v17651_v6, %v30346_v26 }
 0x757   :  { %v12608_v31 = vpop.f32.mrb[77].mxu1  ;;  %v12318_v57 = vpop.f32.mrb[78].mxu0  ;;  %v18307_v11 = vrot.slane %v18299_v56, %v30346_v26  ;;  %v18242_v15 = vrot.slane %v18234_v14, %v30346_v26  ;;  %v18254_v17 = vld [vmem:[#allocation4 + $0x1ac] ss:$0 sm:$0xff]  ;;  %v18210_v36 = vld [vmem:[#allocation4 + $0x1aa] ss:$0 sm:$0xff] }
 0x758   :  { %16090 = vmatpush1.bf16.msra.mxu0 %v23691_v50  ;;  %v12610_v46 = vpop.f32.mrb[78].mxu1  ;;  %v12320_v2 = vpop.f32.mrb[79].mxu0  ;;  %v18204_v18 = vrot.slane %v18197_v5, %v30346_v26  ;;  %v23715_v54 = vld [vmem:[%s31644_s5 + $0x228] ss:$52 sps:$4 sm:$0xff]   ;;  %v18262_v28 = vrot.slane %v18254_v17, %v30346_v26  ;;  %v18213_v62 = vcombine.low %v18209_v7, %v18210_v36  ;;  %v12677_v38 = vld [vmem:[#allocation3 + $0xf0] sm:$0xff] }
 0x759   :  { %16382 = vmatpush1.bf16.msra.mxu1 %v23694_v40  ;;  %16091 = vmatprep.subr.bf16.mxu0 %v23699_v55  ;;  %v12612_v32 = vpop.f32.mrb[79].mxu1  ;;  %v18314_v13 = vrot.slane %v18307_v11, %v30346_v26  ;;  %v18249_v58 = vrot.slane %v18242_v15, %v30346_v26  ;;  %v23726_v50 = vld [vmem:[%s31644_s5 + $0x29c] ss:$52 sps:$4 sm:$0xff]   ;;  %v18274_v40 = vld [vmem:[#allocation4 + $0x1ad] ss:$0 sm:$0xff]  ;;  %v17666_v2 = vrot.slane %v17659_v27, %v30346_v26 }
 0x75a   :  { %14321 = vmatmul.mubr.bf16.gmra.mrb[84].mxu0 %v12661_v63  ;;  %16383 = vmatprep.subr.bf16.mxu1 %v23702_v39  ;;  %v18275_v55 = vld [vmem:[#allocation4 + $0x1b5] ss:$0 sm:$0xff]  ;;  %v23724_v3 = vld [vmem:[%s31644_s5 + $0x298] ss:$52 sps:$4 sm:$0xff]   ;;  %v17646_v39 = vrot.slane %v17639_v60, %v30346_v26  ;;  %v18269_v24 = vrot.slane %v18262_v28, %v30346_v26  ;;  %v23729_v53 = vld [vmem:[%s31644_s5 + $0x2fc] ss:$52 sps:$4 sm:$0xff]   ;;  %v18220_v33 = vrot.slane %v18213_v62, %v30346_v26 }
 0x75b   :  { %14613 = vmatmul.mubr.bf16.gmra.mrb[84].mxu1 %v12661_v63  ;;  %19800 = vmatprep.mubr.msk.bf16.mxu0 %vm5340_vm13, %v12670_v21  ;;  %v18278_v34 = vcombine.low %v18274_v40, %v18275_v55  ;;  %v23732_v31 = vld [vmem:[%s31644_s5 + $0x304] ss:$52 sps:$4 sm:$0xff]   ;;  %v18319_v57 = vld [vmem:[#allocation4 + $0x1b7] ss:$0 sm:$0xff]  ;;  %v18320_v5 = vld [vmem:[#allocation4 + $0x1bf] ss:$0 sm:$0xff] }
 0x75c   :  { %19804 = vmatprep.mubr.msk.bf16.mxu1 %vm5340_vm13, %v12670_v21  ;;  %16092 = vmatpush1.bf16.msra.mxu0 %v23697_v44  ;;  %v14676_v63 = vld [vmem:[#allocation3 + $0x8] sm:$0xff]  ;;  %v23730_v46 = vld [vmem:[%s31644_s5 + $0x300] ss:$52 sps:$4 sm:$0xff]   ;;  %v23745_v14 = vld [vmem:[%s31644_s5 + $0x430] ss:$52 sps:$4 sm:$0xff]  }
 0x75d   :  { %16384 = vmatpush1.bf16.msra.mxu1 %v23700_v4  ;;  %16093 = vmatprep.subr.bf16.mxu0 %v23705_v30  ;;  %v23727_v44 = vld [vmem:[%s31644_s5 + $0x2f8] ss:$52 sps:$4 sm:$0xff]   ;;  %v18227_v4 = vrot.slane %v18220_v33, %v30346_v26  ;;  %v18285_v32 = vrot.slane %v18278_v34, %v30346_v26  ;;  %v18323_v30 = vcombine.low %v18319_v57, %v18320_v5  ;;  %v18364_v11 = vld [vmem:[#allocation4 + $0x221] ss:$0 sm:$0xff]  ;;  %v23760_v17 = vld [vmem:[%s31644_s5 + $0x508] ss:$52 sps:$4 sm:$0xff]  }
 0x75e   :  { %16385 = vmatprep.subr.bf16.mxu1 %v23708_v48  ;;  %17512 = vrot.lane.b32.xlu0 %v17511_v42, %s24135_s10  ;;  %v23738_v21 = vld [vmem:[%s31644_s5 + $0x36c] ss:$52 sps:$4 sm:$0xff]   ;;  %v23736_v48 = vld [vmem:[%s31644_s5 + $0x368] ss:$52 sps:$4 sm:$0xff]   ;;  %v23759_v15 = vld [vmem:[%s31644_s5 + $0x504] ss:$52 sps:$4 sm:$0xff]  }
 0x75f   :  { %18205 = vrot.lane.b32.xlu1 %v18204_v18, %s24131_s16  ;;  %v23741_v16 = vld [vmem:[%s31644_s5 + $0x3cc] ss:$52 sps:$4 sm:$0xff]   ;;  %v18292_v20 = vrot.slane %v18285_v32, %v30346_v26  ;;  %v23744_v18 = vld [vmem:[%s31644_s5 + $0x3d4] ss:$52 sps:$4 sm:$0xff]   ;;  %v18330_v56 = vrot.slane %v18323_v30, %v30346_v26  ;;  %v23769_v60 = vld [vmem:[%s31644_s5 + $0x5d0] ss:$52 sps:$4 sm:$0xff]  }
 0x760   :  { %16094 = vmatpush1.bf16.msra.mxu0 %v23703_v12  ;;  %v18344_v12 = vld [vmem:[#allocation4 + $0x220] ss:$0 sm:$0xff]  ;;  %v23739_v42 = vld [vmem:[%s31644_s5 + $0x3c8] ss:$52 sps:$4 sm:$0xff]   ;;  %v23780_v6 = vld [vmem:[%s31644_s5 + $0x644] ss:$52 sps:$4 sm:$0xff]  }
 0x761   :  { %16386 = vmatpush1.bf16.msra.mxu1 %v23706_v35  ;;  %16095 = vmatprep.subr.bf16.mxu0 %v23711_v43  ;;  %v23742_v35 = vld [vmem:[%s31644_s5 + $0x3d0] ss:$52 sps:$4 sm:$0xff]   ;;  %v23747_v43 = vld [vmem:[%s31644_s5 + $0x434] ss:$52 sps:$4 sm:$0xff]   ;;  %v18337_v52 = vrot.slane %v18330_v56, %v30346_v26  ;;  %v23765_v7 = vld [vmem:[%s31644_s5 + $0x56c] ss:$52 sps:$4 sm:$0xff]  }
 0x762   :  { %14331 = vmatmul.mubr.bf16.gmra.mrb[88].mxu0 %v12669_v45  ;;  %16387 = vmatprep.subr.bf16.mxu1 %v23714_v61  ;;  %v18352_v61 = vrot.slane %v18344_v12, %v30346_v26  ;;  %v23757_v10 = vld [vmem:[%s31644_s5 + $0x500] ss:$52 sps:$4 sm:$0xff]   ;;  %v23777_v28 = vld [vmem:[%s31644_s5 + $0x63c] ss:$52 sps:$4 sm:$0xff]   ;;  %v23775_v62 = vld [vmem:[%s31644_s5 + $0x638] ss:$52 sps:$4 sm:$0xff]  }
 0x763   :  { %14623 = vmatmul.mubr.bf16.gmra.mrb[88].mxu1 %v12669_v45  ;;  %17578 = vrot.lane.b32.xlu0 %v17577_v0, %s24136_s17  ;;  %v23748_v45 = vld [vmem:[%s31644_s5 + $0x438] ss:$52 sps:$4 sm:$0xff]   ;;  %v23768_v36 = vld [vmem:[%s31644_s5 + $0x574] ss:$52 sps:$4 sm:$0xff]   ;;  %v23790_v33 = vld [vmem:[%s31644_s5 + $0x710] ss:$52 sps:$4 sm:$0xff]  }
 0x764   :  { %18315 = vrot.lane.b32.xlu1 %v18314_v13, %s24132_s0  ;;  %19801 = vmatprep.mubr.msk.bf16.mxu0 %vm5340_vm13, %v12678_v9  ;;  %s24137_s0 = smov 34   ;;  %v18359_v0 = vrot.slane %v18352_v61, %v30346_v26  ;;  %v23751_v13 = vld [vmem:[%s31644_s5 + $0x498] ss:$52 sps:$4 sm:$0xff]   ;;  %v23795_v34 = vld [vmem:[%s31644_s5 + $0x774] ss:$52 sps:$4 sm:$0xff]   ;;  %v14683_v5 = vld [vmem:[#allocation3 + $0x40] sm:$0xff] }
 0x765   :  { %19805 = vmatprep.mubr.msk.bf16.mxu1 %vm5340_vm13, %v12678_v9  ;;  %16096 = vmatpush1.bf16.msra.mxu0 %v23709_v8  ;;  %v23753_v8 = vld [vmem:[%s31644_s5 + $0x49c] ss:$52 sps:$4 sm:$0xff]   ;;  %v23783_v40 = vld [vmem:[%s31644_s5 + $0x6a4] ss:$52 sps:$4 sm:$0xff]   ;;  %v23786_v55 = vld [vmem:[%s31644_s5 + $0x6ac] ss:$52 sps:$4 sm:$0xff]  }
 0x766   :  { %16388 = vmatpush1.bf16.msra.mxu1 %v23712_v19  ;;  %16097 = vmatprep.subr.bf16.mxu0 %v23717_v51  ;;  %v18372_v19 = vrot.slane %v18364_v11, %v30346_v26  ;;  %v23754_v51 = vld [vmem:[%s31644_s5 + $0x4a0] ss:$52 sps:$4 sm:$0xff]   ;;  %v14684_v27 = vld [vmem:[#allocation3 + $0x48] sm:$0xff]  ;;  %v23793_v57 = vld [vmem:[%s31644_s5 + $0x770] ss:$52 sps:$4 sm:$0xff]   ;;  %s24151_s16 = smov 24  }
 0x767   :  { %16389 = vmatprep.subr.bf16.mxu1 %v23720_v25  ;;  %17624 = vrot.lane.b32.xlu0 %v17623_v1, %s24137_s0  ;;  %v23762_v25 = vld [vmem:[%s31644_s5 + $0x50c] ss:$52 sps:$4 sm:$0xff]   ;;  %v23766_v1 = vld [vmem:[%s31644_s5 + $0x570] ss:$52 sps:$4 sm:$0xff]   ;;  %v23811_v56 = vld [vmem:[%s31644_s5 + $0x8a8] ss:$52 sps:$4 sm:$0xff]  }
 0x768   :  { %18250 = vrot.lane.b32.xlu1 %v18249_v58, %s24133_s25  ;;  %v18379_v9 = vrot.slane %v18372_v19, %v30346_v26  ;;  %v23774_v58 = vld [vmem:[%s31644_s5 + $0x5dc] ss:$52 sps:$4 sm:$0xff]   ;;  %v23810_v32 = vld [vmem:[%s31644_s5 + $0x84c] ss:$52 sps:$4 sm:$0xff]  }
 0x769   :  { %16098 = vmatpush1.bf16.msra.mxu0 %v23715_v54  ;;  %v23763_v54 = vld [vmem:[%s31644_s5 + $0x568] ss:$52 sps:$4 sm:$0xff]   ;;  %v23805_v30 = vld [vmem:[%s31644_s5 + $0x840] ss:$52 sps:$4 sm:$0xff]   ;;  %v23814_v12 = vld [vmem:[%s31644_s5 + $0x8b0] ss:$52 sps:$4 sm:$0xff]  }
 0x76a   :  { %16390 = vmatpush1.bf16.msra.mxu1 %v23718_v49  ;;  %14341 = vmatmul.mubr.bf16.gmra.mrb[92].mxu0 %v12677_v38  ;;  %v23771_v49 = vld [vmem:[%s31644_s5 + $0x5d4] ss:$52 sps:$4 sm:$0xff]   ;;  %v23825_v61 = vld [vmem:[%s31644_s5 + $0x97c] ss:$52 sps:$4 sm:$0xff]  }
 0x76b   :  { %14633 = vmatmul.mubr.bf16.gmra.mrb[92].mxu1 %v12677_v38  ;;  %16099 = vmatprep.subr.bf16.mxu0 %v23723_v47  ;;  %v23772_v47 = vld [vmem:[%s31644_s5 + $0x5d8] ss:$52 sps:$4 sm:$0xff]   ;;  %v23781_v38 = vld [vmem:[%s31644_s5 + $0x6a0] ss:$52 sps:$4 sm:$0xff]  }
 0x76c   :  { %16391 = vmatprep.subr.bf16.mxu1 %v23726_v50  ;;  %17647 = vrot.lane.b32.xlu0 %v17646_v39, %s24138_s14  ;;  %v23778_v50 = vld [vmem:[%s31644_s5 + $0x640] ss:$52 sps:$4 sm:$0xff]   ;;  %v14678_v11 = vld [vmem:[#allocation3 + $0x18] sm:$0xff] }
 0x76d   :  { %18270 = vrot.lane.b32.xlu1 %v18269_v24, %s24134_s3  ;;  %16100 = vmatpush1.bf16.msra.mxu0 %v23721_v22  ;;  %v14675_v22 = vld [vmem:[#allocation3] sm:$0xff]  ;;  %v23792_v24 = vld [vmem:[%s31644_s5 + $0x714] ss:$52 sps:$4 sm:$0xff]   ;;  %s24157_s3 = smov 8  }
 0x76e   :  { %16119 = vmatprep.mubr.bf16.mxu0 %v14676_v63  ;;  %16392 = vmatpush1.bf16.msra.mxu1 %v23724_v3  ;;  %v23784_v3 = vld [vmem:[%s31644_s5 + $0x6a8] ss:$52 sps:$4 sm:$0xff]   ;;  %v23789_v39 = vld [vmem:[%s31644_s5 + $0x70c] ss:$52 sps:$4 sm:$0xff]  }
 0x76f   :  { %16411 = vmatprep.mubr.bf16.mxu1 %v14676_v63  ;;  %16101 = vmatprep.subr.bf16.mxu0 %v23729_v53  ;;  %v23787_v53 = vld [vmem:[%s31644_s5 + $0x708] ss:$52 sps:$4 sm:$0xff]   ;;  %v23796_v63 = vld [vmem:[%s31644_s5 + $0x778] ss:$52 sps:$4 sm:$0xff]   ;;  %v23829_v19 = vld [vmem:[%s31644_s5 + $0x9e0] ss:$52 sps:$4 sm:$0xff]  }
 0x770   :  { %16393 = vmatprep.subr.bf16.mxu1 %v23732_v31  ;;  %17667 = vrot.lane.b32.xlu0 %v17666_v2, %s24139_s26  ;;  %v23798_v31 = vld [vmem:[%s31644_s5 + $0x77c] ss:$52 sps:$4 sm:$0xff]   ;;  %v23804_v2 = vld [vmem:[%s31644_s5 + $0x7e4] ss:$52 sps:$4 sm:$0xff]  }
 0x771   :  { %18228 = vrot.lane.b32.xlu1 %v18227_v4, %s24135_s10  ;;  %16102 = vmatpush1.bf16.msra.mxu0 %v23727_v44  ;;  %v23801_v44 = vld [vmem:[%s31644_s5 + $0x7dc] ss:$52 sps:$4 sm:$0xff]   ;;  %v23802_v4 = vld [vmem:[%s31644_s5 + $0x7e0] ss:$52 sps:$4 sm:$0xff]  }
 0x772   :  { %16394 = vmatpush1.bf16.msra.mxu1 %v23730_v46  ;;  %16103 = vmatprep.subr.bf16.mxu0 %v23735_v23  ;;  %v14692_v46 = vld [vmem:[#allocation3 + $0x88] sm:$0xff] }
 0x773   :  { %16395 = vmatprep.subr.bf16.mxu1 %v23738_v21  ;;  %v23799_v23 = vld [vmem:[%s31644_s5 + $0x7d8] ss:$52 sps:$4 sm:$0xff]  }
 0x774   :  { %v23807_v21 = vld [vmem:[%s31644_s5 + $0x844] ss:$52 sps:$4 sm:$0xff]  }
 0x775   :  { %18293 = vrot.lane.b32.xlu1 %v18292_v20, %s24136_s17  ;;  %16104 = vmatpush1.bf16.msra.mxu0 %v23733_v41  ;;  %v14691_v41 = vld [vmem:[#allocation3 + $0x80] sm:$0xff]  ;;  %v14700_v20 = vld [vmem:[#allocation3 + $0xc8] sm:$0xff]  ;;  %s24141_s17 = smov 118  }
 0x776   :  { %16396 = vmatpush1.bf16.msra.mxu1 %v23736_v48  ;;  %16105 = vmatprep.subr.bf16.mxu0 %v23741_v16  ;;  %v23808_v48 = vld [vmem:[%s31644_s5 + $0x848] ss:$52 sps:$4 sm:$0xff]   ;;  %v23813_v16 = vld [vmem:[%s31644_s5 + $0x8ac] ss:$52 sps:$4 sm:$0xff]  }
 0x777   :  { %16397 = vmatprep.subr.bf16.mxu1 %v23744_v18  ;;  %v23816_v18 = vld [vmem:[%s31644_s5 + $0x8b4] ss:$52 sps:$4 sm:$0xff]  }
 0x779   :  { %18338 = vrot.lane.b32.xlu1 %v18337_v52, %s24137_s0  ;;  %16106 = vmatpush1.bf16.msra.mxu0 %v23739_v42  ;;  %v23819_v42 = vld [vmem:[%s31644_s5 + $0x914] ss:$52 sps:$4 sm:$0xff]   ;;  %v14699_v52 = vld [vmem:[#allocation3 + $0xc0] sm:$0xff] }
 0x77a   :  { %16398 = vmatpush1.bf16.msra.mxu1 %v23742_v35  ;;  %16107 = vmatprep.subr.bf16.mxu0 %v23747_v43  ;;  %v23822_v35 = vld [vmem:[%s31644_s5 + $0x91c] ss:$52 sps:$4 sm:$0xff]  }
 0x77b   :  { %16399 = vmatprep.subr.bf16.mxu1 %v23750_v59  ;;  %v23817_v43 = vld [vmem:[%s31644_s5 + $0x910] ss:$52 sps:$4 sm:$0xff]   ;;  %v23820_v59 = vld [vmem:[%s31644_s5 + $0x918] ss:$52 sps:$4 sm:$0xff]  }
 0x77d   :  { %18360 = vrot.lane.b32.xlu1 %v18359_v0, %s24138_s14  ;;  %16108 = vmatpush1.bf16.msra.mxu0 %v23745_v14  ;;  %v23828_v14 = vld [vmem:[%s31644_s5 + $0x984] ss:$52 sps:$4 sm:$0xff]  }
 0x77e   :  { %16400 = vmatpush1.bf16.msra.mxu1 %v23748_v45  ;;  %16109 = vmatprep.subr.bf16.mxu0 %v23753_v8  ;;  %v23823_v45 = vld [vmem:[%s31644_s5 + $0x978] ss:$52 sps:$4 sm:$0xff]   ;;  %v23826_v8 = vld [vmem:[%s31644_s5 + $0x980] ss:$52 sps:$4 sm:$0xff]  }
 0x77f   :  { %16401 = vmatprep.subr.bf16.mxu1 %v23756_v37  ;;  %v23831_v0 = vld [vmem:[%s31644_s5 + $0x9e4] ss:$52 sps:$4 sm:$0xff]   ;;  %v23834_v37 = vld [vmem:[%s31644_s5 + $0x9ec] ss:$52 sps:$4 sm:$0xff]  }
 0x781   :  { %18380 = vrot.lane.b32.xlu1 %v18379_v9, %s24139_s26  ;;  %16110 = vmatpush1.bf16.msra.mxu0 %v23751_v13  ;;  %v23832_v13 = vld [vmem:[%s31644_s5 + $0x9e8] ss:$52 sps:$4 sm:$0xff]   ;;  %s24147_s26 = smov 74  }
 0x782   :  { %16402 = vmatpush1.bf16.msra.mxu1 %v23754_v51  ;;  %16111 = vmatprep.subr.bf16.mxu0 %v23759_v15  ;;  %v23837_v51 = vld [vmem:[%s31644_s5 + $0xa4c] ss:$52 sps:$4 sm:$0xff]   ;;  %v23840_v15 = vld [vmem:[%s31644_s5 + $0xa54] ss:$52 sps:$4 sm:$0xff]  }
 0x783   :  { %16403 = vmatprep.subr.bf16.mxu1 %v23762_v25  ;;  %v23835_v9 = vld [vmem:[%s31644_s5 + $0xa48] ss:$52 sps:$4 sm:$0xff]   ;;  %v23838_v25 = vld [vmem:[%s31644_s5 + $0xa50] ss:$52 sps:$4 sm:$0xff]  }
 0x785   :  { %16112 = vmatpush1.bf16.msra.mxu0 %v23757_v10  ;;  %v23843_v10 = vld [vmem:[%s31644_s5 + $0xab4] ss:$52 sps:$4 sm:$0xff]  }
 0x786   :  { %16404 = vmatpush1.bf16.msra.mxu1 %v23760_v17  ;;  %16113 = vmatprep.subr.bf16.mxu0 %v23765_v7  ;;  %v23846_v17 = vld [vmem:[%s31644_s5 + $0xabc] ss:$52 sps:$4 sm:$0xff]  }
 0x787   :  { %16405 = vmatprep.subr.bf16.mxu1 %v23768_v36  ;;  %v23841_v7 = vld [vmem:[%s31644_s5 + $0xab0] ss:$52 sps:$4 sm:$0xff]   ;;  %v23844_v36 = vld [vmem:[%s31644_s5 + $0xab8] ss:$52 sps:$4 sm:$0xff]  }
 0x789   :  { %16114 = vmatpush1.bf16.msra.mxu0 %v23763_v54  ;;  %v23849_v54 = vld [vmem:[%s31644_s5 + $0xb1c] ss:$52 sps:$4 sm:$0xff]  }
 0x78a   :  { %16406 = vmatpush1.bf16.msra.mxu1 %v23766_v1  ;;  %16115 = vmatprep.subr.bf16.mxu0 %v23771_v49  ;;  %v23852_v1 = vld [vmem:[%s31644_s5 + $0xb24] ss:$52 sps:$4 sm:$0xff]  }
 0x78b   :  { %16407 = vmatprep.subr.bf16.mxu1 %v23774_v58  ;;  %v23847_v49 = vld [vmem:[%s31644_s5 + $0xb18] ss:$52 sps:$4 sm:$0xff]   ;;  %v23850_v58 = vld [vmem:[%s31644_s5 + $0xb20] ss:$52 sps:$4 sm:$0xff]  }
 0x78d   :  { %16116 = vmatpush1.bf16.msra.mxu0 %v23769_v60  ;;  %v23855_v60 = vld [vmem:[%s31644_s5 + $0xb84] ss:$52 sps:$4 sm:$0xff]  }
 0x78e   :  { %16408 = vmatpush1.bf16.msra.mxu1 %v23772_v47  ;;  %16117 = vmatprep.subr.bf16.mxu0 %v23777_v28  ;;  %v23858_v47 = vld [vmem:[%s31644_s5 + $0xb8c] ss:$52 sps:$4 sm:$0xff]  }
 0x78f   :  { %16409 = vmatprep.subr.bf16.mxu1 %v23780_v6  ;;  %v23853_v28 = vld [vmem:[%s31644_s5 + $0xb80] ss:$52 sps:$4 sm:$0xff]   ;;  %v23856_v6 = vld [vmem:[%s31644_s5 + $0xb88] ss:$52 sps:$4 sm:$0xff]  }
 0x791   :  { %16118 = vmatpush1.bf16.msra.mxu0 %v23775_v62  ;;  %v23861_v62 = vld [vmem:[%s31644_s5 + $0xbec] ss:$52 sps:$4 sm:$0xff]  }
 0x792   :  { %16410 = vmatpush1.bf16.msra.mxu1 %v23778_v50  ;;  %16160 = vmatprep.subr.bf16.mxu0 %v23783_v40  ;;  %v23864_v50 = vld [vmem:[%s31644_s5 + $0xbf4] ss:$52 sps:$4 sm:$0xff]  }
 0x793   :  { %16452 = vmatprep.subr.bf16.mxu1 %v23786_v55  ;;  %v23859_v40 = vld [vmem:[%s31644_s5 + $0xbe8] ss:$52 sps:$4 sm:$0xff]   ;;  %v23862_v55 = vld [vmem:[%s31644_s5 + $0xbf0] ss:$52 sps:$4 sm:$0xff]  }
 0x794   :  { %16120 = vmatmul.mubr.bf16.vlgmr.msra.gmra.mrb[96].mxu0 %v14675_v22 }
 0x795   :  { %16412 = vmatmul.mubr.bf16.vlgmr.msra.gmra.mrb[96].mxu1 %v14675_v22  ;;  %16129 = vmatprep.mubr.bf16.mxu0 %v14684_v27  ;;  %v23870_v22 = vld [vmem:[%s31644_s5 + $0xc5c] ss:$52 sps:$4 sm:$0xff]  }
 0x796   :  { %16161 = vmatpush1.bf16.msra.mxu0 %v23781_v38  ;;  %16421 = vmatprep.mubr.bf16.mxu1 %v14684_v27  ;;  %v23867_v38 = vld [vmem:[%s31644_s5 + $0xc54] ss:$52 sps:$4 sm:$0xff]   ;;  %v23873_v27 = vld [vmem:[%s31644_s5 + $0xcbc] ss:$52 sps:$4 sm:$0xff]  }
 0x797   :  { %16453 = vmatpush1.bf16.msra.mxu1 %v23784_v3  ;;  %16162 = vmatprep.subr.bf16.mxu0 %v23789_v39  ;;  %v23865_v3 = vld [vmem:[%s31644_s5 + $0xc50] ss:$52 sps:$4 sm:$0xff]   ;;  %v23868_v39 = vld [vmem:[%s31644_s5 + $0xc58] ss:$52 sps:$4 sm:$0xff]  }
 0x798   :  { %16454 = vmatprep.subr.bf16.mxu1 %v23792_v24  ;;  %v23876_v24 = vld [vmem:[%s31644_s5 + $0xcc4] ss:$52 sps:$4 sm:$0xff]  }
 0x79a   :  { %16163 = vmatpush1.bf16.msra.mxu0 %v23787_v53  ;;  %v23871_v53 = vld [vmem:[%s31644_s5 + $0xcb8] ss:$52 sps:$4 sm:$0xff]  }
 0x79b   :  { %16455 = vmatpush1.bf16.msra.mxu1 %v23790_v33  ;;  %16164 = vmatprep.subr.bf16.mxu0 %v23795_v34  ;;  %v23874_v33 = vld [vmem:[%s31644_s5 + $0xcc0] ss:$52 sps:$4 sm:$0xff]   ;;  %v23879_v34 = vld [vmem:[%s31644_s5 + $0xd24] ss:$52 sps:$4 sm:$0xff]  }
 0x79c   :  { %16130 = vmatmul.mubr.bf16.gmra.mrb[100].mxu0 %v14683_v5  ;;  %16456 = vmatprep.subr.bf16.mxu1 %v23798_v31  ;;  %v23882_v31 = vld [vmem:[%s31644_s5 + $0xd2c] ss:$52 sps:$4 sm:$0xff]  }
 0x79d   :  { %16422 = vmatmul.mubr.bf16.gmra.mrb[100].mxu1 %v14683_v5  ;;  %16139 = vmatprep.mubr.bf16.mxu0 %v14692_v46  ;;  %v14677_v5 = vld [vmem:[#allocation3 + $0x10] sm:$0xff] }
 0x79e   :  { %16165 = vmatpush1.bf16.msra.mxu0 %v23793_v57  ;;  %16431 = vmatprep.mubr.bf16.mxu1 %v14692_v46  ;;  %v23877_v57 = vld [vmem:[%s31644_s5 + $0xd20] ss:$52 sps:$4 sm:$0xff]   ;;  %v14686_v46 = vld [vmem:[#allocation3 + $0x58] sm:$0xff] }
 0x79f   :  { %16457 = vmatpush1.bf16.msra.mxu1 %v23796_v63  ;;  %16166 = vmatprep.subr.bf16.mxu0 %v23801_v44  ;;  %v23880_v63 = vld [vmem:[%s31644_s5 + $0xd28] ss:$52 sps:$4 sm:$0xff]   ;;  %v23885_v44 = vld [vmem:[%s31644_s5 + $0xd8c] ss:$52 sps:$4 sm:$0xff]  }
 0x7a0   :  { %16458 = vmatprep.subr.bf16.mxu1 %v23804_v2  ;;  %v23888_v2 = vld [vmem:[%s31644_s5 + $0xd94] ss:$52 sps:$4 sm:$0xff]  }
 0x7a2   :  { %16167 = vmatpush1.bf16.msra.mxu0 %v23799_v23  ;;  %v23883_v23 = vld [vmem:[%s31644_s5 + $0xd88] ss:$52 sps:$4 sm:$0xff]  }
 0x7a3   :  { %16459 = vmatpush1.bf16.msra.mxu1 %v23802_v4  ;;  %16168 = vmatprep.subr.bf16.mxu0 %v23807_v21  ;;  %v23886_v4 = vld [vmem:[%s31644_s5 + $0xd90] ss:$52 sps:$4 sm:$0xff]   ;;  %v23891_v21 = vld [vmem:[%s31644_s5 + $0xdf4] ss:$52 sps:$4 sm:$0xff]  }
 0x7a4   :  { %16140 = vmatmul.mubr.bf16.gmra.mrb[104].mxu0 %v14691_v41  ;;  %16460 = vmatprep.subr.bf16.mxu1 %v23810_v32  ;;  %v23894_v32 = vld [vmem:[%s31644_s5 + $0xdfc] ss:$52 sps:$4 sm:$0xff]  }
 0x7a5   :  { %16432 = vmatmul.mubr.bf16.gmra.mrb[104].mxu1 %v14691_v41  ;;  %16149 = vmatprep.mubr.bf16.mxu0 %v14700_v20  ;;  %v14685_v41 = vld [vmem:[#allocation3 + $0x50] sm:$0xff] }
 0x7a6   :  { %16169 = vmatpush1.bf16.msra.mxu0 %v23805_v30  ;;  %16441 = vmatprep.mubr.bf16.mxu1 %v14700_v20  ;;  %v23889_v30 = vld [vmem:[%s31644_s5 + $0xdf0] ss:$52 sps:$4 sm:$0xff]   ;;  %v14694_v20 = vld [vmem:[#allocation3 + $0x98] sm:$0xff] }
 0x7a7   :  { %16461 = vmatpush1.bf16.msra.mxu1 %v23808_v48  ;;  %16170 = vmatprep.subr.bf16.mxu0 %v23813_v16  ;;  %v23892_v48 = vld [vmem:[%s31644_s5 + $0xdf8] ss:$52 sps:$4 sm:$0xff]   ;;  %v23897_v16 = vld [vmem:[%s31644_s5 + $0xe5c] ss:$52 sps:$4 sm:$0xff]  }
 0x7a8   :  { %16462 = vmatprep.subr.bf16.mxu1 %v23816_v18  ;;  %v23900_v18 = vld [vmem:[%s31644_s5 + $0xe64] ss:$52 sps:$4 sm:$0xff]  }
 0x7aa   :  { %16171 = vmatpush1.bf16.msra.mxu0 %v23811_v56  ;;  %v23895_v56 = vld [vmem:[%s31644_s5 + $0xe58] ss:$52 sps:$4 sm:$0xff]  }
 0x7ab   :  { %16463 = vmatpush1.bf16.msra.mxu1 %v23814_v12  ;;  %16172 = vmatprep.subr.bf16.mxu0 %v23819_v42  ;;  %v23898_v12 = vld [vmem:[%s31644_s5 + $0xe60] ss:$52 sps:$4 sm:$0xff]   ;;  %v23903_v42 = vld [vmem:[%s31644_s5 + $0xec4] ss:$52 sps:$4 sm:$0xff]  }
 0x7ac   :  { %16150 = vmatmul.mubr.bf16.gmra.mrb[108].mxu0 %v14699_v52  ;;  %16464 = vmatprep.subr.bf16.mxu1 %v23822_v35  ;;  %v23906_v35 = vld [vmem:[%s31644_s5 + $0xecc] ss:$52 sps:$4 sm:$0xff]  }
 0x7ad   :  { %16442 = vmatmul.mubr.bf16.gmra.mrb[108].mxu1 %v14699_v52  ;;  %16192 = vmatprep.mubr.bf16.mxu0 %v14678_v11  ;;  %v14693_v52 = vld [vmem:[#allocation3 + $0x90] sm:$0xff] }
 0x7ae   :  { %16173 = vmatpush1.bf16.msra.mxu0 %v23817_v43  ;;  %16484 = vmatprep.mubr.bf16.mxu1 %v14678_v11  ;;  %v23901_v43 = vld [vmem:[%s31644_s5 + $0xec0] ss:$52 sps:$4 sm:$0xff]   ;;  %v14702_v11 = vld [vmem:[#allocation3 + $0xd8] sm:$0xff] }
 0x7af   :  { %16465 = vmatpush1.bf16.msra.mxu1 %v23820_v59  ;;  %16174 = vmatprep.subr.bf16.mxu0 %v23825_v61  ;;  %v23904_v59 = vld [vmem:[%s31644_s5 + $0xec8] ss:$52 sps:$4 sm:$0xff]   ;;  %v23909_v61 = vld [vmem:[%s31644_s5 + $0xf2c] ss:$52 sps:$4 sm:$0xff]  }
 0x7b0   :  { %16466 = vmatprep.subr.bf16.mxu1 %v23828_v14  ;;  %v23912_v14 = vld [vmem:[%s31644_s5 + $0xf34] ss:$52 sps:$4 sm:$0xff]  }
 0x7b2   :  { %16175 = vmatpush1.bf16.msra.mxu0 %v23823_v45  ;;  %v23907_v45 = vld [vmem:[%s31644_s5 + $0xf28] ss:$52 sps:$4 sm:$0xff]  }
 0x7b3   :  { %16467 = vmatpush1.bf16.msra.mxu1 %v23826_v8  ;;  %16176 = vmatprep.subr.bf16.mxu0 %v23831_v0  ;;  %v23910_v8 = vld [vmem:[%s31644_s5 + $0xf30] ss:$52 sps:$4 sm:$0xff]   ;;  %v23915_v0 = vld [vmem:[%s31644_s5 + $0xf94] ss:$52 sps:$4 sm:$0xff]  }
 0x7b4   :  { %16468 = vmatprep.subr.bf16.mxu1 %v23834_v37  ;;  %v23918_v37 = vld [vmem:[%s31644_s5 + $0xf9c] ss:$52 sps:$4 sm:$0xff]  }
 0x7b6   :  { %16177 = vmatpush1.bf16.msra.mxu0 %v23829_v19  ;;  %v23913_v19 = vld [vmem:[%s31644_s5 + $0xf90] ss:$52 sps:$4 sm:$0xff]  }
 0x7b7   :  { %16469 = vmatpush1.bf16.msra.mxu1 %v23832_v13  ;;  %16178 = vmatprep.subr.bf16.mxu0 %v23837_v51  ;;  %v14701_v13 = vld [vmem:[#allocation3 + $0xd0] sm:$0xff]  ;;  %v23916_v51 = vld [vmem:[%s31644_s5 + $0xf98] ss:$52 sps:$4 sm:$0xff]  }
 0x7b8   :  { %16470 = vmatprep.subr.bf16.mxu1 %v23840_v15  ;;  %v23921_v15 = vld [vmem:[%s31644_s5 + $0xffc] ss:$52 sps:$4 sm:$0xff]  }
 0x7ba   :  { %16179 = vmatpush1.bf16.msra.mxu0 %v23835_v9  ;;  %v14680_v9 = vld [vmem:[#allocation3 + $0x28] sm:$0xff] }
 0x7bb   :  { %16471 = vmatpush1.bf16.msra.mxu1 %v23838_v25  ;;  %16180 = vmatprep.subr.bf16.mxu0 %v23843_v10  ;;  %v23924_v25 = vld [vmem:[%s31644_s5 + $0x1004] ss:$52 sps:$4 sm:$0xff]  }
 0x7bc   :  { %16472 = vmatprep.subr.bf16.mxu1 %v23846_v17  ;;  %v23919_v10 = vld [vmem:[%s31644_s5 + $0xff8] ss:$52 sps:$4 sm:$0xff]   ;;  %v23922_v17 = vld [vmem:[%s31644_s5 + $0x1000] ss:$52 sps:$4 sm:$0xff]  }
 0x7be   :  { %16181 = vmatpush1.bf16.msra.mxu0 %v23841_v7  ;;  %v23927_v7 = vld [vmem:[%s31644_s5 + $0x1064] ss:$52 sps:$4 sm:$0xff]  }
 0x7bf   :  { %16473 = vmatpush1.bf16.msra.mxu1 %v23844_v36  ;;  %16182 = vmatprep.subr.bf16.mxu0 %v23849_v54  ;;  %v23930_v36 = vld [vmem:[%s31644_s5 + $0x106c] ss:$52 sps:$4 sm:$0xff]  }
 0x7c0   :  { %16474 = vmatprep.subr.bf16.mxu1 %v23852_v1  ;;  %v23925_v54 = vld [vmem:[%s31644_s5 + $0x1060] ss:$52 sps:$4 sm:$0xff]   ;;  %v23928_v1 = vld [vmem:[%s31644_s5 + $0x1068] ss:$52 sps:$4 sm:$0xff]  }
 0x7c2   :  { %16183 = vmatpush1.bf16.msra.mxu0 %v23847_v49  ;;  %v23933_v49 = vld [vmem:[%s31644_s5 + $0x10cc] ss:$52 sps:$4 sm:$0xff]  }
 0x7c3   :  { %16475 = vmatpush1.bf16.msra.mxu1 %v23850_v58  ;;  %16184 = vmatprep.subr.bf16.mxu0 %v23855_v60  ;;  %v23936_v58 = vld [vmem:[%s31644_s5 + $0x10d4] ss:$52 sps:$4 sm:$0xff]  }
 0x7c4   :  { %16476 = vmatprep.subr.bf16.mxu1 %v23858_v47  ;;  %v23931_v60 = vld [vmem:[%s31644_s5 + $0x10c8] ss:$52 sps:$4 sm:$0xff]   ;;  %v23934_v47 = vld [vmem:[%s31644_s5 + $0x10d0] ss:$52 sps:$4 sm:$0xff]  }
 0x7c6   :  { %16185 = vmatpush1.bf16.msra.mxu0 %v23853_v28  ;;  %v23939_v28 = vld [vmem:[%s31644_s5 + $0x1134] ss:$52 sps:$4 sm:$0xff]  }
 0x7c7   :  { %16477 = vmatpush1.bf16.msra.mxu1 %v23856_v6  ;;  %16186 = vmatprep.subr.bf16.mxu0 %v23861_v62  ;;  %v23942_v6 = vld [vmem:[%s31644_s5 + $0x113c] ss:$52 sps:$4 sm:$0xff]  }
 0x7c8   :  { %16478 = vmatprep.subr.bf16.mxu1 %v23864_v50  ;;  %v23937_v62 = vld [vmem:[%s31644_s5 + $0x1130] ss:$52 sps:$4 sm:$0xff]   ;;  %v23940_v50 = vld [vmem:[%s31644_s5 + $0x1138] ss:$52 sps:$4 sm:$0xff]  }
 0x7ca   :  { %16187 = vmatpush1.bf16.msra.mxu0 %v23859_v40  ;;  %v23945_v40 = vld [vmem:[%s31644_s5 + $0x119c] ss:$52 sps:$4 sm:$0xff]  }
 0x7cb   :  { %16479 = vmatpush1.bf16.msra.mxu1 %v23862_v55  ;;  %16188 = vmatprep.subr.bf16.mxu0 %v23867_v38  ;;  %v23948_v55 = vld [vmem:[%s31644_s5 + $0x11a4] ss:$52 sps:$4 sm:$0xff]  }
 0x7cc   :  { %16480 = vmatprep.subr.bf16.mxu1 %v23870_v22  ;;  %v23943_v38 = vld [vmem:[%s31644_s5 + $0x1198] ss:$52 sps:$4 sm:$0xff]   ;;  %v23946_v22 = vld [vmem:[%s31644_s5 + $0x11a0] ss:$52 sps:$4 sm:$0xff]  }
 0x7ce   :  { %16189 = vmatpush1.bf16.msra.mxu0 %v23865_v3  ;;  %v23951_v3 = vld [vmem:[%s31644_s5 + $0x1204] ss:$52 sps:$4 sm:$0xff]  }
 0x7cf   :  { %16481 = vmatpush1.bf16.msra.mxu1 %v23868_v39  ;;  %16190 = vmatprep.subr.bf16.mxu0 %v23873_v27  ;;  %v23954_v39 = vld [vmem:[%s31644_s5 + $0x120c] ss:$52 sps:$4 sm:$0xff]  }
 0x7d0   :  { %16482 = vmatprep.subr.bf16.mxu1 %v23876_v24  ;;  %v23949_v27 = vld [vmem:[%s31644_s5 + $0x1200] ss:$52 sps:$4 sm:$0xff]   ;;  %v23952_v24 = vld [vmem:[%s31644_s5 + $0x1208] ss:$52 sps:$4 sm:$0xff]  }
 0x7d2   :  { %16191 = vmatpush1.bf16.msra.mxu0 %v23871_v53  ;;  %v23957_v53 = vld [vmem:[%s31644_s5 + $0x126c] ss:$52 sps:$4 sm:$0xff]  }
 0x7d3   :  { %16483 = vmatpush1.bf16.msra.mxu1 %v23874_v33  ;;  %16233 = vmatprep.subr.bf16.mxu0 %v23879_v34  ;;  %v23960_v33 = vld [vmem:[%s31644_s5 + $0x1274] ss:$52 sps:$4 sm:$0xff]  }
 0x7d4   :  { %16525 = vmatprep.subr.bf16.mxu1 %v23882_v31  ;;  %v23955_v34 = vld [vmem:[%s31644_s5 + $0x1268] ss:$52 sps:$4 sm:$0xff]   ;;  %v23958_v31 = vld [vmem:[%s31644_s5 + $0x1270] ss:$52 sps:$4 sm:$0xff]  }
 0x7d5   :  { %16193 = vmatmul.mubr.bf16.vlgmr.msra.gmra.mrb[96].mxu0 %v14677_v5 }
 0x7d6   :  { %16485 = vmatmul.mubr.bf16.vlgmr.msra.gmra.mrb[96].mxu1 %v14677_v5  ;;  %16202 = vmatprep.mubr.bf16.mxu0 %v14686_v46  ;;  %v23966_v5 = vld [vmem:[%s31644_s5 + $0x12dc] ss:$52 sps:$4 sm:$0xff]  }
 0x7d7   :  { %16234 = vmatpush1.bf16.msra.mxu0 %v23877_v57  ;;  %16494 = vmatprep.mubr.bf16.mxu1 %v14686_v46  ;;  %v23963_v57 = vld [vmem:[%s31644_s5 + $0x12d4] ss:$52 sps:$4 sm:$0xff]   ;;  %v23969_v46 = vld [vmem:[%s31644_s5 + $0x133c] ss:$52 sps:$4 sm:$0xff]  }
 0x7d8   :  { %16526 = vmatpush1.bf16.msra.mxu1 %v23880_v63  ;;  %16235 = vmatprep.subr.bf16.mxu0 %v23885_v44  ;;  %v23961_v63 = vld [vmem:[%s31644_s5 + $0x12d0] ss:$52 sps:$4 sm:$0xff]   ;;  %v23964_v44 = vld [vmem:[%s31644_s5 + $0x12d8] ss:$52 sps:$4 sm:$0xff]  }
 0x7d9   :  { %16527 = vmatprep.subr.bf16.mxu1 %v23888_v2  ;;  %v23972_v2 = vld [vmem:[%s31644_s5 + $0x1344] ss:$52 sps:$4 sm:$0xff]  }
 0x7db   :  { %16236 = vmatpush1.bf16.msra.mxu0 %v23883_v23  ;;  %v23967_v23 = vld [vmem:[%s31644_s5 + $0x1338] ss:$52 sps:$4 sm:$0xff]  }
 0x7dc   :  { %16528 = vmatpush1.bf16.msra.mxu1 %v23886_v4  ;;  %16237 = vmatprep.subr.bf16.mxu0 %v23891_v21  ;;  %v23970_v4 = vld [vmem:[%s31644_s5 + $0x1340] ss:$52 sps:$4 sm:$0xff]   ;;  %v23975_v21 = vld [vmem:[%s31644_s5 + $0x13a4] ss:$52 sps:$4 sm:$0xff]  }
 0x7dd   :  { %16203 = vmatmul.mubr.bf16.gmra.mrb[100].mxu0 %v14685_v41  ;;  %16529 = vmatprep.subr.bf16.mxu1 %v23894_v32  ;;  %v23978_v32 = vld [vmem:[%s31644_s5 + $0x13ac] ss:$52 sps:$4 sm:$0xff]  }
 0x7de   :  { %16495 = vmatmul.mubr.bf16.gmra.mrb[100].mxu1 %v14685_v41  ;;  %16212 = vmatprep.mubr.bf16.mxu0 %v14694_v20  ;;  %v14679_v41 = vld [vmem:[#allocation3 + $0x20] sm:$0xff] }
 0x7df   :  { %16238 = vmatpush1.bf16.msra.mxu0 %v23889_v30  ;;  %16504 = vmatprep.mubr.bf16.mxu1 %v14694_v20  ;;  %v23973_v30 = vld [vmem:[%s31644_s5 + $0x13a0] ss:$52 sps:$4 sm:$0xff]   ;;  %v14688_v20 = vld [vmem:[#allocation3 + $0x68] sm:$0xff] }
 0x7e0   :  { %16530 = vmatpush1.bf16.msra.mxu1 %v23892_v48  ;;  %16239 = vmatprep.subr.bf16.mxu0 %v23897_v16  ;;  %v23976_v48 = vld [vmem:[%s31644_s5 + $0x13a8] ss:$52 sps:$4 sm:$0xff]   ;;  %v23981_v16 = vld [vmem:[%s31644_s5 + $0x140c] ss:$52 sps:$4 sm:$0xff]  }
 0x7e1   :  { %16531 = vmatprep.subr.bf16.mxu1 %v23900_v18  ;;  %v23984_v18 = vld [vmem:[%s31644_s5 + $0x1414] ss:$52 sps:$4 sm:$0xff]  }
 0x7e3   :  { %16240 = vmatpush1.bf16.msra.mxu0 %v23895_v56  ;;  %v23979_v56 = vld [vmem:[%s31644_s5 + $0x1408] ss:$52 sps:$4 sm:$0xff]  }
 0x7e4   :  { %16532 = vmatpush1.bf16.msra.mxu1 %v23898_v12  ;;  %16241 = vmatprep.subr.bf16.mxu0 %v23903_v42  ;;  %v23982_v12 = vld [vmem:[%s31644_s5 + $0x1410] ss:$52 sps:$4 sm:$0xff]   ;;  %v23987_v42 = vld [vmem:[%s31644_s5 + $0x1474] ss:$52 sps:$4 sm:$0xff]  }
 0x7e5   :  { %16213 = vmatmul.mubr.bf16.gmra.mrb[104].mxu0 %v14693_v52  ;;  %16533 = vmatprep.subr.bf16.mxu1 %v23906_v35  ;;  %v23990_v35 = vld [vmem:[%s31644_s5 + $0x147c] ss:$52 sps:$4 sm:$0xff]  }
 0x7e6   :  { %16505 = vmatmul.mubr.bf16.gmra.mrb[104].mxu1 %v14693_v52  ;;  %16222 = vmatprep.mubr.bf16.mxu0 %v14702_v11  ;;  %v14687_v52 = vld [vmem:[#allocation3 + $0x60] sm:$0xff] }
 0x7e7   :  { %16242 = vmatpush1.bf16.msra.mxu0 %v23901_v43  ;;  %16514 = vmatprep.mubr.bf16.mxu1 %v14702_v11  ;;  %v23985_v43 = vld [vmem:[%s31644_s5 + $0x1470] ss:$52 sps:$4 sm:$0xff]   ;;  %v14696_v11 = vld [vmem:[#allocation3 + $0xa8] sm:$0xff] }
 0x7e8   :  { %16534 = vmatpush1.bf16.msra.mxu1 %v23904_v59  ;;  %16243 = vmatprep.subr.bf16.mxu0 %v23909_v61  ;;  %v23988_v59 = vld [vmem:[%s31644_s5 + $0x1478] ss:$52 sps:$4 sm:$0xff]   ;;  %v23993_v61 = vld [vmem:[%s31644_s5 + $0x14dc] ss:$52 sps:$4 sm:$0xff]  }
 0x7e9   :  { %16535 = vmatprep.subr.bf16.mxu1 %v23912_v14  ;;  %v23996_v14 = vld [vmem:[%s31644_s5 + $0x14e4] ss:$52 sps:$4 sm:$0xff]  }
 0x7eb   :  { %16244 = vmatpush1.bf16.msra.mxu0 %v23907_v45  ;;  %v23991_v45 = vld [vmem:[%s31644_s5 + $0x14d8] ss:$52 sps:$4 sm:$0xff]  }
 0x7ec   :  { %16536 = vmatpush1.bf16.msra.mxu1 %v23910_v8  ;;  %16245 = vmatprep.subr.bf16.mxu0 %v23915_v0  ;;  %v23994_v8 = vld [vmem:[%s31644_s5 + $0x14e0] ss:$52 sps:$4 sm:$0xff]   ;;  %v23999_v0 = vld [vmem:[%s31644_s5 + $0x1544] ss:$52 sps:$4 sm:$0xff]  }
 0x7ed   :  { %16223 = vmatmul.mubr.bf16.gmra.mrb[108].mxu0 %v14701_v13  ;;  %16537 = vmatprep.subr.bf16.mxu1 %v23918_v37  ;;  %v24002_v37 = vld [vmem:[%s31644_s5 + $0x154c] ss:$52 sps:$4 sm:$0xff]  }
 0x7ee   :  { %16515 = vmatmul.mubr.bf16.gmra.mrb[108].mxu1 %v14701_v13  ;;  %16265 = vmatprep.mubr.bf16.mxu0 %v14680_v9  ;;  %v14695_v13 = vld [vmem:[#allocation3 + $0xa0] sm:$0xff] }
 0x7ef   :  { %16246 = vmatpush1.bf16.msra.mxu0 %v23913_v19  ;;  %16557 = vmatprep.mubr.bf16.mxu1 %v14680_v9  ;;  %v23997_v19 = vld [vmem:[%s31644_s5 + $0x1540] ss:$52 sps:$4 sm:$0xff]  }
 0x7f0   :  { %16538 = vmatpush1.bf16.msra.mxu1 %v23916_v51  ;;  %16247 = vmatprep.subr.bf16.mxu0 %v23921_v15  ;;  %v24000_v51 = vld [vmem:[%s31644_s5 + $0x1548] ss:$52 sps:$4 sm:$0xff]   ;;  %v24005_v9 = vld [vmem:[%s31644_s5 + $0x15ac] ss:$52 sps:$4 sm:$0xff]  }
 0x7f1   :  { %16539 = vmatprep.subr.bf16.mxu1 %v23924_v25  ;;  %v14704_v25 = vld [vmem:[#allocation3 + $0xe8] sm:$0xff] }
 0x7f3   :  { %16248 = vmatpush1.bf16.msra.mxu0 %v23919_v10 }
 0x7f4   :  { %16540 = vmatpush1.bf16.msra.mxu1 %v23922_v17  ;;  %16249 = vmatprep.subr.bf16.mxu0 %v23927_v7  ;;  %v24008_v7 = vld [vmem:[%s31644_s5 + $0x15b4] ss:$52 sps:$4 sm:$0xff]  }
 0x7f5   :  { %16541 = vmatprep.subr.bf16.mxu1 %v23930_v36 }
 0x7f7   :  { %16250 = vmatpush1.bf16.msra.mxu0 %v23925_v54 }
 0x7f8   :  { %16542 = vmatpush1.bf16.msra.mxu1 %v23928_v1  ;;  %16251 = vmatprep.subr.bf16.mxu0 %v23933_v49  ;;  %v24003_v1 = vld [vmem:[%s31644_s5 + $0x15a8] ss:$52 sps:$4 sm:$0xff]  }
 0x7f9   :  { %16543 = vmatprep.subr.bf16.mxu1 %v23936_v58 }
 0x7fb   :  { %16252 = vmatpush1.bf16.msra.mxu0 %v23931_v60  ;;  %v24006_v60 = vld [vmem:[%s31644_s5 + $0x15b0] ss:$52 sps:$4 sm:$0xff]  }
 0x7fc   :  { %16544 = vmatpush1.bf16.msra.mxu1 %v23934_v47  ;;  %16253 = vmatprep.subr.bf16.mxu0 %v23939_v28  ;;  %v24011_v28 = vld [vmem:[%s31644_s5 + $0x1614] ss:$52 sps:$4 sm:$0xff]  }
 0x7fd   :  { %16545 = vmatprep.subr.bf16.mxu1 %v23942_v6  ;;  %v24014_v6 = vld [vmem:[%s31644_s5 + $0x161c] ss:$52 sps:$4 sm:$0xff]  }
 0x7ff   :  { %16254 = vmatpush1.bf16.msra.mxu0 %v23937_v62  ;;  %v14931_v62 = vld [vmem:[%s31644_s5 + $0x16e0] sm:$0x33] }
 0x800   :  { %16546 = vmatpush1.bf16.msra.mxu1 %v23940_v50  ;;  %16255 = vmatprep.subr.bf16.mxu0 %v23945_v40  ;;  %v14932_v50 = vld [vmem:[%s31644_s5 + $0x16e8] sm:$0x33]  ;;  %v24009_v40 = vld [vmem:[%s31644_s5 + $0x1610] ss:$52 sps:$4 sm:$0xff]  }
 0x801   :  { %16547 = vmatprep.subr.bf16.mxu1 %v23948_v55  ;;  %v14703_v55 = vld [vmem:[#allocation3 + $0xe0] sm:$0xff] }
 0x803   :  { %16256 = vmatpush1.bf16.msra.mxu0 %v23943_v38  ;;  %v24012_v38 = vld [vmem:[%s31644_s5 + $0x1618] ss:$52 sps:$4 sm:$0xff]  }
 0x804   :  { %16548 = vmatpush1.bf16.msra.mxu1 %v23946_v22  ;;  %16257 = vmatprep.subr.bf16.mxu0 %v23951_v3  ;;  %v24017_v3 = vld [vmem:[%s31644_s5 + $0x167c] ss:$52 sps:$4 sm:$0xff]  }
 0x805   :  { %16549 = vmatprep.subr.bf16.mxu1 %v23954_v39  ;;  %v20031_v39 = vcombine.high %v14931_v62, %v14931_v62 }
 0x807   :  { %16258 = vmatpush1.bf16.msra.mxu0 %v23949_v27  ;;  %v31101_v27 = vld [vmem:[#allocation3 + $0x38] sm:$0xff] }
 0x808   :  { %16550 = vmatpush1.bf16.msra.mxu1 %v23952_v24  ;;  %16259 = vmatprep.subr.bf16.mxu0 %v23957_v53 }
 0x809   :  { %16551 = vmatprep.subr.bf16.mxu1 %v23960_v33  ;;  %v24020_v33 = vld [vmem:[%s31644_s5 + $0x1684] ss:$52 sps:$4 sm:$0xff]  }
 0x80b   :  { %16260 = vmatpush1.bf16.msra.mxu0 %v23955_v34  ;;  %v20033_v34 = vcombine.high %v14932_v50, %v14932_v50 }
 0x80c   :  { %16552 = vmatpush1.bf16.msra.mxu1 %v23958_v31  ;;  %16261 = vmatprep.subr.bf16.mxu0 %v23963_v57 }
 0x80d   :  { %16553 = vmatprep.subr.bf16.mxu1 %v23966_v5 }
 0x80f   :  { %16262 = vmatpush1.bf16.msra.mxu0 %v23961_v63  ;;  %v24015_v63 = vld [vmem:[%s31644_s5 + $0x1678] ss:$52 sps:$4 sm:$0xff]  }
 0x810   :  { %16554 = vmatpush1.bf16.msra.mxu1 %v23964_v44  ;;  %16263 = vmatprep.subr.bf16.mxu0 %v23969_v46 }
 0x811   :  { %16555 = vmatprep.subr.bf16.mxu1 %v23972_v2  ;;  %v20030_v2 = vcombine.low %v14931_v62, %v14931_v62 }
 0x813   :  { %16264 = vmatpush1.bf16.msra.mxu0 %v23967_v23 }
 0x814   :  { %16556 = vmatpush1.bf16.msra.mxu1 %v23970_v4  ;;  %16306 = vmatprep.subr.bf16.mxu0 %v23975_v21  ;;  %v24018_v21 = vld [vmem:[%s31644_s5 + $0x1680] ss:$52 sps:$4 sm:$0xff]  }
 0x815   :  { %16598 = vmatprep.subr.bf16.mxu1 %v23978_v32 }
 0x816   :  { %16266 = vmatmul.mubr.bf16.vlgmr.msra.gmra.mrb[96].mxu0 %v14679_v41 }
 0x817   :  { %16558 = vmatmul.mubr.bf16.vlgmr.msra.gmra.mrb[96].mxu1 %v14679_v41  ;;  %16275 = vmatprep.mubr.bf16.mxu0 %v14688_v20  ;;  %v20032_v41 = vcombine.low %v14932_v50, %v14932_v50  ;;  %v24034_v50 = vld [vmem:[%s31644_s5 + $0xac0] ss:$52 sps:$4 sm:$0xff]  }
 0x818   :  { %16307 = vmatpush1.bf16.msra.mxu0 %v23973_v30  ;;  %16567 = vmatprep.mubr.bf16.mxu1 %v14688_v20  ;;  %v16079_v30 = vand.u32 %v20031_v39, %v29660_v29 }
 0x819   :  { %16599 = vmatpush1.bf16.msra.mxu1 %v23976_v48  ;;  %16308 = vmatprep.subr.bf16.mxu0 %v23981_v16  ;;  %v16085_v48 = vand.u32 %v20033_v34, %v29660_v29  ;;  %v24035_v34 = vld [vmem:[%s31644_s5 + $0x100] ss:$52 sps:$4 sm:$0xff]  }
 0x81a   :  { %16600 = vmatprep.subr.bf16.mxu1 %v23984_v18  ;;  %v16076_v18 = vand.u32 %v20030_v2, %v29660_v29 }
 0x81c   :  { %16309 = vmatpush1.bf16.msra.mxu0 %v23979_v56  ;;  %v16082_v56 = vand.u32 %v20032_v41, %v29660_v29 }
 0x81d   :  { %16601 = vmatpush1.bf16.msra.mxu1 %v23982_v12  ;;  %16310 = vmatprep.subr.bf16.mxu0 %v23987_v42  ;;  %v24025_v42 = vld [vmem:[%s31644_s5 + $0x370] ss:$52 sps:$4 sm:$0xff]  }
 0x81e   :  { %16276 = vmatmul.mubr.bf16.gmra.mrb[100].mxu0 %v14687_v52  ;;  %16602 = vmatprep.subr.bf16.mxu1 %v23990_v35 }
 0x81f   :  { %16568 = vmatmul.mubr.bf16.gmra.mrb[100].mxu1 %v14687_v52  ;;  %16285 = vmatprep.mubr.bf16.mxu0 %v14696_v11  ;;  %v24026_v52 = vld [vmem:[%s31644_s5 + $0x9f0] ss:$52 sps:$4 sm:$0xff]  }
 0x820   :  { %16311 = vmatpush1.bf16.msra.mxu0 %v23985_v43  ;;  %16577 = vmatprep.mubr.bf16.mxu1 %v14696_v11 }
 0x821   :  { %16603 = vmatpush1.bf16.msra.mxu1 %v23988_v59  ;;  %16312 = vmatprep.subr.bf16.mxu0 %v23993_v61 }
 0x822   :  { %16604 = vmatprep.subr.bf16.mxu1 %v23996_v14 }
 0x824   :  { %16313 = vmatpush1.bf16.msra.mxu0 %v23991_v45 }
 0x825   :  { %16605 = vmatpush1.bf16.msra.mxu1 %v23994_v8  ;;  %16314 = vmatprep.subr.bf16.mxu0 %v23999_v0  ;;  %v14312_v15 = vpop.f32.mrb[80].mxu0  ;;  %v24027_v0 = vld [vmem:[%s31644_s5 + $0x30] ss:$52 sps:$4 sm:$0xff]  }
 0x826   :  { %16286 = vmatmul.mubr.bf16.gmra.mrb[104].mxu0 %v14695_v13  ;;  %16606 = vmatprep.subr.bf16.mxu1 %v24002_v37  ;;  %v14604_v10 = vpop.f32.mrb[80].mxu1  ;;  %v14314_v17 = vpop.f32.mrb[81].mxu0  ;;  %v24028_v15 = vld [vmem:[%s31644_s5 + $0x6b0] ss:$52 sps:$4 sm:$0xff]  }
 0x827   :  { %16578 = vmatmul.mubr.bf16.gmra.mrb[104].mxu1 %v14695_v13  ;;  %16295 = vmatprep.mubr.bf16.mxu0 %v14704_v25  ;;  %v14606_v36 = vpop.f32.mrb[81].mxu1  ;;  %v14316_v54 = vpop.f32.mrb[82].mxu0  ;;  %v24030_v10 = vld [vmem:[%s31644_s5 + $0xa58] ss:$52 sps:$4 sm:$0xff]   ;;  %v17671_v17 = vld [vmem:[#allocation4 + $0x82] ss:$0 sm:$0xff] }
 0x828   :  { %16315 = vmatpush1.bf16.msra.mxu0 %v23997_v19  ;;  %16587 = vmatprep.mubr.bf16.mxu1 %v14704_v25  ;;  %14647 = vst [vmem:[#allocation4 + $0x88] sm:$0xff] %v14316_v54  ;;  %v14608_v49 = vpop.f32.mrb[82].mxu1  ;;  %v14318_v58 = vpop.f32.mrb[83].mxu0  ;;  %v31145_v25 = vld [vmem:[#allocation3 + $0x78] sm:$0xff] }
 0x829   :  { %16607 = vmatpush1.bf16.msra.mxu1 %v24000_v51  ;;  %16316 = vmatprep.subr.bf16.mxu0 %v24005_v9  ;;  %14649 = vst [vmem:[#allocation4 + $0x98] sm:$0xff] %v14608_v49  ;;  %14648 = vst [vmem:[#allocation4 + $0x90] sm:$0xff] %v14318_v58  ;;  %v14610_v47 = vpop.f32.mrb[83].mxu1  ;;  %v31136_v51 = vld [vmem:[#allocation3 + $0x30] sm:$0xff]  ;;  %v24029_v9 = vld [vmem:[%s31644_s5 + $0x3d8] ss:$52 sps:$4 sm:$0xff]  }
 0x82a   :  { %16608 = vmatprep.subr.bf16.mxu1 %v24008_v7  ;;  %v24031_v7 = vld [vmem:[%s31644_s5 + $0x98] ss:$52 sps:$4 sm:$0xff]  }
 0x82c   :  { %16317 = vmatpush1.bf16.msra.mxu0 %v24003_v1 }
 0x82d   :  { %16609 = vmatpush1.bf16.msra.mxu1 %v24006_v60  ;;  %16318 = vmatprep.subr.bf16.mxu0 %v24011_v28  ;;  %v14322_v22 = vpop.f32.mrb[84].mxu0  ;;  %v24032_v60 = vld [vmem:[%s31644_s5 + $0x718] ss:$52 sps:$4 sm:$0xff]  }
 0x82e   :  { %16296 = vmatmul.mubr.bf16.gmra.mrb[108].mxu0 %v14703_v55  ;;  %16610 = vmatprep.subr.bf16.mxu1 %v24014_v6  ;;  %v14614_v24 = vpop.f32.mrb[84].mxu1  ;;  %v14324_v53 = vpop.f32.mrb[85].mxu0  ;;  %v24033_v6 = vld [vmem:[%s31644_s5 + $0x440] ss:$52 sps:$4 sm:$0xff]  }
 0x82f   :  { %16588 = vmatmul.mubr.bf16.gmra.mrb[108].mxu1 %v14703_v55  ;;  %20034 = vmatprep.mubr.msk.bf16.mxu0 %vm5340_vm13, %v31101_v27  ;;  %14653 = vst [vmem:[#allocation4 + $0x100] sm:$0xff] %v14614_v24  ;;  %v14616_v31 = vpop.f32.mrb[85].mxu1  ;;  %v14326_v57 = vpop.f32.mrb[86].mxu0  ;;  %v17697_v5 = vld [vmem:[#allocation4 + $0x8b] ss:$0 sm:$0xff] }
 0x830   :  { %16319 = vmatpush1.bf16.msra.mxu0 %v24009_v40  ;;  %20038 = vmatprep.mubr.msk.bf16.mxu1 %vm5340_vm13, %v31101_v27  ;;  %14654 = vst [vmem:[#allocation4 + $0x108] sm:$0xff] %v14616_v31  ;;  %v14618_v44 = vpop.f32.mrb[86].mxu1  ;;  %v14328_v46 = vpop.f32.mrb[87].mxu0  ;;  %v17705_v23 = vrot.slane %v17697_v5, %v30346_v26  ;;  %v17743_v4 = vld [vmem:[#allocation4 + $0x95] ss:$0 sm:$0xff] }
 0x831   :  { %16611 = vmatpush1.bf16.msra.mxu1 %v24012_v38  ;;  %16320 = vmatprep.subr.bf16.mxu0 %v24017_v3  ;;  %v14620_v32 = vpop.f32.mrb[87].mxu1  ;;  %v17751_v20 = vrot.slane %v17743_v4, %v30346_v26  ;;  %v17763_v61 = vld [vmem:[#allocation4 + $0x96] ss:$0 sm:$0xff]  ;;  %v17672_v13 = vld [vmem:[#allocation4 + $0x8a] ss:$0 sm:$0xff] }
 0x832   :  { %16612 = vmatprep.subr.bf16.mxu1 %v24020_v33  ;;  %v17712_v16 = vrot.slane %v17705_v23, %v30346_v26  ;;  %v17771_v19 = vrot.slane %v17763_v61, %v30346_v26  ;;  %v17675_v36 = vcombine.low %v17671_v17, %v17672_v13  ;;  %v17717_v49 = vld [vmem:[#allocation4 + $0x8c] ss:$0 sm:$0xff]  ;;  %v17718_v58 = vld [vmem:[#allocation4 + $0x94] ss:$0 sm:$0xff]  ;;  %v17783_v53 = vld [vmem:[#allocation4 + $0x97] ss:$0 sm:$0xff] }
 0x833   :  { %v17758_v59 = vrot.slane %v17751_v20, %v30346_v26  ;;  %v17721_v39 = vcombine.low %v17717_v49, %v17718_v58  ;;  %v17784_v33 = vld [vmem:[#allocation4 + $0x9f] ss:$0 sm:$0xff]  ;;  %v31174_v57 = vld [vmem:[#allocation3 + $0x70] sm:$0xff]  ;;  %v24047_v13 = vld [vmem:[%s31644_s5 + $0x238] ss:$52 sps:$4 sm:$0xff]  }
 0x834   :  { %16321 = vmatpush1.bf16.msra.mxu0 %v24015_v63  ;;  %17713 = vrot.lane.b32.xlu0 %v17712_v16, %s24140_s13  ;;  %v17778_v54 = vrot.slane %v17771_v19, %v30346_v26  ;;  %v17682_v22 = vrot.slane %v17675_v36, %v30346_v26  ;;  %v24036_v5 = vld [vmem:[%s31644_s5 + $0x780] ss:$52 sps:$4 sm:$0xff]   ;;  %v31180_v63 = vld [vmem:[#allocation3 + $0xb8] sm:$0xff]  ;;  %v17787_v2 = vcombine.low %v17783_v53, %v17784_v33  ;;  %v24042_v20 = vld [vmem:[%s31644_s5 + $0xb90] ss:$52 sps:$4 sm:$0xff]  }
 0x835   :  { %16613 = vmatpush1.bf16.msra.mxu1 %v24018_v21  ;;  %16322 = vmatprep.subr.bf16.mxu0 %v16079_v30  ;;  %v14332_v12 = vpop.f32.mrb[88].mxu0  ;;  %v24037_v44 = vld [vmem:[%s31644_s5 + $0x4a8] ss:$52 sps:$4 sm:$0xff]   ;;  %v17728_v4 = vrot.slane %v17721_v39, %v30346_v26  ;;  %v18384_v19 = vld [vmem:[#allocation4 + $0x222] ss:$0 sm:$0xff] }
 0x836   :  { %16614 = vmatprep.subr.bf16.mxu1 %v16085_v48  ;;  %v14624_v35 = vpop.f32.mrb[88].mxu1  ;;  %v14334_v43 = vpop.f32.mrb[89].mxu0  ;;  %v24038_v46 = vld [vmem:[%s31644_s5 + $0xb28] ss:$52 sps:$4 sm:$0xff]   ;;  %v17689_v23 = vrot.slane %v17682_v22, %v30346_v26  ;;  %v24041_v48 = vld [vmem:[%s31644_s5 + $0x510] ss:$52 sps:$4 sm:$0xff]  }
 0x837   :  { %v14626_v11 = vpop.f32.mrb[89].mxu1  ;;  %v14336_v14 = vpop.f32.mrb[90].mxu0  ;;  %v24039_v32 = vld [vmem:[%s31644_s5 + $0x168] ss:$52 sps:$4 sm:$0xff]   ;;  %v17735_v16 = vrot.slane %v17728_v4, %v30346_v26  ;;  %v24043_v12 = vld [vmem:[%s31644_s5 + $0x1d0] ss:$52 sps:$4 sm:$0xff]  }
 0x838   :  { %16323 = vmatpush1.bf16.msra.mxu0 %v16076_v18  ;;  %14663 = vst [vmem:[#allocation4 + $0x228] sm:$0xff] %v14336_v14  ;;  %v14628_v45 = vpop.f32.mrb[90].mxu1  ;;  %17759 = vrot.lane.b32.xlu0 %v17758_v59, %s24141_s17  ;;  %v14338_v8 = vpop.f32.mrb[91].mxu0  ;;  %v24040_v30 = vld [vmem:[%s31644_s5 + $0x7e8] ss:$52 sps:$4 sm:$0xff]   ;;  %v17794_v18 = vrot.slane %v17787_v2, %v30346_v26 }
 0x839   :  { %16615 = vmatpush1.bf16.msra.mxu1 %v16082_v56  ;;  %20103 = vmatprep.subr.bf16.mxu0 %v24025_v42  ;;  %14665 = vst [vmem:[#allocation4 + $0x238] sm:$0xff] %v14628_v45  ;;  %v14630_v37 = vpop.f32.mrb[91].mxu1  ;;  %14664 = vst [vmem:[#allocation4 + $0x230] sm:$0xff] %v14338_v8  ;;  %v31212_v56 = vld [vmem:[#allocation3 + $0xb0] sm:$0xff]  ;;  %v17809_v43 = vld [vmem:[#allocation4 + $0x100] ss:$0 sm:$0xff] }
 0x83a   :  { %20143 = vmatprep.subr.bf16.mxu1 %v24026_v52  ;;  %v24044_v35 = vld [vmem:[%s31644_s5 + $0x850] ss:$52 sps:$4 sm:$0xff]   ;;  %v31224_v61 = vld [vmem:[#allocation3 + $0xf8] sm:$0xff]  ;;  %v17801_v11 = vrot.slane %v17794_v18, %v30346_v26  ;;  %v24050_v49 = vld [vmem:[%s31644_s5 + $0xc60] ss:$52 sps:$4 sm:$0xff]  }
 0x83b   :  { %16339 = vmatmul.mubr.bf16.vlgmr.msra.gmra.mrb[96].mxu0 %v31136_v51  ;;  %v24045_v14 = vld [vmem:[%s31644_s5 + $0x578] ss:$52 sps:$4 sm:$0xff]   ;;  %v24051_v58 = vld [vmem:[%s31644_s5 + $0x2a0] ss:$52 sps:$4 sm:$0xff]   ;;  %v24053_v39 = vld [vmem:[%s31644_s5 + $0x648] ss:$52 sps:$4 sm:$0xff]  }
 0x83c   :  { %16631 = vmatmul.mubr.bf16.vlgmr.msra.gmra.mrb[96].mxu1 %v31136_v51  ;;  %20035 = vmatprep.mubr.msk.bf16.mxu0 %vm5340_vm13, %v31145_v25  ;;  %v24046_v45 = vld [vmem:[%s31644_s5 + $0xbf8] ss:$52 sps:$4 sm:$0xff]   ;;  %v24056_v2 = vld [vmem:[%s31644_s5 + $0x988] ss:$52 sps:$4 sm:$0xff]  }
 0x83d   :  { %20039 = vmatprep.mubr.msk.bf16.mxu1 %vm5340_vm13, %v31145_v25  ;;  %20104 = vmatpush3.bf16.msra.mxu0 %v24027_v0  ;;  %v14342_v1 = vpop.f32.mrb[92].mxu0  ;;  %v17817_v0 = vrot.slane %v17809_v43, %v30346_v26  ;;  %v24060_v43 = vld [vmem:[%s31644_s5 + $0x10d8] ss:$52 sps:$4 sm:$0xff]  }
 0x83e   :  { %20144 = vmatpush3.bf16.msra.mxu1 %v24028_v15  ;;  %20105 = vmatprep.subr.bf16.mxu0 %v24029_v9  ;;  %v14634_v47 = vpop.f32.mrb[92].mxu1  ;;  %v14344_v28 = vpop.f32.mrb[93].mxu0  ;;  %v24048_v15 = vld [vmem:[%s31644_s5 + $0x8b8] ss:$52 sps:$4 sm:$0xff]   ;;  %v24049_v1 = vld [vmem:[%s31644_s5 + $0x5e0] ss:$52 sps:$4 sm:$0xff]  }
 0x83f   :  { %20145 = vmatprep.subr.bf16.mxu1 %v24030_v10  ;;  %17779 = vrot.lane.b32.xlu0 %v17778_v54, %s24142_s12  ;;  %14669 = vst [vmem:[#allocation4 + $0x2a0] sm:$0xff] %v14634_v47  ;;  %v14636_v62 = vpop.f32.mrb[93].mxu1  ;;  %v14346_v40 = vpop.f32.mrb[94].mxu0  ;;  %v18409_v55 = vld [vmem:[#allocation4 + $0x22b] ss:$0 sm:$0xff]  ;;  %v17824_v36 = vrot.slane %v17817_v0, %v30346_v26 }
 0x840   :  { %14670 = vst [vmem:[#allocation4 + $0x2a8] sm:$0xff] %v14636_v62  ;;  %v14638_v38 = vpop.f32.mrb[94].mxu1  ;;  %v14348_v3 = vpop.f32.mrb[95].mxu0  ;;  %v18417_v24 = vrot.slane %v18409_v55, %v30346_v26  ;;  %v18454_v41 = vld [vmem:[#allocation4 + $0x235] ss:$0 sm:$0xff] }
 0x841   :  { %20106 = vmatpush3.bf16.msra.mxu0 %v24031_v7  ;;  %v14640_v31 = vpop.f32.mrb[95].mxu1  ;;  %v18462_v42 = vrot.slane %v18454_v41, %v30346_v26  ;;  %v18474_v52 = vld [vmem:[#allocation4 + $0x236] ss:$0 sm:$0xff]  ;;  %v18385_v59 = vld [vmem:[#allocation4 + $0x22a] ss:$0 sm:$0xff] }
 0x842   :  { %20146 = vmatpush3.bf16.msra.mxu1 %v24032_v60  ;;  %20107 = vmatprep.subr.bf16.mxu0 %v24033_v6  ;;  %v18424_v21 = vrot.slane %v18417_v24, %v30346_v26  ;;  %v18482_v37 = vrot.slane %v18474_v52, %v30346_v26  ;;  %v18388_v9 = vcombine.low %v18384_v19, %v18385_v59  ;;  %v17855_v10 = vld [vmem:[#allocation4 + $0x10a] ss:$0 sm:$0xff]  ;;  %v18429_v17 = vld [vmem:[#allocation4 + $0x22c] ss:$0 sm:$0xff]  ;;  %v18430_v7 = vld [vmem:[#allocation4 + $0x234] ss:$0 sm:$0xff] }
 0x843   :  { %16349 = vmatmul.mubr.bf16.gmra.mrb[100].mxu0 %v31174_v57  ;;  %20147 = vmatprep.subr.bf16.mxu1 %v24034_v50  ;;  %v18469_v8 = vrot.slane %v18462_v42, %v30346_v26  ;;  %v17863_v60 = vrot.slane %v17855_v10, %v30346_v26  ;;  %v17875_v28 = vld [vmem:[#allocation4 + $0x10b] ss:$0 sm:$0xff]  ;;  %v18433_v6 = vcombine.low %v18429_v17, %v18430_v7  ;;  %v17829_v62 = vld [vmem:[#allocation4 + $0x101] ss:$0 sm:$0xff]  ;;  %v17830_v50 = vld [vmem:[#allocation4 + $0x109] ss:$0 sm:$0xff] }
 0x844   :  { %16641 = vmatmul.mubr.bf16.gmra.mrb[100].mxu1 %v31174_v57  ;;  %20036 = vmatprep.mubr.msk.bf16.mxu0 %vm5340_vm13, %v31180_v63  ;;  %v18489_v54 = vrot.slane %v18482_v37, %v30346_v26  ;;  %v18395_v47 = vrot.slane %v18388_v9, %v30346_v26  ;;  %v31263_v40 = vld [vmem:[#allocation3 + $0xf0] sm:$0xff]  ;;  %v18495_v22 = vld [vmem:[#allocation4 + $0x23f] ss:$0 sm:$0xff]  ;;  %v16704_v3 = vld [vmem:[#allocation3 + $0x8] sm:$0xff]  ;;  %v17883_v53 = vrot.slane %v17875_v28, %v30346_v26  ;;  %v31867_v42 = vmov 0  }
 0x845   :  { %20040 = vmatprep.mubr.msk.bf16.mxu1 %vm5340_vm13, %v31180_v63  ;;  %20108 = vmatpush3.bf16.msra.mxu0 %v24035_v34  ;;  %v24052_v55 = vld [vmem:[%s31644_s5 + $0x920] ss:$52 sps:$4 sm:$0xff]   ;;  %v24054_v24 = vld [vmem:[%s31644_s5 + $0xcc8] ss:$52 sps:$4 sm:$0xff]   ;;  %v17833_v33 = vcombine.low %v17829_v62, %v17830_v50  ;;  %v17870_v31 = vrot.slane %v17863_v60, %v30346_v26  ;;  %v24058_v41 = vld [vmem:[%s31644_s5 + $0xd30] ss:$52 sps:$4 sm:$0xff]  }
 0x846   :  { %20148 = vmatpush3.bf16.msra.mxu1 %v24036_v5  ;;  %17690 = vrot.lane.b32.xlu0 %v17689_v23, %s24143_s23  ;;  %v18494_v38 = vld [vmem:[#allocation4 + $0x237] ss:$0 sm:$0xff]  ;;  %v16706_v34 = vld [vmem:[#allocation3 + $0x18] sm:$0xff]  ;;  %v18402_v5 = vrot.slane %v18395_v47, %v30346_v26  ;;  %v24057_v23 = vld [vmem:[%s31644_s5 + $0x1070] ss:$52 sps:$4 sm:$0xff]  }
 0x847   :  { %20109 = vmatprep.subr.bf16.mxu0 %v24037_v44  ;;  %20149 = vmatprep.subr.bf16.mxu1 %v24038_v46  ;;  %v24055_v44 = vld [vmem:[%s31644_s5 + $0x308] ss:$52 sps:$4 sm:$0xff]   ;;  %v18440_v46 = vrot.slane %v18433_v6, %v30346_v26  ;;  %v18498_v4 = vcombine.low %v18494_v38, %v18495_v22  ;;  %v18519_v18 = vld [vmem:[#allocation4 + $0x2a0] ss:$0 sm:$0xff]  ;;  %v18539_v7 = vld [vmem:[#allocation4 + $0x2a1] ss:$0 sm:$0xff] }
 0x848   :  { %18425 = vrot.lane.b32.xlu1 %v18424_v21, %s24140_s13  ;;  %v17890_v21 = vrot.slane %v17883_v53, %v30346_v26  ;;  %v16714_v52 = vld [vmem:[#allocation3 + $0x58] sm:$0xff]  ;;  %v24063_v0 = vld [vmem:[%s31644_s5 + $0x1140] ss:$52 sps:$4 sm:$0xff]   ;;  %v18564_v37 = vld [vmem:[#allocation4 + $0x2aa] ss:$0 sm:$0xff] }
 0x849   :  { %20110 = vmatpush3.bf16.msra.mxu0 %v24039_v32  ;;  %v18447_v32 = vrot.slane %v18440_v46, %v30346_v26  ;;  %v24065_v9 = vld [vmem:[%s31644_s5 + $0x1480] ss:$52 sps:$4 sm:$0xff]   ;;  %v18572_v10 = vrot.slane %v18564_v37, %v30346_v26  ;;  %v18584_v17 = vld [vmem:[#allocation4 + $0x2ab] ss:$0 sm:$0xff]  ;;  %v24069_v50 = vld [vmem:[%s31644_s5 + $0x1210] ss:$52 sps:$4 sm:$0xff]  }
 0x84a   :  { %20150 = vmatpush3.bf16.msra.mxu1 %v24040_v30  ;;  %17736 = vrot.lane.b32.xlu0 %v17735_v16, %s24144_s18  ;;  %v17840_v30 = vrot.slane %v17833_v33, %v30346_v26  ;;  %v16703_v16 = vld [vmem:[#allocation3] sm:$0xff]  ;;  %v18592_v47 = vrot.slane %v18584_v17, %v30346_v26  ;;  %v24067_v6 = vld [vmem:[%s31644_s5 + $0xe68] ss:$52 sps:$4 sm:$0xff]   ;;  %v24072_v33 = vld [vmem:[%s31644_s5 + $0x1278] ss:$52 sps:$4 sm:$0xff]  }
 0x84b   :  { %16359 = vmatmul.mubr.bf16.gmra.mrb[104].mxu0 %v31212_v56  ;;  %20111 = vmatprep.subr.bf16.mxu0 %v24041_v48  ;;  %v18505_v48 = vrot.slane %v18498_v4, %v30346_v26  ;;  %v18579_v60 = vrot.slane %v18572_v10, %v30346_v26  ;;  %v24068_v62 = vld [vmem:[%s31644_s5 + $0x14e8] ss:$52 sps:$4 sm:$0xff]   ;;  %v16719_v22 = vld [vmem:[#allocation3 + $0x80] sm:$0xff]  ;;  %v16729_v4 = vld [vmem:[#allocation3 + $0xd0] sm:$0xff] }
 0x84c   :  { %16651 = vmatmul.mubr.bf16.gmra.mrb[104].mxu1 %v31212_v56  ;;  %20151 = vmatprep.subr.bf16.mxu1 %v24042_v20  ;;  %v24059_v20 = vld [vmem:[%s31644_s5 + $0x13b0] ss:$52 sps:$4 sm:$0xff]   ;;  %v17847_v59 = vrot.slane %v17840_v30, %v30346_v26  ;;  %v16728_v53 = vld [vmem:[#allocation3 + $0xc8] sm:$0xff]  ;;  %v24075_v46 = vld [vmem:[%s31644_s5 + $0x12e0] ss:$52 sps:$4 sm:$0xff]  }
 0x84d   :  { %20037 = vmatprep.mubr.msk.bf16.mxu0 %vm5340_vm13, %v31224_v61  ;;  %20041 = vmatprep.mubr.msk.bf16.mxu1 %vm5340_vm13, %v31224_v61  ;;  %v16708_v30 = vld [vmem:[#allocation3 + $0x28] sm:$0xff] }
 0x84e   :  { %20112 = vmatpush3.bf16.msra.mxu0 %v24043_v12  ;;  %20152 = vmatpush3.bf16.msra.mxu1 %v24044_v35  ;;  %v16705_v12 = vld [vmem:[#allocation3 + $0x10] sm:$0xff]  ;;  %v16712_v35 = vld [vmem:[#allocation3 + $0x48] sm:$0xff] }
 0x84f   :  { %17802 = vrot.lane.b32.xlu0 %v17801_v11, %s24145_s19  ;;  %18470 = vrot.lane.b32.xlu1 %v18469_v8, %s24141_s17  ;;  %v18512_v11 = vrot.slane %v18505_v48, %v30346_v26  ;;  %v24062_v8 = vld [vmem:[%s31644_s5 + $0x1418] ss:$52 sps:$4 sm:$0xff]   ;;  %v24080_v48 = vld [vmem:[%s31644_s5 + $0x1688] ss:$52 sps:$4 sm:$0xff]  }
 0x850   :  { %20113 = vmatprep.subr.bf16.mxu0 %v24045_v14  ;;  %20153 = vmatprep.subr.bf16.mxu1 %v24046_v45  ;;  %v24061_v14 = vld [vmem:[%s31644_s5 + $0xd98] ss:$52 sps:$4 sm:$0xff]   ;;  %v18527_v45 = vrot.slane %v18519_v18, %v30346_v26 }
 0x851   :  { %v16716_v18 = vld [vmem:[#allocation3 + $0x68] sm:$0xff] }
 0x852   :  { %20114 = vmatpush3.bf16.msra.mxu0 %v24047_v13  ;;  %20154 = vmatpush3.bf16.msra.mxu1 %v24048_v15  ;;  %v18534_v19 = vrot.slane %v18527_v45, %v30346_v26  ;;  %v16711_v13 = vld [vmem:[#allocation3 + $0x40] sm:$0xff] }
 0x853   :  { %17825 = vrot.lane.b32.xlu0 %v17824_v36, %s24124_s29  ;;  %18490 = vrot.lane.b32.xlu1 %v18489_v54, %s24142_s12  ;;  %v24064_v15 = vld [vmem:[%s31644_s5 + $0xe00] ss:$52 sps:$4 sm:$0xff]   ;;  %v18540_v36 = vld [vmem:[#allocation4 + $0x2a9] ss:$0 sm:$0xff] }
 0x854   :  { %16369 = vmatmul.mubr.bf16.gmra.mrb[108].mxu0 %v31263_v40  ;;  %16661 = vmatmul.mubr.bf16.gmra.mrb[108].mxu1 %v31263_v40  ;;  %v16713_v54 = vld [vmem:[#allocation3 + $0x50] sm:$0xff]  ;;  %v18543_v28 = vcombine.low %v18539_v7, %v18540_v36 }
 0x855   :  { %20115 = vmatprep.subr.bf16.mxu0 %v24049_v1  ;;  %20155 = vmatprep.subr.bf16.mxu1 %v24050_v49  ;;  %v24066_v1 = vld [vmem:[%s31644_s5 + $0x11a8] ss:$52 sps:$4 sm:$0xff]  }
 0x856   :  { %20116 = vmatpush3.bf16.msra.mxu0 %v24051_v58  ;;  %17234 = vmatprep.mubr.bf16.mxu0 %v16704_v3  ;;  %v16720_v49 = vld [vmem:[#allocation3 + $0x88] sm:$0xff]  ;;  %v16722_v58 = vld [vmem:[#allocation3 + $0x98] sm:$0xff]  ;;  %v18550_v38 = vrot.slane %v18543_v28, %v30346_v26  ;;  %v24070_v3 = vld [vmem:[%s31644_s5 + $0xed0] ss:$52 sps:$4 sm:$0xff]  }
 0x857   :  { %20156 = vmatpush3.bf16.msra.mxu1 %v24052_v55  ;;  %17299 = vmatprep.mubr.bf16.mxu1 %v16706_v34  ;;  %v18599_v55 = vrot.slane %v18592_v47, %v30346_v26  ;;  %v16730_v34 = vld [vmem:[#allocation3 + $0xd8] sm:$0xff] }
 0x858   :  { %17871 = vrot.lane.b32.xlu0 %v17870_v31, %s24146_s15  ;;  %18403 = vrot.lane.b32.xlu1 %v18402_v5, %s24143_s23  ;;  %v18557_v31 = vrot.slane %v18550_v38, %v30346_v26  ;;  %v24073_v5 = vld [vmem:[%s31644_s5 + $0xf38] ss:$52 sps:$4 sm:$0xff]   ;;  %s24153_s23 = smov 58  }
 0x859   :  { %20117 = vmatprep.subr.bf16.mxu0 %v24053_v39  ;;  %20157 = vmatprep.subr.bf16.mxu1 %v24054_v24  ;;  %v16721_v39 = vld [vmem:[#allocation3 + $0x90] sm:$0xff] }
 0x85a   :  { %20118 = vmatpush3.bf16.msra.mxu0 %v24055_v44  ;;  %v24071_v24 = vld [vmem:[%s31644_s5 + $0x1550] ss:$52 sps:$4 sm:$0xff]   ;;  %v24074_v44 = vld [vmem:[%s31644_s5 + $0x15b8] ss:$52 sps:$4 sm:$0xff]  }
 0x85b   :  { %20158 = vmatpush3.bf16.msra.mxu1 %v24056_v2  ;;  %20183 = vmatprep.subr.bf16.mxu0 %v24057_v23  ;;  %v16727_v2 = vld [vmem:[#allocation3 + $0xc0] sm:$0xff] }
 0x85c   :  { %17891 = vrot.lane.b32.xlu0 %v17890_v21, %s24147_s26  ;;  %18448 = vrot.lane.b32.xlu1 %v18447_v32, %s24144_s18  ;;  %v24076_v23 = vld [vmem:[%s31644_s5 + $0xfa0] ss:$52 sps:$4 sm:$0xff]   ;;  %v24078_v32 = vld [vmem:[%s31644_s5 + $0x1348] ss:$52 sps:$4 sm:$0xff]   ;;  %s24159_s18 = smov 86  }
 0x85d   :  { %17235 = vmatmul.mubr.bf16.vlgmr.msra.gmra.mrb[112].mxu0 %v16703_v16  ;;  %17397 = vmatprep.subr.bf16.mxu1 %v31867_v42  ;;  %v24077_v21 = vld [vmem:[%s31644_s5 + $0x1620] ss:$52 sps:$4 sm:$0xff]   ;;  %v24081_v16 = vld [vmem:[%s31644_s5 + $0x16f0] ss:$0 sps:$4 sm:$0x33]  }
 0x85e   :  { %17300 = vmatmul.mubr.bf16.vlgmr.msra.gmra.mrb[112].mxu1 %v16705_v12  ;;  %17242 = vmatprep.mubr.bf16.mxu0 %v16712_v35  ;;  %v16715_v12 = vld [vmem:[#allocation3 + $0x60] sm:$0xff]  ;;  %v16724_v35 = vld [vmem:[#allocation3 + $0xa8] sm:$0xff] }
 0x85f   :  { %17307 = vmatprep.mubr.bf16.mxu1 %v16714_v52  ;;  %20184 = vmatpush3.bf16.msra.mxu0 %v24058_v41  ;;  %v24079_v41 = vld [vmem:[%s31644_s5 + $0x1008] ss:$52 sps:$4 sm:$0xff]   ;;  %s24149_s5 = smov 102  }
 0x860   :  { %17398 = vmatpush1.bf16.msra.mxu1 %v24059_v20  ;;  %17848 = vrot.lane.b32.xlu0 %v17847_v59, %s24148_s4  ;;  %v16707_v20 = vld [vmem:[#allocation3 + $0x20] sm:$0xff] }
 0x861   :  { %18513 = vrot.lane.b32.xlu1 %v18512_v11, %s24145_s19  ;;  %20185 = vmatprep.subr.bf16.mxu0 %v24060_v43 }
 0x862   :  { %17399 = vmatprep.subr.bf16.mxu1 %v31867_v42 }
 0x863   :  { %20186 = vmatpush3.bf16.msra.mxu0 %v24061_v14 }
 0x864   :  { %17400 = vmatpush1.bf16.msra.mxu1 %v24062_v8  ;;  %20187 = vmatprep.subr.bf16.mxu0 %v24063_v0 }
 0x865   :  { %18535 = vrot.lane.b32.xlu1 %v18534_v19, %s24124_s29  ;;  %17243 = vmatmul.mubr.bf16.gmra.mrb[116].mxu0 %v16711_v13  ;;  %s24161_s29 = smov [#allocation5]  }
 0x866   :  { %17308 = vmatmul.mubr.bf16.gmra.mrb[116].mxu1 %v16713_v54  ;;  %17401 = vmatprep.subr.bf16.mxu1 %v31867_v42  ;;  %s18894_s14 = sshll.u32 %s24161_s29, 4  ;;  %s18895_s14 = int_to_ptr.vmem [resolvable:$true] %s18894_s14 }
 0x867   :  { %17250 = vmatprep.mubr.bf16.mxu0 %v16720_v49  ;;  %17315 = vmatprep.mubr.bf16.mxu1 %v16722_v58  ;;  %v17895_v49 = vld [vmem:[#allocation4 + $0x10c] ss:$0 sm:$0xff]  ;;  %s24094_s28 = scalar_lea.vmem %s18895_s14, 32  ;;  %p24099_p1 = scmp.lt.s32.totalorder %s18895_s14, %s18895_s14 }
 0x868   :  { %20188 = vmatpush3.bf16.msra.mxu0 %v24064_v15  ;;  %17402 = vmatpush1.bf16.msra.mxu1 %v24065_v9  ;;  %p24095_p0 = scmp.ne.s32.totalorder %s18895_s14, %s24094_s28  ;;  %p24100_p2 = scmp.lt.s32.totalorder %s24094_s28, %s24094_s28 }
 0x869   :  { %18580 = vrot.lane.b32.xlu1 %v18579_v60, %s24146_s15  ;;  %20189 = vmatprep.subr.bf16.mxu0 %v24066_v1  ;;  %s24154_s15 = smov 2  }
 0x86a   :  { %17403 = vmatprep.subr.bf16.mxu1 %v31867_v42  ;;  %p24101_p3 = por %p24100_p2, %p24099_p1 }
 0x86c   :  { %20190 = vmatpush3.bf16.msra.mxu0 %v24067_v6  ;;  %17404 = vmatpush1.bf16.msra.mxu1 %v24068_v62  ;;  %p24102_p4 = pnand %p24101_p3, %p24095_p0 }
 0x86d   :  { %18600 = vrot.lane.b32.xlu1 %v18599_v55, %s24147_s26  ;;  %17251 = vmatmul.mubr.bf16.gmra.mrb[120].mxu0 %v16719_v22  ;;  %s24158_s26 = smov 36  }
 0x86e   :  { %17316 = vmatmul.mubr.bf16.gmra.mrb[120].mxu1 %v16721_v39  ;;  %20191 = vmatprep.subr.bf16.mxu0 %v24069_v50 }
 0x86f   :  { %17405 = vmatprep.subr.bf16.mxu1 %v31867_v42  ;;  %17258 = vmatprep.mubr.bf16.mxu0 %v16728_v53 }
 0x870   :  { %17323 = vmatprep.mubr.bf16.mxu1 %v16730_v34  ;;  %20192 = vmatpush3.bf16.msra.mxu0 %v24070_v3 }
 0x871   :  { %17406 = vmatpush1.bf16.msra.mxu1 %v24071_v24  ;;  %18558 = vrot.lane.b32.xlu1 %v18557_v31, %s24148_s4 }
 0x872   :  { %20193 = vmatprep.subr.bf16.mxu0 %v24072_v33  ;;  %17407 = vmatprep.subr.bf16.mxu1 %v31867_v42 }
 0x874   :  { %20194 = vmatpush3.bf16.msra.mxu0 %v24073_v5 }
 0x875   :  { %17408 = vmatpush1.bf16.msra.mxu1 %v24074_v44  ;;  %17259 = vmatmul.mubr.bf16.gmra.mrb[124].mxu0 %v16727_v2 }
 0x876   :  { %17324 = vmatmul.mubr.bf16.gmra.mrb[124].mxu1 %v16729_v4  ;;  %20195 = vmatprep.subr.bf16.mxu0 %v24075_v46 }
 0x877   :  { %17409 = vmatprep.subr.bf16.mxu1 %v31867_v42  ;;  %17364 = vmatprep.mubr.bf16.mxu0 %v16708_v30 }
 0x878   :  { %20196 = vmatpush3.bf16.msra.mxu0 %v24076_v23  ;;  %20099 = vmatprep.mubr.msk.bf16.mxu1 %vm5340_vm13, %v31101_v27  ;;  %v17200_v27 = vand.u32 %v24081_v16, %v29660_v29  ;;  %v16723_v29 = vld [vmem:[#allocation3 + $0xa0] sm:$0xff]  ;;  %v31420_v16 = vpop.permute.xlu0 %17489 }
 0x879   :  { %17410 = vmatpush1.bf16.msra.mxu1 %v24077_v21  ;;  %20197 = vmatprep.subr.bf16.mxu0 %v24078_v32 }
 0x87a   :  { %17411 = vmatprep.subr.bf16.mxu1 %v31867_v42 }
 0x87c   :  { %20198 = vmatpush3.bf16.msra.mxu0 %v24079_v41 }
 0x87d   :  { %17412 = vmatpush1.bf16.msra.mxu1 %v24080_v48 }
 0x87e   :  { %17413 = vmatprep.subr.bf16.mxu1 %v31867_v42  ;;  %v16732_v42 = vld [vmem:[#allocation3 + $0xe8] sm:$0xff] }
 0x87f   :  { %17365 = vmatmul.mubr.bf16.vlgmr.msra.gmra.mrb[128].mxu0 %v16707_v20 }
 0x880   :  { %17372 = vmatprep.mubr.bf16.mxu0 %v16716_v18 }
 0x881   :  { %17414 = vmatpush1.bf16.msra.mxu1 %v17200_v27 }
 0x884   :  { %17430 = vmatmul.mubr.bf16.vlgmr.msra.gmra.mrb[128].mxu1 %v31136_v51  ;;  %v16731_v51 = vld [vmem:[#allocation3 + $0xe0] sm:$0xff] }
 0x885   :  { %20100 = vmatprep.mubr.msk.bf16.mxu1 %vm5340_vm13, %v31145_v25 }
 0x887   :  { %17373 = vmatmul.mubr.bf16.gmra.mrb[132].mxu0 %v16715_v12 }
 0x888   :  { %17380 = vmatprep.mubr.bf16.mxu0 %v16724_v35 }
 0x88c   :  { %17438 = vmatmul.mubr.bf16.gmra.mrb[132].mxu1 %v31174_v57 }
 0x88d   :  { %20101 = vmatprep.mubr.msk.bf16.mxu1 %vm5340_vm13, %v31180_v63 }
 0x88f   :  { %17381 = vmatmul.mubr.bf16.gmra.mrb[136].mxu0 %v16723_v29 }
 0x890   :  { %17388 = vmatprep.mubr.bf16.mxu0 %v16732_v42 }
 0x894   :  { %17446 = vmatmul.mubr.bf16.gmra.mrb[136].mxu1 %v31212_v56 }
 0x895   :  { %20102 = vmatprep.mubr.msk.bf16.mxu1 %vm5340_vm13, %v31224_v61 }
 0x897   :  { %17389 = vmatmul.mubr.bf16.gmra.mrb[140].mxu0 %v16731_v51  ;;  %v18604_v51 = vld [vmem:[#allocation4 + $0x2ac] ss:$0 sm:$0xff] }
 0x89c   :  { %17454 = vmatmul.mubr.bf16.gmra.mrb[140].mxu1 %v31263_v40 }
 0x90e   :  { %v16340_v25 = vpop.f32.mrb[96].mxu0 }
 0x90f   :  { %v16632_v43 = vpop.f32.mrb[96].mxu1  ;;  %v16342_v52 = vpop.f32.mrb[97].mxu0 }
 0x910   :  { %v16634_v57 = vpop.f32.mrb[97].mxu1  ;;  %v16344_v59 = vpop.f32.mrb[98].mxu0 }
 0x911   :  { %v16636_v11 = vpop.f32.mrb[98].mxu1  ;;  %v16346_v63 = vpop.f32.mrb[99].mxu0 }
 0x912   :  { %v16638_v14 = vpop.f32.mrb[99].mxu1 }
 0x916   :  { %v16350_v45 = vpop.f32.mrb[100].mxu0 }
 0x917   :  { %16679 = vst [vmem:[#allocation4 + $0x110] sm:$0xff] %v16350_v45  ;;  %v16642_v8 = vpop.f32.mrb[100].mxu1  ;;  %v16352_v0 = vpop.f32.mrb[101].mxu0 }
 0x918   :  { %16680 = vst [vmem:[#allocation4 + $0x118] sm:$0xff] %v16352_v0  ;;  %v16644_v56 = vpop.f32.mrb[101].mxu1  ;;  %v16354_v37 = vpop.f32.mrb[102].mxu0 }
 0x919   :  { %v16646_v61 = vpop.f32.mrb[102].mxu1  ;;  %v16356_v19 = vpop.f32.mrb[103].mxu0 }
 0x91a   :  { %16685 = vst [vmem:[#allocation4 + $0x188] sm:$0xff] %v16646_v61  ;;  %16684 = vst [vmem:[#allocation4 + $0x180] sm:$0xff] %v16356_v19  ;;  %v16648_v40 = vpop.f32.mrb[103].mxu1 }
 0x91b   :  { %16686 = vst [vmem:[#allocation4 + $0x190] sm:$0xff] %v16648_v40 }
 0x91e   :  { %v16360_v13 = vpop.f32.mrb[104].mxu0  ;;  %v17921_v15 = vld [vmem:[#allocation4 + $0x115] ss:$0 sm:$0xff]  ;;  %v17941_v9 = vld [vmem:[#allocation4 + $0x116] ss:$0 sm:$0xff] }
 0x91f   :  { %v16652_v10 = vpop.f32.mrb[104].mxu1  ;;  %v16362_v17 = vpop.f32.mrb[105].mxu0  ;;  %v17929_v7 = vrot.slane %v17921_v15, %v30346_v26  ;;  %v17896_v36 = vld [vmem:[#allocation4 + $0x114] ss:$0 sm:$0xff]  ;;  %v17949_v28 = vrot.slane %v17941_v9, %v30346_v26  ;;  %v17961_v5 = vld [vmem:[#allocation4 + $0x117] ss:$0 sm:$0xff] }
 0x920   :  { %v16654_v54 = vpop.f32.mrb[105].mxu1  ;;  %v16364_v1 = vpop.f32.mrb[106].mxu0  ;;  %v17899_v6 = vcombine.low %v17895_v49, %v17896_v36  ;;  %v17962_v23 = vld [vmem:[#allocation4 + $0x11f] ss:$0 sm:$0xff] }
 0x921   :  { %v16656_v58 = vpop.f32.mrb[106].mxu1  ;;  %v16366_v60 = vpop.f32.mrb[107].mxu0  ;;  %v17936_v47 = vrot.slane %v17929_v7, %v30346_v26  ;;  %v17956_v50 = vrot.slane %v17949_v28, %v30346_v26  ;;  %v18033_v38 = vld [vmem:[#allocation4 + $0x18a] ss:$0 sm:$0xff]  ;;  %v18053_v2 = vld [vmem:[#allocation4 + $0x18b] ss:$0 sm:$0xff]  ;;  %v17965_v32 = vcombine.low %v17961_v5, %v17962_v23 }
 0x922   :  { %v16658_v62 = vpop.f32.mrb[107].mxu1  ;;  %v17906_v55 = vrot.slane %v17899_v6, %v30346_v26  ;;  %v18041_v31 = vrot.slane %v18033_v38, %v30346_v26  ;;  %v18061_v21 = vrot.slane %v18053_v2, %v30346_v26  ;;  %v17987_v42 = vld [vmem:[#allocation4 + $0x180] ss:$0 sm:$0xff]  ;;  %v18007_v11 = vld [vmem:[#allocation4 + $0x181] ss:$0 sm:$0xff]  ;;  %v31434_v9 = vpop.permute.xlu0 %17601 }
 0x923   :  { %17937 = vrot.lane.b32.xlu0 %v17936_v47, %s24149_s5  ;;  %v17972_v29 = vrot.slane %v17965_v32, %v30346_v26  ;;  %v18008_v63 = vld [vmem:[#allocation4 + $0x189] ss:$0 sm:$0xff]  ;;  %v17995_v0 = vrot.slane %v17987_v42, %v30346_v26  ;;  %v18073_v40 = vld [vmem:[#allocation4 + $0x18c] ss:$0 sm:$0xff]  ;;  %v18074_v13 = vld [vmem:[#allocation4 + $0x194] ss:$0 sm:$0xff] }
 0x924   :  { %v17913_v34 = vrot.slane %v17906_v55, %v30346_v26  ;;  %v18048_v4 = vrot.slane %v18041_v31, %v30346_v26  ;;  %v18068_v35 = vrot.slane %v18061_v21, %v30346_v26  ;;  %v18011_v37 = vcombine.low %v18007_v11, %v18008_v63 }
 0x925   :  { %v17979_v56 = vrot.slane %v17972_v29, %v30346_v26  ;;  %v18002_v36 = vrot.slane %v17995_v0, %v30346_v26  ;;  %v18077_v1 = vcombine.low %v18073_v40, %v18074_v13 }
 0x926   :  { %v18018_v54 = vrot.slane %v18011_v37, %v30346_v26  ;;  %v31450_v5 = vpop.permute.xlu0 %17535 }
 0x927   :  { %v16370_v22 = vpop.f32.mrb[108].mxu0  ;;  %v16662_v3 = vpop.f32.mrb[108].mxu1  ;;  %17957 = vrot.lane.b32.xlu0 %v17956_v50, %s24150_s11 }
 0x928   :  { %16695 = vst [vmem:[#allocation4 + $0x2b0] sm:$0xff] %v16370_v22  ;;  %v16664_v39 = vpop.f32.mrb[109].mxu1  ;;  %v16372_v24 = vpop.f32.mrb[109].mxu0 }
 0x929   :  { %16696 = vst [vmem:[#allocation4 + $0x2b8] sm:$0xff] %v16372_v24  ;;  %v16374_v53 = vpop.f32.mrb[110].mxu0  ;;  %v16666_v33 = vpop.f32.mrb[110].mxu1  ;;  %v18025_v39 = vrot.slane %v18018_v54, %v30346_v26  ;;  %v18084_v24 = vrot.slane %v18077_v1, %v30346_v26 }
 0x92a   :  { %16701 = vst [vmem:[#allocation4 + $0x328] sm:$0xff] %v16666_v33  ;;  %v16376_v44 = vpop.f32.mrb[111].mxu0  ;;  %v16668_v46 = vpop.f32.mrb[111].mxu1 }
 0x92b   :  { %16700 = vst [vmem:[#allocation4 + $0x320] sm:$0xff] %v16376_v44  ;;  %16702 = vst [vmem:[#allocation4 + $0x330] sm:$0xff] %v16668_v46  ;;  %17914 = vrot.lane.b32.xlu0 %v17913_v34, %s24151_s16  ;;  %v18091_v23 = vrot.slane %v18084_v24, %v30346_v26 }
 0x92f   :  { %18049 = vrot.lane.b32.xlu0 %v18048_v4, %s24152_s21  ;;  %v18629_v30 = vld [vmem:[#allocation4 + $0x2b5] ss:$0 sm:$0xff]  ;;  %v18649_v41 = vld [vmem:[#allocation4 + $0x2b6] ss:$0 sm:$0xff]  ;;  %v18605_v48 = vld [vmem:[#allocation4 + $0x2b4] ss:$0 sm:$0xff] }
 0x930   :  { %v20119_v27 = vpop.f32.mrb[112].mxu0  ;;  %v18637_v20 = vrot.slane %v18629_v30, %v30346_v26  ;;  %v18657_v57 = vrot.slane %v18649_v41, %v30346_v26  ;;  %v18608_v59 = vcombine.low %v18604_v51, %v18605_v48  ;;  %v18669_v28 = vld [vmem:[#allocation4 + $0x2b7] ss:$0 sm:$0xff]  ;;  %v18670_v55 = vld [vmem:[#allocation4 + $0x2bf] ss:$0 sm:$0xff]  ;;  %v31460_v51 = vpop.permute.xlu1 %18205 }
 0x931   :  { %v20159_v18 = vpop.f32.mrb[112].mxu1  ;;  %v20120_v12 = vpop.f32.mrb[113].mxu0  ;;  %v18739_v15 = vld [vmem:[#allocation4 + $0x32a] ss:$0 sm:$0xff]  ;;  %v18759_v50 = vld [vmem:[#allocation4 + $0x32b] ss:$0 sm:$0xff]  ;;  %v18673_v34 = vcombine.low %v18669_v28, %v18670_v55 }
 0x932   :  { %v20160_v25 = vpop.f32.mrb[113].mxu1  ;;  %v20122_v43 = vpop.f32.mrb[114].mxu0  ;;  %v18644_v52 = vrot.slane %v18637_v20, %v30346_v26  ;;  %v18664_v61 = vrot.slane %v18657_v57, %v30346_v26  ;;  %v18615_v19 = vrot.slane %v18608_v59, %v30346_v26  ;;  %v18747_v47 = vrot.slane %v18739_v15, %v30346_v26  ;;  %v18694_v41 = vld [vmem:[#allocation4 + $0x320] ss:$0 sm:$0xff]  ;;  %v18714_v20 = vld [vmem:[#allocation4 + $0x321] ss:$0 sm:$0xff] }
 0x933   :  { %v20162_v14 = vpop.f32.mrb[114].mxu1  ;;  %v20123_v45 = vpop.f32.mrb[115].mxu0  ;;  %18069 = vrot.lane.b32.xlu0 %v18068_v35, %s24153_s23  ;;  %v18767_v33 = vrot.slane %v18759_v50, %v30346_v26  ;;  %v18680_v30 = vrot.slane %v18673_v34, %v30346_v26  ;;  %v18715_v18 = vld [vmem:[#allocation4 + $0x329] ss:$0 sm:$0xff]  ;;  %v18702_v29 = vrot.slane %v18694_v41, %v30346_v26  ;;  %v18779_v25 = vld [vmem:[#allocation4 + $0x32c] ss:$0 sm:$0xff] }
 0x934   :  { %v20163_v8 = vpop.f32.mrb[115].mxu1  ;;  %18645 = vrot.lane.b32.xlu1 %v18644_v52, %s24149_s5  ;;  %v18622_v60 = vrot.slane %v18615_v19, %v30346_v26  ;;  %v18754_v53 = vrot.slane %v18747_v47, %v30346_v26  ;;  %v18718_v42 = vcombine.low %v18714_v20, %v18715_v18  ;;  %v18780_v43 = vld [vmem:[#allocation4 + $0x334] ss:$0 sm:$0xff]  ;;  %v31462_v52 = vpop.permute.xlu0 %17555 }
 0x935   :  { %v18774_v32 = vrot.slane %v18767_v33, %v30346_v26  ;;  %v18687_v35 = vrot.slane %v18680_v30, %v30346_v26  ;;  %v18709_v45 = vrot.slane %v18702_v29, %v30346_v26  ;;  %v18783_v0 = vcombine.low %v18779_v25, %v18780_v43  ;;  %v31468_v40 = vpop.permute.xlu1 %18315  ;;  %v18119_v25 = vld [vmem:[#allocation4 + $0x196] ss:$0 sm:$0xff] }
 0x936   :  { %v18725_v8 = vrot.slane %v18718_v42, %v30346_v26 }
 0x937   :  { %17980 = vrot.lane.b32.xlu0 %v17979_v56, %s24154_s15 }
 0x938   :  { %v20125_v10 = vpop.f32.mrb[116].mxu0  ;;  %18665 = vrot.lane.b32.xlu1 %v18664_v61, %s24150_s11  ;;  %v18732_v15 = vrot.slane %v18725_v8, %v30346_v26 }
 0x939   :  { %v20165_v17 = vpop.f32.mrb[116].mxu1  ;;  %v20126_v7 = vpop.f32.mrb[117].mxu0  ;;  %v18790_v10 = vrot.slane %v18783_v0, %v30346_v26 }
 0x93a   :  { %v20166_v49 = vpop.f32.mrb[117].mxu1  ;;  %v20128_v58 = vpop.f32.mrb[118].mxu0 }
 0x93b   :  { %v20168_v6 = vpop.f32.mrb[118].mxu1  ;;  %v20129_v62 = vpop.f32.mrb[119].mxu0  ;;  %18003 = vrot.lane.b32.xlu0 %v18002_v36, %s24155_s20  ;;  %v18797_v54 = vrot.slane %v18790_v10, %v30346_v26 }
 0x93c   :  { %v20130_v38 = vadd.f32 %v20129_v62, %v20128_v58  ;;  %v20169_v22 = vpop.f32.mrb[119].mxu1  ;;  %18623 = vrot.lane.b32.xlu1 %v18622_v60, %s24151_s16  ;;  %v31473_v7 = vpop.permute.xlu0 %17512 }
 0x93d   :  { %v20170_v3 = vadd.f32 %v20169_v22, %v20168_v6  ;;  %v31476_v1 = vpop.permute.xlu1 %18250 }
 0x93f   :  { %v31447_v31 = vadd.f32 %v20170_v3, %v20130_v38  ;;  %18026 = vrot.lane.b32.xlu0 %v18025_v39, %s24156_s22 }
 0x940   :  { %v20131_v44 = vpop.f32.mrb[120].mxu0  ;;  %18755 = vrot.lane.b32.xlu1 %v18754_v53, %s24152_s21  ;;  %v31479_v47 = vpop.permute.xlu0 %17578 }
 0x941   :  { %v20171_v46 = vpop.f32.mrb[120].mxu1  ;;  %v20132_v2 = vpop.f32.mrb[121].mxu0 }
 0x942   :  { %v20172_v4 = vpop.f32.mrb[121].mxu1  ;;  %v20134_v21 = vpop.f32.mrb[122].mxu0 }
 0x943   :  { %v20174_v48 = vpop.f32.mrb[122].mxu1  ;;  %v20135_v27 = vpop.f32.mrb[123].mxu0  ;;  %18092 = vrot.lane.b32.xlu0 %v18091_v23, %s24157_s3 }
 0x944   :  { %v20175_v12 = vpop.f32.mrb[123].mxu1  ;;  %18775 = vrot.lane.b32.xlu1 %v18774_v32, %s24153_s23  ;;  %v31481_v62 = vpop.permute.xlu1 %18270 }
 0x945   :  { %v31483_v39 = vpop.permute.xlu0 %17624 }
 0x948   :  { %v20137_v57 = vpop.f32.mrb[124].mxu0  ;;  %18688 = vrot.lane.b32.xlu1 %v18687_v35, %s24154_s15  ;;  %v31485_v34 = vpop.permute.xlu1 %18228 }
 0x949   :  { %v20177_v59 = vpop.f32.mrb[124].mxu1  ;;  %v20138_v11 = vpop.f32.mrb[125].mxu0 }
 0x94a   :  { %v20178_v63 = vpop.f32.mrb[125].mxu1  ;;  %v20140_v14 = vpop.f32.mrb[126].mxu0 }
 0x94b   :  { %v20180_v56 = vpop.f32.mrb[126].mxu1  ;;  %v20141_v37 = vpop.f32.mrb[127].mxu0 }
 0x94c   :  { %v20142_v61 = vadd.f32 %v20141_v37, %v20140_v14  ;;  %v20181_v19 = vpop.f32.mrb[127].mxu1  ;;  %18710 = vrot.lane.b32.xlu1 %v18709_v45, %s24155_s20  ;;  %v31488_v32 = vpop.permute.xlu0 %17647  ;;  %v18099_v45 = vld [vmem:[#allocation4 + $0x195] ss:$0 sm:$0xff] }
 0x94d   :  { %v20182_v13 = vadd.f32 %v20181_v19, %v20180_v56  ;;  %v31491_v27 = vpop.permute.xlu1 %18293 }
 0x94f   :  { %v17329_v17 = vadd.f32 %v20182_v13, %v20142_v61  ;;  %v18107_v13 = vrot.slane %v18099_v45, %v30346_v26 }
 0x950   :  { %18733 = vrot.lane.b32.xlu1 %v18732_v15, %s24156_s22  ;;  %v31493_v12 = vpop.permute.xlu0 %17667 }
 0x951   :  { %v31495_v57 = vpop.permute.xlu1 %18338 }
 0x952   :  { %v20199_v36 = vpop.f32.mrb[128].mxu0 }
 0x953   :  { %v20200_v49 = vpop.f32.mrb[129].mxu0 }
 0x954   :  { %v20202_v58 = vpop.f32.mrb[130].mxu0  ;;  %18798 = vrot.lane.b32.xlu1 %v18797_v54, %s24157_s3  ;;  %v31497_v63 = vpop.permute.xlu0 %17713 }
 0x955   :  { %v20203_v60 = vpop.f32.mrb[131].mxu0  ;;  %v31502_v49 = vpop.permute.xlu1 %18360 }
 0x956   :  { %v18114_v60 = vrot.slane %v18107_v13, %v30346_v26  ;;  %v17626_v13 = vrot.slane %v31483_v39, 1 }
 0x957   :  { %v17431_v28 = vpop.f32.mrb[128].mxu1 }
 0x958   :  { %v17433_v6 = vpop.f32.mrb[129].mxu1  ;;  %v31504_v58 = vpop.permute.xlu0 %17759 }
 0x959   :  { %v17434_v50 = vpop.f32.mrb[130].mxu1  ;;  %v31510_v6 = vpop.permute.xlu1 %18380 }
 0x95a   :  { %v17436_v55 = vpop.f32.mrb[131].mxu1  ;;  %v20205_v38 = vpop.f32.mrb[132].mxu0 }
 0x95b   :  { %v20206_v22 = vpop.f32.mrb[133].mxu0  ;;  %v18824_v55 = vld [vmem:[#allocation4 + $0x336] ss:$0 sm:$0xff] }
 0x95c   :  { %v20208_v3 = vpop.f32.mrb[134].mxu0  ;;  %v31512_v50 = vpop.permute.xlu0 %17779 }
 0x95d   :  { %v20209_v24 = vpop.f32.mrb[135].mxu0 }
 0x95e   :  { %v20210_v53 = vadd.f32 %v20209_v24, %v20208_v3  ;;  %v31514_v3 = vpop.permute.xlu1 %18425  ;;  %v18804_v24 = vld [vmem:[#allocation4 + $0x335] ss:$0 sm:$0xff] }
 0x95f   :  { %v17439_v33 = vpop.f32.mrb[132].mxu1 }
 0x960   :  { %v17441_v44 = vpop.f32.mrb[133].mxu1  ;;  %v17378_v46 = vadd.f32 %v20210_v53, %v31447_v31  ;;  %v17691_v33 = vpop.permute.xlu0 %17690 }
 0x961   :  { %v17442_v2 = vpop.f32.mrb[134].mxu1 }
 0x962   :  { %v17443_v23 = vadd.f32 %v17442_v2, %v17378_v46  ;;  %v17444_v4 = vpop.f32.mrb[135].mxu1  ;;  %v20211_v21 = vpop.f32.mrb[136].mxu0  ;;  %v18812_v46 = vrot.slane %v18804_v24, %v30346_v26 }
 0x963   :  { %v20212_v30 = vpop.f32.mrb[137].mxu0  ;;  %v17471_v4 = vld [vmem:[#allocation4] ss:$0 sm:$0xff]  ;;  %v17514_v21 = vrot.slane %v31473_v7, 1 }
 0x964   :  { %17465 = vst.msk [vmem:[#allocation4 + $0x198] sm:$0xff] %vm4768_vm12, %v17443_v23  ;;  %v20214_v41 = vpop.f32.mrb[138].mxu0  ;;  %v17470_v23 = vld [vmem:[%s31645_s6] sm:$0x1]  ;;  %v31523_v30 = vpop.permute.xlu1 %18470 }
 0x965   :  { %v20215_v48 = vpop.f32.mrb[139].mxu0  ;;  %v18819_v41 = vrot.slane %v18812_v46, %v30346_v26 }
 0x967   :  { %v17447_v20 = vpop.f32.mrb[136].mxu1 }
 0x968   :  { %v17449_v18 = vpop.f32.mrb[137].mxu1  ;;  %v17472_v20 = vadd.f32 %v17471_v4, %v17470_v23 }
 0x969   :  { %v17450_v35 = vpop.f32.mrb[138].mxu1  ;;  %v17737_v18 = vpop.permute.xlu0 %17736 }
 0x96a   :  { %v17452_v29 = vpop.f32.mrb[139].mxu1  ;;  %v20217_v31 = vpop.f32.mrb[140].mxu0  ;;  %v17516_v35 = vsel %vm17515_vm0, %v31473_v7, %v17514_v21 }
 0x96b   :  { %v20218_v42 = vpop.f32.mrb[141].mxu0  ;;  %v18120_v43 = vld [vmem:[#allocation4 + $0x19e] ss:$0 sm:$0xff]  ;;  %v18145_v10 = vld [vmem:[#allocation4 + $0x19f] ss:$0 sm:$0xff]  ;;  %v17492_v29 = vadd.f32 %v31420_v16, %v17472_v20 }
 0x96c   :  { %v20220_v59 = vpop.f32.mrb[142].mxu0  ;;  %v18123_v11 = vcombine.low %v18119_v25, %v18120_v43  ;;  %v31531_v25 = vpop.permute.xlu1 %18490  ;;  %v18187_v16 = vld [vmem:[#allocation4 + $0x1a0] ss:$0 sm:$0xff] }
 0x96d   :  { %v20221_v14 = vpop.f32.mrb[143].mxu0  ;;  %v17518_v42 = vadd.f32 %v17516_v35, %v17492_v29  ;;  %v31533_v43 = vpop.permute.xlu0 %17802 }
 0x96e   :  { %v20222_v8 = vadd.f32 %v20221_v14, %v20220_v59  ;;  %v18130_v0 = vrot.slane %v18123_v11, %v30346_v26  ;;  %v17580_v14 = vrot.slane %v31479_v47, 1 }
 0x96f   :  { %v17455_v56 = vpop.f32.mrb[140].mxu1  ;;  %v17538_v59 = vadd.f32 %v31450_v5, %v17518_v42 }
 0x970   :  { %v17457_v37 = vpop.f32.mrb[141].mxu1  ;;  %v17394_v61 = vadd.f32 %v20222_v8, %v17329_v17  ;;  %v18137_v19 = vrot.slane %v18130_v0, %v30346_v26  ;;  %v18153_v17 = vrot.slane %v18145_v10, %v30346_v26  ;;  %v18404_v11 = vpop.permute.xlu1 %18403  ;;  %v18230_v8 = vrot.slane %v31485_v34, 1 }
 0x971   :  { %v17458_v15 = vpop.f32.mrb[142].mxu1  ;;  %v17558_v45 = vadd.f32 %v31462_v52, %v17538_v59  ;;  %v31538_v7 = vpop.permute.xlu0 %17825  ;;  %v17582_v0 = vsel %vm17581_vm1, %v31479_v47, %v17580_v14  ;;  %v17628_v47 = vsel %vm17627_vm2, %v31483_v39, %v17626_v13 }
 0x972   :  { %v17459_v36 = vadd.f32 %v17458_v15, %v17394_v61  ;;  %v17460_v54 = vpop.f32.mrb[143].mxu1  ;;  %18138 = vrot.lane.b32.xlu0 %v18137_v19, %s24158_s26  ;;  %v18160_v28 = vrot.slane %v18153_v17, %v30346_v26  ;;  %v18231_v61 = vsel %vm17515_vm0, %v31485_v34, %v18230_v8  ;;  %v18295_v34 = vrot.slane %v31491_v27, 1 }
 0x973   :  { %v17584_v5 = vadd.f32 %v17582_v0, %v17558_v45 }
 0x974   :  { %17469 = vst.msk [vmem:[#allocation4 + $0x338] sm:$0xff] %vm4768_vm12, %v17459_v36  ;;  %v18449_v37 = vpop.permute.xlu1 %18448  ;;  %vm18165_vm12 = vcmask 401408  }
 0x975   :  { %v31549_v19 = vpop.permute.xlu0 %17871  ;;  %v17604_v15 = vadd.f32 %v31434_v9, %v17584_v5  ;;  %v18450_v14 = vrot.slane %v18449_v37, 1 }
 0x976   :  { %18115 = vrot.lane.b32.xlu0 %v18114_v60, %s24159_s18 }
 0x977   :  { %v17630_v54 = vadd.f32 %v17628_v47, %v17604_v15 }
 0x978   :  { %v31553_v36 = vpop.permute.xlu1 %18513 }
 0x979   :  { %v17892_v17 = vpop.permute.xlu0 %17891 }
 0x97a   :  { %18161 = vrot.lane.b32.xlu0 %v18160_v28, %s24160_s1  ;;  %v17650_v28 = vadd.f32 %v31488_v32, %v17630_v54  ;;  %v18340_v32 = vrot.slane %v31495_v57, 1 }
 0x97b   :  { %v18825_v38 = vld [vmem:[#allocation4 + $0x33e] ss:$0 sm:$0xff]  ;;  %v18849_v2 = vld [vmem:[#allocation4 + $0x33f] ss:$0 sm:$0xff] }
 0x97c   :  { %v18828_v22 = vcombine.low %v18824_v55, %v18825_v38  ;;  %v18857_v48 = vrot.slane %v18849_v2, %v30346_v26  ;;  %v31561_v38 = vpop.permute.xlu1 %18535  ;;  %v17670_v24 = vadd.f32 %v31493_v12, %v17650_v28  ;;  %v17738_v2 = vrot.slane %v17737_v18, 1 }
 0x97d   :  { %v17849_v9 = vpop.permute.xlu0 %17848 }
 0x97e   :  { %v18835_v53 = vrot.slane %v18828_v22, %v30346_v26  ;;  %v18864_v31 = vrot.slane %v18857_v48, %v30346_v26  ;;  %v18296_v22 = vsel %vm17581_vm1, %v31491_v27, %v18295_v34  ;;  %v18341_v27 = vsel %vm17627_vm2, %v31495_v57, %v18340_v32 }
 0x97f   :  { %v18405_v48 = vrot.slane %v18404_v11, 1  ;;  %v17804_v57 = vrot.slane %v31533_v43, 1 }
 0x980   :  { %v18842_v44 = vrot.slane %v18835_v53, %v30346_v26  ;;  %v18186_v26 = vld [vmem:[%s31645_s6] sm:$0x1] }
 0x981   :  { %v18188_v56 = vadd.f32 %v18187_v16, %v18186_v26  ;;  %v17850_v26 = vrot.slane %v17849_v9, 1 }
 0x982   :  { %18843 = vrot.lane.b32.xlu1 %v18842_v44, %s24158_s26  ;;  %v31567_v44 = vpop.permute.xlu1 %18580 }
 0x983   :  { %v18208_v52 = vadd.f32 %v31460_v51, %v18188_v56  ;;  %v17692_v51 = vrot.slane %v17691_v33, 1  ;;  %v17852_v8 = vsel %vm17851_vm6, %v17849_v9, %v17850_v26 }
 0x985   :  { %v18233_v10 = vadd.f32 %v18231_v61, %v18208_v52  ;;  %v17694_v39 = vsel %vm17693_vm3, %v17691_v33, %v17692_v51  ;;  %v17740_v33 = vsel %vm17739_vm4, %v17737_v18, %v17738_v2 }
 0x986   :  { %18820 = vrot.lane.b32.xlu1 %v18819_v41, %s24159_s18  ;;  %v17696_v53 = vadd.f32 %v17694_v39, %v17670_v24  ;;  %v31575_v12 = vpop.permute.xlu1 %18600 }
 0x987   :  { %v18253_v60 = vadd.f32 %v31476_v1, %v18233_v10 }
 0x988   :  { %v17716_v23 = vadd.f32 %v31497_v63, %v17696_v53 }
 0x989   :  { %v18273_v55 = vadd.f32 %v31481_v62, %v18253_v60 }
 0x98a   :  { %18865 = vrot.lane.b32.xlu1 %v18864_v31, %s24160_s1  ;;  %v17742_v41 = vadd.f32 %v17740_v33, %v17716_v23  ;;  %v18559_v29 = vpop.permute.xlu1 %18558  ;;  %v18406_v31 = vsel %vm17693_vm3, %v18404_v11, %v18405_v48  ;;  %v18451_v11 = vsel %vm17739_vm4, %v18449_v37, %v18450_v14 }
 0x98b   :  { %v18298_v1 = vadd.f32 %v18296_v22, %v18273_v55  ;;  %v18560_v60 = vrot.slane %v18559_v29, 1 }
 0x98c   :  { %v17762_v35 = vadd.f32 %v31504_v58, %v17742_v41 }
 0x98d   :  { %v18318_v62 = vadd.f32 %v31468_v40, %v18298_v1  ;;  %v18561_v28 = vsel %vm17851_vm6, %v18559_v29, %v18560_v60 }
 0x98e   :  { %v17782_v18 = vadd.f32 %v31512_v50, %v17762_v35 }
 0x98f   :  { %v18343_v4 = vadd.f32 %v18341_v27, %v18318_v62 }
 0x991   :  { %v18363_v20 = vadd.f32 %v31502_v49, %v18343_v4  ;;  %v17806_v49 = vsel %vm17805_vm5, %v31533_v43, %v17804_v57 }
 0x992   :  { %v17808_v58 = vadd.f32 %v17806_v49, %v17782_v18 }
 0x993   :  { %v18383_v63 = vadd.f32 %v31510_v6, %v18363_v20 }
 0x994   :  { %v17828_v0 = vadd.f32 %v31538_v7, %v17808_v58 }
 0x995   :  { %v17938_v46 = vpop.permute.xlu0 %17937  ;;  %v18408_v42 = vadd.f32 %v18406_v31, %v18383_v63 }
 0x996   :  { %v17854_v5 = vadd.f32 %v17852_v8, %v17828_v0 }
 0x997   :  { %v18428_v16 = vadd.f32 %v31514_v3, %v18408_v42  ;;  %v18515_v3 = vrot.slane %v31553_v36, 1 }
 0x998   :  { %v17874_v43 = vadd.f32 %v31549_v19, %v17854_v5 }
 0x999   :  { %v17958_v21 = vpop.permute.xlu0 %17957  ;;  %v18453_v50 = vadd.f32 %v18451_v11, %v18428_v16  ;;  %v18516_v7 = vsel %vm17805_vm5, %v31553_v36, %v18515_v3 }
 0x99a   :  { %v17894_v47 = vadd.f32 %v17892_v17, %v17874_v43 }
 0x99b   :  { %v18473_v61 = vadd.f32 %v31523_v30, %v18453_v50 }
 0x99d   :  { %v17915_v40 = vpop.permute.xlu0 %17914  ;;  %v18493_v37 = vadd.f32 %v31531_v25, %v18473_v61 }
 0x99e   :  { %v17916_v13 = vrot.slane %v17915_v40, 1 }
 0x99f   :  { %v18518_v34 = vadd.f32 %v18516_v7, %v18493_v37 }
 0x9a0   :  { %v17918_v10 = vsel %vm17917_vm7, %v17915_v40, %v17916_v13 }
 0x9a1   :  { %v18050_v45 = vpop.permute.xlu0 %18049  ;;  %v17920_v30 = vadd.f32 %v17918_v10, %v17894_v47  ;;  %v18538_v55 = vadd.f32 %v31561_v38, %v18518_v34 }
 0x9a3   :  { %v17940_v9 = vadd.f32 %v17938_v46, %v17920_v30  ;;  %v18563_v25 = vadd.f32 %v18561_v28, %v18538_v55 }
 0x9a5   :  { %v18070_v56 = vpop.permute.xlu0 %18069  ;;  %v17960_v24 = vadd.f32 %v17958_v21, %v17940_v9  ;;  %v18583_v36 = vadd.f32 %v31567_v44, %v18563_v25 }
 0x9a6   :  { %v18646_v59 = vpop.permute.xlu1 %18645 }
 0x9a7   :  { %v18603_v46 = vadd.f32 %v31575_v12, %v18583_v36  ;;  %v18180_v36 = vld [vmem:[%s31646_s7] sm:$0x1] }
 0x9a9   :  { %v17981_v15 = vpop.permute.xlu0 %17980 }
 0x9aa   :  { %v18666_v6 = vpop.permute.xlu1 %18665  ;;  %v17982_v19 = vrot.slane %v17981_v15, 1 }
 0x9ac   :  { %v17984_v17 = vsel %vm17983_vm8, %v17981_v15, %v17982_v19 }
 0x9ad   :  { %v18004_v51 = vpop.permute.xlu0 %18003  ;;  %v17986_v32 = vadd.f32 %v17984_v17, %v17960_v24 }
 0x9ae   :  { %v18624_v52 = vpop.permute.xlu1 %18623 }
 0x9af   :  { %v18625_v1 = vrot.slane %v18624_v52, 1  ;;  %v18006_v38 = vadd.f32 %v18004_v51, %v17986_v32 }
 0x9b1   :  { %v18027_v39 = vpop.permute.xlu0 %18026  ;;  %v18626_v62 = vsel %vm17917_vm7, %v18624_v52, %v18625_v1 }
 0x9b2   :  { %v18756_v54 = vpop.permute.xlu1 %18755  ;;  %v18028_v53 = vrot.slane %v18027_v39, 1  ;;  %v18628_v27 = vadd.f32 %v18626_v62, %v18603_v46 }
 0x9b4   :  { %v18030_v23 = vsel %vm18029_vm9, %v18027_v39, %v18028_v53  ;;  %v18648_v48 = vadd.f32 %v18646_v59, %v18628_v27 }
 0x9b5   :  { %v18032_v33 = vadd.f32 %v18030_v23, %v18006_v38  ;;  %v18093_v20 = vpop.permute.xlu0 %18092  ;;  %v18182_v23 = vld [vmem:[%s31647_s8] sm:$0x1] }
 0x9b6   :  { %v18776_v22 = vpop.permute.xlu1 %18775  ;;  %v18094_v29 = vrot.slane %v18093_v20, 1  ;;  %v18668_v40 = vadd.f32 %v18666_v6, %v18648_v48 }
 0x9b7   :  { %v18052_v21 = vadd.f32 %v18050_v45, %v18032_v33 }
 0x9b8   :  { %v18096_v42 = vsel %vm18095_vm10, %v18093_v20, %v18094_v29 }
 0x9b9   :  { %v18072_v31 = vadd.f32 %v18070_v56, %v18052_v21  ;;  %v18884_v21 = vld [vmem:[%s31647_s8] sm:$0x1] }
 0x9ba   :  { %v18689_v2 = vpop.permute.xlu1 %18688 }
 0x9bb   :  { %v18690_v41 = vrot.slane %v18689_v2, 1  ;;  %v18098_v14 = vadd.f32 %v18096_v42, %v18072_v31 }
 0x9bd   :  { %v18691_v44 = vsel %vm17983_vm8, %v18689_v2, %v18690_v41 }
 0x9be   :  { %v18711_v4 = vpop.permute.xlu1 %18710  ;;  %v18693_v18 = vadd.f32 %v18691_v44, %v18668_v40 }
 0x9c0   :  { %v18713_v45 = vadd.f32 %v18711_v4, %v18693_v18  ;;  %v18882_v4 = vld [vmem:[%s31646_s7] sm:$0x1] }
 0x9c2   :  { %v18734_v35 = vpop.permute.xlu1 %18733 }
 0x9c3   :  { %v18735_v63 = vrot.slane %v18734_v35, 1 }
 0x9c5   :  { %v18736_v49 = vsel %vm18029_vm9, %v18734_v35, %v18735_v63 }
 0x9c6   :  { %v18738_v16 = vadd.f32 %v18736_v49, %v18713_v45  ;;  %v18799_v50 = vpop.permute.xlu1 %18798 }
 0x9c7   :  { %v18800_v5 = vrot.slane %v18799_v50, 1 }
 0x9c8   :  { %v18758_v0 = vadd.f32 %v18756_v54, %v18738_v16 }
 0x9c9   :  { %v18801_v13 = vsel %vm18095_vm10, %v18799_v50, %v18800_v5 }
 0x9ca   :  { %v18778_v61 = vadd.f32 %v18776_v22, %v18758_v0 }
 0x9cc   :  { %v18803_v15 = vadd.f32 %v18801_v13, %v18778_v61 }
 0x9e4   :  { %v18139_v57 = vpop.permute.xlu0 %18138 }
 0x9e5   :  { %v18140_v12 = vrot.slane %v18139_v57, 1 }
 0x9e7   :  { %v18142_v58 = vsel %vm18141_vm11, %v18139_v57, %v18140_v12 }
 0x9e8   :  { %v18116_v59 = vpop.permute.xlu0 %18115 }
 0x9e9   :  { %v18118_v26 = vadd.f32 %v18116_v59, %v18098_v14 }
 0x9eb   :  { %v18144_v11 = vadd.f32 %v18142_v58, %v18118_v26 }
 0x9ec   :  { %v18162_v8 = vpop.permute.xlu0 %18161 }
 0x9ed   :  { %v18164_v6 = vadd.f32 %v18162_v8, %v18144_v11 }
 0x9ef   :  { %v18166_v56 = vsel %vm18165_vm12, %v18164_v6, 0.0 }
 0x9f0   :  { %18167 = vadd.xlane.f32.xlu0 %v18166_v56 }
 0x9f4   :  { %v18844_v52 = vpop.permute.xlu1 %18843 }
 0x9f5   :  { %v18845_v43 = vrot.slane %v18844_v52, 1 }
 0x9f7   :  { %v18846_v10 = vsel %vm18141_vm11, %v18844_v52, %v18845_v43 }
 0x9f8   :  { %v18821_v3 = vpop.permute.xlu1 %18820 }
 0x9f9   :  { %v18823_v37 = vadd.f32 %v18821_v3, %v18803_v15 }
 0x9fb   :  { %v18848_v47 = vadd.f32 %v18846_v10, %v18823_v37 }
 0x9fc   :  { %v18866_v7 = vpop.permute.xlu1 %18865 }
 0x9fd   :  { %v18868_v60 = vadd.f32 %v18866_v7, %v18848_v47 }
 0x9ff   :  { %v18869_v54 = vsel %vm18165_vm12, %v18868_v60, 0.0 }
 0xa00   :  { %18870 = vadd.xlane.f32.xlu1 %v18869_v54 }
 0xa7d   :  { %v18168_v34 = vpop.xlane.xlu0 %18167 }
 0xa7e   :  { %v18170_v30 = vmul.f32 0.02, %v18168_v34 }
 0xa80   :  { %v18171_v51 = vsub.f32 %v18164_v6, %v18170_v30 }
 0xa82   :  { %v18172_v28 = vmul.f32 %v18171_v51, %v18171_v51 }
 0xa84   :  { %v18173_v19 = vsel %vm18165_vm12, %v18172_v28, 0.0 }
 0xa85   :  { %18174 = vadd.xlane.f32.xlu0 %v18173_v19 }
 0xa8d   :  { %v18871_v55 = vpop.xlane.xlu1 %18870 }
 0xa8e   :  { %v18872_v9 = vmul.f32 0.02, %v18871_v55 }
 0xa90   :  { %v18873_v22 = vsub.f32 %v18868_v60, %v18872_v9 }
 0xa92   :  { %v18874_v25 = vmul.f32 %v18873_v22, %v18873_v22 }
 0xa94   :  { %v18875_v39 = vsel %vm18165_vm12, %v18874_v25, 0.0 }
 0xa95   :  { %18876 = vadd.xlane.f32.xlu0 %v18875_v39 }
 0xb12   :  { %v18175_v17 = vpop.xlane.xlu0 %18174 }
 0xb13   :  { %v18176_v24 = vmul.f32 0.02, %v18175_v17 }
 0xb15   :  { %v18177_v1 = vadd.f32 1e-05, %v18176_v24 }
 0xb17   :  { %24082 = vrsqrt.f32 %v18177_v1 }
 0xb21   :  { %v24083_v53 = vpop.eup %24082 }
 0xb22   :  { %v18179_v32 = vmul.f32 %v24083_v53, %v18171_v51  ;;  %v18877_v2 = vpop.xlane.xlu0 %18876 }
 0xb23   :  { %v18878_v62 = vmul.f32 0.02, %v18877_v2 }
 0xb24   :  { %v18181_v38 = vmul.f32 %v18180_v36, %v18179_v32 }
 0xb25   :  { %v18879_v46 = vadd.f32 1e-05, %v18878_v62 }
 0xb26   :  { %v18183_v27 = vadd.f32 %v18182_v23, %v18181_v38 }
 0xb27   :  { %24084 = vrsqrt.f32 %v18879_v46 }
 0xb28   :  { %24086 = vtanh.f32 %v18183_v27 }
 0xb31   :  { %v24085_v33 = vpop.eup %24084 }
 0xb32   :  { %v24087_v41 = vpop.eup %24086  ;;  %v18881_v48 = vmul.f32 %v24085_v33, %v18873_v22 }
 0xb33   :  { %18185 = vst.msk [vmem:[#allocation5] sm:$0x1] %vm18165_vm12, %v24087_v41 }
 0xb34   :  { %v18883_v20 = vmul.f32 %v18882_v4, %v18881_v48 }
 0xb36   :  { %v18885_v35 = vadd.f32 %v18884_v21, %v18883_v20 }
 0xb38   :  { %24088 = vtanh.f32 %v18885_v35 }
 0xb42   :  { %v24089_v29 = vpop.eup %24088 }
 0xb43   :  { %18887 = vst.msk [vmem:[#allocation5 + $0x1] sm:$0x1] %vm18165_vm12, %v24089_v29 }
 0xb44   :  { %24105 = shalt.err (!%p24102_p4)
}
 0xb45   :  { %s24106_s8 = scalar_lea.hbm %s31648_s9, 32 }
 0xb46   :  { %p24107_p5 = scmp.ne.s32.totalorder %s31648_s9, %s24106_s8  ;;  %p24110_p6 = scmp.lt.u32.totalorder %s24106_s8, %s31648_s9 }
 0xb48   :  { %p24112_p7 = pnand %p24110_p6, %p24107_p5 }
 0xb4a   :  { %24115 = shalt.err (!%p24112_p7)
}
 0xb4b   :  { %18897 = dma.vmem_to_hbm [thread:$0]  %s18895_s14, 32, %s31648_s9, [#allocation6]  }
 0xb4c   :  { %24116 = dma.done.wait [#allocation6], 32  }
 0xb4d   :  { %24117 = vsyncadd [#allocation6], 4294967264 }
 0xb4e   :  { %18901 = vsyncpa [#allocation6], 1 }

</bundles_post_ra>
